<compile_context>
chip_gen: v7x
topology: tpu7x:2x2x1
jax: 0.10.0
libtpu: 0.0.40
codegen_flags: <defaults>
</compile_context>

<pallas_src>
import numpy as np
import jax
import jax.numpy as jnp
from jax.experimental import pallas as pl
from jax.experimental.pallas import tpu as pltpu


# ------------------------------- Pallas kernel -------------------------------

def cnn5_fused_kernel(xw_ref, s_ref, w1s_ref, b1_ref, w2t_ref, b2_ref,
                      w1rc_ref, bf1_ref, wf2t_ref, bf2_ref, wf3t_ref, bf3_ref,
                      o_ref):
    """Whole CNN5 forward for one batch element; every intermediate stays in VMEM.

    xw   : (1, 640, 16) bf16   W[a, u] = x_pad1[10*a + u]  (u = pool_offset k1 + tap t)
    s    : (896, 640)  bf16    0/1 selection: g[m*64 + j] = p1[10*j + m - 2] (else 0)
    w1s  : (10, 16, 128) bf16  conv1 weight per pool offset: w1s[k1, k1+t, co] = w1[co, 0, t]
    b1   : (1, 128)  f32       conv1 bias (Cout padded 100 -> 128)
    w2t  : (5, 128, 16) bf16   conv2 weight per tap: w2t[t, cin, co]
    b2   : (1, 16)   f32       conv2 bias (Cout padded 10 -> 16)
    w1rc : (10, 64, 128) f32   fc1 weight: w1rc[c, l, o] = wf1[o, c*60 + l]  (l >= 60 -> 0)
    wf2t/bf2, wf3t/bf3         remaining FC weights (transposed) / biases
    o_ref: (1, 1, 2)           logits
    """
    f32, bf16 = jnp.float32, jnp.bfloat16
    xw = xw_ref[0]                                                        # (640, 16) bf16

    # ---- conv1 + maxpool(10): running max over the 10 pool offsets (no big materialization) ----
    p1 = jnp.dot(xw, w1s_ref[0], preferred_element_type=f32)              # (640, 128) f32
    for k1 in range(1, 10):
        p1 = jnp.maximum(p1, jnp.dot(xw, w1s_ref[k1], preferred_element_type=f32))
    p1 = (p1 + b1_ref[...]).astype(bf16)                                  # bias commutes with max

    # ---- regroup pooled conv1 output into conv2's grouped-window layout (exact 0/1 matmul) ----
    # g[m*64 + j, cin] = p1_pad[10*j + m, cin]; invalid rows (j>=60 / out-of-range) -> 0.
    g = jnp.dot(s_ref[...], p1, preferred_element_type=f32).astype(bf16)  # (896, 128)

    # ---- conv2: 5 accumulated dots over aligned 640-row slices (no per-offset concats) ----
    y = jnp.dot(g[0:640, :], w2t_ref[0], preferred_element_type=f32)      # (640, 16)
    for t in range(1, 5):
        y = y + jnp.dot(g[t * 64:t * 64 + 640, :], w2t_ref[t], preferred_element_type=f32)
    # maxpool(10) over the pool-offset row blocks + bias
    p2 = y[0:64, :]
    for k2 in range(1, 10):
        p2 = jnp.maximum(p2, y[k2 * 64:(k2 + 1) * 64, :])
    p2 = p2 + b2_ref[...]                                                 # (64, 16) f32

    # ---- fc1 (flatten order c*60 + l baked into w1rc) via 10 broadcast FMAs + ReLU ----
    acc = p2[:, 0:1] * w1rc_ref[0]                                        # (64, 128) f32
    for c in range(1, 10):
        acc = acc + p2[:, c:c + 1] * w1rc_ref[c]
    h = jnp.sum(acc, axis=0, keepdims=True) + bf1_ref[...]                # (1, 128)
    h = jnp.maximum(h, 0.0)

    # ---- fc2 + ReLU, fc3 ----
    h = jnp.maximum(jnp.dot(h, wf2t_ref[...], preferred_element_type=f32) + bf2_ref[...], 0.0)
    o_ref[0] = jnp.dot(h, wf3t_ref[...], preferred_element_type=f32) + bf3_ref[...]


# ----------------------------- pallas_call wrapper -----------------------------

def cnn5_pallas(xw, kp):
    B = xw.shape[0]

    def const_spec(a):
        nd = a.ndim
        # constants: block index never changes -> single-buffered (review item 9)
        return pl.BlockSpec(a.shape, lambda b, _nd=nd: (0,) * _nd,
                            pipeline_mode=pl.Buffered(1))

    consts = (kp["s"], kp["w1s"], kp["b1"], kp["w2t"], kp["b2"],
              kp["w1rc"], kp["bf1"], kp["wf2t"], kp["bf2"], kp["wf3t"], kp["bf3"])

    out = pl.pallas_call(
        cnn5_fused_kernel,
        out_shape=jax.ShapeDtypeStruct((B, 1, 2), jnp.float32),
        grid=(B,),
        in_specs=[pl.BlockSpec((1, 640, 16), lambda b: (b, 0, 0))]
                 + [const_spec(a) for a in consts],
        out_specs=pl.BlockSpec((1, 1, 2), lambda b: (b, 0, 0)),
        compiler_params=pltpu.CompilerParams(
            dimension_semantics=("parallel",)),      # ~3 MiB VMEM -> default scoped limit is enough
    )(xw, *consts)
    return out[:, 0, :]


# --------------------------- one-time weight re-layout ---------------------------

def prepare_kernel_params(params):
    """Re-layout PyTorch-style parameters for the fused kernel (run ONCE, outside jit)."""
    w1 = np.asarray(params["w1"], np.float32)        # (100, 1, 5)
    b1 = np.asarray(params["b1"], np.float32)        # (100,)
    w2 = np.asarray(params["w2"], np.float32)        # (10, 100, 5)
    b2 = np.asarray(params["b2"], np.float32)        # (10,)
    wf1 = np.asarray(params["wf1"], np.float32)      # (128, 600)

    # conv1 weight per pool offset k1; contraction index u = k1 + tap t (u in [0,16))
    w1s = np.zeros((10, 16, 128), np.float32)
    for k1 in range(10):
        for t in range(5):
            w1s[k1, k1 + t, :100] = w1[:, 0, t]
    b1p = np.zeros((1, 128), np.float32)
    b1p[0, :100] = b1

    # 0/1 selection matrix: g[m*64 + j] = p1[10*j + m - 2]; rows with j>=60 or an
    # out-of-range position stay all-zero, reproducing conv2's zero 'same' padding.
    s = np.zeros((896, 640), np.float32)
    for m in range(14):
        for j in range(60):
            q1 = 10 * j + m - 2
            if 0 <= q1 < 600:
                s[m * 64 + j, q1] = 1.0

    # conv2 weight per tap, cin padded 100->128, cout padded 10->16
    w2t = np.zeros((5, 128, 16), np.float32)
    for t in range(5):
        w2t[t, :100, :10] = w2[:, :, t].T
    b2p = np.zeros((1, 16), np.float32)
    b2p[0, :10] = b2

    # fc1 weight permuted to [channel c][position l (padded 60->64)][out o]
    w1rc = np.zeros((10, 64, 128), np.float32)
    w1rc[:, :60, :] = np.transpose(wf1.reshape(128, 10, 60), (1, 2, 0))

    return dict(
        s=jnp.asarray(s, jnp.bfloat16),
        w1s=jnp.asarray(w1s, jnp.bfloat16),
        b1=jnp.asarray(b1p),
        w2t=jnp.asarray(w2t, jnp.bfloat16),
        b2=jnp.asarray(b2p),
        w1rc=jnp.asarray(w1rc),
        bf1=jnp.asarray(np.asarray(params["bf1"], np.float32).reshape(1, 128)),
        wf2t=jnp.asarray(np.asarray(params["wf2"], np.float32).T),      # (128, 16)
        bf2=jnp.asarray(np.asarray(params["bf2"], np.float32).reshape(1, 16)),
        wf3t=jnp.asarray(np.asarray(params["wf3"], np.float32).T),      # (16, 2)
        bf3=jnp.asarray(np.asarray(params["bf3"], np.float32).reshape(1, 2)),
    )


# --------------------------------- glue (JAX) ---------------------------------

def _conv1_windows(x):
    """x: (B, 1, 6000) -> W: (B, 640, 16) bf16 with W[b, a, u] = x_pad1[b, 10*a + u],
    where x_pad1 is x zero-padded by 2 on each side (conv1 'same' padding).
    Only pad / reshape / slice / concat -- no transpose, no gather (review item 1).
    Rows a >= 600 and columns u >= 14 are never used by the kernel (zero weights / zero
    selection-matrix columns)."""
    B = x.shape[0]
    xp = jnp.pad(x[:, 0, :].astype(jnp.bfloat16), ((0, 0), (2, 414)))   # (B, 6416); xp[i]=x[i-2]
    r0 = xp[:, 0:6400].reshape(B, 640, 10)                              # u in [0, 10)
    r1 = xp[:, 10:6410].reshape(B, 640, 10)[:, :, 0:6]                  # u in [10, 16)
    return jnp.concatenate([r0, r1], axis=2)                            # (B, 640, 16)


def cnn5_forward(x, kp):
    """x: (B, 1, 6000) float32 -> (B, 2) float32, matching PyTorch CNN5.forward."""
    return cnn5_pallas(_conv1_windows(x), kp)


# ------------------------------ pure-JAX reference ------------------------------

def cnn5_reference(x, params):
    dn = ("NCH", "OIH", "NCH")
    y = jax.lax.conv_general_dilated(x, params["w1"], (1,), [(2, 2)], dimension_numbers=dn)
    y = y + params["b1"][None, :, None]
    y = jax.lax.reduce_window(y, -jnp.inf, jax.lax.max, (1, 1, 10), (1, 1, 10), "VALID")
    y = jax.lax.conv_general_dilated(y, params["w2"], (1,), [(2, 2)], dimension_numbers=dn)
    y = y + params["b2"][None, :, None]
    y = jax.lax.reduce_window(y, -jnp.inf, jax.lax.max, (1, 1, 10), (1, 1, 10), "VALID")
    f = y.reshape(y.shape[0], -1)
    h = jnp.maximum(f @ params["wf1"].T + params["bf1"], 0.0)
    h = jnp.maximum(h @ params["wf2"].T + params["bf2"], 0.0)
    return h @ params["wf3"].T + params["bf3"]


# ------------------------------------ main ------------------------------------

if __name__ == "__main__":
    key = jax.random.PRNGKey(0)
    keys = jax.random.split(key, 11)
    # The hardcoded x.view(batch, 10*60) in CNN5 forces input length 6000 (two /10 pools).
    B, L = 2, 6000
    params = {
        "w1":  0.10 * jax.random.normal(keys[0], (100, 1, 5), jnp.float32),
        "b1":  0.10 * jax.random.normal(keys[1], (100,), jnp.float32),
        "w2":  0.05 * jax.random.normal(keys[2], (10, 100, 5), jnp.float32),
        "b2":  0.10 * jax.random.normal(keys[3], (10,), jnp.float32),
        "wf1": 0.05 * jax.random.normal(keys[4], (128, 600), jnp.float32),
        "bf1": 0.10 * jax.random.normal(keys[5], (128,), jnp.float32),
        "wf2": 0.10 * jax.random.normal(keys[6], (16, 128), jnp.float32),
        "bf2": 0.10 * jax.random.normal(keys[7], (16,), jnp.float32),
        "wf3": 0.10 * jax.random.normal(keys[8], (2, 16), jnp.float32),
        "bf3": 0.10 * jax.random.normal(keys[9], (2,), jnp.float32),
    }
    x = jax.random.normal(keys[10], (B, 1, L), jnp.float32)

    kp = prepare_kernel_params(params)          # one-time re-layout, outside the jitted forward
    fwd = jax.jit(cnn5_forward)
    out = jax.block_until_ready(fwd(x, kp))
    assert out.shape == (B, 2) and out.dtype == jnp.float32

    ref = cnn5_reference(x, params)
    # Loose tolerance on purpose: both the kernel and the XLA reference run bf16-operand matmuls
    # on the MXU (default TPU precision), so each side carries ~1e-2-level relative rounding.
    assert jnp.allclose(out, ref, rtol=5e-2, atol=5e-2), (out, ref)

    print("KERNEL_OK")
</pallas_src>

<mosaic_0001>
module attributes {stable_mosaic.version = 11 : i64} {
  func.func @cnn5_fused_kernel(%arg0: i32, %arg1: memref<1x640x16xbf16, #tpu.memory_space<vmem>>, %arg2: memref<896x640xbf16, #tpu.memory_space<vmem>>, %arg3: memref<10x16x128xbf16, #tpu.memory_space<vmem>>, %arg4: memref<1x128xf32, #tpu.memory_space<vmem>>, %arg5: memref<5x128x16xbf16, #tpu.memory_space<vmem>>, %arg6: memref<1x16xf32, #tpu.memory_space<vmem>>, %arg7: memref<10x64x128xf32, #tpu.memory_space<vmem>>, %arg8: memref<1x128xf32, #tpu.memory_space<vmem>>, %arg9: memref<128x16xf32, #tpu.memory_space<vmem>>, %arg10: memref<1x16xf32, #tpu.memory_space<vmem>>, %arg11: memref<16x2xf32, #tpu.memory_space<vmem>>, %arg12: memref<1x2xf32, #tpu.memory_space<vmem>>, %arg13: memref<1x1x2xf32, #tpu.memory_space<vmem>>) attributes {dimension_semantics = [#tpu.dimension_semantics<parallel>], iteration_bounds = array<i64: 2>, scalar_prefetch = 0 : i64, scratch_operands = 0 : i64, tpu.core_type = #tpu.core_type<tc>, window_params = [{transform_indices = @transform_0, window_bounds = array<i64: 1, 640, 16>}, {pipeline_mode = #tpu.pipeline_mode<synchronous>, transform_indices = @transform_1, window_bounds = array<i64: 896, 640>}, {pipeline_mode = #tpu.pipeline_mode<synchronous>, transform_indices = @transform_2, window_bounds = array<i64: 10, 16, 128>}, {pipeline_mode = #tpu.pipeline_mode<synchronous>, transform_indices = @transform_3, window_bounds = array<i64: 1, 128>}, {pipeline_mode = #tpu.pipeline_mode<synchronous>, transform_indices = @transform_4, window_bounds = array<i64: 5, 128, 16>}, {pipeline_mode = #tpu.pipeline_mode<synchronous>, transform_indices = @transform_5, window_bounds = array<i64: 1, 16>}, {pipeline_mode = #tpu.pipeline_mode<synchronous>, transform_indices = @transform_6, window_bounds = array<i64: 10, 64, 128>}, {pipeline_mode = #tpu.pipeline_mode<synchronous>, transform_indices = @transform_7, window_bounds = array<i64: 1, 128>}, {pipeline_mode = #tpu.pipeline_mode<synchronous>, transform_indices = @transform_8, window_bounds = array<i64: 128, 16>}, {pipeline_mode = #tpu.pipeline_mode<synchronous>, transform_indices = @transform_9, window_bounds = array<i64: 1, 16>}, {pipeline_mode = #tpu.pipeline_mode<synchronous>, transform_indices = @transform_10, window_bounds = array<i64: 16, 2>}, {pipeline_mode = #tpu.pipeline_mode<synchronous>, transform_indices = @transform_11, window_bounds = array<i64: 1, 2>}, {transform_indices = @transform_12, window_bounds = array<i64: 1, 1, 2>}]} {
    %c0 = arith.constant 0 : index
    %c0_0 = arith.constant 0 : index
    %c0_1 = arith.constant 0 : index
    %0 = vector.load %arg1[%c0, %c0_0, %c0_1] : memref<1x640x16xbf16, #tpu.memory_space<vmem>>, vector<1x640x16xbf16>
    %1 = vector.shape_cast %0 : vector<1x640x16xbf16> to vector<640x16xbf16>
    %c0_2 = arith.constant 0 : index
    %c0_3 = arith.constant 0 : index
    %c0_4 = arith.constant 0 : index
    %2 = vector.load %arg3[%c0_2, %c0_3, %c0_4] : memref<10x16x128xbf16, #tpu.memory_space<vmem>>, vector<1x16x128xbf16>
    %3 = vector.shape_cast %2 : vector<1x16x128xbf16> to vector<16x128xbf16>
    %cst = arith.constant dense<0.000000e+00> : vector<640x128xf32>
    %4 = tpu.matmul %1, %3, %cst {dimension_numbers = #tpu.dot_dimension_numbers<[1], [0], [0], [1], [0, 0, 1, 1], [], []>} : vector<640x16xbf16>, vector<16x128xbf16>, vector<640x128xf32> -> vector<640x128xf32>
    %c1 = arith.constant 1 : index
    %c0_5 = arith.constant 0 : index
    %c0_6 = arith.constant 0 : index
    %5 = vector.load %arg3[%c1, %c0_5, %c0_6] : memref<10x16x128xbf16, #tpu.memory_space<vmem>>, vector<1x16x128xbf16>
    %6 = vector.shape_cast %5 : vector<1x16x128xbf16> to vector<16x128xbf16>
    %cst_7 = arith.constant dense<0.000000e+00> : vector<640x128xf32>
    %7 = tpu.matmul %1, %6, %cst_7 {dimension_numbers = #tpu.dot_dimension_numbers<[1], [0], [0], [1], [0, 0, 1, 1], [], []>} : vector<640x16xbf16>, vector<16x128xbf16>, vector<640x128xf32> -> vector<640x128xf32>
    %8 = arith.maximumf %4, %7 : vector<640x128xf32>
    %c2 = arith.constant 2 : index
    %c0_8 = arith.constant 0 : index
    %c0_9 = arith.constant 0 : index
    %9 = vector.load %arg3[%c2, %c0_8, %c0_9] : memref<10x16x128xbf16, #tpu.memory_space<vmem>>, vector<1x16x128xbf16>
    %10 = vector.shape_cast %9 : vector<1x16x128xbf16> to vector<16x128xbf16>
    %cst_10 = arith.constant dense<0.000000e+00> : vector<640x128xf32>
    %11 = tpu.matmul %1, %10, %cst_10 {dimension_numbers = #tpu.dot_dimension_numbers<[1], [0], [0], [1], [0, 0, 1, 1], [], []>} : vector<640x16xbf16>, vector<16x128xbf16>, vector<640x128xf32> -> vector<640x128xf32>
    %12 = arith.maximumf %8, %11 : vector<640x128xf32>
    %c3 = arith.constant 3 : index
    %c0_11 = arith.constant 0 : index
    %c0_12 = arith.constant 0 : index
    %13 = vector.load %arg3[%c3, %c0_11, %c0_12] : memref<10x16x128xbf16, #tpu.memory_space<vmem>>, vector<1x16x128xbf16>
    %14 = vector.shape_cast %13 : vector<1x16x128xbf16> to vector<16x128xbf16>
    %cst_13 = arith.constant dense<0.000000e+00> : vector<640x128xf32>
    %15 = tpu.matmul %1, %14, %cst_13 {dimension_numbers = #tpu.dot_dimension_numbers<[1], [0], [0], [1], [0, 0, 1, 1], [], []>} : vector<640x16xbf16>, vector<16x128xbf16>, vector<640x128xf32> -> vector<640x128xf32>
    %16 = arith.maximumf %12, %15 : vector<640x128xf32>
    %c4 = arith.constant 4 : index
    %c0_14 = arith.constant 0 : index
    %c0_15 = arith.constant 0 : index
    %17 = vector.load %arg3[%c4, %c0_14, %c0_15] : memref<10x16x128xbf16, #tpu.memory_space<vmem>>, vector<1x16x128xbf16>
    %18 = vector.shape_cast %17 : vector<1x16x128xbf16> to vector<16x128xbf16>
    %cst_16 = arith.constant dense<0.000000e+00> : vector<640x128xf32>
    %19 = tpu.matmul %1, %18, %cst_16 {dimension_numbers = #tpu.dot_dimension_numbers<[1], [0], [0], [1], [0, 0, 1, 1], [], []>} : vector<640x16xbf16>, vector<16x128xbf16>, vector<640x128xf32> -> vector<640x128xf32>
    %20 = arith.maximumf %16, %19 : vector<640x128xf32>
    %c5 = arith.constant 5 : index
    %c0_17 = arith.constant 0 : index
    %c0_18 = arith.constant 0 : index
    %21 = vector.load %arg3[%c5, %c0_17, %c0_18] : memref<10x16x128xbf16, #tpu.memory_space<vmem>>, vector<1x16x128xbf16>
    %22 = vector.shape_cast %21 : vector<1x16x128xbf16> to vector<16x128xbf16>
    %cst_19 = arith.constant dense<0.000000e+00> : vector<640x128xf32>
    %23 = tpu.matmul %1, %22, %cst_19 {dimension_numbers = #tpu.dot_dimension_numbers<[1], [0], [0], [1], [0, 0, 1, 1], [], []>} : vector<640x16xbf16>, vector<16x128xbf16>, vector<640x128xf32> -> vector<640x128xf32>
    %24 = arith.maximumf %20, %23 : vector<640x128xf32>
    %c6 = arith.constant 6 : index
    %c0_20 = arith.constant 0 : index
    %c0_21 = arith.constant 0 : index
    %25 = vector.load %arg3[%c6, %c0_20, %c0_21] : memref<10x16x128xbf16, #tpu.memory_space<vmem>>, vector<1x16x128xbf16>
    %26 = vector.shape_cast %25 : vector<1x16x128xbf16> to vector<16x128xbf16>
    %cst_22 = arith.constant dense<0.000000e+00> : vector<640x128xf32>
    %27 = tpu.matmul %1, %26, %cst_22 {dimension_numbers = #tpu.dot_dimension_numbers<[1], [0], [0], [1], [0, 0, 1, 1], [], []>} : vector<640x16xbf16>, vector<16x128xbf16>, vector<640x128xf32> -> vector<640x128xf32>
    %28 = arith.maximumf %24, %27 : vector<640x128xf32>
    %c7 = arith.constant 7 : index
    %c0_23 = arith.constant 0 : index
    %c0_24 = arith.constant 0 : index
    %29 = vector.load %arg3[%c7, %c0_23, %c0_24] : memref<10x16x128xbf16, #tpu.memory_space<vmem>>, vector<1x16x128xbf16>
    %30 = vector.shape_cast %29 : vector<1x16x128xbf16> to vector<16x128xbf16>
    %cst_25 = arith.constant dense<0.000000e+00> : vector<640x128xf32>
    %31 = tpu.matmul %1, %30, %cst_25 {dimension_numbers = #tpu.dot_dimension_numbers<[1], [0], [0], [1], [0, 0, 1, 1], [], []>} : vector<640x16xbf16>, vector<16x128xbf16>, vector<640x128xf32> -> vector<640x128xf32>
    %32 = arith.maximumf %28, %31 : vector<640x128xf32>
    %c8 = arith.constant 8 : index
    %c0_26 = arith.constant 0 : index
    %c0_27 = arith.constant 0 : index
    %33 = vector.load %arg3[%c8, %c0_26, %c0_27] : memref<10x16x128xbf16, #tpu.memory_space<vmem>>, vector<1x16x128xbf16>
    %34 = vector.shape_cast %33 : vector<1x16x128xbf16> to vector<16x128xbf16>
    %cst_28 = arith.constant dense<0.000000e+00> : vector<640x128xf32>
    %35 = tpu.matmul %1, %34, %cst_28 {dimension_numbers = #tpu.dot_dimension_numbers<[1], [0], [0], [1], [0, 0, 1, 1], [], []>} : vector<640x16xbf16>, vector<16x128xbf16>, vector<640x128xf32> -> vector<640x128xf32>
    %36 = arith.maximumf %32, %35 : vector<640x128xf32>
    %c9 = arith.constant 9 : index
    %c0_29 = arith.constant 0 : index
    %c0_30 = arith.constant 0 : index
    %37 = vector.load %arg3[%c9, %c0_29, %c0_30] : memref<10x16x128xbf16, #tpu.memory_space<vmem>>, vector<1x16x128xbf16>
    %38 = vector.shape_cast %37 : vector<1x16x128xbf16> to vector<16x128xbf16>
    %cst_31 = arith.constant dense<0.000000e+00> : vector<640x128xf32>
    %39 = tpu.matmul %1, %38, %cst_31 {dimension_numbers = #tpu.dot_dimension_numbers<[1], [0], [0], [1], [0, 0, 1, 1], [], []>} : vector<640x16xbf16>, vector<16x128xbf16>, vector<640x128xf32> -> vector<640x128xf32>
    %40 = arith.maximumf %36, %39 : vector<640x128xf32>
    %c0_32 = arith.constant 0 : index
    %c0_33 = arith.constant 0 : index
    %41 = vector.load %arg4[%c0_32, %c0_33] : memref<1x128xf32, #tpu.memory_space<vmem>>, vector<1x128xf32>
    %42 = vector.broadcast %41 : vector<1x128xf32> to vector<640x128xf32>
    %43 = arith.addf %40, %42 : vector<640x128xf32>
    %44 = arith.truncf %43 : vector<640x128xf32> to vector<640x128xbf16>
    %c0_34 = arith.constant 0 : index
    %c0_35 = arith.constant 0 : index
    %45 = vector.load %arg2[%c0_34, %c0_35] : memref<896x640xbf16, #tpu.memory_space<vmem>>, vector<896x640xbf16>
    %cst_36 = arith.constant dense<0.000000e+00> : vector<896x128xf32>
    %46 = tpu.matmul %45, %44, %cst_36 {dimension_numbers = #tpu.dot_dimension_numbers<[1], [0], [0], [1], [0, 0, 1, 1], [], []>} : vector<896x640xbf16>, vector<640x128xbf16>, vector<896x128xf32> -> vector<896x128xf32>
    %47 = arith.truncf %46 : vector<896x128xf32> to vector<896x128xbf16>
    %48 = vector.extract_strided_slice %47 {offsets = [0, 0], sizes = [640, 128], strides = [1, 1]} : vector<896x128xbf16> to vector<640x128xbf16>
    %c0_37 = arith.constant 0 : index
    %c0_38 = arith.constant 0 : index
    %c0_39 = arith.constant 0 : index
    %49 = vector.load %arg5[%c0_37, %c0_38, %c0_39] : memref<5x128x16xbf16, #tpu.memory_space<vmem>>, vector<1x128x16xbf16>
    %50 = vector.shape_cast %49 : vector<1x128x16xbf16> to vector<128x16xbf16>
    %cst_40 = arith.constant dense<0.000000e+00> : vector<640x16xf32>
    %51 = tpu.matmul %48, %50, %cst_40 {dimension_numbers = #tpu.dot_dimension_numbers<[1], [0], [0], [1], [0, 0, 1, 1], [], []>} : vector<640x128xbf16>, vector<128x16xbf16>, vector<640x16xf32> -> vector<640x16xf32>
    %52 = vector.extract_strided_slice %47 {offsets = [64, 0], sizes = [640, 128], strides = [1, 1]} : vector<896x128xbf16> to vector<640x128xbf16>
    %c1_41 = arith.constant 1 : index
    %c0_42 = arith.constant 0 : index
    %c0_43 = arith.constant 0 : index
    %53 = vector.load %arg5[%c1_41, %c0_42, %c0_43] : memref<5x128x16xbf16, #tpu.memory_space<vmem>>, vector<1x128x16xbf16>
    %54 = vector.shape_cast %53 : vector<1x128x16xbf16> to vector<128x16xbf16>
    %cst_44 = arith.constant dense<0.000000e+00> : vector<640x16xf32>
    %55 = tpu.matmul %52, %54, %cst_44 {dimension_numbers = #tpu.dot_dimension_numbers<[1], [0], [0], [1], [0, 0, 1, 1], [], []>} : vector<640x128xbf16>, vector<128x16xbf16>, vector<640x16xf32> -> vector<640x16xf32>
    %56 = arith.addf %51, %55 : vector<640x16xf32>
    %57 = vector.extract_strided_slice %47 {offsets = [128, 0], sizes = [640, 128], strides = [1, 1]} : vector<896x128xbf16> to vector<640x128xbf16>
    %c2_45 = arith.constant 2 : index
    %c0_46 = arith.constant 0 : index
    %c0_47 = arith.constant 0 : index
    %58 = vector.load %arg5[%c2_45, %c0_46, %c0_47] : memref<5x128x16xbf16, #tpu.memory_space<vmem>>, vector<1x128x16xbf16>
    %59 = vector.shape_cast %58 : vector<1x128x16xbf16> to vector<128x16xbf16>
    %cst_48 = arith.constant dense<0.000000e+00> : vector<640x16xf32>
    %60 = tpu.matmul %57, %59, %cst_48 {dimension_numbers = #tpu.dot_dimension_numbers<[1], [0], [0], [1], [0, 0, 1, 1], [], []>} : vector<640x128xbf16>, vector<128x16xbf16>, vector<640x16xf32> -> vector<640x16xf32>
    %61 = arith.addf %56, %60 : vector<640x16xf32>
    %62 = vector.extract_strided_slice %47 {offsets = [192, 0], sizes = [640, 128], strides = [1, 1]} : vector<896x128xbf16> to vector<640x128xbf16>
    %c3_49 = arith.constant 3 : index
    %c0_50 = arith.constant 0 : index
    %c0_51 = arith.constant 0 : index
    %63 = vector.load %arg5[%c3_49, %c0_50, %c0_51] : memref<5x128x16xbf16, #tpu.memory_space<vmem>>, vector<1x128x16xbf16>
    %64 = vector.shape_cast %63 : vector<1x128x16xbf16> to vector<128x16xbf16>
    %cst_52 = arith.constant dense<0.000000e+00> : vector<640x16xf32>
    %65 = tpu.matmul %62, %64, %cst_52 {dimension_numbers = #tpu.dot_dimension_numbers<[1], [0], [0], [1], [0, 0, 1, 1], [], []>} : vector<640x128xbf16>, vector<128x16xbf16>, vector<640x16xf32> -> vector<640x16xf32>
    %66 = arith.addf %61, %65 : vector<640x16xf32>
    %67 = vector.extract_strided_slice %47 {offsets = [256, 0], sizes = [640, 128], strides = [1, 1]} : vector<896x128xbf16> to vector<640x128xbf16>
    %c4_53 = arith.constant 4 : index
    %c0_54 = arith.constant 0 : index
    %c0_55 = arith.constant 0 : index
    %68 = vector.load %arg5[%c4_53, %c0_54, %c0_55] : memref<5x128x16xbf16, #tpu.memory_space<vmem>>, vector<1x128x16xbf16>
    %69 = vector.shape_cast %68 : vector<1x128x16xbf16> to vector<128x16xbf16>
    %cst_56 = arith.constant dense<0.000000e+00> : vector<640x16xf32>
    %70 = tpu.matmul %67, %69, %cst_56 {dimension_numbers = #tpu.dot_dimension_numbers<[1], [0], [0], [1], [0, 0, 1, 1], [], []>} : vector<640x128xbf16>, vector<128x16xbf16>, vector<640x16xf32> -> vector<640x16xf32>
    %71 = arith.addf %66, %70 : vector<640x16xf32>
    %72 = vector.extract_strided_slice %71 {offsets = [0, 0], sizes = [64, 16], strides = [1, 1]} : vector<640x16xf32> to vector<64x16xf32>
    %73 = vector.extract_strided_slice %71 {offsets = [64, 0], sizes = [64, 16], strides = [1, 1]} : vector<640x16xf32> to vector<64x16xf32>
    %74 = arith.maximumf %72, %73 : vector<64x16xf32>
    %75 = vector.extract_strided_slice %71 {offsets = [128, 0], sizes = [64, 16], strides = [1, 1]} : vector<640x16xf32> to vector<64x16xf32>
    %76 = arith.maximumf %74, %75 : vector<64x16xf32>
    %77 = vector.extract_strided_slice %71 {offsets = [192, 0], sizes = [64, 16], strides = [1, 1]} : vector<640x16xf32> to vector<64x16xf32>
    %78 = arith.maximumf %76, %77 : vector<64x16xf32>
    %79 = vector.extract_strided_slice %71 {offsets = [256, 0], sizes = [64, 16], strides = [1, 1]} : vector<640x16xf32> to vector<64x16xf32>
    %80 = arith.maximumf %78, %79 : vector<64x16xf32>
    %81 = vector.extract_strided_slice %71 {offsets = [320, 0], sizes = [64, 16], strides = [1, 1]} : vector<640x16xf32> to vector<64x16xf32>
    %82 = arith.maximumf %80, %81 : vector<64x16xf32>
    %83 = vector.extract_strided_slice %71 {offsets = [384, 0], sizes = [64, 16], strides = [1, 1]} : vector<640x16xf32> to vector<64x16xf32>
    %84 = arith.maximumf %82, %83 : vector<64x16xf32>
    %85 = vector.extract_strided_slice %71 {offsets = [448, 0], sizes = [64, 16], strides = [1, 1]} : vector<640x16xf32> to vector<64x16xf32>
    %86 = arith.maximumf %84, %85 : vector<64x16xf32>
    %87 = vector.extract_strided_slice %71 {offsets = [512, 0], sizes = [64, 16], strides = [1, 1]} : vector<640x16xf32> to vector<64x16xf32>
    %88 = arith.maximumf %86, %87 : vector<64x16xf32>
    %89 = vector.extract_strided_slice %71 {offsets = [576, 0], sizes = [64, 16], strides = [1, 1]} : vector<640x16xf32> to vector<64x16xf32>
    %90 = arith.maximumf %88, %89 : vector<64x16xf32>
    %c0_57 = arith.constant 0 : index
    %c0_58 = arith.constant 0 : index
    %91 = vector.load %arg6[%c0_57, %c0_58] : memref<1x16xf32, #tpu.memory_space<vmem>>, vector<1x16xf32>
    %92 = vector.broadcast %91 : vector<1x16xf32> to vector<64x16xf32>
    %93 = arith.addf %90, %92 : vector<64x16xf32>
    %94 = vector.extract_strided_slice %93 {offsets = [0, 0], sizes = [64, 1], strides = [1, 1]} : vector<64x16xf32> to vector<64x1xf32>
    %c0_59 = arith.constant 0 : index
    %c0_60 = arith.constant 0 : index
    %c0_61 = arith.constant 0 : index
    %95 = vector.load %arg7[%c0_59, %c0_60, %c0_61] : memref<10x64x128xf32, #tpu.memory_space<vmem>>, vector<1x64x128xf32>
    %96 = vector.shape_cast %95 : vector<1x64x128xf32> to vector<64x128xf32>
    %97 = vector.broadcast %94 : vector<64x1xf32> to vector<64x128xf32>
    %98 = arith.mulf %97, %96 : vector<64x128xf32>
    %99 = vector.extract_strided_slice %93 {offsets = [0, 1], sizes = [64, 1], strides = [1, 1]} : vector<64x16xf32> to vector<64x1xf32>
    %c1_62 = arith.constant 1 : index
    %c0_63 = arith.constant 0 : index
    %c0_64 = arith.constant 0 : index
    %100 = vector.load %arg7[%c1_62, %c0_63, %c0_64] : memref<10x64x128xf32, #tpu.memory_space<vmem>>, vector<1x64x128xf32>
    %101 = vector.shape_cast %100 : vector<1x64x128xf32> to vector<64x128xf32>
    %102 = vector.broadcast %99 : vector<64x1xf32> to vector<64x128xf32>
    %103 = arith.mulf %102, %101 : vector<64x128xf32>
    %104 = arith.addf %98, %103 : vector<64x128xf32>
    %105 = vector.extract_strided_slice %93 {offsets = [0, 2], sizes = [64, 1], strides = [1, 1]} : vector<64x16xf32> to vector<64x1xf32>
    %c2_65 = arith.constant 2 : index
    %c0_66 = arith.constant 0 : index
    %c0_67 = arith.constant 0 : index
    %106 = vector.load %arg7[%c2_65, %c0_66, %c0_67] : memref<10x64x128xf32, #tpu.memory_space<vmem>>, vector<1x64x128xf32>
    %107 = vector.shape_cast %106 : vector<1x64x128xf32> to vector<64x128xf32>
    %108 = vector.broadcast %105 : vector<64x1xf32> to vector<64x128xf32>
    %109 = arith.mulf %108, %107 : vector<64x128xf32>
    %110 = arith.addf %104, %109 : vector<64x128xf32>
    %111 = vector.extract_strided_slice %93 {offsets = [0, 3], sizes = [64, 1], strides = [1, 1]} : vector<64x16xf32> to vector<64x1xf32>
    %c3_68 = arith.constant 3 : index
    %c0_69 = arith.constant 0 : index
    %c0_70 = arith.constant 0 : index
    %112 = vector.load %arg7[%c3_68, %c0_69, %c0_70] : memref<10x64x128xf32, #tpu.memory_space<vmem>>, vector<1x64x128xf32>
    %113 = vector.shape_cast %112 : vector<1x64x128xf32> to vector<64x128xf32>
    %114 = vector.broadcast %111 : vector<64x1xf32> to vector<64x128xf32>
    %115 = arith.mulf %114, %113 : vector<64x128xf32>
    %116 = arith.addf %110, %115 : vector<64x128xf32>
    %117 = vector.extract_strided_slice %93 {offsets = [0, 4], sizes = [64, 1], strides = [1, 1]} : vector<64x16xf32> to vector<64x1xf32>
    %c4_71 = arith.constant 4 : index
    %c0_72 = arith.constant 0 : index
    %c0_73 = arith.constant 0 : index
    %118 = vector.load %arg7[%c4_71, %c0_72, %c0_73] : memref<10x64x128xf32, #tpu.memory_space<vmem>>, vector<1x64x128xf32>
    %119 = vector.shape_cast %118 : vector<1x64x128xf32> to vector<64x128xf32>
    %120 = vector.broadcast %117 : vector<64x1xf32> to vector<64x128xf32>
    %121 = arith.mulf %120, %119 : vector<64x128xf32>
    %122 = arith.addf %116, %121 : vector<64x128xf32>
    %123 = vector.extract_strided_slice %93 {offsets = [0, 5], sizes = [64, 1], strides = [1, 1]} : vector<64x16xf32> to vector<64x1xf32>
    %c5_74 = arith.constant 5 : index
    %c0_75 = arith.constant 0 : index
    %c0_76 = arith.constant 0 : index
    %124 = vector.load %arg7[%c5_74, %c0_75, %c0_76] : memref<10x64x128xf32, #tpu.memory_space<vmem>>, vector<1x64x128xf32>
    %125 = vector.shape_cast %124 : vector<1x64x128xf32> to vector<64x128xf32>
    %126 = vector.broadcast %123 : vector<64x1xf32> to vector<64x128xf32>
    %127 = arith.mulf %126, %125 : vector<64x128xf32>
    %128 = arith.addf %122, %127 : vector<64x128xf32>
    %129 = vector.extract_strided_slice %93 {offsets = [0, 6], sizes = [64, 1], strides = [1, 1]} : vector<64x16xf32> to vector<64x1xf32>
    %c6_77 = arith.constant 6 : index
    %c0_78 = arith.constant 0 : index
    %c0_79 = arith.constant 0 : index
    %130 = vector.load %arg7[%c6_77, %c0_78, %c0_79] : memref<10x64x128xf32, #tpu.memory_space<vmem>>, vector<1x64x128xf32>
    %131 = vector.shape_cast %130 : vector<1x64x128xf32> to vector<64x128xf32>
    %132 = vector.broadcast %129 : vector<64x1xf32> to vector<64x128xf32>
    %133 = arith.mulf %132, %131 : vector<64x128xf32>
    %134 = arith.addf %128, %133 : vector<64x128xf32>
    %135 = vector.extract_strided_slice %93 {offsets = [0, 7], sizes = [64, 1], strides = [1, 1]} : vector<64x16xf32> to vector<64x1xf32>
    %c7_80 = arith.constant 7 : index
    %c0_81 = arith.constant 0 : index
    %c0_82 = arith.constant 0 : index
    %136 = vector.load %arg7[%c7_80, %c0_81, %c0_82] : memref<10x64x128xf32, #tpu.memory_space<vmem>>, vector<1x64x128xf32>
    %137 = vector.shape_cast %136 : vector<1x64x128xf32> to vector<64x128xf32>
    %138 = vector.broadcast %135 : vector<64x1xf32> to vector<64x128xf32>
    %139 = arith.mulf %138, %137 : vector<64x128xf32>
    %140 = arith.addf %134, %139 : vector<64x128xf32>
    %141 = vector.extract_strided_slice %93 {offsets = [0, 8], sizes = [64, 1], strides = [1, 1]} : vector<64x16xf32> to vector<64x1xf32>
    %c8_83 = arith.constant 8 : index
    %c0_84 = arith.constant 0 : index
    %c0_85 = arith.constant 0 : index
    %142 = vector.load %arg7[%c8_83, %c0_84, %c0_85] : memref<10x64x128xf32, #tpu.memory_space<vmem>>, vector<1x64x128xf32>
    %143 = vector.shape_cast %142 : vector<1x64x128xf32> to vector<64x128xf32>
    %144 = vector.broadcast %141 : vector<64x1xf32> to vector<64x128xf32>
    %145 = arith.mulf %144, %143 : vector<64x128xf32>
    %146 = arith.addf %140, %145 : vector<64x128xf32>
    %147 = vector.extract_strided_slice %93 {offsets = [0, 9], sizes = [64, 1], strides = [1, 1]} : vector<64x16xf32> to vector<64x1xf32>
    %c9_86 = arith.constant 9 : index
    %c0_87 = arith.constant 0 : index
    %c0_88 = arith.constant 0 : index
    %148 = vector.load %arg7[%c9_86, %c0_87, %c0_88] : memref<10x64x128xf32, #tpu.memory_space<vmem>>, vector<1x64x128xf32>
    %149 = vector.shape_cast %148 : vector<1x64x128xf32> to vector<64x128xf32>
    %150 = vector.broadcast %147 : vector<64x1xf32> to vector<64x128xf32>
    %151 = arith.mulf %150, %149 : vector<64x128xf32>
    %152 = arith.addf %146, %151 : vector<64x128xf32>
    %cst_89 = arith.constant dense<0.000000e+00> : vector<128xf32>
    %153 = vector.multi_reduction <add>, %152, %cst_89 [0] : vector<64x128xf32> to vector<128xf32>
    %154 = vector.shape_cast %153 : vector<128xf32> to vector<1x128xf32>
    %c0_90 = arith.constant 0 : index
    %c0_91 = arith.constant 0 : index
    %155 = vector.load %arg8[%c0_90, %c0_91] : memref<1x128xf32, #tpu.memory_space<vmem>>, vector<1x128xf32>
    %156 = arith.addf %154, %155 : vector<1x128xf32>
    %cst_92 = arith.constant 0.000000e+00 : f32
    %157 = vector.broadcast %cst_92 : f32 to vector<1x128xf32>
    %158 = arith.maximumf %156, %157 : vector<1x128xf32>
    %c0_93 = arith.constant 0 : index
    %c0_94 = arith.constant 0 : index
    %159 = vector.load %arg9[%c0_93, %c0_94] : memref<128x16xf32, #tpu.memory_space<vmem>>, vector<128x16xf32>
    %cst_95 = arith.constant dense<0.000000e+00> : vector<1x16xf32>
    %160 = tpu.matmul %158, %159, %cst_95 {dimension_numbers = #tpu.dot_dimension_numbers<[1], [0], [0], [1], [0, 0, 1, 1], [], []>} : vector<1x128xf32>, vector<128x16xf32>, vector<1x16xf32> -> vector<1x16xf32>
    %c0_96 = arith.constant 0 : index
    %c0_97 = arith.constant 0 : index
    %161 = vector.load %arg10[%c0_96, %c0_97] : memref<1x16xf32, #tpu.memory_space<vmem>>, vector<1x16xf32>
    %162 = arith.addf %160, %161 : vector<1x16xf32>
    %cst_98 = arith.constant 0.000000e+00 : f32
    %163 = vector.broadcast %cst_98 : f32 to vector<1x16xf32>
    %164 = arith.maximumf %162, %163 : vector<1x16xf32>
    %c0_99 = arith.constant 0 : index
    %c0_100 = arith.constant 0 : index
    %165 = vector.load %arg11[%c0_99, %c0_100] : memref<16x2xf32, #tpu.memory_space<vmem>>, vector<16x2xf32>
    %cst_101 = arith.constant dense<0.000000e+00> : vector<1x2xf32>
    %166 = tpu.matmul %164, %165, %cst_101 {dimension_numbers = #tpu.dot_dimension_numbers<[1], [0], [0], [1], [0, 0, 1, 1], [], []>} : vector<1x16xf32>, vector<16x2xf32>, vector<1x2xf32> -> vector<1x2xf32>
    %c0_102 = arith.constant 0 : index
    %c0_103 = arith.constant 0 : index
    %167 = vector.load %arg12[%c0_102, %c0_103] : memref<1x2xf32, #tpu.memory_space<vmem>>, vector<1x2xf32>
    %168 = arith.addf %166, %167 : vector<1x2xf32>
    %c0_104 = arith.constant 0 : index
    %c0_105 = arith.constant 0 : index
    %c0_106 = arith.constant 0 : index
    %169 = vector.load %arg13[%c0_104, %c0_105, %c0_106] : memref<1x1x2xf32, #tpu.memory_space<vmem>>, vector<1x1x2xf32>
    %170 = vector.shape_cast %169 : vector<1x1x2xf32> to vector<1x2xf32>
    %171 = vector.shape_cast %168 : vector<1x2xf32> to vector<1x1x2xf32>
    tpu.vector_store %arg13[%c0_104, %c0_105, %c0_106], %171 {strides = array<i32>} : memref<1x1x2xf32, #tpu.memory_space<vmem>>, vector<1x1x2xf32>,
    return
  }
  func.func @transform_0(%arg0: i32) -> (i32, i32, i32) {
    %c0_i32 = arith.constant 0 : i32
    %c0_i32_0 = arith.constant 0 : i32
    %c0_i32_1 = arith.constant 0 : i32
    return %arg0, %c0_i32, %c0_i32_0 : i32, i32, i32
  }
  func.func @transform_1(%arg0: i32) -> (i32, i32) {
    %c0_i32 = arith.constant 0 : i32
    %c0_i32_0 = arith.constant 0 : i32
    %c0_i32_1 = arith.constant 0 : i32
    return %c0_i32, %c0_i32_0 : i32, i32
  }
  func.func @transform_2(%arg0: i32) -> (i32, i32, i32) {
    %c0_i32 = arith.constant 0 : i32
    %c0_i32_0 = arith.constant 0 : i32
    %c0_i32_1 = arith.constant 0 : i32
    %c0_i32_2 = arith.constant 0 : i32
    return %c0_i32, %c0_i32_0, %c0_i32_1 : i32, i32, i32
  }
  func.func @transform_3(%arg0: i32) -> (i32, i32) {
    %c0_i32 = arith.constant 0 : i32
    %c0_i32_0 = arith.constant 0 : i32
    %c0_i32_1 = arith.constant 0 : i32
    return %c0_i32, %c0_i32_0 : i32, i32
  }
  func.func @transform_4(%arg0: i32) -> (i32, i32, i32) {
    %c0_i32 = arith.constant 0 : i32
    %c0_i32_0 = arith.constant 0 : i32
    %c0_i32_1 = arith.constant 0 : i32
    %c0_i32_2 = arith.constant 0 : i32
    return %c0_i32, %c0_i32_0, %c0_i32_1 : i32, i32, i32
  }
  func.func @transform_5(%arg0: i32) -> (i32, i32) {
    %c0_i32 = arith.constant 0 : i32
    %c0_i32_0 = arith.constant 0 : i32
    %c0_i32_1 = arith.constant 0 : i32
    return %c0_i32, %c0_i32_0 : i32, i32
  }
  func.func @transform_6(%arg0: i32) -> (i32, i32, i32) {
    %c0_i32 = arith.constant 0 : i32
    %c0_i32_0 = arith.constant 0 : i32
    %c0_i32_1 = arith.constant 0 : i32
    %c0_i32_2 = arith.constant 0 : i32
    return %c0_i32, %c0_i32_0, %c0_i32_1 : i32, i32, i32
  }
  func.func @transform_7(%arg0: i32) -> (i32, i32) {
    %c0_i32 = arith.constant 0 : i32
    %c0_i32_0 = arith.constant 0 : i32
    %c0_i32_1 = arith.constant 0 : i32
    return %c0_i32, %c0_i32_0 : i32, i32
  }
  func.func @transform_8(%arg0: i32) -> (i32, i32) {
    %c0_i32 = arith.constant 0 : i32
    %c0_i32_0 = arith.constant 0 : i32
    %c0_i32_1 = arith.constant 0 : i32
    return %c0_i32, %c0_i32_0 : i32, i32
  }
  func.func @transform_9(%arg0: i32) -> (i32, i32) {
    %c0_i32 = arith.constant 0 : i32
    %c0_i32_0 = arith.constant 0 : i32
    %c0_i32_1 = arith.constant 0 : i32
    return %c0_i32, %c0_i32_0 : i32, i32
  }
  func.func @transform_10(%arg0: i32) -> (i32, i32) {
    %c0_i32 = arith.constant 0 : i32
    %c0_i32_0 = arith.constant 0 : i32
    %c0_i32_1 = arith.constant 0 : i32
    return %c0_i32, %c0_i32_0 : i32, i32
  }
  func.func @transform_11(%arg0: i32) -> (i32, i32) {
    %c0_i32 = arith.constant 0 : i32
    %c0_i32_0 = arith.constant 0 : i32
    %c0_i32_1 = arith.constant 0 : i32
    return %c0_i32, %c0_i32_0 : i32, i32
  }
  func.func @transform_12(%arg0: i32) -> (i32, i32, i32) {
    %c0_i32 = arith.constant 0 : i32
    %c0_i32_0 = arith.constant 0 : i32
    %c0_i32_1 = arith.constant 0 : i32
    return %arg0, %c0_i32, %c0_i32_0 : i32, i32, i32
  }
}

</mosaic_0001>

<bundles_post_ra>
// kernel: cnn5_forward.1
= control target key start
LH: loop header
LB: loop body
LE: loop exit
PB: predicated region body
PF: predicated region fallthrough
CT: control target
= control target key end

     0   :  { %s23023_s0 = inlined_call_operand.vmem [shape: bf16[2,640,16], index: 0, kind: input, shape index: {}]   ;;  %s23024_s1 = inlined_call_operand.vmem [shape: bf16[896,640], index: 1, kind: input, shape index: {}]   ;;  %s23025_s2 = inlined_call_operand.vmem [shape: bf16[10,16,128], index: 2, kind: input, shape index: {}]   ;;  %s23026_s3 = inlined_call_operand.vmem [shape: f32[1,128], index: 3, kind: input, shape index: {}]   ;;  %s23027_s4 = inlined_call_operand.vmem [shape: bf16[5,128,16], index: 4, kind: input, shape index: {}]   ;;  %s23028_s5 = inlined_call_operand.vmem [shape: f32[1,16], index: 5, kind: input, shape index: {}]   ;;  %s23029_s6 = inlined_call_operand.vmem [shape: f32[10,64,128], index: 6, kind: input, shape index: {}]   ;;  %s23030_s7 = inlined_call_operand.vmem [shape: f32[1,128], index: 7, kind: input, shape index: {}]   ;;  %s23031_s8 = inlined_call_operand.vmem [shape: f32[128,16], index: 8, kind: input, shape index: {}]   ;;  %s23032_s9 = inlined_call_operand.vmem [shape: f32[1,16], index: 9, kind: input, shape index: {}]   ;;  %s23033_s10 = inlined_call_operand.vmem [shape: f32[16,2], index: 10, kind: input, shape index: {}]   ;;  %s23034_s11 = inlined_call_operand.vmem [shape: f32[1,2], index: 11, kind: input, shape index: {}]   ;;  %s23035_s12 = inlined_call_operand.hbm [shape: f32[2,1,2], index: 12, kind: output, shape index: {}]  }
   0x1   :  { %23751 = sst [smem:[#allocation228_spill]] %s23023_s0 }
   0x2   :  { %23752 = sst [smem:[#allocation229_spill]] %s23024_s1 }
   0x3   :  { %17 = vsyncpa [#allocation3], 0 }
   0x4   :  { %19 = vsyncpa [#allocation3 + $0x1], 0  ;;  %s16387_s21 = smov 0   ;;  %s16389_s22 = smov 0  }
   0x5   :  { %s16391_s23 = smov 0   ;;  %s16393_s24 = smov 0  }
   0x6 LB: > { %s16408_s25 = sadd.s32 4294967295, %s16306_s24   ;;  %s11805_s26 = sadd.s32 4294967294, %s16306_s24   ;;  %s16306_s24 = sphi %s16393_s24, %s25604_s24   ;;  %s16302_s23 = sphi %s16391_s23, %s25603_s23   ;;  %s16298_s22 = sphi %s16389_s22, %s25602_s22   ;;  %s16294_s21 = sphi %s16387_s21, %s25601_s21  }
   0x7   : > { %s16412_s27 = sadd.s32 1, %s16306_s24   ;;  %s289_s28 = sadd.s32 1, %s16302_s23 }
   0x8   : > { %s286_s29 = ssub.s32 %s16306_s24, %s16412_s27  ;;  %p299_p0 = scmp.ne.s32.totalorder %s16302_s23, %s16298_s22 }
   0x9   : > { %p287_p1 = scmp.eq.s32.totalorder %s286_s29, 0  ;;  %p300_p2 = scmp.eq.s32.totalorder %s16408_s25, 1 }
   0xa   : > { %p305_p3 = scmp.ne.s32.totalorder %s16298_s22, %s16294_s21  ;;  %p306_p4 = scmp.eq.s32.totalorder %s11805_s26, 1 }
   0xb   : > { %s16423_s30 = scalar_select %p287_p1, %s16302_s23, %s289_s28  }
   0xc   : > { %p16425_p5 = por %p300_p2, %p299_p0  ;;  %p16429_p6 = por %p306_p4, %p305_p3 }
   0xd   : > { %p11808_p7 = scmp.ge.s32.totalorder %s16306_s24, 1  ;;  %p365_p8 = scmp.lt.s32.totalorder %s16306_s24, 3 }
   0xf   : > { %p366_p9 = pnand %p11808_p7, %p365_p8 }
  0x11   : > { %369 = sbr.rel (%p366_p9) target bundleno = 3718 (0xe86), region = 68 }
  0x18   : > { %v15649_v0 = vld [vmem:[%s23025_s2] sm:$0xff]   ;;  %p406_p10 = scmp.lt.s32.totalorder %s16408_s25, 1  ;;  %vm700_vm0 = vcmask 130048   ;;  %v15664_v1 = vld [vmem:[%s23025_s2 + $0x8] sm:$0xff]   ;;  %s23755_s0 = sld [smem:[#allocation228_spill]]  ;;  %v15691_v36 = vld [vmem:[%s23025_s2 + $0x18] sm:$0xff]  }
  0x19   : > { %13474 = vmatprep.subr.bf16.mxu0 %v15649_v0  ;;  %14971 = vmatprep.subr.bf16.mxu1 %v15664_v1  ;;  %v15692_v38 = vld [vmem:[%s23025_s2 + $0x10] sm:$0xff]   ;;  %v15693_v57 = vld [vmem:[%s23025_s2 + $0x20] sm:$0xff]   ;;  %v15694_v58 = vld [vmem:[%s23025_s2 + $0x28] sm:$0xff]   ;;  %s25149_s1 = sld [smem:[#allocation229_spill]]  ;;  %vm16319_vm1 = vmmov 0   ;;  %s12737_s17 = sshll.u32 %s16408_s25, 4 }
  0x1a   : > { %s407_s19 = scalar_select %p406_p10, %s16408_s25, 1  ;;  %13475 = vmatpush3.bf16.msra.mxu0 %v15649_v0  ;;  %14972 = vmatpush3.bf16.msra.mxu1 %v15664_v1  ;;  %vm11735_vm2 = vcmask 8192  }
  0x1b   : > { %13556 = vmatprep.subr.bf16.mxu0 %v15664_v1  ;;  %13720 = vmatprep.subr.bf16.mxu1 %v15691_v36  ;;  %s22981_s28 = scalar_lea.hbm %s23035_s12, %s12737_s17  ;;  %s16321_s25 = smov [#allocation2]  }
  0x1c   : > { %s15517_s20 = smul.u32 320, %s407_s19 }
  0x1e   : > { %s16446_s29 = scalar_lea.vmem %s23755_s0, %s15517_s20  ;;  %s404_s0 = sand.u32 1, %s16298_s22  }
  0x1f   : > { %v16449_v2 = vld [vmem:[%s16446_s29] sm:$0xff]   ;;  %v16452_v3 = vld [vmem:[%s16446_s29 + $0x8] sm:$0xff]   ;;  %v16457_v4 = vld [vmem:[%s16446_s29 + $0x10] sm:$0xff]   ;;  %s405_s18 = scalar_lea.vmem [#allocation2], %s404_s0  ;;  %s11738_s15 = scalar_lea.sflag [#allocation3], %s404_s0 }
  0x20   : > { %13476 = vmatprep.mubr.msk.bf16.mxu0 %vm700_vm0, %v16449_v2  ;;  %v16464_v5 = vld [vmem:[%s16446_s29 + $0x18] sm:$0xff]   ;;  %v16467_v6 = vld [vmem:[%s16446_s29 + $0x20] sm:$0xff]   ;;  %v16474_v7 = vld [vmem:[%s16446_s29 + $0x28] sm:$0xff]   ;;  %s11750_s19 = sshll.u32 %s405_s18, 4  ;;  %s22983_s19 = int_to_ptr.vmem [resolvable:$true] %s11750_s19 }
  0x21   : > { %13477 = vmatmul.mubr.msk.bf16.vlgmr.msra.gmra.mrb[0].mxu0 %vm700_vm0, %v16452_v3  ;;  %v16477_v8 = vld [vmem:[%s16446_s29 + $0x30] sm:$0xff]   ;;  %v15666_v10 = vld [vmem:[%s16446_s29 + $0x78] sm:$0xff]   ;;  %v15667_v11 = vld [vmem:[%s16446_s29 + $0x80] sm:$0xff]   ;;  %s16244_s16 = scalar_lea.vmem %s22983_s19, 16 }
  0x22   : > { %13480 = vmatprep.mubr.msk.bf16.mxu0 %vm700_vm0, %v16457_v4  ;;  %13557 = vmatpush3.bf16.msra.mxu0 %v15664_v1  ;;  %v15665_v9 = vld [vmem:[%s16446_s29 + $0x70] sm:$0xff]   ;;  %v15668_v12 = vld [vmem:[%s16446_s29 + $0x88] sm:$0xff]   ;;  %v16492_v14 = vld [vmem:[%s16446_s29 + $0x38] sm:$0xff]   ;;  %p16245_p11 = scmp.ne.s32.totalorder %s22983_s19, %s16244_s16 }
  0x23   : > { %13586 = vmatprep.mubr.msk.bf16.mxu1 %vm700_vm0, %v15665_v9  ;;  %v15669_v13 = vld [vmem:[%s16446_s29 + $0x90] sm:$0xff]   ;;  %v16495_v15 = vld [vmem:[%s16446_s29 + $0x40] sm:$0xff]   ;;  %v15670_v16 = vld [vmem:[%s16446_s29 + $0x98] sm:$0xff]   ;;  %13638 = vmatprep.subr.bf16.mxu0 %v15692_v38 }
  0x24   : > { %13587 = vmatmul.mubr.msk.bf16.vlgmr.msra.gmra.mrb[0].mxu1 %vm700_vm0, %v15666_v10  ;;  %v15671_v17 = vld [vmem:[%s16446_s29 + $0xa0] sm:$0xff]   ;;  %v16506_v18 = vld [vmem:[%s16446_s29 + $0x48] sm:$0xff]   ;;  %v16509_v19 = vld [vmem:[%s16446_s29 + $0x50] sm:$0xff]   ;;  %p16246_p12 = pnand %p16245_p11, %p16425_p5 }
  0x25   : > { %13590 = vmatprep.mubr.msk.bf16.mxu1 %vm700_vm0, %v15667_v11  ;;  %v16518_v20 = vld [vmem:[%s16446_s29 + $0x58] sm:$0xff]   ;;  %v15672_v21 = vld [vmem:[%s16446_s29 + $0xa8] sm:$0xff]   ;;  %v15673_v22 = vld [vmem:[%s16446_s29 + $0xb0] sm:$0xff]   ;;  %13721 = vmatpush3.bf16.msra.mxu1 %v15691_v36 }
  0x26   : > { %v16523_v23 = vld [vmem:[%s16446_s29 + $0x60] sm:$0xff]   ;;  %v15674_v24 = vld [vmem:[%s16446_s29 + $0xb8] sm:$0xff]   ;;  %v16534_v26 = vld [vmem:[%s16446_s29 + $0x68] sm:$0xff]   ;;  %13884 = vmatprep.subr.bf16.mxu1 %v15694_v58  ;;  %p16247_p13 = pneg %p16246_p12 }
  0x27   : > { %v15675_v25 = vld [vmem:[%s16446_s29 + $0xc0] sm:$0xff]   ;;  %v16541_v27 = vld [vmem:[%s16446_s29 + $0xc8] sm:$0xff]   ;;  %v16545_v28 = vld [vmem:[%s16446_s29 + $0xd0] sm:$0xff]  }
  0x28   : > { %v16553_v29 = vld [vmem:[%s16446_s29 + $0xd8] sm:$0xff]   ;;  %v16557_v30 = vld [vmem:[%s16446_s29 + $0xe0] sm:$0xff]   ;;  %v16565_v31 = vld [vmem:[%s16446_s29 + $0xe8] sm:$0xff]  }
  0x29   : > { %13481 = vmatmul.mubr.msk.bf16.gmra.mrb[4].mxu0 %vm700_vm0, %v16464_v5  ;;  %v16569_v32 = vld [vmem:[%s16446_s29 + $0xf0] sm:$0xff]   ;;  %v16577_v33 = vld [vmem:[%s16446_s29 + $0xf8] sm:$0xff]   ;;  %v16581_v34 = vld [vmem:[%s16446_s29 + $0x100] sm:$0xff]  }
  0x2a   : > { %13484 = vmatprep.mubr.msk.bf16.mxu0 %vm700_vm0, %v16467_v6  ;;  %v16589_v35 = vld [vmem:[%s16446_s29 + $0x108] sm:$0xff]   ;;  %v16596_v37 = vld [vmem:[%s16446_s29 + $0x110] sm:$0xff]   ;;  %v16607_v39 = vld [vmem:[%s16446_s29 + $0x118] sm:$0xff]  }
  0x2b   : > { %v16611_v40 = vld [vmem:[%s16446_s29 + $0x120] sm:$0xff]   ;;  %v16620_v41 = vld [vmem:[%s16446_s29 + $0x128] sm:$0xff]   ;;  %v16625_v42 = vld [vmem:[%s16446_s29 + $0x130] sm:$0xff]  }
  0x2c   : > { %13591 = vmatmul.mubr.msk.bf16.gmra.mrb[4].mxu1 %vm700_vm0, %v15668_v12  ;;  %v16634_v43 = vld [vmem:[%s16446_s29 + $0x138] sm:$0xff]   ;;  %v16685_v44 = vld [vmem:[%s16446_s29] sm:$0xff]   ;;  %v16694_v45 = vld [vmem:[%s16446_s29 + $0x8] sm:$0xff]  }
  0x2d   : > { %13594 = vmatprep.mubr.msk.bf16.mxu1 %vm700_vm0, %v15669_v13  ;;  %v16699_v46 = vld [vmem:[%s16446_s29 + $0x10] sm:$0xff]   ;;  %v16711_v48 = vld [vmem:[%s16446_s29 + $0x18] sm:$0xff]   ;;  %v16716_v49 = vld [vmem:[%s16446_s29 + $0x20] sm:$0xff]  }
  0x2e   : > { %v16706_v47 = vld [vmem:[%s16446_s29 + $0x70] sm:$0xff]   ;;  %v16721_v50 = vld [vmem:[%s16446_s29 + $0x78] sm:$0xff]   ;;  %v16726_v51 = vld [vmem:[%s16446_s29 + $0x80] sm:$0xff]  }
  0x2f   : > { %v16731_v52 = vld [vmem:[%s16446_s29 + $0x28] sm:$0xff]   ;;  %v16736_v53 = vld [vmem:[%s16446_s29 + $0x30] sm:$0xff]   ;;  %v16751_v56 = vld [vmem:[%s16446_s29 + $0x38] sm:$0xff]  }
  0x30   : > { %23756 = vst [vmem:[#allocation5_spill] sm:$0xff] %v16731_v52  ;;  %23757 = vst [vmem:[#allocation6_spill] sm:$0xff] %v16736_v53  ;;  %v16741_v54 = vld [vmem:[%s16446_s29 + $0x88] sm:$0xff]   ;;  %v16746_v55 = vld [vmem:[%s16446_s29 + $0x90] sm:$0xff]  }
  0x31   : > { %13485 = vmatmul.mubr.msk.bf16.gmra.mrb[8].mxu0 %vm700_vm0, %v16474_v7  ;;  %23758 = vst [vmem:[#allocation7_spill] sm:$0xff] %v16746_v55  ;;  %v16762_v59 = vld [vmem:[%s16446_s29 + $0x40] sm:$0xff]   ;;  %v16767_v60 = vld [vmem:[%s16446_s29 + $0x98] sm:$0xff]   ;;  %v16777_v62 = vld [vmem:[%s16446_s29 + $0x48] sm:$0xff]  }
  0x32   : > { %13488 = vmatprep.mubr.msk.bf16.mxu0 %vm700_vm0, %v16477_v8  ;;  %v16772_v61 = vld [vmem:[%s16446_s29 + $0xa0] sm:$0xff]   ;;  %v16782_v63 = vld [vmem:[%s16446_s29 + $0x50] sm:$0xff]   ;;  %v16787_v0 = vld [vmem:[%s16446_s29 + $0xa8] sm:$0xff]  }
  0x33   : > { %23759 = vst [vmem:[#allocation8_spill] sm:$0xff] %v16782_v63  ;;  %23760 = vst [vmem:[#allocation9_spill] sm:$0xff] %v16787_v0  ;;  %v16792_v1 = vld [vmem:[%s16446_s29 + $0xb0] sm:$0xff]  }
  0x34   : > { %13595 = vmatmul.mubr.msk.bf16.gmra.mrb[8].mxu1 %vm700_vm0, %v15670_v16  ;;  %23761 = vst [vmem:[#allocation10_spill] sm:$0xff] %v16792_v1 }
  0x35   : > { %13598 = vmatprep.mubr.msk.bf16.mxu1 %vm700_vm0, %v15671_v17 }
  0x39   : > { %13489 = vmatmul.mubr.msk.bf16.gmra.mrb[12].mxu0 %vm700_vm0, %v16492_v14 }
  0x3a   : > { %13492 = vmatprep.mubr.msk.bf16.mxu0 %vm700_vm0, %v16495_v15 }
  0x3c   : > { %13599 = vmatmul.mubr.msk.bf16.gmra.mrb[12].mxu1 %vm700_vm0, %v15672_v21 }
  0x3d   : > { %13602 = vmatprep.mubr.msk.bf16.mxu1 %vm700_vm0, %v15673_v22 }
  0x41   : > { %13493 = vmatmul.mubr.msk.bf16.gmra.mrb[16].mxu0 %vm700_vm0, %v16506_v18 }
  0x42   : > { %13496 = vmatprep.mubr.msk.bf16.mxu0 %vm700_vm0, %v16509_v19 }
  0x44   : > { %13603 = vmatmul.mubr.msk.bf16.gmra.mrb[16].mxu1 %vm700_vm0, %v15674_v24 }
  0x45   : > { %13606 = vmatprep.mubr.msk.bf16.mxu1 %vm700_vm0, %v15675_v25 }
  0x49   : > { %13497 = vmatmul.mubr.msk.bf16.gmra.mrb[20].mxu0 %vm700_vm0, %v16518_v20 }
  0x4a   : > { %13500 = vmatprep.mubr.msk.bf16.mxu0 %vm700_vm0, %v16523_v23 }
  0x4c   : > { %13607 = vmatmul.mubr.msk.bf16.gmra.mrb[20].mxu1 %vm700_vm0, %v16541_v27 }
  0x4d   : > { %13610 = vmatprep.mubr.msk.bf16.mxu1 %vm700_vm0, %v16545_v28 }
  0x51   : > { %13501 = vmatmul.mubr.msk.bf16.gmra.mrb[24].mxu0 %vm700_vm0, %v16534_v26 }
  0x52   : > { %13504 = vmatprep.mubr.msk.bf16.mxu0 %vm700_vm0, %v15665_v9 }
  0x54   : > { %13611 = vmatmul.mubr.msk.bf16.gmra.mrb[24].mxu1 %vm700_vm0, %v16553_v29 }
  0x55   : > { %13614 = vmatprep.mubr.msk.bf16.mxu1 %vm700_vm0, %v16557_v30 }
  0x59   : > { %13505 = vmatmul.mubr.msk.bf16.gmra.mrb[28].mxu0 %vm700_vm0, %v15666_v10 }
  0x5a   : > { %13508 = vmatprep.mubr.msk.bf16.mxu0 %vm700_vm0, %v15667_v11 }
  0x5c   : > { %13615 = vmatmul.mubr.msk.bf16.gmra.mrb[28].mxu1 %vm700_vm0, %v16565_v31 }
  0x5d   : > { %13618 = vmatprep.mubr.msk.bf16.mxu1 %vm700_vm0, %v16569_v32 }
  0x61   : > { %13509 = vmatmul.mubr.msk.bf16.gmra.mrb[32].mxu0 %vm700_vm0, %v15668_v12 }
  0x62   : > { %13512 = vmatprep.mubr.msk.bf16.mxu0 %vm700_vm0, %v15669_v13 }
  0x64   : > { %13619 = vmatmul.mubr.msk.bf16.gmra.mrb[32].mxu1 %vm700_vm0, %v16577_v33 }
  0x65   : > { %13622 = vmatprep.mubr.msk.bf16.mxu1 %vm700_vm0, %v16581_v34 }
  0x69   : > { %13513 = vmatmul.mubr.msk.bf16.gmra.mrb[36].mxu0 %vm700_vm0, %v15670_v16 }
  0x6a   : > { %13516 = vmatprep.mubr.msk.bf16.mxu0 %vm700_vm0, %v15671_v17 }
  0x6c   : > { %13623 = vmatmul.mubr.msk.bf16.gmra.mrb[36].mxu1 %vm700_vm0, %v16589_v35 }
  0x6d   : > { %13626 = vmatprep.mubr.msk.bf16.mxu1 %vm700_vm0, %v16596_v37 }
  0x71   : > { %13517 = vmatmul.mubr.msk.bf16.gmra.mrb[40].mxu0 %vm700_vm0, %v15672_v21 }
  0x72   : > { %13520 = vmatprep.mubr.msk.bf16.mxu0 %vm700_vm0, %v15673_v22 }
  0x74   : > { %13627 = vmatmul.mubr.msk.bf16.gmra.mrb[40].mxu1 %vm700_vm0, %v16607_v39 }
  0x75   : > { %13630 = vmatprep.mubr.msk.bf16.mxu1 %vm700_vm0, %v16611_v40 }
  0x79   : > { %13521 = vmatmul.mubr.msk.bf16.gmra.mrb[44].mxu0 %vm700_vm0, %v15674_v24 }
  0x7a   : > { %13524 = vmatprep.mubr.msk.bf16.mxu0 %vm700_vm0, %v15675_v25 }
  0x7c   : > { %13631 = vmatmul.mubr.msk.bf16.gmra.mrb[44].mxu1 %vm700_vm0, %v16620_v41 }
  0x7d   : > { %13634 = vmatprep.mubr.msk.bf16.mxu1 %vm700_vm0, %v16625_v42 }
  0x81   : > { %13525 = vmatmul.mubr.msk.bf16.gmra.mrb[48].mxu0 %vm700_vm0, %v16541_v27 }
  0x82   : > { %13528 = vmatprep.mubr.msk.bf16.mxu0 %vm700_vm0, %v16545_v28 }
  0x84   : > { %13635 = vmatmul.mubr.msk.bf16.gmra.mrb[48].mxu1 %vm700_vm0, %v16634_v43 }
  0x85   : > { %13722 = vmatprep.mubr.msk.bf16.mxu1 %vm700_vm0, %v16449_v2  ;;  %v16797_v2 = vld [vmem:[%s16446_s29 + $0x58] sm:$0xff]  }
  0x86   : > { %23762 = vst [vmem:[#allocation11_spill] sm:$0xff] %v16797_v2 }
  0x89   : > { %13529 = vmatmul.mubr.msk.bf16.gmra.mrb[52].mxu0 %vm700_vm0, %v16553_v29 }
  0x8a   : > { %13532 = vmatprep.mubr.msk.bf16.mxu0 %vm700_vm0, %v16557_v30 }
  0x8c   : > { %13723 = vmatmul.mubr.msk.bf16.vlgmr.msra.gmra.mrb[52].mxu1 %vm700_vm0, %v16452_v3  ;;  %v16802_v3 = vld [vmem:[%s16446_s29 + $0x60] sm:$0xff]  }
  0x8d   : > { %13726 = vmatprep.mubr.msk.bf16.mxu1 %vm700_vm0, %v16457_v4  ;;  %13885 = vmatpush3.bf16.msra.mxu1 %v15694_v58  ;;  %23763 = vst [vmem:[#allocation12_spill] sm:$0xff] %v16802_v3  ;;  %v16807_v4 = vld [vmem:[%s16446_s29 + $0xb8] sm:$0xff]  }
  0x8e   : > { %23764 = vst [vmem:[#allocation13_spill] sm:$0xff] %v16807_v4 }
  0x91   : > { %13533 = vmatmul.mubr.msk.bf16.gmra.mrb[56].mxu0 %vm700_vm0, %v16565_v31 }
  0x92   : > { %13536 = vmatprep.mubr.msk.bf16.mxu0 %vm700_vm0, %v16569_v32 }
  0x94   : > { %13727 = vmatmul.mubr.msk.bf16.gmra.mrb[56].mxu1 %vm700_vm0, %v16464_v5  ;;  %v16812_v5 = vld [vmem:[%s16446_s29 + $0xc0] sm:$0xff]  }
  0x95   : > { %13730 = vmatprep.mubr.msk.bf16.mxu1 %vm700_vm0, %v16467_v6  ;;  %23765 = vst [vmem:[#allocation14_spill] sm:$0xff] %v16812_v5 }
  0x99   : > { %13537 = vmatmul.mubr.msk.bf16.gmra.mrb[60].mxu0 %vm700_vm0, %v16577_v33 }
  0x9a   : > { %13540 = vmatprep.mubr.msk.bf16.mxu0 %vm700_vm0, %v16581_v34 }
  0x9c   : > { %13731 = vmatmul.mubr.msk.bf16.gmra.mrb[60].mxu1 %vm700_vm0, %v16474_v7 }
  0x9d   : > { %13734 = vmatprep.mubr.msk.bf16.mxu1 %vm700_vm0, %v16477_v8 }
  0xa1   : > { %13541 = vmatmul.mubr.msk.bf16.gmra.mrb[64].mxu0 %vm700_vm0, %v16589_v35 }
  0xa2   : > { %13544 = vmatprep.mubr.msk.bf16.mxu0 %vm700_vm0, %v16596_v37 }
  0xa4   : > { %13735 = vmatmul.mubr.msk.bf16.gmra.mrb[64].mxu1 %vm700_vm0, %v16492_v14 }
  0xa5   : > { %13738 = vmatprep.mubr.msk.bf16.mxu1 %vm700_vm0, %v16495_v15 }
  0xa9   : > { %13545 = vmatmul.mubr.msk.bf16.gmra.mrb[68].mxu0 %vm700_vm0, %v16607_v39 }
  0xaa   : > { %13548 = vmatprep.mubr.msk.bf16.mxu0 %vm700_vm0, %v16611_v40 }
  0xac   : > { %13739 = vmatmul.mubr.msk.bf16.gmra.mrb[68].mxu1 %vm700_vm0, %v16506_v18 }
  0xad   : > { %13742 = vmatprep.mubr.msk.bf16.mxu1 %vm700_vm0, %v16509_v19 }
  0xb1   : > { %13549 = vmatmul.mubr.msk.bf16.gmra.mrb[72].mxu0 %vm700_vm0, %v16620_v41 }
  0xb2   : > { %13552 = vmatprep.mubr.msk.bf16.mxu0 %vm700_vm0, %v16625_v42 }
  0xb4   : > { %13743 = vmatmul.mubr.msk.bf16.gmra.mrb[72].mxu1 %vm700_vm0, %v16518_v20 }
  0xb5   : > { %13746 = vmatprep.mubr.msk.bf16.mxu1 %vm700_vm0, %v16523_v23 }
  0xb9   : > { %13553 = vmatmul.mubr.msk.bf16.gmra.mrb[76].mxu0 %vm700_vm0, %v16634_v43 }
  0xba   : > { %13558 = vmatprep.mubr.msk.bf16.mxu0 %vm700_vm0, %v16685_v44 }
  0xbc   : > { %13747 = vmatmul.mubr.msk.bf16.gmra.mrb[76].mxu1 %vm700_vm0, %v16534_v26 }
  0xbd   : > { %13750 = vmatprep.mubr.msk.bf16.mxu1 %vm700_vm0, %v16706_v47 }
  0xc1   : > { %13559 = vmatmul.mubr.msk.bf16.vlgmr.msra.gmra.mrb[80].mxu0 %vm700_vm0, %v16694_v45 }
  0xc2   : > { %13562 = vmatprep.mubr.msk.bf16.mxu0 %vm700_vm0, %v16699_v46  ;;  %13639 = vmatpush3.bf16.msra.mxu0 %v15692_v38 }
  0xc3   : > { %13802 = vmatprep.subr.bf16.mxu0 %v15693_v57 }
  0xc4   : > { %13751 = vmatmul.mubr.msk.bf16.gmra.mrb[80].mxu1 %vm700_vm0, %v16721_v50 }
  0xc5   : > { %13754 = vmatprep.mubr.msk.bf16.mxu1 %vm700_vm0, %v16726_v51 }
  0xc9   : > { %13563 = vmatmul.mubr.msk.bf16.gmra.mrb[84].mxu0 %vm700_vm0, %v16711_v48 }
  0xca   : > { %13566 = vmatprep.mubr.msk.bf16.mxu0 %vm700_vm0, %v16716_v49 }
  0xcc   : > { %13755 = vmatmul.mubr.msk.bf16.gmra.mrb[84].mxu1 %vm700_vm0, %v16741_v54 }
  0xcd   : > { %13758 = vmatprep.mubr.msk.bf16.mxu1 %vm700_vm0, %v16746_v55 }
  0xd1   : > { %13567 = vmatmul.mubr.msk.bf16.gmra.mrb[88].mxu0 %vm700_vm0, %v16731_v52 }
  0xd2   : > { %13570 = vmatprep.mubr.msk.bf16.mxu0 %vm700_vm0, %v16736_v53 }
  0xd4   : > { %13759 = vmatmul.mubr.msk.bf16.gmra.mrb[88].mxu1 %vm700_vm0, %v16767_v60 }
  0xd5   : > { %13762 = vmatprep.mubr.msk.bf16.mxu1 %vm700_vm0, %v16772_v61 }
  0xd9   : > { %13571 = vmatmul.mubr.msk.bf16.gmra.mrb[92].mxu0 %vm700_vm0, %v16751_v56 }
  0xda   : > { %13574 = vmatprep.mubr.msk.bf16.mxu0 %vm700_vm0, %v16762_v59 }
  0xdc   : > { %13763 = vmatmul.mubr.msk.bf16.gmra.mrb[92].mxu1 %vm700_vm0, %v16787_v0 }
  0xdd   : > { %13766 = vmatprep.mubr.msk.bf16.mxu1 %vm700_vm0, %v16792_v1 }
  0xe1   : > { %13575 = vmatmul.mubr.msk.bf16.gmra.mrb[96].mxu0 %vm700_vm0, %v16777_v62 }
  0xe2   : > { %13578 = vmatprep.mubr.msk.bf16.mxu0 %vm700_vm0, %v16782_v63 }
  0xe4   : > { %13767 = vmatmul.mubr.msk.bf16.gmra.mrb[96].mxu1 %vm700_vm0, %v16807_v4 }
  0xe5   : > { %13770 = vmatprep.mubr.msk.bf16.mxu1 %vm700_vm0, %v16812_v5 }
  0xe9   : > { %13579 = vmatmul.mubr.msk.bf16.gmra.mrb[100].mxu0 %vm700_vm0, %v16797_v2 }
  0xea   : > { %13582 = vmatprep.mubr.msk.bf16.mxu0 %vm700_vm0, %v16802_v3 }
  0xec   : > { %13771 = vmatmul.mubr.msk.bf16.gmra.mrb[100].mxu1 %vm700_vm0, %v16541_v27 }
  0xed   : > { %13774 = vmatprep.mubr.msk.bf16.mxu1 %vm700_vm0, %v16545_v28 }
  0xf1   : > { %13583 = vmatmul.mubr.msk.bf16.gmra.mrb[104].mxu0 %vm700_vm0, %v16534_v26 }
  0xf2   : > { %13640 = vmatprep.mubr.msk.bf16.mxu0 %vm700_vm0, %v16685_v44 }
  0xf4   : > { %v16820_v6 = vpop.f32.mrb[0].mxu0  ;;  %13775 = vmatmul.mubr.msk.bf16.gmra.mrb[104].mxu1 %vm700_vm0, %v16553_v29 }
  0xf5   : > { %v16822_v7 = vpop.f32.mrb[1].mxu0  ;;  %13778 = vmatprep.mubr.msk.bf16.mxu1 %vm700_vm0, %v16557_v30 }
  0xf6   : > { %v16824_v8 = vpop.f32.mrb[2].mxu0 }
  0xf7   : > { %v16826_v9 = vpop.f32.mrb[3].mxu0  ;;  %v16852_v14 = vpop.f32.mrb[0].mxu1 }
  0xf8   : > { %23767 = vst [vmem:[#allocation16_spill] sm:$0xff] %v16852_v14  ;;  %v16854_v15 = vpop.f32.mrb[1].mxu1 }
  0xf9   : > { %13641 = vmatmul.mubr.msk.bf16.vlgmr.msra.gmra.mrb[108].mxu0 %vm700_vm0, %v16694_v45  ;;  %23768 = vst [vmem:[#allocation17_spill] sm:$0xff] %v16854_v15  ;;  %v16858_v17 = vpop.f32.mrb[2].mxu1 }
  0xfa   : > { %13644 = vmatprep.mubr.msk.bf16.mxu0 %vm700_vm0, %v16699_v46  ;;  %13803 = vmatpush3.bf16.msra.mxu0 %v15693_v57  ;;  %23770 = vst [vmem:[#allocation19_spill] sm:$0xff] %v16858_v17  ;;  %v16862_v19 = vpop.f32.mrb[3].mxu1 }
  0xfb   : > { %23772 = vst [vmem:[#allocation21_spill] sm:$0xff] %v16862_v19 }
  0xfc   : > { %v16836_v10 = vpop.f32.mrb[4].mxu0  ;;  %13779 = vmatmul.mubr.msk.bf16.gmra.mrb[108].mxu1 %vm700_vm0, %v16565_v31 }
  0xfd   : > { %v16838_v11 = vpop.f32.mrb[5].mxu0  ;;  %13782 = vmatprep.mubr.msk.bf16.mxu1 %vm700_vm0, %v16569_v32 }
  0xfe   : > { %v16840_v12 = vpop.f32.mrb[6].mxu0 }
  0xff   : > { %v16842_v13 = vpop.f32.mrb[7].mxu0  ;;  %v16876_v22 = vpop.f32.mrb[4].mxu1 }
 0x100   : > { %23766 = vst [vmem:[#allocation15_spill] sm:$0xff] %v16842_v13  ;;  %23775 = vst [vmem:[#allocation24_spill] sm:$0xff] %v16876_v22  ;;  %v16878_v23 = vpop.f32.mrb[5].mxu1 }
 0x101   : > { %13645 = vmatmul.mubr.msk.bf16.gmra.mrb[112].mxu0 %vm700_vm0, %v16711_v48  ;;  %23776 = vst [vmem:[#allocation25_spill] sm:$0xff] %v16878_v23  ;;  %v16882_v25 = vpop.f32.mrb[6].mxu1 }
 0x102   : > { %13648 = vmatprep.mubr.msk.bf16.mxu0 %vm700_vm0, %v16716_v49  ;;  %23778 = vst [vmem:[#allocation27_spill] sm:$0xff] %v16882_v25  ;;  %v16886_v27 = vpop.f32.mrb[7].mxu1 }
 0x103   : > { %23780 = vst [vmem:[#allocation29_spill] sm:$0xff] %v16886_v27 }
 0x104   : > { %v16856_v16 = vpop.f32.mrb[8].mxu0  ;;  %13783 = vmatmul.mubr.msk.bf16.gmra.mrb[112].mxu1 %vm700_vm0, %v16577_v33 }
 0x105   : > { %23769 = vst [vmem:[#allocation18_spill] sm:$0xff] %v16856_v16  ;;  %v16860_v18 = vpop.f32.mrb[9].mxu0  ;;  %13786 = vmatprep.mubr.msk.bf16.mxu1 %vm700_vm0, %v16581_v34 }
 0x106   : > { %23771 = vst [vmem:[#allocation20_spill] sm:$0xff] %v16860_v18  ;;  %v16864_v20 = vpop.f32.mrb[10].mxu0 }
 0x107   : > { %23773 = vst [vmem:[#allocation22_spill] sm:$0xff] %v16864_v20  ;;  %v16866_v21 = vpop.f32.mrb[11].mxu0  ;;  %v16900_v30 = vpop.f32.mrb[8].mxu1 }
 0x108   : > { %23774 = vst [vmem:[#allocation23_spill] sm:$0xff] %v16866_v21  ;;  %23783 = vst [vmem:[#allocation32_spill] sm:$0xff] %v16900_v30  ;;  %v16902_v31 = vpop.f32.mrb[9].mxu1 }
 0x109   : > { %13649 = vmatmul.mubr.msk.bf16.gmra.mrb[116].mxu0 %vm700_vm0, %v16731_v52  ;;  %23784 = vst [vmem:[#allocation33_spill] sm:$0xff] %v16902_v31  ;;  %v16906_v36 = vpop.f32.mrb[10].mxu1 }
 0x10a   : > { %13652 = vmatprep.mubr.msk.bf16.mxu0 %vm700_vm0, %v16736_v53  ;;  %23786 = vst [vmem:[#allocation35_spill] sm:$0xff] %v16906_v36  ;;  %v16910_v33 = vpop.f32.mrb[11].mxu1 }
 0x10b   : > { %23788 = vst [vmem:[#allocation37_spill] sm:$0xff] %v16910_v33 }
 0x10c   : > { %v16880_v24 = vpop.f32.mrb[12].mxu0  ;;  %13787 = vmatmul.mubr.msk.bf16.gmra.mrb[116].mxu1 %vm700_vm0, %v16589_v35 }
 0x10d   : > { %23777 = vst [vmem:[#allocation26_spill] sm:$0xff] %v16880_v24  ;;  %v16884_v26 = vpop.f32.mrb[13].mxu0  ;;  %13790 = vmatprep.mubr.msk.bf16.mxu1 %vm700_vm0, %v16596_v37  ;;  %v16969_v24 = vld [vmem:[%s16446_s29 + $0x68] sm:$0xff]  }
 0x10e   : > { %23779 = vst [vmem:[#allocation28_spill] sm:$0xff] %v16884_v26  ;;  %v16888_v28 = vpop.f32.mrb[14].mxu0  ;;  %23807 = vst [vmem:[#allocation56_spill] sm:$0xff] %v16969_v24 }
 0x10f   : > { %23781 = vst [vmem:[#allocation30_spill] sm:$0xff] %v16888_v28  ;;  %v16890_v29 = vpop.f32.mrb[15].mxu0  ;;  %v16924_v58 = vpop.f32.mrb[12].mxu1 }
 0x110   : > { %23782 = vst [vmem:[#allocation31_spill] sm:$0xff] %v16890_v29  ;;  %23791 = vst [vmem:[#allocation40_spill] sm:$0xff] %v16924_v58 }
 0x111   : > { %13653 = vmatmul.mubr.msk.bf16.gmra.mrb[120].mxu0 %vm700_vm0, %v16751_v56 }
 0x112   : > { %13656 = vmatprep.mubr.msk.bf16.mxu0 %vm700_vm0, %v16762_v59 }
 0x114   : > { %v16904_v32 = vpop.f32.mrb[16].mxu0  ;;  %13791 = vmatmul.mubr.msk.bf16.gmra.mrb[120].mxu1 %vm700_vm0, %v16607_v39 }
 0x115   : > { %23785 = vst [vmem:[#allocation34_spill] sm:$0xff] %v16904_v32  ;;  %v16908_v38 = vpop.f32.mrb[17].mxu0  ;;  %13794 = vmatprep.mubr.msk.bf16.mxu1 %vm700_vm0, %v16611_v40 }
 0x116   : > { %23787 = vst [vmem:[#allocation36_spill] sm:$0xff] %v16908_v38  ;;  %v16912_v57 = vpop.f32.mrb[18].mxu0  ;;  %v16926_v38 = vpop.f32.mrb[13].mxu1 }
 0x117   : > { %23789 = vst [vmem:[#allocation38_spill] sm:$0xff] %v16912_v57  ;;  %v16914_v34 = vpop.f32.mrb[19].mxu0  ;;  %23792 = vst [vmem:[#allocation41_spill] sm:$0xff] %v16926_v38  ;;  %v16930_v57 = vpop.f32.mrb[14].mxu1 }
 0x118   : > { %23790 = vst [vmem:[#allocation39_spill] sm:$0xff] %v16914_v34  ;;  %23794 = vst [vmem:[#allocation43_spill] sm:$0xff] %v16930_v57  ;;  %v16934_v35 = vpop.f32.mrb[15].mxu1 }
 0x119   : > { %13657 = vmatmul.mubr.msk.bf16.gmra.mrb[124].mxu0 %vm700_vm0, %v16777_v62  ;;  %23796 = vst [vmem:[#allocation45_spill] sm:$0xff] %v16934_v35 }
 0x11a   : > { %13660 = vmatprep.mubr.msk.bf16.mxu0 %vm700_vm0, %v16782_v63 }
 0x11c   : > { %v16928_v32 = vpop.f32.mrb[20].mxu0  ;;  %13795 = vmatmul.mubr.msk.bf16.gmra.mrb[124].mxu1 %vm700_vm0, %v16620_v41 }
 0x11d   : > { %23793 = vst [vmem:[#allocation42_spill] sm:$0xff] %v16928_v32  ;;  %v16932_v34 = vpop.f32.mrb[21].mxu0  ;;  %13798 = vmatprep.mubr.msk.bf16.mxu1 %vm700_vm0, %v16625_v42 }
 0x11e   : > { %23795 = vst [vmem:[#allocation44_spill] sm:$0xff] %v16932_v34  ;;  %v16936_v29 = vpop.f32.mrb[22].mxu0  ;;  %v16948_v34 = vpop.f32.mrb[16].mxu1 }
 0x11f   : > { %23797 = vst [vmem:[#allocation46_spill] sm:$0xff] %v16936_v29  ;;  %v16938_v37 = vpop.f32.mrb[23].mxu0  ;;  %23799 = vst [vmem:[#allocation48_spill] sm:$0xff] %v16948_v34  ;;  %v16950_v32 = vpop.f32.mrb[17].mxu1 }
 0x120   : > { %23798 = vst [vmem:[#allocation47_spill] sm:$0xff] %v16938_v37  ;;  %23800 = vst [vmem:[#allocation49_spill] sm:$0xff] %v16950_v32  ;;  %v16954_v28 = vpop.f32.mrb[18].mxu1  ;;  %v17169_v32 = vld [vmem:[%s16446_s29 + $0xd0] sm:$0xff]  }
 0x121   : > { %13661 = vmatmul.mubr.msk.bf16.gmra.mrb[128].mxu0 %vm700_vm0, %v16797_v2  ;;  %23802 = vst [vmem:[#allocation51_spill] sm:$0xff] %v16954_v28  ;;  %v16958_v39 = vpop.f32.mrb[19].mxu1  ;;  %23857 = vst [vmem:[#allocation106_spill] sm:$0xff] %v17169_v32 }
 0x122   : > { %13664 = vmatprep.mubr.msk.bf16.mxu0 %vm700_vm0, %v16802_v3  ;;  %23804 = vst [vmem:[#allocation53_spill] sm:$0xff] %v16958_v39 }
 0x124   : > { %v16952_v29 = vpop.f32.mrb[24].mxu0  ;;  %13799 = vmatmul.mubr.msk.bf16.gmra.mrb[128].mxu1 %vm700_vm0, %v16634_v43 }
 0x125   : > { %23801 = vst [vmem:[#allocation50_spill] sm:$0xff] %v16952_v29  ;;  %v16956_v37 = vpop.f32.mrb[25].mxu0  ;;  %13886 = vmatprep.mubr.msk.bf16.mxu1 %vm700_vm0, %v16685_v44 }
 0x126   : > { %23803 = vst [vmem:[#allocation52_spill] sm:$0xff] %v16956_v37  ;;  %v16960_v26 = vpop.f32.mrb[26].mxu0  ;;  %v16975_v37 = vpop.f32.mrb[20].mxu1 }
 0x127   : > { %23805 = vst [vmem:[#allocation54_spill] sm:$0xff] %v16960_v26  ;;  %v16962_v40 = vpop.f32.mrb[27].mxu0  ;;  %23808 = vst [vmem:[#allocation57_spill] sm:$0xff] %v16975_v37  ;;  %v16977_v29 = vpop.f32.mrb[21].mxu1  ;;  %v17164_v37 = vld [vmem:[%s16446_s29 + $0xc8] sm:$0xff]  }
 0x128   : > { %23806 = vst [vmem:[#allocation55_spill] sm:$0xff] %v16962_v40  ;;  %23809 = vst [vmem:[#allocation58_spill] sm:$0xff] %v16977_v29  ;;  %v16981_v40 = vpop.f32.mrb[22].mxu1 }
 0x129   : > { %13665 = vmatmul.mubr.msk.bf16.gmra.mrb[132].mxu0 %vm700_vm0, %v16969_v24  ;;  %23811 = vst [vmem:[#allocation60_spill] sm:$0xff] %v16981_v40  ;;  %v16987_v21 = vpop.f32.mrb[23].mxu1  ;;  %23856 = vst [vmem:[#allocation105_spill] sm:$0xff] %v17164_v37 }
 0x12a   : > { %13668 = vmatprep.mubr.msk.bf16.mxu0 %vm700_vm0, %v16706_v47  ;;  %23813 = vst [vmem:[#allocation62_spill] sm:$0xff] %v16987_v21  ;;  %v17007_v20 = vpop.f32.mrb[24].mxu1 }
 0x12b   : > { %23816 = vst [vmem:[#allocation65_spill] sm:$0xff] %v17007_v20  ;;  %v17009_v16 = vpop.f32.mrb[25].mxu1  ;;  %v17202_v20 = vld [vmem:[%s16446_s29 + $0xd8] sm:$0xff]  }
 0x12c   : > { %v16979_v26 = vpop.f32.mrb[28].mxu0  ;;  %23817 = vst [vmem:[#allocation66_spill] sm:$0xff] %v17009_v16  ;;  %13887 = vmatmul.mubr.msk.bf16.vlgmr.msra.gmra.mrb[132].mxu1 %vm700_vm0, %v16694_v45  ;;  %23866 = vst [vmem:[#allocation115_spill] sm:$0xff] %v17202_v20 }
 0x12d   : > { %23810 = vst [vmem:[#allocation59_spill] sm:$0xff] %v16979_v26  ;;  %v16985_v42 = vpop.f32.mrb[29].mxu0  ;;  %13890 = vmatprep.mubr.msk.bf16.mxu1 %vm700_vm0, %v16699_v46 }
 0x12e   : > { %23812 = vst [vmem:[#allocation61_spill] sm:$0xff] %v16985_v42  ;;  %v16991_v18 = vpop.f32.mrb[30].mxu0 }
 0x12f   : > { %23814 = vst [vmem:[#allocation63_spill] sm:$0xff] %v16991_v18  ;;  %v16995_v13 = vpop.f32.mrb[31].mxu0  ;;  %v17013_v18 = vpop.f32.mrb[26].mxu1 }
 0x130   : > { %23815 = vst [vmem:[#allocation64_spill] sm:$0xff] %v16995_v13  ;;  %23819 = vst [vmem:[#allocation68_spill] sm:$0xff] %v17013_v18  ;;  %v17019_v19 = vpop.f32.mrb[27].mxu1 }
 0x131   : > { %13669 = vmatmul.mubr.msk.bf16.gmra.mrb[136].mxu0 %vm700_vm0, %v16721_v50  ;;  %23821 = vst [vmem:[#allocation70_spill] sm:$0xff] %v17019_v19  ;;  %v17039_v13 = vpop.f32.mrb[28].mxu1 }
 0x132   : > { %13672 = vmatprep.mubr.msk.bf16.mxu0 %vm700_vm0, %v16726_v51  ;;  %23824 = vst [vmem:[#allocation73_spill] sm:$0xff] %v17039_v13  ;;  %v17041_v42 = vpop.f32.mrb[29].mxu1  ;;  %v17240_v13 = vld [vmem:[%s16446_s29 + $0xe8] sm:$0xff]  }
 0x133   : > { %23825 = vst [vmem:[#allocation74_spill] sm:$0xff] %v17041_v42  ;;  %23876 = vst [vmem:[#allocation125_spill] sm:$0xff] %v17240_v13 }
 0x134   : > { %v17011_v17 = vpop.f32.mrb[32].mxu0  ;;  %13891 = vmatmul.mubr.msk.bf16.gmra.mrb[136].mxu1 %vm700_vm0, %v16711_v48 }
 0x135   : > { %23818 = vst [vmem:[#allocation67_spill] sm:$0xff] %v17011_v17  ;;  %v17017_v41 = vpop.f32.mrb[33].mxu0  ;;  %13894 = vmatprep.mubr.msk.bf16.mxu1 %vm700_vm0, %v16716_v49 }
 0x136   : > { %23820 = vst [vmem:[#allocation69_spill] sm:$0xff] %v17017_v41  ;;  %v17023_v15 = vpop.f32.mrb[34].mxu0 }
 0x137   : > { %23822 = vst [vmem:[#allocation71_spill] sm:$0xff] %v17023_v15  ;;  %v17027_v14 = vpop.f32.mrb[35].mxu0  ;;  %v17045_v15 = vpop.f32.mrb[30].mxu1 }
 0x138   : > { %23823 = vst [vmem:[#allocation72_spill] sm:$0xff] %v17027_v14  ;;  %23827 = vst [vmem:[#allocation76_spill] sm:$0xff] %v17045_v15  ;;  %v17051_v14 = vpop.f32.mrb[31].mxu1 }
 0x139   : > { %13673 = vmatmul.mubr.msk.bf16.gmra.mrb[140].mxu0 %vm700_vm0, %v16741_v54  ;;  %23829 = vst [vmem:[#allocation78_spill] sm:$0xff] %v17051_v14  ;;  %v17071_v23 = vpop.f32.mrb[32].mxu1 }
 0x13a   : > { %13676 = vmatprep.mubr.msk.bf16.mxu0 %vm700_vm0, %v16746_v55  ;;  %23832 = vst [vmem:[#allocation81_spill] sm:$0xff] %v17071_v23  ;;  %v17073_v22 = vpop.f32.mrb[33].mxu1  ;;  %v17278_v23 = vld [vmem:[%s16446_s29 + $0xf8] sm:$0xff]  }
 0x13b   : > { %23833 = vst [vmem:[#allocation82_spill] sm:$0xff] %v17073_v22  ;;  %23886 = vst [vmem:[#allocation135_spill] sm:$0xff] %v17278_v23 }
 0x13c   : > { %v17043_v25 = vpop.f32.mrb[36].mxu0  ;;  %13895 = vmatmul.mubr.msk.bf16.gmra.mrb[140].mxu1 %vm700_vm0, %v16731_v52 }
 0x13d   : > { %23826 = vst [vmem:[#allocation75_spill] sm:$0xff] %v17043_v25  ;;  %v17049_v27 = vpop.f32.mrb[37].mxu0  ;;  %13898 = vmatprep.mubr.msk.bf16.mxu1 %vm700_vm0, %v16736_v53 }
 0x13e   : > { %23828 = vst [vmem:[#allocation77_spill] sm:$0xff] %v17049_v27  ;;  %v17055_v41 = vpop.f32.mrb[38].mxu0 }
 0x13f   : > { %23830 = vst [vmem:[#allocation79_spill] sm:$0xff] %v17055_v41  ;;  %v17059_v17 = vpop.f32.mrb[39].mxu0  ;;  %v17077_v41 = vpop.f32.mrb[34].mxu1 }
 0x140   : > { %23831 = vst [vmem:[#allocation80_spill] sm:$0xff] %v17059_v17  ;;  %23835 = vst [vmem:[#allocation84_spill] sm:$0xff] %v17077_v41  ;;  %v17083_v17 = vpop.f32.mrb[35].mxu1 }
 0x141   : > { %13677 = vmatmul.mubr.msk.bf16.gmra.mrb[144].mxu0 %vm700_vm0, %v16767_v60  ;;  %23837 = vst [vmem:[#allocation86_spill] sm:$0xff] %v17083_v17  ;;  %v17103_v31 = vpop.f32.mrb[36].mxu1 }
 0x142   : > { %13680 = vmatprep.mubr.msk.bf16.mxu0 %vm700_vm0, %v16772_v61  ;;  %23840 = vst [vmem:[#allocation89_spill] sm:$0xff] %v17103_v31  ;;  %v17105_v30 = vpop.f32.mrb[37].mxu1  ;;  %v17316_v31 = vld [vmem:[%s16446_s29 + $0x108] sm:$0xff]  }
 0x143   : > { %23841 = vst [vmem:[#allocation90_spill] sm:$0xff] %v17105_v30  ;;  %23896 = vst [vmem:[#allocation145_spill] sm:$0xff] %v17316_v31 }
 0x144   : > { %v17075_v36 = vpop.f32.mrb[40].mxu0  ;;  %13899 = vmatmul.mubr.msk.bf16.gmra.mrb[144].mxu1 %vm700_vm0, %v16751_v56 }
 0x145   : > { %23834 = vst [vmem:[#allocation83_spill] sm:$0xff] %v17075_v36  ;;  %v17081_v33 = vpop.f32.mrb[41].mxu0  ;;  %13902 = vmatprep.mubr.msk.bf16.mxu1 %vm700_vm0, %v16762_v59 }
 0x146   : > { %23836 = vst [vmem:[#allocation85_spill] sm:$0xff] %v17081_v33  ;;  %v17087_v27 = vpop.f32.mrb[42].mxu0 }
 0x147   : > { %23838 = vst [vmem:[#allocation87_spill] sm:$0xff] %v17087_v27  ;;  %v17091_v25 = vpop.f32.mrb[43].mxu0  ;;  %v17109_v27 = vpop.f32.mrb[38].mxu1 }
 0x148   : > { %23839 = vst [vmem:[#allocation88_spill] sm:$0xff] %v17091_v25  ;;  %23843 = vst [vmem:[#allocation92_spill] sm:$0xff] %v17109_v27  ;;  %v17115_v25 = vpop.f32.mrb[39].mxu1  ;;  %v17330_v27 = vld [vmem:[%s23025_s2 + $0x30] sm:$0xff]  }
 0x149   : > { %13681 = vmatmul.mubr.msk.bf16.gmra.mrb[148].mxu0 %vm700_vm0, %v16787_v0  ;;  %23845 = vst [vmem:[#allocation94_spill] sm:$0xff] %v17115_v25  ;;  %v17135_v38 = vpop.f32.mrb[40].mxu1  ;;  %13966 = vmatprep.subr.bf16.mxu0 %v17330_v27 }
 0x14a   : > { %13684 = vmatprep.mubr.msk.bf16.mxu0 %vm700_vm0, %v16792_v1  ;;  %23848 = vst [vmem:[#allocation97_spill] sm:$0xff] %v17135_v38  ;;  %v17137_v58 = vpop.f32.mrb[41].mxu1 }
 0x14b   : > { %23849 = vst [vmem:[#allocation98_spill] sm:$0xff] %v17137_v58 }
 0x14c   : > { %v17107_v57 = vpop.f32.mrb[44].mxu0  ;;  %13903 = vmatmul.mubr.msk.bf16.gmra.mrb[148].mxu1 %vm700_vm0, %v16777_v62 }
 0x14d   : > { %23842 = vst [vmem:[#allocation91_spill] sm:$0xff] %v17107_v57  ;;  %v17113_v35 = vpop.f32.mrb[45].mxu0  ;;  %13906 = vmatprep.mubr.msk.bf16.mxu1 %vm700_vm0, %v16782_v63 }
 0x14e   : > { %23844 = vst [vmem:[#allocation93_spill] sm:$0xff] %v17113_v35  ;;  %v17119_v33 = vpop.f32.mrb[46].mxu0 }
 0x14f   : > { %23846 = vst [vmem:[#allocation95_spill] sm:$0xff] %v17119_v33  ;;  %v17123_v36 = vpop.f32.mrb[47].mxu0  ;;  %v17141_v33 = vpop.f32.mrb[42].mxu1 }
 0x150   : > { %23847 = vst [vmem:[#allocation96_spill] sm:$0xff] %v17123_v36  ;;  %23851 = vst [vmem:[#allocation100_spill] sm:$0xff] %v17141_v33  ;;  %v17147_v36 = vpop.f32.mrb[43].mxu1 }
 0x151   : > { %13685 = vmatmul.mubr.msk.bf16.gmra.mrb[152].mxu0 %vm700_vm0, %v16807_v4  ;;  %23853 = vst [vmem:[#allocation102_spill] sm:$0xff] %v17147_v36  ;;  %v17173_v34 = vpop.f32.mrb[44].mxu1 }
 0x152   : > { %13688 = vmatprep.mubr.msk.bf16.mxu0 %vm700_vm0, %v16812_v5  ;;  %23858 = vst [vmem:[#allocation107_spill] sm:$0xff] %v17173_v34  ;;  %v17175_v40 = vpop.f32.mrb[45].mxu1  ;;  %v17401_v34 = vld [vmem:[%s16446_s29 + $0x128] sm:$0xff]  }
 0x153   : > { %23859 = vst [vmem:[#allocation108_spill] sm:$0xff] %v17175_v40  ;;  %v17179_v21 = vpop.f32.mrb[46].mxu1  ;;  %23916 = vst [vmem:[#allocation165_spill] sm:$0xff] %v17401_v34 }
 0x154   : > { %v17139_v28 = vpop.f32.mrb[48].mxu0  ;;  %23861 = vst [vmem:[#allocation110_spill] sm:$0xff] %v17179_v21  ;;  %v17185_v29 = vpop.f32.mrb[47].mxu1  ;;  %13907 = vmatmul.mubr.msk.bf16.gmra.mrb[152].mxu1 %vm700_vm0, %v16797_v2 }
 0x155   : > { %23850 = vst [vmem:[#allocation99_spill] sm:$0xff] %v17139_v28  ;;  %v17145_v39 = vpop.f32.mrb[49].mxu0  ;;  %23863 = vst [vmem:[#allocation112_spill] sm:$0xff] %v17185_v29  ;;  %13910 = vmatprep.mubr.msk.bf16.mxu1 %vm700_vm0, %v16802_v3 }
 0x156   : > { %23852 = vst [vmem:[#allocation101_spill] sm:$0xff] %v17145_v39  ;;  %v17151_v35 = vpop.f32.mrb[50].mxu0  ;;  %v17207_v39 = vld [vmem:[%s16446_s29 + $0xe0] sm:$0xff]  }
 0x157   : > { %23854 = vst [vmem:[#allocation103_spill] sm:$0xff] %v17151_v35  ;;  %v17155_v57 = vpop.f32.mrb[51].mxu0  ;;  %23867 = vst [vmem:[#allocation116_spill] sm:$0xff] %v17207_v39  ;;  %v17211_v26 = vpop.f32.mrb[48].mxu1 }
 0x158   : > { %23855 = vst [vmem:[#allocation104_spill] sm:$0xff] %v17155_v57  ;;  %23868 = vst [vmem:[#allocation117_spill] sm:$0xff] %v17211_v26  ;;  %v17213_v18 = vpop.f32.mrb[49].mxu1  ;;  %v17439_v26 = vld [vmem:[%s16446_s29 + $0x138] sm:$0xff]  }
 0x159   : > { %13689 = vmatmul.mubr.msk.bf16.gmra.mrb[156].mxu0 %vm700_vm0, %v17164_v37  ;;  %23869 = vst [vmem:[#allocation118_spill] sm:$0xff] %v17213_v18  ;;  %v17217_v19 = vpop.f32.mrb[50].mxu1 }
 0x15a   : > { %13692 = vmatprep.mubr.msk.bf16.mxu0 %vm700_vm0, %v17169_v32  ;;  %23871 = vst [vmem:[#allocation120_spill] sm:$0xff] %v17217_v19  ;;  %v17223_v16 = vpop.f32.mrb[51].mxu1 }
 0x15b   : > { %23873 = vst [vmem:[#allocation122_spill] sm:$0xff] %v17223_v16 }
 0x15c   : > { %v17177_v43 = vpop.f32.mrb[52].mxu0  ;;  %13911 = vmatmul.mubr.msk.bf16.gmra.mrb[156].mxu1 %vm700_vm0, %v16969_v24 }
 0x15d   : > { %23860 = vst [vmem:[#allocation109_spill] sm:$0xff] %v17177_v43  ;;  %v17183_v35 = vpop.f32.mrb[53].mxu0  ;;  %13914 = vmatprep.mubr.msk.bf16.mxu1 %vm700_vm0, %v16706_v47 }
 0x15e   : > { %23862 = vst [vmem:[#allocation111_spill] sm:$0xff] %v17183_v35  ;;  %v17189_v28 = vpop.f32.mrb[54].mxu0  ;;  %v17245_v35 = vld [vmem:[%s16446_s29 + $0xf0] sm:$0xff]  }
 0x15f   : > { %23864 = vst [vmem:[#allocation113_spill] sm:$0xff] %v17189_v28  ;;  %v17193_v63 = vpop.f32.mrb[55].mxu0  ;;  %23877 = vst [vmem:[#allocation126_spill] sm:$0xff] %v17245_v35  ;;  %v17249_v3 = vpop.f32.mrb[52].mxu1 }
 0x160   : > { %23865 = vst [vmem:[#allocation114_spill] sm:$0xff] %v17193_v63  ;;  %23878 = vst [vmem:[#allocation127_spill] sm:$0xff] %v17249_v3  ;;  %v17251_v15 = vpop.f32.mrb[53].mxu1 }
 0x161   : > { %13693 = vmatmul.mubr.msk.bf16.gmra.mrb[160].mxu0 %vm700_vm0, %v17202_v20  ;;  %23879 = vst [vmem:[#allocation128_spill] sm:$0xff] %v17251_v15  ;;  %v17255_v14 = vpop.f32.mrb[54].mxu1 }
 0x162   : > { %13696 = vmatprep.mubr.msk.bf16.mxu0 %vm700_vm0, %v17207_v39  ;;  %23881 = vst [vmem:[#allocation130_spill] sm:$0xff] %v17255_v14  ;;  %v17261_v42 = vpop.f32.mrb[55].mxu1  ;;  %v24140_v14 = vld [vmem:[#allocation64_spill] sm:$0xff] }
 0x163   : > { %23883 = vst [vmem:[#allocation132_spill] sm:$0xff] %v17261_v42 }
 0x164   : > { %v17215_v57 = vpop.f32.mrb[56].mxu0  ;;  %13915 = vmatmul.mubr.msk.bf16.gmra.mrb[160].mxu1 %vm700_vm0, %v16721_v50 }
 0x165   : > { %23870 = vst [vmem:[#allocation119_spill] sm:$0xff] %v17215_v57  ;;  %v17221_v28 = vpop.f32.mrb[57].mxu0  ;;  %13918 = vmatprep.mubr.msk.bf16.mxu1 %vm700_vm0, %v16726_v51 }
 0x166   : > { %23872 = vst [vmem:[#allocation121_spill] sm:$0xff] %v17221_v28  ;;  %v17227_v43 = vpop.f32.mrb[58].mxu0  ;;  %v17283_v28 = vld [vmem:[%s16446_s29 + $0x100] sm:$0xff]  }
 0x167   : > { %23874 = vst [vmem:[#allocation123_spill] sm:$0xff] %v17227_v43  ;;  %v17231_v2 = vpop.f32.mrb[59].mxu0  ;;  %23887 = vst [vmem:[#allocation136_spill] sm:$0xff] %v17283_v28  ;;  %v17287_v3 = vpop.f32.mrb[56].mxu1 }
 0x168   : > { %23875 = vst [vmem:[#allocation124_spill] sm:$0xff] %v17231_v2  ;;  %23888 = vst [vmem:[#allocation137_spill] sm:$0xff] %v17287_v3  ;;  %v17289_v41 = vpop.f32.mrb[57].mxu1 }
 0x169   : > { %13697 = vmatmul.mubr.msk.bf16.gmra.mrb[164].mxu0 %vm700_vm0, %v17240_v13  ;;  %23889 = vst [vmem:[#allocation138_spill] sm:$0xff] %v17289_v41  ;;  %v17293_v17 = vpop.f32.mrb[58].mxu1 }
 0x16a   : > { %13700 = vmatprep.mubr.msk.bf16.mxu0 %vm700_vm0, %v17245_v35  ;;  %23891 = vst [vmem:[#allocation140_spill] sm:$0xff] %v17293_v17  ;;  %v17299_v22 = vpop.f32.mrb[59].mxu1 }
 0x16b   : > { %23893 = vst [vmem:[#allocation142_spill] sm:$0xff] %v17299_v22  ;;  %v24043_v22 = vld [vmem:[#allocation31_spill] sm:$0xff] }
 0x16c   : > { %v17253_v63 = vpop.f32.mrb[60].mxu0  ;;  %13919 = vmatmul.mubr.msk.bf16.gmra.mrb[164].mxu1 %vm700_vm0, %v16741_v54 }
 0x16d   : > { %23880 = vst [vmem:[#allocation129_spill] sm:$0xff] %v17253_v63  ;;  %v17259_v43 = vpop.f32.mrb[61].mxu0  ;;  %13922 = vmatprep.mubr.msk.bf16.mxu1 %vm700_vm0, %v16746_v55 }
 0x16e   : > { %23882 = vst [vmem:[#allocation131_spill] sm:$0xff] %v17259_v43  ;;  %v17265_v57 = vpop.f32.mrb[62].mxu0  ;;  %v17321_v43 = vld [vmem:[%s16446_s29 + $0x110] sm:$0xff]  }
 0x16f   : > { %23884 = vst [vmem:[#allocation133_spill] sm:$0xff] %v17265_v57  ;;  %v17269_v15 = vpop.f32.mrb[63].mxu0  ;;  %23897 = vst [vmem:[#allocation146_spill] sm:$0xff] %v17321_v43  ;;  %v17325_v3 = vpop.f32.mrb[60].mxu1 }
 0x170   : > { %23885 = vst [vmem:[#allocation134_spill] sm:$0xff] %v17269_v15  ;;  %23898 = vst [vmem:[#allocation147_spill] sm:$0xff] %v17325_v3  ;;  %v15696_v15 = vld [vmem:[%s23025_s2 + $0x38] sm:$0xff]   ;;  %v17335_v25 = vpop.f32.mrb[61].mxu1 }
 0x171   : > { %13701 = vmatmul.mubr.msk.bf16.gmra.mrb[168].mxu0 %vm700_vm0, %v17278_v23  ;;  %23899 = vst [vmem:[#allocation148_spill] sm:$0xff] %v17335_v25  ;;  %14048 = vmatprep.subr.bf16.mxu1 %v15696_v15  ;;  %v17368_v25 = vld [vmem:[%s16446_s29 + $0x120] sm:$0xff]  }
 0x172   : > { %13704 = vmatprep.mubr.msk.bf16.mxu0 %vm700_vm0, %v17283_v28  ;;  %14049 = vmatpush3.bf16.msra.mxu1 %v15696_v15  ;;  %v17363_v15 = vld [vmem:[%s16446_s29 + $0x118] sm:$0xff]   ;;  %23907 = vst [vmem:[#allocation156_spill] sm:$0xff] %v17368_v25 }
 0x173   : > { %23906 = vst [vmem:[#allocation155_spill] sm:$0xff] %v17363_v15 }
 0x174   : > { %v17291_v2 = vpop.f32.mrb[64].mxu0  ;;  %13923 = vmatmul.mubr.msk.bf16.gmra.mrb[168].mxu1 %vm700_vm0, %v16767_v60 }
 0x175   : > { %23890 = vst [vmem:[#allocation139_spill] sm:$0xff] %v17291_v2  ;;  %v17297_v57 = vpop.f32.mrb[65].mxu0  ;;  %13926 = vmatprep.mubr.msk.bf16.mxu1 %vm700_vm0, %v16772_v61 }
 0x176   : > { %23892 = vst [vmem:[#allocation141_spill] sm:$0xff] %v17297_v57  ;;  %v17303_v63 = vpop.f32.mrb[66].mxu0 }
 0x177   : > { %23894 = vst [vmem:[#allocation143_spill] sm:$0xff] %v17303_v63  ;;  %v17307_v41 = vpop.f32.mrb[67].mxu0  ;;  %v17339_v63 = vpop.f32.mrb[62].mxu1 }
 0x178   : > { %23895 = vst [vmem:[#allocation144_spill] sm:$0xff] %v17307_v41  ;;  %23901 = vst [vmem:[#allocation150_spill] sm:$0xff] %v17339_v63  ;;  %v17346_v2 = vpop.f32.mrb[63].mxu1 }
 0x179   : > { %13705 = vmatmul.mubr.msk.bf16.gmra.mrb[172].mxu0 %vm700_vm0, %v17316_v31  ;;  %23903 = vst [vmem:[#allocation152_spill] sm:$0xff] %v17346_v2  ;;  %v17372_v63 = vpop.f32.mrb[64].mxu1  ;;  %v24086_v2 = vld [vmem:[#allocation46_spill] sm:$0xff] }
 0x17a   : > { %13708 = vmatprep.mubr.msk.bf16.mxu0 %vm700_vm0, %v17321_v43  ;;  %23908 = vst [vmem:[#allocation157_spill] sm:$0xff] %v17372_v63  ;;  %v17374_v33 = vpop.f32.mrb[65].mxu1 }
 0x17b   : > { %23909 = vst [vmem:[#allocation158_spill] sm:$0xff] %v17374_v33  ;;  %v17378_v36 = vpop.f32.mrb[66].mxu1 }
 0x17c   : > { %v17337_v41 = vpop.f32.mrb[68].mxu0  ;;  %23911 = vst [vmem:[#allocation160_spill] sm:$0xff] %v17378_v36  ;;  %v17384_v58 = vpop.f32.mrb[67].mxu1  ;;  %13927 = vmatmul.mubr.msk.bf16.gmra.mrb[172].mxu1 %vm700_vm0, %v16787_v0 }
 0x17d   : > { %23900 = vst [vmem:[#allocation149_spill] sm:$0xff] %v17337_v41  ;;  %v17344_v57 = vpop.f32.mrb[69].mxu0  ;;  %23913 = vst [vmem:[#allocation162_spill] sm:$0xff] %v17384_v58  ;;  %13930 = vmatprep.mubr.msk.bf16.mxu1 %vm700_vm0, %v16792_v1  ;;  %v23948_v58 = vld [vmem:[#allocation28_spill] sm:$0xff] }
 0x17e   : > { %23902 = vst [vmem:[#allocation151_spill] sm:$0xff] %v17344_v57  ;;  %v17350_v3 = vpop.f32.mrb[70].mxu0  ;;  %v17406_v57 = vld [vmem:[%s16446_s29 + $0x130] sm:$0xff]  }
 0x17f   : > { %23904 = vst [vmem:[#allocation153_spill] sm:$0xff] %v17350_v3  ;;  %v17354_v55 = vpop.f32.mrb[71].mxu0  ;;  %23917 = vst [vmem:[#allocation166_spill] sm:$0xff] %v17406_v57  ;;  %v17410_v41 = vpop.f32.mrb[68].mxu1 }
 0x180   : > { %23905 = vst [vmem:[#allocation154_spill] sm:$0xff] %v17354_v55  ;;  %23918 = vst [vmem:[#allocation167_spill] sm:$0xff] %v17410_v41  ;;  %v17412_v21 = vpop.f32.mrb[69].mxu1 }
 0x181   : > { %13709 = vmatmul.mubr.msk.bf16.gmra.mrb[176].mxu0 %vm700_vm0, %v17363_v15  ;;  %23919 = vst [vmem:[#allocation168_spill] sm:$0xff] %v17412_v21  ;;  %v17416_v55 = vpop.f32.mrb[70].mxu1 }
 0x182   : > { %13712 = vmatprep.mubr.msk.bf16.mxu0 %vm700_vm0, %v17368_v25  ;;  %23921 = vst [vmem:[#allocation170_spill] sm:$0xff] %v17416_v55  ;;  %v17422_v40 = vpop.f32.mrb[71].mxu1 }
 0x183   : > { %23923 = vst [vmem:[#allocation172_spill] sm:$0xff] %v17422_v40 }
 0x184   : > { %v17376_v30 = vpop.f32.mrb[72].mxu0  ;;  %13931 = vmatmul.mubr.msk.bf16.gmra.mrb[176].mxu1 %vm700_vm0, %v16807_v4 }
 0x185   : > { %23910 = vst [vmem:[#allocation159_spill] sm:$0xff] %v17376_v30  ;;  %v17382_v3 = vpop.f32.mrb[73].mxu0  ;;  %13934 = vmatprep.mubr.msk.bf16.mxu1 %vm700_vm0, %v16812_v5 }
 0x186   : > { %23912 = vst [vmem:[#allocation161_spill] sm:$0xff] %v17382_v3  ;;  %v17388_v38 = vpop.f32.mrb[74].mxu0 }
 0x187   : > { %23914 = vst [vmem:[#allocation163_spill] sm:$0xff] %v17388_v38  ;;  %v17392_v33 = vpop.f32.mrb[75].mxu0  ;;  %v17445_v41 = vpop.f32.mrb[72].mxu1 }
 0x188   : > { %23915 = vst [vmem:[#allocation164_spill] sm:$0xff] %v17392_v33  ;;  %23926 = vst [vmem:[#allocation175_spill] sm:$0xff] %v17445_v41  ;;  %v17447_v3 = vpop.f32.mrb[73].mxu1  ;;  %v23940_v41 = vld [vmem:[#allocation20_spill] sm:$0xff] }
 0x189   : > { %13713 = vmatmul.mubr.msk.bf16.gmra.mrb[180].mxu0 %vm700_vm0, %v17401_v34  ;;  %23927 = vst [vmem:[#allocation176_spill] sm:$0xff] %v17447_v3 }
 0x18a   : > { %13716 = vmatprep.mubr.msk.bf16.mxu0 %vm700_vm0, %v17406_v57 }
 0x18c   : > { %v17414_v38 = vpop.f32.mrb[76].mxu0  ;;  %13935 = vmatmul.mubr.msk.bf16.gmra.mrb[180].mxu1 %vm700_vm0, %v17164_v37 }
 0x18d   : > { %23920 = vst [vmem:[#allocation169_spill] sm:$0xff] %v17414_v38  ;;  %v17420_v33 = vpop.f32.mrb[77].mxu0  ;;  %13938 = vmatprep.mubr.msk.bf16.mxu1 %vm700_vm0, %v17169_v32 }
 0x18e   : > { %23922 = vst [vmem:[#allocation171_spill] sm:$0xff] %v17420_v33  ;;  %v17426_v30 = vpop.f32.mrb[78].mxu0 }
 0x18f   : > { %23924 = vst [vmem:[#allocation173_spill] sm:$0xff] %v17426_v30  ;;  %v17430_v21 = vpop.f32.mrb[79].mxu0  ;;  %v17451_v30 = vpop.f32.mrb[74].mxu1 }
 0x190   : > { %23925 = vst [vmem:[#allocation174_spill] sm:$0xff] %v17430_v21  ;;  %23928 = vst [vmem:[#allocation177_spill] sm:$0xff] %v17451_v30  ;;  %v17457_v21 = vpop.f32.mrb[75].mxu1 }
 0x191   : > { %13717 = vmatmul.mubr.msk.bf16.gmra.mrb[184].mxu0 %vm700_vm0, %v17439_v26  ;;  %23929 = vst [vmem:[#allocation178_spill] sm:$0xff] %v17457_v21 }
 0x192   : > { %13804 = vmatprep.mubr.msk.bf16.mxu0 %vm700_vm0, %v16685_v44  ;;  %v17478_v44 = vpop.f32.mrb[76].mxu1 }
 0x193   : > { %23930 = vst [vmem:[#allocation179_spill] sm:$0xff] %v17478_v44  ;;  %v17480_v18 = vpop.f32.mrb[77].mxu1 }
 0x194   : > { %v17449_v19 = vpop.f32.mrb[80].mxu0  ;;  %23931 = vst [vmem:[#allocation180_spill] sm:$0xff] %v17480_v18  ;;  %v17484_v37 = vpop.f32.mrb[78].mxu1  ;;  %13939 = vmatmul.mubr.msk.bf16.gmra.mrb[184].mxu1 %vm700_vm0, %v17202_v20  ;;  %v23938_v20 = vld [vmem:[#allocation18_spill] sm:$0xff] }
 0x195   : > { %v17455_v16 = vpop.f32.mrb[81].mxu0  ;;  %23932 = vst [vmem:[#allocation181_spill] sm:$0xff] %v17484_v37  ;;  %v17490_v30 = vpop.f32.mrb[79].mxu1  ;;  %v23934_v37 = vld [vmem:[#allocation15_spill] sm:$0xff]  ;;  %13942 = vmatprep.mubr.msk.bf16.mxu1 %vm700_vm0, %v17207_v39  ;;  %v23991_v29 = vmax.f32 %v16820_v6, %v17449_v19 }
 0x196   : > { %v17461_v33 = vpop.f32.mrb[82].mxu0  ;;  %23933 = vst [vmem:[#allocation182_spill] sm:$0xff] %v17490_v30 }
 0x197   : > { %v17465_v38 = vpop.f32.mrb[83].mxu0 }
 0x199   : > { %13805 = vmatmul.mubr.msk.bf16.vlgmr.msra.gmra.mrb[188].mxu0 %vm700_vm0, %v16694_v45  ;;  %v17510_v45 = vpop.f32.mrb[80].mxu1 }
 0x19a   : > { %13808 = vmatprep.mubr.msk.bf16.mxu0 %vm700_vm0, %v16699_v46  ;;  %13967 = vmatpush3.bf16.msra.mxu0 %v17330_v27  ;;  %23935 = vst [vmem:[#allocation15_spill] sm:$0xff] %v17510_v45  ;;  %v17512_v27 = vpop.f32.mrb[81].mxu1  ;;  %v23941_v45 = vld [vmem:[#allocation22_spill] sm:$0xff] }
 0x19b   : > { %23936 = vst [vmem:[#allocation183_spill] sm:$0xff] %v17512_v27  ;;  %v17516_v44 = vpop.f32.mrb[82].mxu1 }
 0x19c   : > { %v17482_v21 = vpop.f32.mrb[84].mxu0  ;;  %23937 = vst [vmem:[#allocation184_spill] sm:$0xff] %v17516_v44  ;;  %v17522_v39 = vpop.f32.mrb[83].mxu1  ;;  %13943 = vmatmul.mubr.msk.bf16.gmra.mrb[188].mxu1 %vm700_vm0, %v17240_v13  ;;  %v23942_v44 = vld [vmem:[#allocation23_spill] sm:$0xff]  ;;  %v23946_v13 = vld [vmem:[#allocation26_spill] sm:$0xff] }
 0x19d   : > { %v17488_v32 = vpop.f32.mrb[85].mxu0  ;;  %23939 = vst [vmem:[#allocation18_spill] sm:$0xff] %v17522_v39  ;;  %13946 = vmatprep.mubr.msk.bf16.mxu1 %vm700_vm0, %v17245_v35 }
 0x19e   : > { %v17494_v46 = vpop.f32.mrb[86].mxu0 }
 0x19f   : > { %v17498_v18 = vpop.f32.mrb[87].mxu0  ;;  %v17542_v5 = vpop.f32.mrb[84].mxu1 }
 0x1a0   : > { %23943 = vst [vmem:[#allocation20_spill] sm:$0xff] %v17542_v5  ;;  %v17544_v4 = vpop.f32.mrb[85].mxu1  ;;  %v23950_v5 = vld [vmem:[#allocation30_spill] sm:$0xff] }
 0x1a1   : > { %13809 = vmatmul.mubr.msk.bf16.gmra.mrb[192].mxu0 %vm700_vm0, %v16711_v48  ;;  %23944 = vst [vmem:[#allocation22_spill] sm:$0xff] %v17544_v4  ;;  %v17548_v55 = vpop.f32.mrb[86].mxu1 }
 0x1a2   : > { %13812 = vmatprep.mubr.msk.bf16.mxu0 %vm700_vm0, %v16716_v49  ;;  %23945 = vst [vmem:[#allocation23_spill] sm:$0xff] %v17548_v55  ;;  %v17554_v35 = vpop.f32.mrb[87].mxu1  ;;  %v23964_v55 = vld [vmem:[#allocation8_spill] sm:$0xff] }
 0x1a3   : > { %23947 = vst [vmem:[#allocation26_spill] sm:$0xff] %v17554_v35 }
 0x1a4   : > { %v17514_v30 = vpop.f32.mrb[88].mxu0  ;;  %13947 = vmatmul.mubr.msk.bf16.gmra.mrb[192].mxu1 %vm700_vm0, %v17278_v23  ;;  %v23956_v23 = vld [vmem:[#allocation34_spill] sm:$0xff] }
 0x1a5   : > { %v17520_v3 = vpop.f32.mrb[89].mxu0  ;;  %13950 = vmatprep.mubr.msk.bf16.mxu1 %vm700_vm0, %v17283_v28 }
 0x1a6   : > { %v17526_v40 = vpop.f32.mrb[90].mxu0 }
 0x1a7   : > { %v17530_v27 = vpop.f32.mrb[91].mxu0  ;;  %v17574_v0 = vpop.f32.mrb[88].mxu1 }
 0x1a8   : > { %23953 = vst [vmem:[#allocation185_spill] sm:$0xff] %v17574_v0 }
 0x1a9   : > { %13813 = vmatmul.mubr.msk.bf16.gmra.mrb[196].mxu0 %vm700_vm0, %v16731_v52 }
 0x1aa   : > { %13816 = vmatprep.mubr.msk.bf16.mxu0 %vm700_vm0, %v16736_v53  ;;  %v17576_v53 = vpop.f32.mrb[89].mxu1 }
 0x1ab   : > { %23954 = vst [vmem:[#allocation186_spill] sm:$0xff] %v17576_v53  ;;  %v17580_v52 = vpop.f32.mrb[90].mxu1 }
 0x1ac   : > { %v17546_v39 = vpop.f32.mrb[92].mxu0  ;;  %23955 = vst [vmem:[#allocation187_spill] sm:$0xff] %v17580_v52  ;;  %v17586_v28 = vpop.f32.mrb[91].mxu1  ;;  %13951 = vmatmul.mubr.msk.bf16.gmra.mrb[196].mxu1 %vm700_vm0, %v17316_v31  ;;  %v23968_v31 = vld [vmem:[#allocation42_spill] sm:$0xff]  ;;  %v23977_v52 = vld [vmem:[#allocation12_spill] sm:$0xff] }
 0x1ad   : > { %v17552_v1 = vpop.f32.mrb[93].mxu0  ;;  %23958 = vst [vmem:[#allocation188_spill] sm:$0xff] %v17586_v28  ;;  %13954 = vmatprep.mubr.msk.bf16.mxu1 %vm700_vm0, %v17321_v43 }
 0x1ae   : > { %v17558_v36 = vpop.f32.mrb[94].mxu0 }
 0x1af   : > { %23949 = vst [vmem:[#allocation28_spill] sm:$0xff] %v17558_v36  ;;  %v17562_v4 = vpop.f32.mrb[95].mxu0  ;;  %v17606_v28 = vpop.f32.mrb[92].mxu1 }
 0x1b0   : > { %23951 = vst [vmem:[#allocation30_spill] sm:$0xff] %v17562_v4  ;;  %23965 = vst [vmem:[#allocation8_spill] sm:$0xff] %v17606_v28  ;;  %v17608_v0 = vpop.f32.mrb[93].mxu1 }
 0x1b1   : > { %13817 = vmatmul.mubr.msk.bf16.gmra.mrb[200].mxu0 %vm700_vm0, %v16751_v56  ;;  %v23959_v56 = vld [vmem:[#allocation36_spill] sm:$0xff]  ;;  %23966 = vst [vmem:[#allocation190_spill] sm:$0xff] %v17608_v0 }
 0x1b2   : > { %13820 = vmatprep.mubr.msk.bf16.mxu0 %vm700_vm0, %v16762_v59  ;;  %v17612_v59 = vpop.f32.mrb[94].mxu1 }
 0x1b3   : > { %23967 = vst [vmem:[#allocation191_spill] sm:$0xff] %v17612_v59  ;;  %v17618_v43 = vpop.f32.mrb[95].mxu1 }
 0x1b4   : > { %v17578_v35 = vpop.f32.mrb[96].mxu0  ;;  %23970 = vst [vmem:[#allocation192_spill] sm:$0xff] %v17618_v43  ;;  %13955 = vmatmul.mubr.msk.bf16.gmra.mrb[200].mxu1 %vm700_vm0, %v17363_v15  ;;  %v23976_v43 = vld [vmem:[#allocation11_spill] sm:$0xff]  ;;  %v23981_v15 = vld [vmem:[#allocation50_spill] sm:$0xff] }
 0x1b5   : > { %v17584_v4 = vpop.f32.mrb[97].mxu0  ;;  %13958 = vmatprep.mubr.msk.bf16.mxu1 %vm700_vm0, %v17368_v25 }
 0x1b6   : > { %23957 = vst [vmem:[#allocation34_spill] sm:$0xff] %v17584_v4  ;;  %v17590_v36 = vpop.f32.mrb[98].mxu0 }
 0x1b7   : > { %23960 = vst [vmem:[#allocation36_spill] sm:$0xff] %v17590_v36  ;;  %v17594_v53 = vpop.f32.mrb[99].mxu0 }
 0x1b8   : > { %23962 = vst [vmem:[#allocation189_spill] sm:$0xff] %v17594_v53 }
 0x1b9   : > { %13821 = vmatmul.mubr.msk.bf16.gmra.mrb[204].mxu0 %vm700_vm0, %v16777_v62 }
 0x1ba   : > { %13824 = vmatprep.mubr.msk.bf16.mxu0 %vm700_vm0, %v23964_v55 }
 0x1bc   : > { %v17610_v36 = vpop.f32.mrb[100].mxu0  ;;  %13959 = vmatmul.mubr.msk.bf16.gmra.mrb[204].mxu1 %vm700_vm0, %v17401_v34 }
 0x1bd   : > { %v17616_v53 = vpop.f32.mrb[101].mxu0  ;;  %13962 = vmatprep.mubr.msk.bf16.mxu1 %vm700_vm0, %v17406_v57 }
 0x1be   : > { %23969 = vst [vmem:[#allocation42_spill] sm:$0xff] %v17616_v53  ;;  %v17622_v4 = vpop.f32.mrb[102].mxu0  ;;  %v17638_v53 = vpop.f32.mrb[96].mxu1 }
 0x1bf   : > { %23972 = vst [vmem:[#allocation193_spill] sm:$0xff] %v17622_v4  ;;  %v17626_v0 = vpop.f32.mrb[103].mxu0  ;;  %23978 = vst [vmem:[#allocation11_spill] sm:$0xff] %v17638_v53  ;;  %v17640_v28 = vpop.f32.mrb[97].mxu1 }
 0x1c0   : > { %23974 = vst [vmem:[#allocation194_spill] sm:$0xff] %v17626_v0  ;;  %23979 = vst [vmem:[#allocation12_spill] sm:$0xff] %v17640_v28  ;;  %v17644_v55 = vpop.f32.mrb[98].mxu1 }
 0x1c1   : > { %13825 = vmatmul.mubr.msk.bf16.gmra.mrb[208].mxu0 %vm700_vm0, %v23976_v43  ;;  %23980 = vst [vmem:[#allocation195_spill] sm:$0xff] %v17644_v55  ;;  %v17650_v25 = vpop.f32.mrb[99].mxu1  ;;  %v23983_v43 = vld [vmem:[#allocation52_spill] sm:$0xff] }
 0x1c2   : > { %13828 = vmatprep.mubr.msk.bf16.mxu0 %vm700_vm0, %v23977_v52  ;;  %23982 = vst [vmem:[#allocation50_spill] sm:$0xff] %v17650_v25  ;;  %v17670_v59 = vpop.f32.mrb[100].mxu1 }
 0x1c3   : > { %23988 = vst [vmem:[#allocation197_spill] sm:$0xff] %v17670_v59  ;;  %v17672_v53 = vpop.f32.mrb[101].mxu1  ;;  %v23994_v59 = vld [vmem:[#allocation127_spill] sm:$0xff] }
 0x1c4   : > { %v17642_v4 = vpop.f32.mrb[104].mxu0  ;;  %23989 = vst [vmem:[#allocation198_spill] sm:$0xff] %v17672_v53  ;;  %13963 = vmatmul.mubr.msk.bf16.gmra.mrb[208].mxu1 %vm700_vm0, %v17439_v26  ;;  %v24009_v53 = vmax.f32 %v16840_v12, %v17494_v46  ;;  %v24014_v46 = vld [vmem:[#allocation7_spill] sm:$0xff]  ;;  %v24021_v12 = vmax.f32 %v23940_v41, %v17520_v3  ;;  %v24027_v3 = vmax.f32 %v23942_v44, %v17530_v27 }
 0x1c5   : > { %v17648_v0 = vpop.f32.mrb[105].mxu0 }
 0x1c6   : > { %v17654_v62 = vpop.f32.mrb[106].mxu0 }
 0x1c7   : > { %23984 = vst [vmem:[#allocation52_spill] sm:$0xff] %v17654_v62  ;;  %v17658_v28 = vpop.f32.mrb[107].mxu0  ;;  %v17674_v62 = vpop.f32.mrb[102].mxu1 }
 0x1c8   : > { %23986 = vst [vmem:[#allocation196_spill] sm:$0xff] %v17658_v28  ;;  %23990 = vst [vmem:[#allocation199_spill] sm:$0xff] %v17674_v62  ;;  %v17681_v28 = vpop.f32.mrb[103].mxu1  ;;  %v23995_v62 = vmax.f32 %v16824_v8, %v17461_v33  ;;  %v24135_v8 = vld [vmem:[#allocation19_spill] sm:$0xff] }
 0x1c9   : > { %13829 = vmatmul.mubr.msk.bf16.gmra.mrb[212].mxu0 %vm700_vm0, %v16969_v24  ;;  %23992 = vst [vmem:[#allocation200_spill] sm:$0xff] %v17681_v28  ;;  %v23993_v24 = vmax.f32 %v16822_v7, %v17455_v16  ;;  %v23998_v7 = vmax.f32 %v16826_v9, %v17465_v38  ;;  %v17717_v9 = vpop.f32.mrb[104].mxu1 }
 0x1ca   : > { %13832 = vmatprep.mubr.msk.bf16.mxu0 %vm700_vm0, %v16706_v47  ;;  %24000 = vst [vmem:[#allocation202_spill] sm:$0xff] %v17717_v9  ;;  %v17719_v38 = vpop.f32.mrb[105].mxu1  ;;  %v24338_v9 = vld [vmem:[#allocation84_spill] sm:$0xff] }
 0x1cb   : > { %24001 = vst [vmem:[#allocation203_spill] sm:$0xff] %v17719_v38  ;;  %v18450_v38 = vld [vmem:[%s16446_s29 + $0xf0] sm:$0xff]  }
 0x1cc   : > { %v13642_v25 = vpop.f32.mrb[108].mxu0 }
 0x1cd   : > { %v17679_v34 = vmax.f32 %v23991_v29, %v13642_v25  ;;  %v1659_v57 = vpop.f32.mrb[109].mxu0 }
 0x1ce   : > { %v17686_v47 = vmax.f32 %v23993_v24, %v1659_v57  ;;  %v13643_v55 = vpop.f32.mrb[110].mxu0  ;;  %v17705_v24 = vld [vmem:[%s16446_s29] sm:$0xff]   ;;  %v17721_v57 = vpop.f32.mrb[106].mxu1 }
 0x1cf   : > { %v17693_v52 = vmax.f32 %v23995_v62, %v13643_v55  ;;  %v1662_v6 = vpop.f32.mrb[111].mxu0  ;;  %14050 = vmatprep.mubr.msk.bf16.mxu1 %vm700_vm0, %v17705_v24  ;;  %24002 = vst [vmem:[#allocation204_spill] sm:$0xff] %v17721_v57  ;;  %v24003_v62 = vmax.f32 %v16836_v10, %v17482_v21  ;;  %v17743_v21 = vld [vmem:[%s16446_s29 + $0x8] sm:$0xff]   ;;  %v24316_v57 = vld [vmem:[#allocation76_spill] sm:$0xff] }
 0x1d0   : > { %v17702_v16 = vmax.f32 %v23998_v7, %v1662_v6  ;;  %v17728_v6 = vpop.f32.mrb[107].mxu1  ;;  %v24006_v7 = vmax.f32 %v16838_v11, %v17488_v32  ;;  %14051 = vmatmul.mubr.msk.bf16.vlgmr.msra.gmra.mrb[212].mxu1 %vm700_vm0, %v17743_v21  ;;  %v24012_v32 = vmax.f32 %v23934_v37, %v17498_v18 }
 0x1d1   : > { %23996 = vst [vmem:[#allocation127_spill] sm:$0xff] %v17693_v52  ;;  %13833 = vmatmul.mubr.msk.bf16.gmra.mrb[216].mxu0 %vm700_vm0, %v16721_v50  ;;  %24005 = vst [vmem:[#allocation206_spill] sm:$0xff] %v17728_v6  ;;  %v17767_v18 = vpop.f32.mrb[108].mxu1  ;;  %v18394_v6 = vld [vmem:[%s16446_s29 + $0xe0] sm:$0xff]  }
 0x1d2   : > { %23999 = vst [vmem:[#allocation201_spill] sm:$0xff] %v17702_v16  ;;  %13836 = vmatprep.mubr.msk.bf16.mxu0 %vm700_vm0, %v16726_v51  ;;  %24015 = vst [vmem:[#allocation7_spill] sm:$0xff] %v17767_v18  ;;  %v17769_v37 = vpop.f32.mrb[109].mxu1 }
 0x1d3   : > { %24016 = vst [vmem:[#allocation210_spill] sm:$0xff] %v17769_v37  ;;  %v24334_v37 = vld [vmem:[#allocation82_spill] sm:$0xff] }
 0x1d4   : > { %v13646_v33 = vpop.f32.mrb[112].mxu0  ;;  %24345 = vst [vmem:[#allocation82_spill] sm:$0xff] %v18450_v38 }
 0x1d5   : > { %v17726_v55 = vmax.f32 %v24003_v62, %v13646_v33  ;;  %v1675_v50 = vpop.f32.mrb[113].mxu0  ;;  %v24151_v33 = vld [vmem:[#allocation67_spill] sm:$0xff] }
 0x1d6   : > { %v17733_v51 = vmax.f32 %v24006_v7, %v1675_v50  ;;  %v13647_v29 = vpop.f32.mrb[114].mxu0  ;;  %v17755_v50 = vld [vmem:[%s16446_s29 + $0x10] sm:$0xff]   ;;  %v17771_v7 = vpop.f32.mrb[110].mxu1 }
 0x1d7   : > { %24004 = vst [vmem:[#allocation205_spill] sm:$0xff] %v17726_v55  ;;  %v17740_v42 = vmax.f32 %v24009_v53, %v13647_v29  ;;  %v1678_v10 = vpop.f32.mrb[115].mxu0  ;;  %14054 = vmatprep.mubr.msk.bf16.mxu1 %vm700_vm0, %v17755_v50  ;;  %24017 = vst [vmem:[#allocation211_spill] sm:$0xff] %v17771_v7 }
 0x1d8   : > { %24007 = vst [vmem:[#allocation207_spill] sm:$0xff] %v17733_v51  ;;  %v17752_v62 = vmax.f32 %v24012_v32, %v1678_v10  ;;  %v24018_v10 = vmax.f32 %v23938_v20, %v17514_v30  ;;  %14055 = vmatmul.mubr.msk.bf16.gmra.mrb[216].mxu1 %vm700_vm0, %v16711_v48  ;;  %v24038_v48 = vld [vmem:[#allocation28_spill] sm:$0xff]  ;;  %v24108_v30 = vld [vmem:[#allocation54_spill] sm:$0xff]  ;;  %v24134_v51 = vld [vmem:[#allocation63_spill] sm:$0xff] }
 0x1d9   : > { %24010 = vst [vmem:[#allocation208_spill] sm:$0xff] %v17740_v42  ;;  %13837 = vmatmul.mubr.msk.bf16.gmra.mrb[220].mxu0 %vm700_vm0, %v16741_v54  ;;  %v17778_v54 = vpop.f32.mrb[111].mxu1  ;;  %14058 = vmatprep.mubr.msk.bf16.mxu1 %vm700_vm0, %v16716_v49  ;;  %v24033_v49 = vmax.f32 %v23946_v13, %v17546_v39  ;;  %v24041_v39 = vld [vmem:[#allocation5_spill] sm:$0xff]  ;;  %v24136_v55 = vmax.f32 %v24134_v51, %v24135_v8 }
 0x1da   : > { %24013 = vst [vmem:[#allocation209_spill] sm:$0xff] %v17752_v62  ;;  %13840 = vmatprep.mubr.msk.bf16.mxu0 %vm700_vm0, %v24014_v46  ;;  %24020 = vst [vmem:[#allocation213_spill] sm:$0xff] %v17778_v54  ;;  %v24024_v62 = vmax.f32 %v23941_v45, %v17526_v40  ;;  %v17811_v45 = vpop.f32.mrb[112].mxu1  ;;  %v24039_v40 = vmax.f32 %v23950_v5, %v24038_v48  ;;  %v24145_v51 = vld [vmem:[#allocation125_spill] sm:$0xff] }
 0x1db   : > { %24030 = vst [vmem:[#allocation217_spill] sm:$0xff] %v17811_v45  ;;  %v17813_v44 = vpop.f32.mrb[113].mxu1 }
 0x1dc   : > { %v13650_v29 = vpop.f32.mrb[116].mxu0  ;;  %24031 = vst [vmem:[#allocation218_spill] sm:$0xff] %v17813_v44 }
 0x1dd   : > { %v17776_v32 = vmax.f32 %v24018_v10, %v13650_v29  ;;  %v1691_v53 = vpop.f32.mrb[117].mxu0 }
 0x1de   : > { %v17783_v11 = vmax.f32 %v24021_v12, %v1691_v53  ;;  %v13651_v46 = vpop.f32.mrb[118].mxu0 }
 0x1df   : > { %24019 = vst [vmem:[#allocation212_spill] sm:$0xff] %v17776_v32  ;;  %v17790_v17 = vmax.f32 %v24024_v62, %v13651_v46  ;;  %v1694_v20 = vpop.f32.mrb[119].mxu0  ;;  %v17815_v62 = vpop.f32.mrb[114].mxu1  ;;  %v24036_v46 = vmax.f32 %v23948_v58, %v17552_v1  ;;  %v24044_v1 = vld [vmem:[#allocation30_spill] sm:$0xff] }
 0x1e0   : > { %24022 = vst [vmem:[#allocation214_spill] sm:$0xff] %v17783_v11  ;;  %v17799_v41 = vmax.f32 %v24027_v3, %v1694_v20  ;;  %24032 = vst [vmem:[#allocation219_spill] sm:$0xff] %v17815_v62  ;;  %14059 = vmatmul.mubr.msk.bf16.gmra.mrb[220].mxu1 %vm700_vm0, %v24041_v39  ;;  %v24045_v58 = vmax.f32 %v24043_v22, %v24044_v1  ;;  %v24051_v39 = vld [vmem:[#allocation10_spill] sm:$0xff]  ;;  %v24109_v11 = vld [vmem:[#allocation52_spill] sm:$0xff] }
 0x1e1   : > { %24025 = vst [vmem:[#allocation215_spill] sm:$0xff] %v17790_v17  ;;  %13841 = vmatmul.mubr.msk.bf16.gmra.mrb[224].mxu0 %vm700_vm0, %v16767_v60  ;;  %v17822_v60 = vpop.f32.mrb[115].mxu1  ;;  %v24110_v25 = vmax.f32 %v24108_v30, %v24109_v11  ;;  %v24118_v30 = vld [vmem:[#allocation115_spill] sm:$0xff]  ;;  %v24129_v3 = vld [vmem:[#allocation61_spill] sm:$0xff] }
 0x1e2   : > { %24028 = vst [vmem:[#allocation216_spill] sm:$0xff] %v17799_v41  ;;  %13844 = vmatprep.mubr.msk.bf16.mxu0 %vm700_vm0, %v16772_v61  ;;  %24035 = vst [vmem:[#allocation221_spill] sm:$0xff] %v17822_v60  ;;  %v24087_v41 = vld [vmem:[#allocation193_spill] sm:$0xff] }
 0x1e3   : > { %v24088_v53 = vmax.f32 %v24086_v2, %v24087_v41  ;;  %v24102_v41 = vmax.f32 %v23981_v15, %v17642_v4  ;;  %v17981_v15 = vld [vmem:[%s16446_s29 + $0x58] sm:$0xff]   ;;  %v24356_v60 = vld [vmem:[#allocation141_spill] sm:$0xff] }
 0x1e4   : > { %v13654_v27 = vpop.f32.mrb[120].mxu0 }
 0x1e5   : > { %v17820_v12 = vmax.f32 %v24033_v49, %v13654_v27  ;;  %v1707_v10 = vpop.f32.mrb[121].mxu0  ;;  %v17855_v49 = vpop.f32.mrb[116].mxu1  ;;  %v24062_v27 = vld [vmem:[#allocation38_spill] sm:$0xff] }
 0x1e6   : > { %v17827_v20 = vmax.f32 %v24036_v46, %v1707_v10  ;;  %v13655_v61 = vpop.f32.mrb[122].mxu0  ;;  %v24047_v46 = vld [vmem:[#allocation6_spill] sm:$0xff]  ;;  %24052 = vst [vmem:[#allocation31_spill] sm:$0xff] %v17855_v49  ;;  %v17857_v22 = vpop.f32.mrb[117].mxu1 }
 0x1e7   : > { %24034 = vst [vmem:[#allocation220_spill] sm:$0xff] %v17820_v12  ;;  %v17834_v29 = vmax.f32 %v24039_v40, %v13655_v61  ;;  %v1710_v13 = vpop.f32.mrb[123].mxu0  ;;  %14062 = vmatprep.mubr.msk.bf16.mxu1 %vm700_vm0, %v24047_v46  ;;  %v24049_v40 = vld [vmem:[#allocation9_spill] sm:$0xff]  ;;  %24053 = vst [vmem:[#allocation30_spill] sm:$0xff] %v17857_v22  ;;  %v17859_v1 = vpop.f32.mrb[118].mxu1  ;;  %v24058_v61 = vld [vmem:[#allocation34_spill] sm:$0xff] }
 0x1e8   : > { %24037 = vst [vmem:[#allocation222_spill] sm:$0xff] %v17827_v20  ;;  %v17843_v10 = vmax.f32 %v24045_v58, %v1710_v13  ;;  %24054 = vst [vmem:[#allocation6_spill] sm:$0xff] %v17859_v1  ;;  %v24055_v58 = vmax.f32 %v23956_v23, %v17578_v35  ;;  %v17866_v5 = vpop.f32.mrb[119].mxu1  ;;  %v24059_v48 = vmax.f32 %v23959_v56, %v24058_v61  ;;  %v24063_v20 = vld [vmem:[#allocation36_spill] sm:$0xff]  ;;  %v24068_v61 = vld [vmem:[#allocation189_spill] sm:$0xff] }
 0x1e9   : > { %24040 = vst [vmem:[#allocation28_spill] sm:$0xff] %v17834_v29  ;;  %13845 = vmatmul.mubr.msk.bf16.gmra.mrb[228].mxu0 %vm700_vm0, %v24049_v40  ;;  %24057 = vst [vmem:[#allocation10_spill] sm:$0xff] %v17866_v5  ;;  %v24064_v63 = vmax.f32 %v24062_v27, %v24063_v20  ;;  %v17881_v35 = vld [vmem:[%s16446_s29 + $0x38] sm:$0xff]   ;;  %v17893_v29 = vld [vmem:[%s16446_s29 + $0x40] sm:$0xff]   ;;  %v24078_v20 = vmax.f32 %v23968_v31, %v17610_v36 }
 0x1ea   : > { %24046 = vst [vmem:[#allocation5_spill] sm:$0xff] %v17843_v10  ;;  %13848 = vmatprep.mubr.msk.bf16.mxu0 %vm700_vm0, %v24051_v39  ;;  %14063 = vmatmul.mubr.msk.bf16.gmra.mrb[224].mxu1 %vm700_vm0, %v17881_v35  ;;  %v24072_v27 = vld [vmem:[#allocation13_spill] sm:$0xff]  ;;  %v24081_v56 = vld [vmem:[#allocation44_spill] sm:$0xff]  ;;  %v24376_v1 = vld [vmem:[#allocation151_spill] sm:$0xff] }
 0x1eb   : > { %14066 = vmatprep.mubr.msk.bf16.mxu1 %vm700_vm0, %v17893_v29  ;;  %v17931_v36 = vld [vmem:[%s16446_s29 + $0x48] sm:$0xff]   ;;  %v24381_v5 = vld [vmem:[#allocation100_spill] sm:$0xff] }
 0x1ec   : > { %v13658_v13 = vpop.f32.mrb[124].mxu0 }
 0x1ed   : > { %v17864_v46 = vmax.f32 %v24055_v58, %v13658_v13  ;;  %v1723_v40 = vpop.f32.mrb[125].mxu0  ;;  %v24074_v13 = vld [vmem:[#allocation14_spill] sm:$0xff] }
 0x1ee   : > { %v17871_v39 = vmax.f32 %v24059_v48, %v1723_v40  ;;  %v13659_v10 = vpop.f32.mrb[126].mxu0  ;;  %v24067_v48 = vld [vmem:[#allocation39_spill] sm:$0xff] }
 0x1ef   : > { %24056 = vst [vmem:[#allocation9_spill] sm:$0xff] %v17864_v46  ;;  %v17878_v12 = vmax.f32 %v24064_v63, %v13659_v10  ;;  %v1726_v23 = vpop.f32.mrb[127].mxu0  ;;  %v24069_v58 = vmax.f32 %v24067_v48, %v24068_v61  ;;  %v24082_v10 = vld [vmem:[#allocation42_spill] sm:$0xff] }
 0x1f0   : > { %24060 = vst [vmem:[#allocation34_spill] sm:$0xff] %v17871_v39  ;;  %v17943_v46 = vld [vmem:[%s16446_s29 + $0x50] sm:$0xff]  }
 0x1f1   : > { %24065 = vst [vmem:[#allocation38_spill] sm:$0xff] %v17878_v12  ;;  %v17890_v40 = vmax.f32 %v24069_v58, %v1726_v23  ;;  %13849 = vmatmul.mubr.msk.bf16.gmra.mrb[232].mxu0 %vm700_vm0, %v24072_v27  ;;  %v17905_v23 = vpop.f32.mrb[120].mxu1 }
 0x1f2   : > { %13852 = vmatprep.mubr.msk.bf16.mxu0 %vm700_vm0, %v24074_v13  ;;  %24075 = vst [vmem:[#allocation39_spill] sm:$0xff] %v17905_v23  ;;  %v17907_v48 = vpop.f32.mrb[121].mxu1  ;;  %14067 = vmatmul.mubr.msk.bf16.gmra.mrb[228].mxu1 %vm700_vm0, %v17931_v36 }
 0x1f3   : > { %24070 = vst [vmem:[#allocation36_spill] sm:$0xff] %v17890_v40  ;;  %24076 = vst [vmem:[#allocation189_spill] sm:$0xff] %v17907_v48  ;;  %v17909_v58 = vpop.f32.mrb[122].mxu1  ;;  %v24083_v40 = vmax.f32 %v24081_v56, %v24082_v10  ;;  %v24092_v10 = vld [vmem:[#allocation194_spill] sm:$0xff]  ;;  %14070 = vmatprep.mubr.msk.bf16.mxu1 %vm700_vm0, %v17943_v46  ;;  %v24105_v56 = vmax.f32 %v23983_v43, %v17648_v0  ;;  %v24114_v43 = vld [vmem:[#allocation196_spill] sm:$0xff] }
 0x1f4   : > { %v13662_v61 = vpop.f32.mrb[128].mxu0  ;;  %24077 = vst [vmem:[#allocation13_spill] sm:$0xff] %v17909_v58  ;;  %v17916_v12 = vpop.f32.mrb[123].mxu1  ;;  %v24120_v0 = vld [vmem:[#allocation116_spill] sm:$0xff]  ;;  %v24396_v58 = vld [vmem:[#allocation161_spill] sm:$0xff] }
 0x1f5   : > { %v17914_v63 = vmax.f32 %v24078_v20, %v13662_v61  ;;  %v1739_v27 = vpop.f32.mrb[129].mxu0  ;;  %24080 = vst [vmem:[#allocation223_spill] sm:$0xff] %v17916_v12  ;;  %v24098_v20 = vld [vmem:[#allocation106_spill] sm:$0xff] }
 0x1f6   : > { %v17921_v13 = vmax.f32 %v24083_v40, %v1739_v27  ;;  %v13663_v39 = vpop.f32.mrb[130].mxu0  ;;  %v24091_v40 = vld [vmem:[#allocation47_spill] sm:$0xff]  ;;  %v24401_v12 = vld [vmem:[#allocation110_spill] sm:$0xff] }
 0x1f7   : > { %24079 = vst [vmem:[#allocation14_spill] sm:$0xff] %v17914_v63  ;;  %v17928_v17 = vmax.f32 %v24088_v53, %v13663_v39  ;;  %v1742_v31 = vpop.f32.mrb[131].mxu0  ;;  %v24093_v61 = vmax.f32 %v24091_v40, %v24092_v10  ;;  %v24096_v53 = vld [vmem:[#allocation105_spill] sm:$0xff] }
 0x1f8   : > { %24084 = vst [vmem:[#allocation44_spill] sm:$0xff] %v17921_v13  ;;  %v17993_v63 = vld [vmem:[%s16446_s29 + $0x60] sm:$0xff]  }
 0x1f9   : > { %24089 = vst [vmem:[#allocation42_spill] sm:$0xff] %v17928_v17  ;;  %v17940_v27 = vmax.f32 %v24093_v61, %v1742_v31  ;;  %13853 = vmatmul.mubr.msk.bf16.gmra.mrb[236].mxu0 %vm700_vm0, %v24096_v53  ;;  %v17955_v31 = vpop.f32.mrb[124].mxu1 }
 0x1fa   : > { %13856 = vmatprep.mubr.msk.bf16.mxu0 %vm700_vm0, %v24098_v20  ;;  %24099 = vst [vmem:[#allocation193_spill] sm:$0xff] %v17955_v31  ;;  %v17957_v40 = vpop.f32.mrb[125].mxu1  ;;  %14071 = vmatmul.mubr.msk.bf16.gmra.mrb[232].mxu1 %vm700_vm0, %v17981_v15 }
 0x1fb   : > { %24094 = vst [vmem:[#allocation46_spill] sm:$0xff] %v17940_v27  ;;  %24100 = vst [vmem:[#allocation47_spill] sm:$0xff] %v17957_v40  ;;  %v17959_v61 = vpop.f32.mrb[126].mxu1  ;;  %14074 = vmatprep.mubr.msk.bf16.mxu1 %vm700_vm0, %v17993_v63 }
 0x1fc   : > { %v13666_v10 = vpop.f32.mrb[132].mxu0  ;;  %24101 = vst [vmem:[#allocation194_spill] sm:$0xff] %v17959_v61  ;;  %v17966_v13 = vpop.f32.mrb[127].mxu1  ;;  %v24416_v61 = vld [vmem:[#allocation171_spill] sm:$0xff] }
 0x1fd   : > { %v17964_v2 = vmax.f32 %v24102_v41, %v13666_v10  ;;  %v1755_v17 = vpop.f32.mrb[133].mxu0  ;;  %24104 = vst [vmem:[#allocation106_spill] sm:$0xff] %v17966_v13  ;;  %v24124_v41 = vld [vmem:[#allocation59_spill] sm:$0xff]  ;;  %v24420_v13 = vld [vmem:[#allocation173_spill] sm:$0xff] }
 0x1fe   : > { %v17971_v39 = vmax.f32 %v24105_v56, %v1755_v17  ;;  %v13667_v27 = vpop.f32.mrb[134].mxu0  ;;  %v24113_v17 = vld [vmem:[#allocation55_spill] sm:$0xff] }
 0x1ff   : > { %24103 = vst [vmem:[#allocation105_spill] sm:$0xff] %v17964_v2  ;;  %v17978_v32 = vmax.f32 %v24110_v25, %v13667_v27  ;;  %v1758_v4 = vpop.f32.mrb[135].mxu0  ;;  %v24115_v56 = vmax.f32 %v24113_v17, %v24114_v43  ;;  %v24130_v27 = vld [vmem:[#allocation17_spill] sm:$0xff] }
 0x200   : > { %24106 = vst [vmem:[#allocation224_spill] sm:$0xff] %v17971_v39  ;;  %v24125_v39 = vld [vmem:[#allocation16_spill] sm:$0xff] }
 0x201   : > { %24111 = vst [vmem:[#allocation54_spill] sm:$0xff] %v17978_v32  ;;  %v17990_v10 = vmax.f32 %v24115_v56, %v1758_v4  ;;  %13857 = vmatmul.mubr.msk.bf16.gmra.mrb[240].mxu0 %vm700_vm0, %v24118_v30  ;;  %v18005_v4 = vpop.f32.mrb[128].mxu1  ;;  %v24126_v11 = vmax.f32 %v24124_v41, %v24125_v39  ;;  %v24138_v41 = vld [vmem:[#allocation56_spill] sm:$0xff] }
 0x202   : > { %13860 = vmatprep.mubr.msk.bf16.mxu0 %vm700_vm0, %v24120_v0  ;;  %24121 = vst [vmem:[#allocation55_spill] sm:$0xff] %v18005_v4  ;;  %v18007_v17 = vpop.f32.mrb[129].mxu1  ;;  %14075 = vmatmul.mubr.msk.bf16.gmra.mrb[236].mxu1 %vm700_vm0, %v24138_v41  ;;  %v24156_v41 = vld [vmem:[#allocation69_spill] sm:$0xff] }
 0x203   : > { %24116 = vst [vmem:[#allocation52_spill] sm:$0xff] %v17990_v10  ;;  %24122 = vst [vmem:[#allocation196_spill] sm:$0xff] %v18007_v17  ;;  %v18009_v56 = vpop.f32.mrb[130].mxu1  ;;  %v24131_v10 = vmax.f32 %v24129_v3, %v24130_v27  ;;  %v24141_v3 = vld [vmem:[#allocation21_spill] sm:$0xff] }
 0x204   : > { %v13670_v43 = vpop.f32.mrb[136].mxu0  ;;  %24123 = vst [vmem:[#allocation115_spill] sm:$0xff] %v18009_v56  ;;  %v18016_v32 = vpop.f32.mrb[131].mxu1 }
 0x205   : > { %v18014_v25 = vmax.f32 %v24126_v11, %v13670_v43  ;;  %v1771_v30 = vpop.f32.mrb[137].mxu0  ;;  %24128 = vst [vmem:[#allocation59_spill] sm:$0xff] %v18016_v32  ;;  %v24147_v43 = vld [vmem:[#allocation126_spill] sm:$0xff] }
 0x206   : > { %v18021_v0 = vmax.f32 %v24131_v10, %v1771_v30  ;;  %v13671_v2 = vpop.f32.mrb[138].mxu0  ;;  %v24142_v10 = vmax.f32 %v24140_v14, %v24141_v3  ;;  %v18040_v30 = vld [vmem:[%s16446_s29 + $0x70] sm:$0xff]   ;;  %v18052_v14 = vpop.f32.mrb[132].mxu1 }
 0x207   : > { %24127 = vst [vmem:[#allocation116_spill] sm:$0xff] %v18014_v25  ;;  %v18028_v16 = vmax.f32 %v24136_v55, %v13671_v2  ;;  %v1774_v39 = vpop.f32.mrb[139].mxu0  ;;  %14078 = vmatprep.mubr.msk.bf16.mxu1 %vm700_vm0, %v18040_v30  ;;  %24148 = vst [vmem:[#allocation63_spill] sm:$0xff] %v18052_v14  ;;  %v24152_v55 = vld [vmem:[#allocation24_spill] sm:$0xff]  ;;  %v24157_v2 = vld [vmem:[#allocation25_spill] sm:$0xff] }
 0x208   : > { %24132 = vst [vmem:[#allocation16_spill] sm:$0xff] %v18021_v0  ;;  %v18037_v27 = vmax.f32 %v24142_v10, %v1774_v39  ;;  %v18054_v39 = vpop.f32.mrb[133].mxu1  ;;  %v24153_v8 = vmax.f32 %v24151_v33, %v24152_v55  ;;  %v24162_v14 = vld [vmem:[#allocation27_spill] sm:$0xff]  ;;  %v18090_v25 = vld [vmem:[%s16446_s29 + $0x80] sm:$0xff]   ;;  %v24438_v32 = vld [vmem:[#allocation130_spill] sm:$0xff] }
 0x209   : > { %24137 = vst [vmem:[#allocation61_spill] sm:$0xff] %v18028_v16  ;;  %13861 = vmatmul.mubr.msk.bf16.gmra.mrb[244].mxu0 %vm700_vm0, %v24145_v51  ;;  %24149 = vst [vmem:[#allocation19_spill] sm:$0xff] %v18054_v39  ;;  %v18056_v10 = vpop.f32.mrb[134].mxu1  ;;  %v24161_v39 = vld [vmem:[#allocation71_spill] sm:$0xff]  ;;  %v24175_v55 = vld [vmem:[#allocation136_spill] sm:$0xff] }
 0x20a   : > { %24143 = vst [vmem:[#allocation17_spill] sm:$0xff] %v18037_v27  ;;  %13864 = vmatprep.mubr.msk.bf16.mxu0 %vm700_vm0, %v24147_v43  ;;  %24150 = vst [vmem:[#allocation56_spill] sm:$0xff] %v18056_v10  ;;  %v18063_v11 = vpop.f32.mrb[135].mxu1  ;;  %v24158_v27 = vmax.f32 %v24156_v41, %v24157_v2  ;;  %v24163_v10 = vmax.f32 %v24161_v39, %v24162_v14  ;;  %v24168_v41 = vld [vmem:[#allocation29_spill] sm:$0xff]  ;;  %v24173_v39 = vld [vmem:[#allocation135_spill] sm:$0xff] }
 0x20b   : > { %24155 = vst [vmem:[#allocation21_spill] sm:$0xff] %v18063_v11  ;;  %24171 = vst [vmem:[#allocation69_spill] sm:$0xff] %v18090_v25  ;;  %v24180_v14 = vld [vmem:[#allocation32_spill] sm:$0xff]  ;;  %v24184_v2 = vld [vmem:[#allocation77_spill] sm:$0xff] }
 0x20c   : > { %v13674_v3 = vpop.f32.mrb[140].mxu0  ;;  %v24189_v11 = vld [vmem:[#allocation79_spill] sm:$0xff] }
 0x20d   : > { %v18061_v16 = vmax.f32 %v24153_v8, %v13674_v3  ;;  %v1787_v51 = vpop.f32.mrb[141].mxu0  ;;  %v18078_v8 = vld [vmem:[%s16446_s29 + $0x78] sm:$0xff]  }
 0x20e   : > { %v18068_v43 = vmax.f32 %v24158_v27, %v1787_v51  ;;  %v13675_v0 = vpop.f32.mrb[142].mxu0  ;;  %24165 = vst [vmem:[#allocation67_spill] sm:$0xff] %v18078_v8  ;;  %14079 = vmatmul.mubr.msk.bf16.gmra.mrb[240].mxu1 %vm700_vm0, %v18078_v8  ;;  %v24167_v27 = vld [vmem:[#allocation72_spill] sm:$0xff] }
 0x20f   : > { %24154 = vst [vmem:[#allocation64_spill] sm:$0xff] %v18061_v16  ;;  %v18075_v52 = vmax.f32 %v24163_v10, %v13675_v0  ;;  %v1790_v33 = vpop.f32.mrb[143].mxu0  ;;  %v24169_v3 = vmax.f32 %v24167_v27, %v24168_v41  ;;  %14082 = vmatprep.mubr.msk.bf16.mxu1 %vm700_vm0, %v18090_v25  ;;  %v24185_v10 = vld [vmem:[#allocation33_spill] sm:$0xff]  ;;  %v24190_v25 = vld [vmem:[#allocation35_spill] sm:$0xff] }
 0x210   : > { %24159 = vst [vmem:[#allocation125_spill] sm:$0xff] %v18068_v43  ;;  %v24179_v43 = vld [vmem:[#allocation75_spill] sm:$0xff] }
 0x211   : > { %24164 = vst [vmem:[#allocation126_spill] sm:$0xff] %v18075_v52  ;;  %v18087_v51 = vmax.f32 %v24169_v3, %v1790_v33  ;;  %13865 = vmatmul.mubr.msk.bf16.gmra.mrb[248].mxu0 %vm700_vm0, %v24173_v39  ;;  %v18102_v33 = vpop.f32.mrb[136].mxu1  ;;  %v24181_v0 = vmax.f32 %v24179_v43, %v24180_v14  ;;  %v24208_v14 = vld [vmem:[#allocation40_spill] sm:$0xff] }
 0x212   : > { %13868 = vmatprep.mubr.msk.bf16.mxu0 %vm700_vm0, %v24175_v55  ;;  %24176 = vst [vmem:[#allocation25_spill] sm:$0xff] %v18102_v33  ;;  %v18104_v27 = vpop.f32.mrb[137].mxu1  ;;  %v24213_v33 = vld [vmem:[#allocation41_spill] sm:$0xff] }
 0x213   : > { %24170 = vst [vmem:[#allocation24_spill] sm:$0xff] %v18087_v51  ;;  %24177 = vst [vmem:[#allocation71_spill] sm:$0xff] %v18104_v27  ;;  %v18106_v3 = vpop.f32.mrb[138].mxu1  ;;  %v24186_v51 = vmax.f32 %v24184_v2, %v24185_v10  ;;  %v24196_v10 = vld [vmem:[#allocation37_spill] sm:$0xff]  ;;  %v18140_v27 = vld [vmem:[%s16446_s29 + $0x90] sm:$0xff]  }
 0x214   : > { %v13678_v41 = vpop.f32.mrb[144].mxu0  ;;  %24178 = vst [vmem:[#allocation27_spill] sm:$0xff] %v18106_v3  ;;  %v18113_v42 = vpop.f32.mrb[139].mxu1  ;;  %v24191_v3 = vmax.f32 %v24189_v11, %v24190_v25  ;;  %24199 = vst [vmem:[#allocation77_spill] sm:$0xff] %v18140_v27  ;;  %v24201_v11 = vld [vmem:[#allocation145_spill] sm:$0xff] }
 0x215   : > { %v18111_v52 = vmax.f32 %v24181_v0, %v13678_v41  ;;  %v1803_v39 = vpop.f32.mrb[145].mxu0  ;;  %24183 = vst [vmem:[#allocation29_spill] sm:$0xff] %v18113_v42  ;;  %v18128_v0 = vld [vmem:[%s16446_s29 + $0x88] sm:$0xff]   ;;  %v18160_v25 = vpop.f32.mrb[140].mxu1 }
 0x216   : > { %v18118_v55 = vmax.f32 %v24186_v51, %v1803_v39  ;;  %v13679_v16 = vpop.f32.mrb[146].mxu0  ;;  %24193 = vst [vmem:[#allocation75_spill] sm:$0xff] %v18128_v0  ;;  %14083 = vmatmul.mubr.msk.bf16.gmra.mrb[244].mxu1 %vm700_vm0, %v18128_v0  ;;  %v24195_v51 = vld [vmem:[#allocation80_spill] sm:$0xff]  ;;  %24204 = vst [vmem:[#allocation33_spill] sm:$0xff] %v18160_v25  ;;  %v18162_v2 = vpop.f32.mrb[141].mxu1  ;;  %v24217_v0 = vld [vmem:[#allocation87_spill] sm:$0xff] }
 0x217   : > { %24182 = vst [vmem:[#allocation72_spill] sm:$0xff] %v18111_v52  ;;  %v18125_v8 = vmax.f32 %v24191_v3, %v13679_v16  ;;  %v1806_v43 = vpop.f32.mrb[147].mxu0  ;;  %v24197_v41 = vmax.f32 %v24195_v51, %v24196_v10  ;;  %14086 = vmatprep.mubr.msk.bf16.mxu1 %vm700_vm0, %v18140_v27  ;;  %v18151_v3 = vld [vmem:[%s23025_s2 + $0x40] sm:$0xff]   ;;  %24205 = vst [vmem:[#allocation79_spill] sm:$0xff] %v18162_v2  ;;  %v18165_v16 = vpop.f32.mrb[142].mxu1 }
 0x218   : > { %24187 = vst [vmem:[#allocation135_spill] sm:$0xff] %v18118_v55  ;;  %14130 = vmatprep.subr.bf16.mxu0 %v18151_v3  ;;  %24206 = vst [vmem:[#allocation35_spill] sm:$0xff] %v18165_v16  ;;  %v24218_v16 = vld [vmem:[#allocation43_spill] sm:$0xff]  ;;  %v18199_v27 = vld [vmem:[%s16446_s29 + $0xa0] sm:$0xff]  }
 0x219   : > { %24192 = vst [vmem:[#allocation136_spill] sm:$0xff] %v18125_v8  ;;  %v18137_v39 = vmax.f32 %v24197_v41, %v1806_v43  ;;  %13869 = vmatmul.mubr.msk.bf16.gmra.mrb[252].mxu0 %vm700_vm0, %v24201_v11  ;;  %v15698_v43 = vld [vmem:[%s23025_s2 + $0x48] sm:$0xff]   ;;  %v24207_v8 = vld [vmem:[#allocation83_spill] sm:$0xff] }
 0x21a   : > { %v24203_v41 = vld [vmem:[#allocation146_spill] sm:$0xff]  ;;  %14212 = vmatprep.subr.bf16.mxu1 %v15698_v43  ;;  %v24209_v55 = vmax.f32 %v24207_v8, %v24208_v14  ;;  %v24231_v14 = vld [vmem:[#allocation156_spill] sm:$0xff] }
 0x21b   : > { %24198 = vst [vmem:[#allocation32_spill] sm:$0xff] %v18137_v39  ;;  %13872 = vmatprep.mubr.msk.bf16.mxu0 %vm700_vm0, %v24203_v41  ;;  %14213 = vmatpush3.bf16.msra.mxu1 %v15698_v43  ;;  %v18172_v41 = vpop.f32.mrb[143].mxu1  ;;  %v24212_v39 = vld [vmem:[#allocation85_spill] sm:$0xff]  ;;  %v24219_v43 = vmax.f32 %v24217_v0, %v24218_v16  ;;  %v24236_v16 = vld [vmem:[#allocation48_spill] sm:$0xff] }
 0x21c   : > { %v13682_v11 = vpop.f32.mrb[148].mxu0  ;;  %24211 = vst [vmem:[#allocation37_spill] sm:$0xff] %v18172_v41  ;;  %v24214_v52 = vmax.f32 %v24212_v39, %v24213_v33  ;;  %v24224_v39 = vld [vmem:[#allocation45_spill] sm:$0xff]  ;;  %24227 = vst [vmem:[#allocation85_spill] sm:$0xff] %v18199_v27  ;;  %v24245_v41 = vld [vmem:[#allocation95_spill] sm:$0xff] }
 0x21d   : > { %v18170_v10 = vmax.f32 %v24209_v55, %v13682_v11  ;;  %v1819_v51 = vpop.f32.mrb[149].mxu0  ;;  %v18187_v55 = vld [vmem:[%s16446_s29 + $0x98] sm:$0xff]   ;;  %v24240_v33 = vld [vmem:[#allocation93_spill] sm:$0xff] }
 0x21e   : > { %v18177_v2 = vmax.f32 %v24214_v52, %v1819_v51  ;;  %v13683_v25 = vpop.f32.mrb[150].mxu0  ;;  %24221 = vst [vmem:[#allocation83_spill] sm:$0xff] %v18187_v55  ;;  %14087 = vmatmul.mubr.msk.bf16.gmra.mrb[248].mxu1 %vm700_vm0, %v18187_v55  ;;  %v24223_v52 = vld [vmem:[#allocation88_spill] sm:$0xff] }
 0x21f   : > { %24210 = vst [vmem:[#allocation80_spill] sm:$0xff] %v18170_v10  ;;  %v18184_v19 = vmax.f32 %v24219_v43, %v13683_v25  ;;  %v1822_v8 = vpop.f32.mrb[151].mxu0  ;;  %v24225_v51 = vmax.f32 %v24223_v52, %v24224_v39  ;;  %14090 = vmatprep.mubr.msk.bf16.mxu1 %vm700_vm0, %v18199_v27  ;;  %v24229_v25 = vld [vmem:[#allocation155_spill] sm:$0xff]  ;;  %v24241_v43 = vld [vmem:[#allocation49_spill] sm:$0xff] }
 0x220   : > { %24215 = vst [vmem:[#allocation145_spill] sm:$0xff] %v18177_v2  ;;  %v24235_v2 = vld [vmem:[#allocation91_spill] sm:$0xff] }
 0x221   : > { %24220 = vst [vmem:[#allocation146_spill] sm:$0xff] %v18184_v19  ;;  %v18196_v11 = vmax.f32 %v24225_v51, %v1822_v8  ;;  %13873 = vmatmul.mubr.msk.bf16.gmra.mrb[0].mxu0 %vm700_vm0, %v24229_v25  ;;  %v18211_v8 = vpop.f32.mrb[144].mxu1  ;;  %v24237_v0 = vmax.f32 %v24235_v2, %v24236_v16  ;;  %v24246_v27 = vld [vmem:[#allocation51_spill] sm:$0xff]  ;;  %v24259_v16 = vld [vmem:[#allocation166_spill] sm:$0xff] }
 0x222   : > { %13876 = vmatprep.mubr.msk.bf16.mxu0 %vm700_vm0, %v24231_v14  ;;  %24232 = vst [vmem:[#allocation41_spill] sm:$0xff] %v18211_v8  ;;  %v18213_v52 = vpop.f32.mrb[145].mxu1 }
 0x223   : > { %24226 = vst [vmem:[#allocation40_spill] sm:$0xff] %v18196_v11  ;;  %24233 = vst [vmem:[#allocation87_spill] sm:$0xff] %v18213_v52  ;;  %v18215_v51 = vpop.f32.mrb[146].mxu1  ;;  %v24242_v11 = vmax.f32 %v24240_v33, %v24241_v43  ;;  %v24252_v43 = vld [vmem:[#allocation53_spill] sm:$0xff]  ;;  %v18249_v52 = vld [vmem:[%s16446_s29 + $0xb0] sm:$0xff]  }
 0x224   : > { %v13686_v39 = vpop.f32.mrb[152].mxu0  ;;  %24234 = vst [vmem:[#allocation43_spill] sm:$0xff] %v18215_v51  ;;  %v18222_v42 = vpop.f32.mrb[147].mxu1  ;;  %v24247_v51 = vmax.f32 %v24245_v41, %v24246_v27  ;;  %24255 = vst [vmem:[#allocation93_spill] sm:$0xff] %v18249_v52  ;;  %v24257_v41 = vld [vmem:[#allocation165_spill] sm:$0xff] }
 0x225   : > { %v18220_v19 = vmax.f32 %v24237_v0, %v13686_v39  ;;  %v1835_v25 = vpop.f32.mrb[153].mxu0  ;;  %24239 = vst [vmem:[#allocation45_spill] sm:$0xff] %v18222_v42  ;;  %v18237_v0 = vld [vmem:[%s16446_s29 + $0xa8] sm:$0xff]   ;;  %v24273_v42 = vld [vmem:[#allocation103_spill] sm:$0xff] }
 0x226   : > { %v18227_v14 = vmax.f32 %v24242_v11, %v1835_v25  ;;  %v13687_v10 = vpop.f32.mrb[154].mxu0  ;;  %24249 = vst [vmem:[#allocation91_spill] sm:$0xff] %v18237_v0  ;;  %14091 = vmatmul.mubr.msk.bf16.gmra.mrb[252].mxu1 %vm700_vm0, %v18237_v0  ;;  %v24251_v11 = vld [vmem:[#allocation96_spill] sm:$0xff]  ;;  %v24268_v33 = vld [vmem:[#allocation101_spill] sm:$0xff] }
 0x227   : > { %24238 = vst [vmem:[#allocation88_spill] sm:$0xff] %v18220_v19  ;;  %v18234_v55 = vmax.f32 %v24247_v51, %v13687_v10  ;;  %v1838_v2 = vpop.f32.mrb[155].mxu0  ;;  %v24253_v39 = vmax.f32 %v24251_v11, %v24252_v43  ;;  %14094 = vmatprep.mubr.msk.bf16.mxu1 %vm700_vm0, %v18249_v52  ;;  %v24264_v10 = vld [vmem:[#allocation57_spill] sm:$0xff]  ;;  %v24269_v51 = vld [vmem:[#allocation58_spill] sm:$0xff]  ;;  %v24274_v52 = vld [vmem:[#allocation60_spill] sm:$0xff] }
 0x228   : > { %24243 = vst [vmem:[#allocation155_spill] sm:$0xff] %v18227_v14  ;;  %v24263_v14 = vld [vmem:[#allocation99_spill] sm:$0xff] }
 0x229   : > { %24248 = vst [vmem:[#allocation156_spill] sm:$0xff] %v18234_v55  ;;  %v18246_v25 = vmax.f32 %v24253_v39, %v1838_v2  ;;  %13877 = vmatmul.mubr.msk.bf16.gmra.mrb[4].mxu0 %vm700_vm0, %v24257_v41  ;;  %v18261_v2 = vpop.f32.mrb[148].mxu1  ;;  %v24265_v27 = vmax.f32 %v24263_v14, %v24264_v10 }
 0x22a   : > { %13880 = vmatprep.mubr.msk.bf16.mxu0 %vm700_vm0, %v24259_v16  ;;  %24260 = vst [vmem:[#allocation49_spill] sm:$0xff] %v18261_v2  ;;  %v18263_v11 = vpop.f32.mrb[149].mxu1 }
 0x22b   : > { %24254 = vst [vmem:[#allocation48_spill] sm:$0xff] %v18246_v25  ;;  %24261 = vst [vmem:[#allocation95_spill] sm:$0xff] %v18263_v11  ;;  %v18265_v39 = vpop.f32.mrb[150].mxu1  ;;  %v24270_v25 = vmax.f32 %v24268_v33, %v24269_v51  ;;  %v24279_v51 = vld [vmem:[#allocation62_spill] sm:$0xff]  ;;  %v18299_v11 = vld [vmem:[%s16446_s29 + $0xc0] sm:$0xff]  }
 0x22c   : > { %v13690_v43 = vpop.f32.mrb[156].mxu0  ;;  %24262 = vst [vmem:[#allocation51_spill] sm:$0xff] %v18265_v39  ;;  %v18272_v8 = vpop.f32.mrb[151].mxu1  ;;  %v24275_v39 = vmax.f32 %v24273_v42, %v24274_v52  ;;  %v24287_v33 = vld [vmem:[#allocation65_spill] sm:$0xff]  ;;  %v24292_v52 = vld [vmem:[#allocation66_spill] sm:$0xff] }
 0x22d   : > { %v18270_v55 = vmax.f32 %v24265_v27, %v13690_v43  ;;  %v1851_v41 = vpop.f32.mrb[157].mxu0  ;;  %24267 = vst [vmem:[#allocation53_spill] sm:$0xff] %v18272_v8  ;;  %v18287_v27 = vld [vmem:[%s16446_s29 + $0xb8] sm:$0xff]   ;;  %v24565_v8 = vld [vmem:[#allocation42_spill] sm:$0xff] }
 0x22e   : > { %v18277_v16 = vmax.f32 %v24270_v25, %v1851_v41  ;;  %v13691_v19 = vpop.f32.mrb[158].mxu0  ;;  %14095 = vmatmul.mubr.msk.bf16.gmra.mrb[0].mxu1 %vm700_vm0, %v18287_v27  ;;  %v24278_v25 = vld [vmem:[#allocation104_spill] sm:$0xff] }
 0x22f   : > { %24266 = vst [vmem:[#allocation96_spill] sm:$0xff] %v18270_v55  ;;  %v18284_v0 = vmax.f32 %v24275_v39, %v13691_v19  ;;  %v1854_v14 = vpop.f32.mrb[159].mxu0  ;;  %v24280_v43 = vmax.f32 %v24278_v25, %v24279_v51  ;;  %14098 = vmatprep.mubr.msk.bf16.mxu1 %vm700_vm0, %v18299_v11  ;;  %v18311_v39 = vpop.f32.mrb[152].mxu1  ;;  %v24295_v55 = vld [vmem:[#allocation113_spill] sm:$0xff] }
 0x230   : > { %24271 = vst [vmem:[#allocation165_spill] sm:$0xff] %v18277_v16  ;;  %24283 = vst [vmem:[#allocation57_spill] sm:$0xff] %v18311_v39 }
 0x231   : > { %24276 = vst [vmem:[#allocation166_spill] sm:$0xff] %v18284_v0  ;;  %v18296_v41 = vmax.f32 %v24280_v43, %v1854_v14  ;;  %13881 = vmatmul.mubr.msk.bf16.gmra.mrb[8].mxu0 %vm700_vm0, %v17439_v26  ;;  %v18313_v14 = vpop.f32.mrb[153].mxu1  ;;  %v24286_v43 = vld [vmem:[#allocation109_spill] sm:$0xff]  ;;  %v24291_v0 = vld [vmem:[#allocation111_spill] sm:$0xff] }
 0x232   : > { %13968 = vmatprep.mubr.msk.bf16.mxu0 %vm700_vm0, %v17705_v24  ;;  %24284 = vst [vmem:[#allocation101_spill] sm:$0xff] %v18313_v14  ;;  %v18315_v51 = vpop.f32.mrb[154].mxu1  ;;  %v24288_v10 = vmax.f32 %v24286_v43, %v24287_v33  ;;  %v24293_v28 = vmax.f32 %v24291_v0, %v24292_v52  ;;  %v24296_v14 = vld [vmem:[#allocation68_spill] sm:$0xff]  ;;  %v24300_v0 = vld [vmem:[#allocation70_spill] sm:$0xff]  ;;  %v24307_v43 = vld [vmem:[#allocation73_spill] sm:$0xff] }
 0x233   : > { %24281 = vst [vmem:[#allocation99_spill] sm:$0xff] %v18296_v41  ;;  %24285 = vst [vmem:[#allocation58_spill] sm:$0xff] %v18315_v51  ;;  %v18322_v26 = vpop.f32.mrb[155].mxu1  ;;  %v24297_v51 = vmax.f32 %v24295_v55, %v24296_v14  ;;  %v24312_v55 = vld [vmem:[#allocation74_spill] sm:$0xff] }
 0x234   : > { %v13694_v25 = vpop.f32.mrb[160].mxu0  ;;  %24290 = vst [vmem:[#allocation60_spill] sm:$0xff] %v18322_v26  ;;  %v24589_v26 = vld [vmem:[#allocation181_spill] sm:$0xff] }
 0x235   : > { %v18320_v19 = vmax.f32 %v24288_v10, %v13694_v25  ;;  %v1867_v42 = vpop.f32.mrb[161].mxu0  ;;  %v24299_v25 = vld [vmem:[#allocation114_spill] sm:$0xff] }
 0x236   : > { %v18327_v41 = vmax.f32 %v24293_v28, %v1867_v42  ;;  %v13695_v16 = vpop.f32.mrb[162].mxu0  ;;  %14099 = vmatmul.mubr.msk.bf16.gmra.mrb[4].mxu1 %vm700_vm0, %v24096_v53  ;;  %v24301_v28 = vmax.f32 %v24299_v25, %v24300_v0  ;;  %v24311_v53 = vld [vmem:[#allocation121_spill] sm:$0xff] }
 0x237   : > { %24289 = vst [vmem:[#allocation103_spill] sm:$0xff] %v18320_v19  ;;  %v18334_v39 = vmax.f32 %v24297_v51, %v13695_v16  ;;  %v1870_v33 = vpop.f32.mrb[163].mxu0  ;;  %14102 = vmatprep.mubr.msk.bf16.mxu1 %vm700_vm0, %v24098_v20  ;;  %v18356_v16 = vpop.f32.mrb[156].mxu1  ;;  %v24306_v51 = vld [vmem:[#allocation119_spill] sm:$0xff] }
 0x238   : > { %24294 = vst [vmem:[#allocation104_spill] sm:$0xff] %v18327_v41  ;;  %v18343_v42 = vmax.f32 %v24301_v28, %v1870_v33  ;;  %24303 = vst [vmem:[#allocation65_spill] sm:$0xff] %v18356_v16  ;;  %v18358_v52 = vpop.f32.mrb[157].mxu1  ;;  %v24308_v33 = vmax.f32 %v24306_v51, %v24307_v43  ;;  %v18382_v43 = vld [vmem:[%s16446_s29 + $0xd8] sm:$0xff]   ;;  %v24337_v41 = vld [vmem:[#allocation133_spill] sm:$0xff] }
 0x239   : > { %24298 = vst [vmem:[#allocation62_spill] sm:$0xff] %v18334_v39  ;;  %13969 = vmatmul.mubr.msk.bf16.vlgmr.msra.gmra.mrb[12].mxu0 %vm700_vm0, %v17743_v21  ;;  %24304 = vst [vmem:[#allocation111_spill] sm:$0xff] %v18358_v52  ;;  %v18360_v14 = vpop.f32.mrb[158].mxu1  ;;  %v24339_v19 = vmax.f32 %v24337_v41, %v24338_v9  ;;  %v18457_v41 = vld [vmem:[%s16446_s29 + $0x28] sm:$0xff]   ;;  %v24351_v9 = vld [vmem:[#allocation139_spill] sm:$0xff] }
 0x23a   : > { %24302 = vst [vmem:[#allocation109_spill] sm:$0xff] %v18343_v42  ;;  %13972 = vmatprep.mubr.msk.bf16.mxu0 %vm700_vm0, %v17755_v50  ;;  %14131 = vmatpush3.bf16.msra.mxu0 %v18151_v3  ;;  %24305 = vst [vmem:[#allocation66_spill] sm:$0xff] %v18360_v14  ;;  %v18367_v28 = vpop.f32.mrb[159].mxu1  ;;  %v24313_v3 = vmax.f32 %v24311_v53, %v24312_v55  ;;  %v24315_v42 = vld [vmem:[#allocation123_spill] sm:$0xff]  ;;  %v24319_v53 = vld [vmem:[#allocation124_spill] sm:$0xff] }
 0x23b   : > { %24310 = vst [vmem:[#allocation68_spill] sm:$0xff] %v18367_v28  ;;  %v24317_v39 = vmax.f32 %v24315_v42, %v24316_v57  ;;  %v18408_v42 = vld [vmem:[%s16446_s29 + $0x20] sm:$0xff]   ;;  %24346 = vst [vmem:[#allocation133_spill] sm:$0xff] %v18457_v41 }
 0x23c   : > { %v13698_v20 = vpop.f32.mrb[164].mxu0  ;;  %24324 = vst [vmem:[#allocation121_spill] sm:$0xff] %v18408_v42  ;;  %v24328_v57 = vld [vmem:[#allocation129_spill] sm:$0xff]  ;;  %v24609_v28 = vld [vmem:[#allocation184_spill] sm:$0xff] }
 0x23d   : > { %v18365_v25 = vmax.f32 %v24308_v33, %v13698_v20  ;;  %v1883_v0 = vpop.f32.mrb[165].mxu0  ;;  %v24320_v33 = vld [vmem:[#allocation78_spill] sm:$0xff]  ;;  %v24329_v55 = vld [vmem:[#allocation81_spill] sm:$0xff] }
 0x23e   : > { %v18372_v10 = vmax.f32 %v24313_v3, %v1883_v0  ;;  %v13699_v2 = vpop.f32.mrb[166].mxu0  ;;  %14103 = vmatmul.mubr.msk.bf16.gmra.mrb[8].mxu1 %vm700_vm0, %v18382_v43  ;;  %v24321_v0 = vmax.f32 %v24319_v53, %v24320_v33  ;;  %v24330_v7 = vmax.f32 %v24328_v57, %v24329_v55  ;;  %v18438_v57 = vld [vmem:[%s16446_s29 + $0xe8] sm:$0xff]  }
 0x23f   : > { %24309 = vst [vmem:[#allocation113_spill] sm:$0xff] %v18365_v25  ;;  %v18379_v51 = vmax.f32 %v24317_v39, %v13699_v2  ;;  %v1886_v20 = vpop.f32.mrb[167].mxu0  ;;  %14106 = vmatprep.mubr.msk.bf16.mxu1 %vm700_vm0, %v18394_v6  ;;  %v18401_v2 = vld [vmem:[%s16446_s29 + $0x18] sm:$0xff]  }
 0x240   : > { %24314 = vst [vmem:[#allocation114_spill] sm:$0xff] %v18372_v10  ;;  %v18391_v3 = vmax.f32 %v24321_v0, %v1886_v20  ;;  %24323 = vst [vmem:[#allocation73_spill] sm:$0xff] %v18401_v2  ;;  %v18412_v20 = vpop.f32.mrb[160].mxu1 }
 0x241   : > { %24318 = vst [vmem:[#allocation70_spill] sm:$0xff] %v18379_v51  ;;  %13973 = vmatmul.mubr.msk.bf16.gmra.mrb[16].mxu0 %vm700_vm0, %v18401_v2  ;;  %24325 = vst [vmem:[#allocation74_spill] sm:$0xff] %v18412_v20  ;;  %v18414_v53 = vpop.f32.mrb[161].mxu1 }
 0x242   : > { %24322 = vst [vmem:[#allocation119_spill] sm:$0xff] %v18391_v3  ;;  %13976 = vmatprep.mubr.msk.bf16.mxu0 %vm700_vm0, %v18408_v42  ;;  %24326 = vst [vmem:[#allocation123_spill] sm:$0xff] %v18414_v53  ;;  %v18416_v0 = vpop.f32.mrb[162].mxu1  ;;  %v24333_v3 = vld [vmem:[#allocation131_spill] sm:$0xff] }
 0x243   : > { %24327 = vst [vmem:[#allocation76_spill] sm:$0xff] %v18416_v0  ;;  %v18423_v54 = vpop.f32.mrb[163].mxu1  ;;  %v24335_v10 = vmax.f32 %v24333_v3, %v24334_v37  ;;  %v24342_v3 = vld [vmem:[#allocation86_spill] sm:$0xff]  ;;  %v24352_v37 = vld [vmem:[#allocation89_spill] sm:$0xff]  ;;  %v18492_v0 = vld [vmem:[%s16446_s29 + $0xf8] sm:$0xff]  }
 0x244   : > { %v13702_v33 = vpop.f32.mrb[168].mxu0  ;;  %24332 = vst [vmem:[#allocation78_spill] sm:$0xff] %v18423_v54  ;;  %v24353_v62 = vmax.f32 %v24351_v9, %v24352_v37  ;;  %v24361_v54 = vld [vmem:[#allocation92_spill] sm:$0xff]  ;;  %v24365_v9 = vld [vmem:[#allocation94_spill] sm:$0xff] }
 0x245   : > { %v18421_v51 = vmax.f32 %v24330_v7, %v13702_v33  ;;  %v1899_v39 = vpop.f32.mrb[169].mxu0  ;;  %v24364_v37 = vld [vmem:[#allocation144_spill] sm:$0xff] }
 0x246   : > { %v18428_v18 = vmax.f32 %v24335_v10, %v1899_v39  ;;  %v13703_v25 = vpop.f32.mrb[170].mxu0  ;;  %14107 = vmatmul.mubr.msk.bf16.gmra.mrb[12].mxu1 %vm700_vm0, %v18438_v57  ;;  %v24341_v10 = vld [vmem:[#allocation134_spill] sm:$0xff] }
 0x247   : > { %24331 = vst [vmem:[#allocation124_spill] sm:$0xff] %v18421_v51  ;;  %v18435_v55 = vmax.f32 %v24339_v19, %v13703_v25  ;;  %v1902_v7 = vpop.f32.mrb[171].mxu0  ;;  %v24343_v39 = vmax.f32 %v24341_v10, %v24342_v3  ;;  %14110 = vmatprep.mubr.msk.bf16.mxu1 %vm700_vm0, %v18450_v38  ;;  %v18464_v25 = vld [vmem:[%s16446_s29 + $0x30] sm:$0xff]  }
 0x248   : > { %24336 = vst [vmem:[#allocation129_spill] sm:$0xff] %v18428_v18  ;;  %24347 = vst [vmem:[#allocation84_spill] sm:$0xff] %v18464_v25 }
 0x249   : > { %24340 = vst [vmem:[#allocation81_spill] sm:$0xff] %v18435_v55  ;;  %v18447_v33 = vmax.f32 %v24343_v39, %v1902_v7  ;;  %13977 = vmatmul.mubr.msk.bf16.gmra.mrb[20].mxu0 %vm700_vm0, %v18457_v41  ;;  %v18468_v7 = vpop.f32.mrb[164].mxu1 }
 0x24a   : > { %13980 = vmatprep.mubr.msk.bf16.mxu0 %vm700_vm0, %v18464_v25  ;;  %24348 = vst [vmem:[#allocation134_spill] sm:$0xff] %v18468_v7  ;;  %v18470_v10 = vpop.f32.mrb[165].mxu1  ;;  %v24360_v7 = vld [vmem:[#allocation143_spill] sm:$0xff] }
 0x24b   : > { %24344 = vst [vmem:[#allocation131_spill] sm:$0xff] %v18447_v33  ;;  %24349 = vst [vmem:[#allocation86_spill] sm:$0xff] %v18470_v10  ;;  %v18472_v39 = vpop.f32.mrb[166].mxu1  ;;  %v24357_v33 = vld [vmem:[#allocation90_spill] sm:$0xff]  ;;  %v24362_v10 = vmax.f32 %v24360_v7, %v24361_v54  ;;  %v24380_v7 = vld [vmem:[#allocation153_spill] sm:$0xff] }
 0x24c   : > { %v13706_v3 = vpop.f32.mrb[172].mxu0  ;;  %24350 = vst [vmem:[#allocation225_spill] sm:$0xff] %v18472_v39  ;;  %v18479_v19 = vpop.f32.mrb[167].mxu1  ;;  %v24358_v18 = vmax.f32 %v24356_v60, %v24357_v33  ;;  %v24366_v60 = vmax.f32 %v24364_v37, %v24365_v9  ;;  %v24371_v37 = vld [vmem:[#allocation149_spill] sm:$0xff] }
 0x24d   : > { %v18477_v55 = vmax.f32 %v24353_v62, %v13706_v3  ;;  %v1915_v44 = vpop.f32.mrb[173].mxu0  ;;  %24355 = vst [vmem:[#allocation89_spill] sm:$0xff] %v18479_v19  ;;  %v18516_v33 = vpop.f32.mrb[168].mxu1  ;;  %v24372_v9 = vld [vmem:[#allocation97_spill] sm:$0xff]  ;;  %v24655_v19 = vld [vmem:[#allocation187_spill] sm:$0xff] }
 0x24e   : > { %v18484_v45 = vmax.f32 %v24358_v18, %v1915_v44  ;;  %v13707_v51 = vpop.f32.mrb[174].mxu0  ;;  %14111 = vmatmul.mubr.msk.bf16.gmra.mrb[16].mxu1 %vm700_vm0, %v18492_v0  ;;  %v18504_v44 = vld [vmem:[%s16446_s29 + $0x100] sm:$0xff]   ;;  %24368 = vst [vmem:[#allocation92_spill] sm:$0xff] %v18516_v33 }
 0x24f   : > { %24354 = vst [vmem:[#allocation139_spill] sm:$0xff] %v18477_v55  ;;  %v18489_v38 = vmax.f32 %v24362_v10, %v13707_v51  ;;  %v1918_v39 = vpop.f32.mrb[175].mxu0  ;;  %14114 = vmatprep.mubr.msk.bf16.mxu1 %vm700_vm0, %v18504_v44  ;;  %v18520_v10 = vpop.f32.mrb[169].mxu1 }
 0x250   : > { %24359 = vst [vmem:[#allocation141_spill] sm:$0xff] %v18484_v45  ;;  %v18501_v18 = vmax.f32 %v24366_v60, %v1918_v39  ;;  %24369 = vst [vmem:[#allocation144_spill] sm:$0xff] %v18520_v10  ;;  %v18522_v39 = vpop.f32.mrb[170].mxu1  ;;  %v24373_v60 = vmax.f32 %v24371_v37, %v24372_v9  ;;  %v18542_v10 = vld [vmem:[%s16446_s29 + $0x108] sm:$0xff]  }
 0x251   : > { %24363 = vst [vmem:[#allocation90_spill] sm:$0xff] %v18489_v38  ;;  %13981 = vmatmul.mubr.msk.bf16.gmra.mrb[24].mxu0 %vm700_vm0, %v17881_v35  ;;  %24370 = vst [vmem:[#allocation94_spill] sm:$0xff] %v18522_v39  ;;  %v18529_v62 = vpop.f32.mrb[171].mxu1  ;;  %v24377_v38 = vld [vmem:[#allocation98_spill] sm:$0xff] }
 0x252   : > { %24367 = vst [vmem:[#allocation143_spill] sm:$0xff] %v18501_v18  ;;  %13984 = vmatprep.mubr.msk.bf16.mxu0 %vm700_vm0, %v17893_v29  ;;  %24375 = vst [vmem:[#allocation97_spill] sm:$0xff] %v18529_v62  ;;  %v24378_v22 = vmax.f32 %v24376_v1, %v24377_v38  ;;  %v24382_v18 = vmax.f32 %v24380_v7, %v24381_v5  ;;  %v24384_v37 = vld [vmem:[#allocation154_spill] sm:$0xff]  ;;  %v24677_v62 = vld [vmem:[#allocation191_spill] sm:$0xff] }
 0x253   : > { %v24385_v9 = vld [vmem:[#allocation102_spill] sm:$0xff] }
 0x254   : > { %v13710_v3 = vpop.f32.mrb[176].mxu0  ;;  %v24386_v38 = vmax.f32 %v24384_v37, %v24385_v9  ;;  %v18554_v1 = vld [vmem:[%s16446_s29 + $0x110] sm:$0xff]  }
 0x255   : > { %v18527_v54 = vmax.f32 %v24373_v60, %v13710_v3  ;;  %v1931_v51 = vpop.f32.mrb[177].mxu0  ;;  %v24391_v37 = vld [vmem:[#allocation159_spill] sm:$0xff] }
 0x256   : > { %v18534_v45 = vmax.f32 %v24378_v22, %v1931_v51  ;;  %v13711_v49 = vpop.f32.mrb[178].mxu0  ;;  %14115 = vmatmul.mubr.msk.bf16.gmra.mrb[20].mxu1 %vm700_vm0, %v18542_v10  ;;  %v24392_v9 = vld [vmem:[#allocation107_spill] sm:$0xff] }
 0x257   : > { %24374 = vst [vmem:[#allocation149_spill] sm:$0xff] %v18527_v54  ;;  %v18539_v55 = vmax.f32 %v24382_v18, %v13711_v49  ;;  %v1934_v39 = vpop.f32.mrb[179].mxu0  ;;  %14118 = vmatprep.mubr.msk.bf16.mxu1 %vm700_vm0, %v18554_v1  ;;  %v18566_v18 = vpop.f32.mrb[172].mxu1  ;;  %v24400_v51 = vld [vmem:[#allocation163_spill] sm:$0xff] }
 0x258   : > { %24379 = vst [vmem:[#allocation151_spill] sm:$0xff] %v18534_v45  ;;  %v18551_v22 = vmax.f32 %v24386_v38, %v1934_v39  ;;  %24388 = vst [vmem:[#allocation100_spill] sm:$0xff] %v18566_v18  ;;  %v18570_v7 = vpop.f32.mrb[173].mxu1  ;;  %v24393_v38 = vmax.f32 %v24391_v37, %v24392_v9  ;;  %v24404_v37 = vld [vmem:[#allocation164_spill] sm:$0xff] }
 0x259   : > { %24383 = vst [vmem:[#allocation98_spill] sm:$0xff] %v18539_v55  ;;  %13985 = vmatmul.mubr.msk.bf16.gmra.mrb[28].mxu0 %vm700_vm0, %v17931_v36  ;;  %24389 = vst [vmem:[#allocation154_spill] sm:$0xff] %v18570_v7  ;;  %v18572_v60 = vpop.f32.mrb[174].mxu1  ;;  %v24397_v55 = vld [vmem:[#allocation108_spill] sm:$0xff] }
 0x25a   : > { %24387 = vst [vmem:[#allocation153_spill] sm:$0xff] %v18551_v22  ;;  %13988 = vmatprep.mubr.msk.bf16.mxu0 %vm700_vm0, %v17943_v46  ;;  %24390 = vst [vmem:[#allocation102_spill] sm:$0xff] %v18572_v60  ;;  %v18579_v3 = vpop.f32.mrb[175].mxu1  ;;  %v24398_v48 = vmax.f32 %v24396_v58, %v24397_v55  ;;  %v24402_v22 = vmax.f32 %v24400_v51, %v24401_v12  ;;  %v18592_v7 = vld [vmem:[%s16446_s29 + $0x118] sm:$0xff]   ;;  %v18604_v55 = vld [vmem:[%s16446_s29 + $0x120] sm:$0xff]  }
 0x25b   : > { %24395 = vst [vmem:[#allocation107_spill] sm:$0xff] %v18579_v3  ;;  %v24405_v9 = vld [vmem:[#allocation112_spill] sm:$0xff]  ;;  %v24699_v3 = vld [vmem:[#allocation195_spill] sm:$0xff] }
 0x25c   : > { %v13714_v39 = vpop.f32.mrb[180].mxu0  ;;  %v24406_v58 = vmax.f32 %v24404_v37, %v24405_v9  ;;  %v24411_v37 = vld [vmem:[#allocation169_spill] sm:$0xff] }
 0x25d   : > { %v18577_v49 = vmax.f32 %v24393_v38, %v13714_v39  ;;  %v1947_v5 = vpop.f32.mrb[181].mxu0  ;;  %v24412_v9 = vld [vmem:[#allocation117_spill] sm:$0xff] }
 0x25e   : > { %v18584_v45 = vmax.f32 %v24398_v48, %v1947_v5  ;;  %v13715_v23 = vpop.f32.mrb[182].mxu0  ;;  %14119 = vmatmul.mubr.msk.bf16.gmra.mrb[24].mxu1 %vm700_vm0, %v18592_v7 }
 0x25f   : > { %24394 = vst [vmem:[#allocation159_spill] sm:$0xff] %v18577_v49  ;;  %v18589_v54 = vmax.f32 %v24402_v22, %v13715_v23  ;;  %v1950_v60 = vpop.f32.mrb[183].mxu0  ;;  %14122 = vmatprep.mubr.msk.bf16.mxu1 %vm700_vm0, %v18604_v55  ;;  %v18616_v22 = vpop.f32.mrb[176].mxu1 }
 0x260   : > { %24399 = vst [vmem:[#allocation161_spill] sm:$0xff] %v18584_v45  ;;  %v18601_v48 = vmax.f32 %v24406_v58, %v1950_v60  ;;  %24408 = vst [vmem:[#allocation110_spill] sm:$0xff] %v18616_v22  ;;  %v18620_v51 = vpop.f32.mrb[177].mxu1  ;;  %v24413_v58 = vmax.f32 %v24411_v37, %v24412_v9  ;;  %v24424_v37 = vld [vmem:[#allocation174_spill] sm:$0xff] }
 0x261   : > { %24403 = vst [vmem:[#allocation108_spill] sm:$0xff] %v18589_v54  ;;  %13989 = vmatmul.mubr.msk.bf16.gmra.mrb[32].mxu0 %vm700_vm0, %v17981_v15  ;;  %24409 = vst [vmem:[#allocation164_spill] sm:$0xff] %v18620_v51  ;;  %v18622_v38 = vpop.f32.mrb[178].mxu1  ;;  %v24417_v54 = vld [vmem:[#allocation118_spill] sm:$0xff] }
 0x262   : > { %24407 = vst [vmem:[#allocation163_spill] sm:$0xff] %v18601_v48  ;;  %13992 = vmatprep.mubr.msk.bf16.mxu0 %vm700_vm0, %v17993_v63  ;;  %24410 = vst [vmem:[#allocation112_spill] sm:$0xff] %v18622_v38  ;;  %v18629_v39 = vpop.f32.mrb[179].mxu1  ;;  %v24418_v40 = vmax.f32 %v24416_v61, %v24417_v54  ;;  %v24421_v48 = vld [vmem:[#allocation120_spill] sm:$0xff]  ;;  %v18642_v51 = vld [vmem:[%s16446_s29 + $0x128] sm:$0xff]  }
 0x263   : > { %24415 = vst [vmem:[#allocation117_spill] sm:$0xff] %v18629_v39  ;;  %v24422_v31 = vmax.f32 %v24420_v13, %v24421_v48  ;;  %v24425_v9 = vld [vmem:[#allocation122_spill] sm:$0xff] }
 0x264   : > { %v13718_v60 = vpop.f32.mrb[184].mxu0  ;;  %v24426_v61 = vmax.f32 %v24424_v37, %v24425_v9  ;;  %v18654_v54 = vld [vmem:[%s16446_s29 + $0x130] sm:$0xff]   ;;  %v24431_v9 = vmax.f32 %v17679_v34, %v23994_v59 }
 0x265   : > { %v18627_v12 = vmax.f32 %v24413_v58, %v13718_v60  ;;  %v1963_v23 = vpop.f32.mrb[185].mxu0  ;;  %v24434_v60 = vld [vmem:[#allocation128_spill] sm:$0xff]  ;;  %v24720_v39 = vld [vmem:[#allocation166_spill] sm:$0xff] }
 0x266   : > { %v18634_v45 = vmax.f32 %v24418_v40, %v1963_v23  ;;  %v13719_v5 = vpop.f32.mrb[186].mxu0  ;;  %14123 = vmatmul.mubr.msk.bf16.gmra.mrb[28].mxu1 %vm700_vm0, %v18642_v51  ;;  %v18669_v23 = vpop.f32.mrb[180].mxu1  ;;  %v24435_v56 = vmax.f32 %v17686_v47, %v24434_v60  ;;  %v24448_v60 = vld [vmem:[#allocation67_spill] sm:$0xff] }
 0x267   : > { %24414 = vst [vmem:[#allocation169_spill] sm:$0xff] %v18627_v12  ;;  %v18639_v49 = vmax.f32 %v24422_v31, %v13719_v5  ;;  %v1966_v38 = vpop.f32.mrb[187].mxu0  ;;  %14126 = vmatprep.mubr.msk.bf16.mxu1 %vm700_vm0, %v18654_v54  ;;  %v18661_v31 = vld [vmem:[%s16446_s29 + $0x68] sm:$0xff]   ;;  %24428 = vst [vmem:[#allocation120_spill] sm:$0xff] %v18669_v23  ;;  %v24437_v5 = vld [vmem:[#allocation127_spill] sm:$0xff] }
 0x268   : > { %24419 = vst [vmem:[#allocation171_spill] sm:$0xff] %v18634_v45  ;;  %v18651_v40 = vmax.f32 %v24426_v61, %v1966_v38  ;;  %v18673_v38 = vpop.f32.mrb[181].mxu1  ;;  %v18695_v12 = vld [vmem:[%s16446_s29 + $0x138] sm:$0xff]  }
 0x269   : > { %24423 = vst [vmem:[#allocation118_spill] sm:$0xff] %v18639_v49  ;;  %13993 = vmatmul.mubr.msk.bf16.gmra.mrb[36].mxu0 %vm700_vm0, %v18661_v31  ;;  %24429 = vst [vmem:[#allocation174_spill] sm:$0xff] %v18673_v38  ;;  %v18675_v37 = vpop.f32.mrb[182].mxu1 }
 0x26a   : > { %24427 = vst [vmem:[#allocation173_spill] sm:$0xff] %v18651_v40  ;;  %13996 = vmatprep.mubr.msk.bf16.mxu0 %vm700_vm0, %v18040_v30  ;;  %24430 = vst [vmem:[#allocation122_spill] sm:$0xff] %v18675_v37  ;;  %v18682_v48 = vpop.f32.mrb[183].mxu1  ;;  %v24439_v40 = vmax.f32 %v24437_v5, %v24438_v32  ;;  %v24450_v5 = vld [vmem:[#allocation69_spill] sm:$0xff] }
 0x26b   : > { %24433 = vst [vmem:[#allocation227_spill] sm:$0xff] %v18682_v48  ;;  %24441 = vst [vmem:[#allocation130_spill] sm:$0xff] %v18695_v12  ;;  %v18716_v59 = vpop.f32.mrb[184].mxu1  ;;  %v24456_v32 = vld [vmem:[#allocation137_spill] sm:$0xff] }
 0x26c   : > { %v13806_v58 = vpop.f32.mrb[188].mxu0 }
 0x26d   : > { %v18680_v61 = vmax.f32 %v24431_v9, %v13806_v58  ;;  %v2543_v13 = vpop.f32.mrb[189].mxu0  ;;  %v24443_v58 = vld [vmem:[#allocation201_spill] sm:$0xff]  ;;  %v24444_v9 = vld [vmem:[#allocation132_spill] sm:$0xff] }
 0x26e   : > { %v18687_v49 = vmax.f32 %v24435_v56, %v2543_v13  ;;  %v13807_v17 = vpop.f32.mrb[190].mxu0  ;;  %14127 = vmatmul.mubr.msk.bf16.gmra.mrb[32].mxu1 %vm700_vm0, %v18695_v12  ;;  %v24445_v47 = vmax.f32 %v24443_v58, %v24444_v9  ;;  %24451 = vst [vmem:[#allocation132_spill] sm:$0xff] %v18716_v59  ;;  %v18720_v9 = vpop.f32.mrb[185].mxu1  ;;  %v24465_v58 = vld [vmem:[#allocation140_spill] sm:$0xff] }
 0x26f   : > { %24432 = vst [vmem:[#allocation226_spill] sm:$0xff] %v18680_v61  ;;  %v18692_v45 = vmax.f32 %v24439_v40, %v13807_v17  ;;  %v2546_v4 = vpop.f32.mrb[191].mxu0  ;;  %14214 = vmatprep.mubr.msk.bf16.mxu1 %vm700_vm0, %v17705_v24  ;;  %24453 = vst [vmem:[#allocation67_spill] sm:$0xff] %v18720_v9  ;;  %v24455_v17 = vld [vmem:[#allocation205_spill] sm:$0xff]  ;;  %v24460_v40 = vld [vmem:[#allocation207_spill] sm:$0xff] }
 0x270   : > { %24436 = vst [vmem:[#allocation128_spill] sm:$0xff] %v18687_v49  ;;  %v18704_v56 = vmax.f32 %v24445_v47, %v2546_v4  ;;  %v18722_v47 = vpop.f32.mrb[186].mxu1  ;;  %v24457_v49 = vmax.f32 %v24455_v17, %v24456_v32  ;;  %v24464_v4 = vld [vmem:[#allocation208_spill] sm:$0xff]  ;;  %v24469_v17 = vld [vmem:[#allocation209_spill] sm:$0xff] }
 0x271   : > { %24440 = vst [vmem:[#allocation127_spill] sm:$0xff] %v18692_v45  ;;  %13997 = vmatmul.mubr.msk.bf16.gmra.mrb[40].mxu0 %vm700_vm0, %v24448_v60  ;;  %24454 = vst [vmem:[#allocation69_spill] sm:$0xff] %v18722_v47  ;;  %v18729_v13 = vpop.f32.mrb[187].mxu1  ;;  %v24461_v45 = vld [vmem:[#allocation138_spill] sm:$0xff] }
 0x272   : > { %24446 = vst [vmem:[#allocation201_spill] sm:$0xff] %v18704_v56  ;;  %14000 = vmatprep.mubr.msk.bf16.mxu0 %vm700_vm0, %v24450_v5  ;;  %24459 = vst [vmem:[#allocation137_spill] sm:$0xff] %v18729_v13  ;;  %v24462_v48 = vmax.f32 %v24460_v40, %v24461_v45  ;;  %v24466_v56 = vmax.f32 %v24464_v4, %v24465_v58  ;;  %v18760_v40 = vpop.f32.mrb[188].mxu1  ;;  %v24491_v58 = vld [vmem:[#allocation150_spill] sm:$0xff] }
 0x273   : > { %24477 = vst [vmem:[#allocation140_spill] sm:$0xff] %v18760_v40  ;;  %v18764_v4 = vpop.f32.mrb[189].mxu1 }
 0x274   : > { %v13810_v24 = vpop.f32.mrb[192].mxu0  ;;  %24479 = vst [vmem:[#allocation209_spill] sm:$0xff] %v18764_v4 }
 0x275   : > { %v18727_v34 = vmax.f32 %v24457_v49, %v13810_v24  ;;  %v2559_v61 = vpop.f32.mrb[193].mxu0  ;;  %v24470_v24 = vld [vmem:[#allocation142_spill] sm:$0xff] }
 0x276   : > { %v18734_v59 = vmax.f32 %v24462_v48, %v2559_v61  ;;  %v13811_v37 = vpop.f32.mrb[194].mxu0  ;;  %14215 = vmatmul.mubr.msk.bf16.vlgmr.msra.gmra.mrb[36].mxu1 %vm700_vm0, %v17743_v21  ;;  %v24471_v13 = vmax.f32 %v24469_v17, %v24470_v24  ;;  %v24481_v17 = vld [vmem:[#allocation212_spill] sm:$0xff]  ;;  %v24482_v24 = vld [vmem:[#allocation147_spill] sm:$0xff]  ;;  %v24486_v61 = vld [vmem:[#allocation214_spill] sm:$0xff] }
 0x277   : > { %24458 = vst [vmem:[#allocation205_spill] sm:$0xff] %v18727_v34  ;;  %v18739_v9 = vmax.f32 %v24466_v56, %v13811_v37  ;;  %v2562_v47 = vpop.f32.mrb[195].mxu0  ;;  %14218 = vmatprep.mubr.msk.bf16.mxu1 %vm700_vm0, %v17755_v50  ;;  %v24474_v37 = vld [vmem:[#allocation75_spill] sm:$0xff]  ;;  %v24476_v56 = vld [vmem:[#allocation77_spill] sm:$0xff]  ;;  %v24483_v48 = vmax.f32 %v24481_v17, %v24482_v24  ;;  %v24495_v17 = vld [vmem:[#allocation216_spill] sm:$0xff] }
 0x278   : > { %24463 = vst [vmem:[#allocation207_spill] sm:$0xff] %v18734_v59  ;;  %v18748_v12 = vmax.f32 %v24471_v13, %v2562_v47  ;;  %v18766_v47 = vpop.f32.mrb[190].mxu1  ;;  %v24490_v13 = vld [vmem:[#allocation215_spill] sm:$0xff]  ;;  %v24496_v24 = vld [vmem:[#allocation152_spill] sm:$0xff] }
 0x279   : > { %24467 = vst [vmem:[#allocation138_spill] sm:$0xff] %v18739_v9  ;;  %14001 = vmatmul.mubr.msk.bf16.gmra.mrb[44].mxu0 %vm700_vm0, %v24474_v37  ;;  %24480 = vst [vmem:[#allocation142_spill] sm:$0xff] %v18766_v47  ;;  %v18773_v21 = vpop.f32.mrb[191].mxu1  ;;  %v24487_v9 = vld [vmem:[#allocation148_spill] sm:$0xff] }
 0x27a   : > { %24472 = vst [vmem:[#allocation208_spill] sm:$0xff] %v18748_v12  ;;  %14004 = vmatprep.mubr.msk.bf16.mxu0 %vm700_vm0, %v24476_v56  ;;  %24485 = vst [vmem:[#allocation77_spill] sm:$0xff] %v18773_v21  ;;  %v24488_v59 = vmax.f32 %v24486_v61, %v24487_v9  ;;  %v24492_v12 = vmax.f32 %v24490_v13, %v24491_v58  ;;  %v24497_v21 = vmax.f32 %v24495_v17, %v24496_v24  ;;  %v24502_v61 = vld [vmem:[#allocation85_spill] sm:$0xff]  ;;  %v18804_v58 = vpop.f32.mrb[192].mxu1  ;;  %v24507_v9 = vld [vmem:[#allocation220_spill] sm:$0xff] }
 0x27b   : > { %24503 = vst [vmem:[#allocation148_spill] sm:$0xff] %v18804_v58  ;;  %v24517_v13 = vld [vmem:[#allocation160_spill] sm:$0xff] }
 0x27c   : > { %v13814_v50 = vpop.f32.mrb[196].mxu0 }
 0x27d   : > { %v18771_v32 = vmax.f32 %v24483_v48, %v13814_v50  ;;  %v2575_v45 = vpop.f32.mrb[197].mxu0  ;;  %v24508_v50 = vld [vmem:[#allocation157_spill] sm:$0xff] }
 0x27e   : > { %v18778_v49 = vmax.f32 %v24488_v59, %v2575_v45  ;;  %v13815_v34 = vpop.f32.mrb[198].mxu0  ;;  %14219 = vmatmul.mubr.msk.bf16.gmra.mrb[40].mxu1 %vm700_vm0, %v18401_v2  ;;  %v24509_v59 = vmax.f32 %v24507_v9, %v24508_v50  ;;  %v24521_v9 = vld [vmem:[#allocation5_spill] sm:$0xff] }
 0x27f   : > { %24484 = vst [vmem:[#allocation75_spill] sm:$0xff] %v18771_v32  ;;  %v18783_v4 = vmax.f32 %v24492_v12, %v13815_v34  ;;  %v2578_v47 = vpop.f32.mrb[199].mxu0  ;;  %14222 = vmatprep.mubr.msk.bf16.mxu1 %vm700_vm0, %v18408_v42  ;;  %v24500_v12 = vld [vmem:[#allocation83_spill] sm:$0xff]  ;;  %v24512_v34 = vld [vmem:[#allocation222_spill] sm:$0xff] }
 0x280   : > { %24489 = vst [vmem:[#allocation212_spill] sm:$0xff] %v18778_v49  ;;  %v18792_v40 = vmax.f32 %v24497_v21, %v2578_v47  ;;  %v18808_v47 = vpop.f32.mrb[193].mxu1  ;;  %v24516_v21 = vld [vmem:[#allocation28_spill] sm:$0xff] }
 0x281   : > { %24493 = vst [vmem:[#allocation147_spill] sm:$0xff] %v18783_v4  ;;  %14005 = vmatmul.mubr.msk.bf16.gmra.mrb[48].mxu0 %vm700_vm0, %v24500_v12  ;;  %24505 = vst [vmem:[#allocation215_spill] sm:$0xff] %v18808_v47  ;;  %v18810_v24 = vpop.f32.mrb[194].mxu1  ;;  %v24513_v4 = vld [vmem:[#allocation158_spill] sm:$0xff] }
 0x282   : > { %24498 = vst [vmem:[#allocation214_spill] sm:$0xff] %v18792_v40  ;;  %14008 = vmatprep.mubr.msk.bf16.mxu0 %vm700_vm0, %v24502_v61  ;;  %24506 = vst [vmem:[#allocation150_spill] sm:$0xff] %v18810_v24  ;;  %v18817_v45 = vpop.f32.mrb[195].mxu1  ;;  %v24514_v32 = vmax.f32 %v24512_v34, %v24513_v4  ;;  %v24518_v40 = vmax.f32 %v24516_v21, %v24517_v13  ;;  %v24528_v34 = vld [vmem:[#allocation93_spill] sm:$0xff]  ;;  %v24543_v21 = vld [vmem:[#allocation170_spill] sm:$0xff] }
 0x283   : > { %24511 = vst [vmem:[#allocation152_spill] sm:$0xff] %v18817_v45  ;;  %v18848_v13 = vpop.f32.mrb[196].mxu1  ;;  %v24533_v4 = vld [vmem:[#allocation9_spill] sm:$0xff] }
 0x284   : > { %v13818_v17 = vpop.f32.mrb[200].mxu0  ;;  %24529 = vst [vmem:[#allocation157_spill] sm:$0xff] %v18848_v13 }
 0x285   : > { %v18815_v49 = vmax.f32 %v24509_v59, %v13818_v17  ;;  %v2591_v48 = vpop.f32.mrb[201].mxu0  ;;  %v24522_v17 = vld [vmem:[#allocation162_spill] sm:$0xff]  ;;  %v24534_v59 = vld [vmem:[#allocation167_spill] sm:$0xff] }
 0x286   : > { %v18822_v58 = vmax.f32 %v24514_v32, %v2591_v48  ;;  %v13819_v42 = vpop.f32.mrb[202].mxu0  ;;  %14223 = vmatmul.mubr.msk.bf16.gmra.mrb[44].mxu1 %vm700_vm0, %v18457_v41  ;;  %v24523_v45 = vmax.f32 %v24521_v9, %v24522_v17  ;;  %v24535_v32 = vmax.f32 %v24533_v4, %v24534_v59  ;;  %v24547_v4 = vld [vmem:[#allocation36_spill] sm:$0xff] }
 0x287   : > { %24510 = vst [vmem:[#allocation216_spill] sm:$0xff] %v18815_v49  ;;  %v18827_v47 = vmax.f32 %v24518_v40, %v13819_v42  ;;  %v2594_v24 = vpop.f32.mrb[203].mxu0  ;;  %14226 = vmatprep.mubr.msk.bf16.mxu1 %vm700_vm0, %v18464_v25  ;;  %v24526_v42 = vld [vmem:[#allocation91_spill] sm:$0xff]  ;;  %v24538_v40 = vld [vmem:[#allocation34_spill] sm:$0xff] }
 0x288   : > { %24515 = vst [vmem:[#allocation83_spill] sm:$0xff] %v18822_v58  ;;  %v18836_v2 = vmax.f32 %v24523_v45, %v2594_v24  ;;  %v18852_v24 = vpop.f32.mrb[197].mxu1  ;;  %v24542_v45 = vld [vmem:[#allocation38_spill] sm:$0xff] }
 0x289   : > { %24519 = vst [vmem:[#allocation85_spill] sm:$0xff] %v18827_v47  ;;  %14009 = vmatmul.mubr.msk.bf16.gmra.mrb[52].mxu0 %vm700_vm0, %v24526_v42  ;;  %24531 = vst [vmem:[#allocation222_spill] sm:$0xff] %v18852_v24  ;;  %v18854_v17 = vpop.f32.mrb[198].mxu1  ;;  %v24539_v47 = vld [vmem:[#allocation168_spill] sm:$0xff] }
 0x28a   : > { %24524 = vst [vmem:[#allocation220_spill] sm:$0xff] %v18836_v2  ;;  %14012 = vmatprep.mubr.msk.bf16.mxu0 %vm700_vm0, %v24528_v34  ;;  %24532 = vst [vmem:[#allocation158_spill] sm:$0xff] %v18854_v17  ;;  %v18861_v48 = vpop.f32.mrb[199].mxu1  ;;  %v24540_v49 = vmax.f32 %v24538_v40, %v24539_v47  ;;  %v24544_v2 = vmax.f32 %v24542_v45, %v24543_v21  ;;  %v24556_v21 = vld [vmem:[#allocation14_spill] sm:$0xff]  ;;  %v24557_v45 = vld [vmem:[#allocation175_spill] sm:$0xff] }
 0x28b   : > { %24537 = vst [vmem:[#allocation160_spill] sm:$0xff] %v18861_v48  ;;  %v24561_v47 = vld [vmem:[#allocation44_spill] sm:$0xff] }
 0x28c   : > { %v13822_v9 = vpop.f32.mrb[204].mxu0 }
 0x28d   : > { %v18859_v58 = vmax.f32 %v24535_v32, %v13822_v9  ;;  %v2607_v50 = vpop.f32.mrb[205].mxu0  ;;  %v24548_v9 = vld [vmem:[#allocation172_spill] sm:$0xff] }
 0x28e   : > { %v18866_v13 = vmax.f32 %v24540_v49, %v2607_v50  ;;  %v13823_v25 = vpop.f32.mrb[206].mxu0  ;;  %14227 = vmatmul.mubr.msk.bf16.gmra.mrb[48].mxu1 %vm700_vm0, %v17881_v35  ;;  %v24549_v48 = vmax.f32 %v24547_v4, %v24548_v9  ;;  %v24562_v32 = vld [vmem:[#allocation176_spill] sm:$0xff] }
 0x28f   : > { %24536 = vst [vmem:[#allocation28_spill] sm:$0xff] %v18859_v58  ;;  %v18871_v24 = vmax.f32 %v24544_v2, %v13823_v25  ;;  %v2610_v17 = vpop.f32.mrb[207].mxu0  ;;  %14230 = vmatprep.mubr.msk.bf16.mxu1 %vm700_vm0, %v17893_v29  ;;  %v18892_v25 = vpop.f32.mrb[200].mxu1  ;;  %v24563_v2 = vmax.f32 %v24561_v47, %v24562_v32  ;;  %v18938_v47 = vld [vmem:[%s16446_s29 + $0xd0] sm:$0xff]  }
 0x290   : > { %24541 = vst [vmem:[#allocation5_spill] sm:$0xff] %v18866_v13  ;;  %v18880_v41 = vmax.f32 %v24549_v48, %v2610_v17  ;;  %24553 = vst [vmem:[#allocation93_spill] sm:$0xff] %v18892_v25  ;;  %v18896_v40 = vpop.f32.mrb[201].mxu1  ;;  %v24558_v17 = vmax.f32 %v24556_v21, %v24557_v45  ;;  %v24570_v45 = vld [vmem:[#allocation46_spill] sm:$0xff] }
 0x291   : > { %24545 = vst [vmem:[#allocation162_spill] sm:$0xff] %v18871_v24  ;;  %14013 = vmatmul.mubr.msk.bf16.gmra.mrb[56].mxu0 %vm700_vm0, %v18287_v27  ;;  %24554 = vst [vmem:[#allocation9_spill] sm:$0xff] %v18896_v40  ;;  %v18898_v48 = vpop.f32.mrb[202].mxu1 }
 0x292   : > { %24550 = vst [vmem:[#allocation91_spill] sm:$0xff] %v18880_v41  ;;  %14016 = vmatprep.mubr.msk.bf16.mxu0 %vm700_vm0, %v18299_v11  ;;  %24555 = vst [vmem:[#allocation167_spill] sm:$0xff] %v18898_v48  ;;  %v18905_v35 = vpop.f32.mrb[203].mxu1  ;;  %v24566_v41 = vld [vmem:[#allocation177_spill] sm:$0xff] }
 0x293   : > { %24560 = vst [vmem:[#allocation168_spill] sm:$0xff] %v18905_v35  ;;  %v24567_v49 = vmax.f32 %v24565_v8, %v24566_v41  ;;  %v18931_v41 = vld [vmem:[%s16446_s29 + $0xc8] sm:$0xff]  }
 0x294   : > { %v13826_v29 = vpop.f32.mrb[208].mxu0 }
 0x295   : > { %v18903_v4 = vmax.f32 %v24558_v17, %v13826_v29  ;;  %v2623_v9 = vpop.f32.mrb[209].mxu0  ;;  %v24571_v17 = vld [vmem:[#allocation178_spill] sm:$0xff] }
 0x296   : > { %v18910_v24 = vmax.f32 %v24563_v2, %v2623_v9  ;;  %v13827_v50 = vpop.f32.mrb[210].mxu0  ;;  %14231 = vmatmul.mubr.msk.bf16.gmra.mrb[52].mxu1 %vm700_vm0, %v17931_v36  ;;  %v24572_v58 = vmax.f32 %v24570_v45, %v24571_v17  ;;  %v24579_v9 = vld [vmem:[#allocation105_spill] sm:$0xff]  ;;  %v24580_v45 = vld [vmem:[#allocation179_spill] sm:$0xff]  ;;  %v24584_v36 = vld [vmem:[#allocation224_spill] sm:$0xff] }
 0x297   : > { %24559 = vst [vmem:[#allocation34_spill] sm:$0xff] %v18903_v4  ;;  %v18915_v13 = vmax.f32 %v24567_v49, %v13827_v50  ;;  %v2626_v59 = vpop.f32.mrb[211].mxu0  ;;  %14234 = vmatprep.mubr.msk.bf16.mxu1 %vm700_vm0, %v17943_v46  ;;  %v24581_v17 = vmax.f32 %v24579_v9, %v24580_v45  ;;  %v24588_v46 = vld [vmem:[#allocation54_spill] sm:$0xff]  ;;  %v24592_v9 = vld [vmem:[#allocation52_spill] sm:$0xff] }
 0x298   : > { %24564 = vst [vmem:[#allocation38_spill] sm:$0xff] %v18910_v24  ;;  %v18924_v35 = vmax.f32 %v24572_v58, %v2626_v59  ;;  %v18942_v58 = vpop.f32.mrb[204].mxu1  ;;  %v24593_v45 = vld [vmem:[#allocation182_spill] sm:$0xff] }
 0x299   : > { %24568 = vst [vmem:[#allocation170_spill] sm:$0xff] %v18915_v13  ;;  %14017 = vmatmul.mubr.msk.bf16.gmra.mrb[60].mxu0 %vm700_vm0, %v18931_v41  ;;  %24576 = vst [vmem:[#allocation172_spill] sm:$0xff] %v18942_v58  ;;  %v18946_v59 = vpop.f32.mrb[205].mxu1  ;;  %v24585_v13 = vld [vmem:[#allocation180_spill] sm:$0xff] }
 0x29a   : > { %24573 = vst [vmem:[#allocation36_spill] sm:$0xff] %v18924_v35  ;;  %14020 = vmatprep.mubr.msk.bf16.mxu0 %vm700_vm0, %v18938_v47  ;;  %24577 = vst [vmem:[#allocation14_spill] sm:$0xff] %v18946_v59  ;;  %v18948_v50 = vpop.f32.mrb[206].mxu1  ;;  %v24586_v32 = vmax.f32 %v24584_v36, %v24585_v13  ;;  %v24590_v35 = vmax.f32 %v24588_v46, %v24589_v26  ;;  %v24599_v36 = vld [vmem:[#allocation116_spill] sm:$0xff] }
 0x29b   : > { %24578 = vst [vmem:[#allocation175_spill] sm:$0xff] %v18948_v50  ;;  %v18955_v21 = vpop.f32.mrb[207].mxu1 }
 0x29c   : > { %v13830_v2 = vpop.f32.mrb[212].mxu0  ;;  %24583 = vst [vmem:[#allocation176_spill] sm:$0xff] %v18955_v21  ;;  %v18986_v13 = vpop.f32.mrb[208].mxu1 }
 0x29d   : > { %v18953_v8 = vmax.f32 %v24581_v17, %v13830_v2  ;;  %v2639_v49 = vpop.f32.mrb[213].mxu0  ;;  %v24594_v17 = vmax.f32 %v24592_v9, %v24593_v45  ;;  %24596 = vst [vmem:[#allocation178_spill] sm:$0xff] %v18986_v13 }
 0x29e   : > { %v18960_v24 = vmax.f32 %v24586_v32, %v2639_v49  ;;  %v13831_v29 = vpop.f32.mrb[214].mxu0  ;;  %14235 = vmatmul.mubr.msk.bf16.gmra.mrb[56].mxu1 %vm700_vm0, %v17981_v15  ;;  %v24600_v49 = vld [vmem:[#allocation15_spill] sm:$0xff] }
 0x29f   : > { %24582 = vst [vmem:[#allocation44_spill] sm:$0xff] %v18953_v8  ;;  %v18965_v4 = vmax.f32 %v24590_v35, %v13831_v29  ;;  %v2642_v50 = vpop.f32.mrb[215].mxu0  ;;  %14238 = vmatprep.mubr.msk.bf16.mxu1 %vm700_vm0, %v17993_v63  ;;  %v18990_v29 = vpop.f32.mrb[209].mxu1  ;;  %v24601_v46 = vmax.f32 %v24599_v36, %v24600_v49  ;;  %v24605_v15 = vld [vmem:[#allocation183_spill] sm:$0xff]  ;;  %v24608_v35 = vld [vmem:[#allocation61_spill] sm:$0xff]  ;;  %v24613_v49 = vld [vmem:[#allocation18_spill] sm:$0xff] }
 0x2a0   : > { %24587 = vst [vmem:[#allocation42_spill] sm:$0xff] %v18960_v24  ;;  %v18974_v21 = vmax.f32 %v24594_v17, %v2642_v50  ;;  %24597 = vst [vmem:[#allocation105_spill] sm:$0xff] %v18990_v29  ;;  %v18992_v32 = vpop.f32.mrb[210].mxu1  ;;  %v24604_v17 = vld [vmem:[#allocation16_spill] sm:$0xff]  ;;  %v24612_v36 = vld [vmem:[#allocation17_spill] sm:$0xff] }
 0x2a1   : > { %24591 = vst [vmem:[#allocation177_spill] sm:$0xff] %v18965_v4  ;;  %14021 = vmatmul.mubr.msk.bf16.gmra.mrb[64].mxu0 %vm700_vm0, %v18382_v43  ;;  %24598 = vst [vmem:[#allocation179_spill] sm:$0xff] %v18992_v32  ;;  %v18999_v45 = vpop.f32.mrb[211].mxu1  ;;  %v24606_v26 = vmax.f32 %v24604_v17, %v24605_v15 }
 0x2a2   : > { %24595 = vst [vmem:[#allocation46_spill] sm:$0xff] %v18974_v21  ;;  %14024 = vmatprep.mubr.msk.bf16.mxu0 %vm700_vm0, %v18394_v6  ;;  %24603 = vst [vmem:[#allocation180_spill] sm:$0xff] %v18999_v45  ;;  %v24610_v21 = vmax.f32 %v24608_v35, %v24609_v28  ;;  %v24632_v35 = vld [vmem:[#allocation23_spill] sm:$0xff]  ;;  %v24905_v45 = vld [vmem:[#allocation56_spill] sm:$0xff] }
 0x2a3   : > { %v19030_v15 = vpop.f32.mrb[212].mxu1 }
 0x2a4   : > { %v13834_v63 = vpop.f32.mrb[216].mxu0  ;;  %24618 = vst [vmem:[#allocation182_spill] sm:$0xff] %v19030_v15 }
 0x2a5   : > { %v18997_v50 = vmax.f32 %v24601_v46, %v13834_v63  ;;  %v2655_v9 = vpop.f32.mrb[217].mxu0  ;;  %v24614_v46 = vmax.f32 %v24612_v36, %v24613_v49  ;;  %v24622_v36 = vld [vmem:[#allocation64_spill] sm:$0xff] }
 0x2a6   : > { %v19004_v2 = vmax.f32 %v24606_v26, %v2655_v9  ;;  %v13835_v14 = vpop.f32.mrb[218].mxu0  ;;  %14239 = vmatmul.mubr.msk.bf16.gmra.mrb[60].mxu1 %vm700_vm0, %v18661_v31  ;;  %v24617_v26 = vld [vmem:[#allocation82_spill] sm:$0xff]  ;;  %v19034_v9 = vpop.f32.mrb[213].mxu1  ;;  %v24623_v49 = vld [vmem:[#allocation20_spill] sm:$0xff] }
 0x2a7   : > { %24602 = vst [vmem:[#allocation224_spill] sm:$0xff] %v18997_v50  ;;  %v19009_v4 = vmax.f32 %v24610_v21, %v13835_v14  ;;  %v2658_v52 = vpop.f32.mrb[219].mxu0  ;;  %14242 = vmatprep.mubr.msk.bf16.mxu1 %vm700_vm0, %v18040_v30  ;;  %24620 = vst [vmem:[#allocation116_spill] sm:$0xff] %v19034_v9  ;;  %v19036_v17 = vpop.f32.mrb[214].mxu1  ;;  %v24627_v14 = vld [vmem:[#allocation125_spill] sm:$0xff] }
 0x2a8   : > { %24607 = vst [vmem:[#allocation54_spill] sm:$0xff] %v19004_v2  ;;  %v19018_v24 = vmax.f32 %v24614_v46, %v2658_v52  ;;  %24621 = vst [vmem:[#allocation15_spill] sm:$0xff] %v19036_v17  ;;  %v24624_v46 = vmax.f32 %v24622_v36, %v24623_v49  ;;  %v19043_v21 = vpop.f32.mrb[215].mxu1  ;;  %v24631_v52 = vld [vmem:[#allocation126_spill] sm:$0xff]  ;;  %v24636_v49 = vld [vmem:[#allocation24_spill] sm:$0xff] }
 0x2a9   : > { %24611 = vst [vmem:[#allocation181_spill] sm:$0xff] %v19009_v4  ;;  %14025 = vmatmul.mubr.msk.bf16.gmra.mrb[68].mxu0 %vm700_vm0, %v18438_v57  ;;  %24626 = vst [vmem:[#allocation183_spill] sm:$0xff] %v19043_v21  ;;  %v24628_v4 = vld [vmem:[#allocation22_spill] sm:$0xff] }
 0x2aa   : > { %24615 = vst [vmem:[#allocation52_spill] sm:$0xff] %v19018_v24  ;;  %14028 = vmatprep.mubr.msk.bf16.mxu0 %vm700_vm0, %v24617_v26  ;;  %v24629_v53 = vmax.f32 %v24627_v14, %v24628_v4  ;;  %v24633_v24 = vmax.f32 %v24631_v52, %v24632_v35  ;;  %v24645_v14 = vld [vmem:[#allocation72_spill] sm:$0xff]  ;;  %v24646_v35 = vld [vmem:[#allocation185_spill] sm:$0xff]  ;;  %v24650_v4 = vld [vmem:[#allocation135_spill] sm:$0xff] }
 0x2ab   : > { %v24647_v52 = vmax.f32 %v24645_v14, %v24646_v35  ;;  %v24651_v36 = vld [vmem:[#allocation186_spill] sm:$0xff]  ;;  %v24658_v14 = vld [vmem:[#allocation32_spill] sm:$0xff] }
 0x2ac   : > { %v13838_v30 = vpop.f32.mrb[220].mxu0  ;;  %v24659_v35 = vld [vmem:[#allocation188_spill] sm:$0xff] }
 0x2ad   : > { %v19041_v28 = vmax.f32 %v24624_v46, %v13838_v30  ;;  %v2671_v63 = vpop.f32.mrb[221].mxu0  ;;  %v24637_v46 = vld [vmem:[#allocation26_spill] sm:$0xff] }
 0x2ae   : > { %v19048_v2 = vmax.f32 %v24629_v53, %v2671_v63  ;;  %v13839_v20 = vpop.f32.mrb[222].mxu0  ;;  %14243 = vmatmul.mubr.msk.bf16.gmra.mrb[64].mxu1 %vm700_vm0, %v24448_v60  ;;  %v24638_v8 = vmax.f32 %v24636_v49, %v24637_v46 }
 0x2af   : > { %24625 = vst [vmem:[#allocation16_spill] sm:$0xff] %v19041_v28  ;;  %v19053_v50 = vmax.f32 %v24633_v24, %v13839_v20  ;;  %v2674_v16 = vpop.f32.mrb[223].mxu0  ;;  %14246 = vmatprep.mubr.msk.bf16.mxu1 %vm700_vm0, %v24450_v5  ;;  %v19074_v24 = vpop.f32.mrb[216].mxu1  ;;  %v24652_v20 = vmax.f32 %v24650_v4, %v24651_v36 }
 0x2b0   : > { %24630 = vst [vmem:[#allocation61_spill] sm:$0xff] %v19048_v2  ;;  %v19062_v21 = vmax.f32 %v24638_v8, %v2674_v16  ;;  %24642 = vst [vmem:[#allocation18_spill] sm:$0xff] %v19074_v24  ;;  %v19078_v8 = vpop.f32.mrb[217].mxu1  ;;  %v24654_v16 = vld [vmem:[#allocation136_spill] sm:$0xff] }
 0x2b1   : > { %24634 = vst [vmem:[#allocation184_spill] sm:$0xff] %v19053_v50  ;;  %14029 = vmatmul.mubr.msk.bf16.gmra.mrb[72].mxu0 %vm700_vm0, %v18492_v0  ;;  %24643 = vst [vmem:[#allocation82_spill] sm:$0xff] %v19078_v8  ;;  %v19080_v63 = vpop.f32.mrb[218].mxu1 }
 0x2b2   : > { %24639 = vst [vmem:[#allocation17_spill] sm:$0xff] %v19062_v21  ;;  %14032 = vmatprep.mubr.msk.bf16.mxu0 %vm700_vm0, %v18504_v44  ;;  %24644 = vst [vmem:[#allocation64_spill] sm:$0xff] %v19080_v63  ;;  %v19087_v60 = vpop.f32.mrb[219].mxu1  ;;  %v24656_v21 = vmax.f32 %v24654_v16, %v24655_v19  ;;  %v24667_v16 = vld [vmem:[#allocation80_spill] sm:$0xff]  ;;  %v24672_v19 = vld [vmem:[#allocation145_spill] sm:$0xff] }
 0x2b3   : > { %24649 = vst [vmem:[#allocation125_spill] sm:$0xff] %v19087_v60  ;;  %v24945_v60 = vld [vmem:[#allocation147_spill] sm:$0xff] }
 0x2b4   : > { %v13842_v5 = vpop.f32.mrb[224].mxu0 }
 0x2b5   : > { %v19085_v49 = vmax.f32 %v24647_v52, %v13842_v5  ;;  %v2687_v46 = vpop.f32.mrb[225].mxu0  ;;  %v24660_v52 = vmax.f32 %v24658_v14, %v24659_v35  ;;  %v24673_v5 = vld [vmem:[#allocation190_spill] sm:$0xff] }
 0x2b6   : > { %v19092_v50 = vmax.f32 %v24652_v20, %v2687_v46  ;;  %v13843_v53 = vpop.f32.mrb[226].mxu0  ;;  %14247 = vmatmul.mubr.msk.bf16.gmra.mrb[68].mxu1 %vm700_vm0, %v24474_v37  ;;  %v24668_v46 = vld [vmem:[#allocation8_spill] sm:$0xff] }
 0x2b7   : > { %24648 = vst [vmem:[#allocation20_spill] sm:$0xff] %v19085_v49  ;;  %v19097_v2 = vmax.f32 %v24656_v21, %v13843_v53  ;;  %v2690_v30 = vpop.f32.mrb[227].mxu0  ;;  %14250 = vmatprep.mubr.msk.bf16.mxu1 %vm700_vm0, %v24476_v56  ;;  %v19118_v53 = vpop.f32.mrb[220].mxu1  ;;  %v24669_v14 = vmax.f32 %v24667_v16, %v24668_v46  ;;  %v24674_v21 = vmax.f32 %v24672_v19, %v24673_v5  ;;  %v24680_v16 = vld [vmem:[#allocation40_spill] sm:$0xff] }
 0x2b8   : > { %24653 = vst [vmem:[#allocation22_spill] sm:$0xff] %v19092_v50  ;;  %v19106_v28 = vmax.f32 %v24660_v52, %v2690_v30  ;;  %24664 = vst [vmem:[#allocation24_spill] sm:$0xff] %v19118_v53  ;;  %v19122_v4 = vpop.f32.mrb[221].mxu1  ;;  %v24676_v30 = vld [vmem:[#allocation146_spill] sm:$0xff]  ;;  %v24681_v46 = vld [vmem:[#allocation192_spill] sm:$0xff] }
 0x2b9   : > { %24657 = vst [vmem:[#allocation126_spill] sm:$0xff] %v19097_v2  ;;  %14033 = vmatmul.mubr.msk.bf16.gmra.mrb[76].mxu0 %vm700_vm0, %v18542_v10  ;;  %24665 = vst [vmem:[#allocation26_spill] sm:$0xff] %v19122_v4  ;;  %v19124_v20 = vpop.f32.mrb[222].mxu1 }
 0x2ba   : > { %24661 = vst [vmem:[#allocation23_spill] sm:$0xff] %v19106_v28  ;;  %14036 = vmatprep.mubr.msk.bf16.mxu0 %vm700_vm0, %v18554_v1  ;;  %24666 = vst [vmem:[#allocation72_spill] sm:$0xff] %v19124_v20  ;;  %v19131_v37 = vpop.f32.mrb[223].mxu1  ;;  %v24678_v28 = vmax.f32 %v24676_v30, %v24677_v62  ;;  %v24689_v30 = vld [vmem:[#allocation88_spill] sm:$0xff]  ;;  %v24694_v62 = vld [vmem:[#allocation155_spill] sm:$0xff] }
 0x2bb   : > { %24671 = vst [vmem:[#allocation135_spill] sm:$0xff] %v19131_v37  ;;  %v24965_v37 = vld [vmem:[#allocation85_spill] sm:$0xff] }
 0x2bc   : > { %v13846_v56 = vpop.f32.mrb[228].mxu0 }
 0x2bd   : > { %v19129_v35 = vmax.f32 %v24669_v14, %v13846_v56  ;;  %v2703_v52 = vpop.f32.mrb[229].mxu0  ;;  %v24682_v14 = vmax.f32 %v24680_v16, %v24681_v46  ;;  %v24695_v56 = vld [vmem:[#allocation12_spill] sm:$0xff] }
 0x2be   : > { %v19136_v2 = vmax.f32 %v24674_v21, %v2703_v52  ;;  %v13847_v36 = vpop.f32.mrb[230].mxu0  ;;  %14251 = vmatmul.mubr.msk.bf16.gmra.mrb[72].mxu1 %vm700_vm0, %v24500_v12  ;;  %v24690_v52 = vld [vmem:[#allocation11_spill] sm:$0xff] }
 0x2bf   : > { %24670 = vst [vmem:[#allocation185_spill] sm:$0xff] %v19129_v35  ;;  %v19141_v50 = vmax.f32 %v24678_v28, %v13847_v36  ;;  %v2706_v33 = vpop.f32.mrb[231].mxu0  ;;  %14254 = vmatprep.mubr.msk.bf16.mxu1 %vm700_vm0, %v24502_v61  ;;  %v19162_v36 = vpop.f32.mrb[224].mxu1  ;;  %v24691_v16 = vmax.f32 %v24689_v30, %v24690_v52  ;;  %v24696_v28 = vmax.f32 %v24694_v62, %v24695_v56  ;;  %v24702_v30 = vld [vmem:[#allocation48_spill] sm:$0xff]  ;;  %v24703_v52 = vld [vmem:[#allocation50_spill] sm:$0xff] }
 0x2c0   : > { %24675 = vst [vmem:[#allocation186_spill] sm:$0xff] %v19136_v2  ;;  %v19150_v49 = vmax.f32 %v24682_v14, %v2706_v33  ;;  %24686 = vst [vmem:[#allocation32_spill] sm:$0xff] %v19162_v36  ;;  %v19166_v19 = vpop.f32.mrb[225].mxu1  ;;  %v24698_v33 = vld [vmem:[#allocation156_spill] sm:$0xff] }
 0x2c1   : > { %24679 = vst [vmem:[#allocation136_spill] sm:$0xff] %v19141_v50  ;;  %14037 = vmatmul.mubr.msk.bf16.gmra.mrb[80].mxu0 %vm700_vm0, %v18592_v7  ;;  %24687 = vst [vmem:[#allocation188_spill] sm:$0xff] %v19166_v19  ;;  %v19168_v21 = vpop.f32.mrb[226].mxu1 }
 0x2c2   : > { %24683 = vst [vmem:[#allocation187_spill] sm:$0xff] %v19150_v49  ;;  %14040 = vmatprep.mubr.msk.bf16.mxu0 %vm700_vm0, %v18604_v55  ;;  %24688 = vst [vmem:[#allocation80_spill] sm:$0xff] %v19168_v21  ;;  %v19175_v12 = vpop.f32.mrb[227].mxu1  ;;  %v24700_v49 = vmax.f32 %v24698_v33, %v24699_v3  ;;  %v24711_v33 = vld [vmem:[#allocation96_spill] sm:$0xff]  ;;  %v24716_v3 = vld [vmem:[#allocation165_spill] sm:$0xff] }
 0x2c3   : > { %24693 = vst [vmem:[#allocation145_spill] sm:$0xff] %v19175_v12  ;;  %v24985_v12 = vld [vmem:[#allocation162_spill] sm:$0xff] }
 0x2c4   : > { %v13850_v61 = vpop.f32.mrb[232].mxu0 }
 0x2c5   : > { %v19173_v46 = vmax.f32 %v24691_v16, %v13850_v61  ;;  %v2719_v14 = vpop.f32.mrb[233].mxu0  ;;  %v24704_v16 = vmax.f32 %v24702_v30, %v24703_v52  ;;  %v24717_v61 = vld [vmem:[#allocation198_spill] sm:$0xff] }
 0x2c6   : > { %v19180_v50 = vmax.f32 %v24696_v28, %v2719_v14  ;;  %v13851_v5 = vpop.f32.mrb[234].mxu0  ;;  %14255 = vmatmul.mubr.msk.bf16.gmra.mrb[76].mxu1 %vm700_vm0, %v24526_v42  ;;  %v24712_v14 = vld [vmem:[#allocation197_spill] sm:$0xff] }
 0x2c7   : > { %24692 = vst [vmem:[#allocation8_spill] sm:$0xff] %v19173_v46  ;;  %v19185_v2 = vmax.f32 %v24700_v49, %v13851_v5  ;;  %v2722_v18 = vpop.f32.mrb[235].mxu0  ;;  %14258 = vmatprep.mubr.msk.bf16.mxu1 %vm700_vm0, %v24528_v34  ;;  %v19206_v5 = vpop.f32.mrb[228].mxu1  ;;  %v24713_v30 = vmax.f32 %v24711_v33, %v24712_v14  ;;  %v24718_v49 = vmax.f32 %v24716_v3, %v24717_v61  ;;  %v24724_v33 = vld [vmem:[#allocation99_spill] sm:$0xff]  ;;  %v24725_v14 = vld [vmem:[#allocation200_spill] sm:$0xff] }
 0x2c8   : > { %24697 = vst [vmem:[#allocation190_spill] sm:$0xff] %v19180_v50  ;;  %v19194_v35 = vmax.f32 %v24704_v16, %v2722_v18  ;;  %24708 = vst [vmem:[#allocation40_spill] sm:$0xff] %v19206_v5  ;;  %v19210_v62 = vpop.f32.mrb[229].mxu1  ;;  %v24740_v61 = vld [vmem:[#allocation203_spill] sm:$0xff] }
 0x2c9   : > { %24701 = vst [vmem:[#allocation146_spill] sm:$0xff] %v19185_v2  ;;  %14041 = vmatmul.mubr.msk.bf16.gmra.mrb[84].mxu0 %vm700_vm0, %v18642_v51  ;;  %24709 = vst [vmem:[#allocation192_spill] sm:$0xff] %v19210_v62  ;;  %v19212_v28 = vpop.f32.mrb[230].mxu1 }
 0x2ca   : > { %24705 = vst [vmem:[#allocation191_spill] sm:$0xff] %v19194_v35  ;;  %14044 = vmatprep.mubr.msk.bf16.mxu0 %vm700_vm0, %v18654_v54  ;;  %24710 = vst [vmem:[#allocation88_spill] sm:$0xff] %v19212_v28  ;;  %v19219_v42 = vpop.f32.mrb[231].mxu1  ;;  %v24721_v35 = vld [vmem:[#allocation199_spill] sm:$0xff] }
 0x2cb   : > { %24715 = vst [vmem:[#allocation155_spill] sm:$0xff] %v19219_v42  ;;  %v24722_v56 = vmax.f32 %v24720_v39, %v24721_v35  ;;  %v24728_v35 = vld [vmem:[#allocation130_spill] sm:$0xff] }
 0x2cc   : > { %v13854_v34 = vpop.f32.mrb[236].mxu0  ;;  %v25006_v42 = vld [vmem:[#allocation58_spill] sm:$0xff] }
 0x2cd   : > { %v19217_v52 = vmax.f32 %v24713_v30, %v13854_v34  ;;  %v2735_v16 = vpop.f32.mrb[237].mxu0  ;;  %v24726_v30 = vmax.f32 %v24724_v33, %v24725_v14  ;;  %v19250_v3 = vpop.f32.mrb[232].mxu1  ;;  %v24734_v33 = vld [vmem:[#allocation103_spill] sm:$0xff]  ;;  %v24735_v14 = vld [vmem:[#allocation202_spill] sm:$0xff] }
 0x2ce   : > { %v19224_v2 = vmax.f32 %v24718_v49, %v2735_v16  ;;  %v13855_v18 = vpop.f32.mrb[238].mxu0  ;;  %14259 = vmatmul.mubr.msk.bf16.gmra.mrb[80].mxu1 %vm700_vm0, %v18287_v27  ;;  %24730 = vst [vmem:[#allocation48_spill] sm:$0xff] %v19250_v3  ;;  %v24743_v49 = vld [vmem:[#allocation62_spill] sm:$0xff] }
 0x2cf   : > { %24714 = vst [vmem:[#allocation11_spill] sm:$0xff] %v19217_v52  ;;  %v19229_v50 = vmax.f32 %v24722_v56, %v13855_v18  ;;  %v2738_v22 = vpop.f32.mrb[239].mxu0  ;;  %14262 = vmatprep.mubr.msk.bf16.mxu1 %vm700_vm0, %v18299_v11  ;;  %v16211_v56 = vld [vmem:[%s16446_s29] sm:$0xff]   ;;  %v19254_v18 = vpop.f32.mrb[233].mxu1 }
 0x2d0   : > { %24719 = vst [vmem:[#allocation12_spill] sm:$0xff] %v19224_v2  ;;  %v19238_v46 = vmax.f32 %v24726_v30, %v2738_v22  ;;  %24732 = vst [vmem:[#allocation50_spill] sm:$0xff] %v19254_v18  ;;  %v19256_v16 = vpop.f32.mrb[234].mxu1  ;;  %v24736_v30 = vmax.f32 %v24734_v33, %v24735_v14  ;;  %v24748_v14 = vld [vmem:[#allocation109_spill] sm:$0xff]  ;;  %v24759_v33 = vld [vmem:[#allocation7_spill] sm:$0xff] }
 0x2d1   : > { %24723 = vst [vmem:[#allocation156_spill] sm:$0xff] %v19229_v50  ;;  %14045 = vmatmul.mubr.msk.bf16.gmra.mrb[88].mxu0 %vm700_vm0, %v24728_v35  ;;  %24733 = vst [vmem:[#allocation96_spill] sm:$0xff] %v19256_v16  ;;  %v19263_v34 = vpop.f32.mrb[235].mxu1 }
 0x2d2   : > { %24727 = vst [vmem:[#allocation195_spill] sm:$0xff] %v19238_v46  ;;  %14132 = vmatprep.mubr.msk.bf16.mxu0 %vm700_vm0, %v16211_v56  ;;  %24738 = vst [vmem:[#allocation165_spill] sm:$0xff] %v19263_v34  ;;  %v24739_v56 = vld [vmem:[#allocation104_spill] sm:$0xff] }
 0x2d3   : > { %v24741_v50 = vmax.f32 %v24739_v56, %v24740_v61  ;;  %v24744_v46 = vld [vmem:[#allocation204_spill] sm:$0xff]  ;;  %v24763_v61 = vld [vmem:[#allocation114_spill] sm:$0xff]  ;;  %v24768_v56 = vld [vmem:[#allocation211_spill] sm:$0xff] }
 0x2d4   : > { %v13858_v11 = vpop.f32.mrb[240].mxu0  ;;  %v24745_v2 = vmax.f32 %v24743_v49, %v24744_v46  ;;  %v16213_v49 = vld [vmem:[%s16446_s29 + $0x10] sm:$0xff]   ;;  %v24758_v46 = vld [vmem:[#allocation113_spill] sm:$0xff] }
 0x2d5   : > { %v19261_v39 = vmax.f32 %v24736_v30, %v13858_v11  ;;  %v2751_v27 = vpop.f32.mrb[241].mxu0  ;;  %v24749_v30 = vld [vmem:[#allocation206_spill] sm:$0xff] }
 0x2d6   : > { %v19268_v38 = vmax.f32 %v24741_v50, %v2751_v27  ;;  %v13859_v22 = vpop.f32.mrb[242].mxu0  ;;  %14263 = vmatmul.mubr.msk.bf16.gmra.mrb[84].mxu1 %vm700_vm0, %v18931_v41  ;;  %v24750_v34 = vmax.f32 %v24748_v14, %v24749_v30  ;;  %v24760_v50 = vmax.f32 %v24758_v46, %v24759_v33  ;;  %v24772_v46 = vld [vmem:[#allocation119_spill] sm:$0xff] }
 0x2d7   : > { %24737 = vst [vmem:[#allocation197_spill] sm:$0xff] %v19261_v39  ;;  %v19273_v23 = vmax.f32 %v24745_v2, %v13859_v22  ;;  %v2754_v52 = vpop.f32.mrb[243].mxu0  ;;  %14266 = vmatprep.mubr.msk.bf16.mxu1 %vm700_vm0, %v18938_v47  ;;  %v16212_v2 = vld [vmem:[%s16446_s29 + $0x8] sm:$0xff]   ;;  %v19294_v22 = vpop.f32.mrb[236].mxu1 }
 0x2d8   : > { %24742 = vst [vmem:[#allocation198_spill] sm:$0xff] %v19268_v38  ;;  %v19282_v16 = vmax.f32 %v24750_v34, %v2754_v52  ;;  %24754 = vst [vmem:[#allocation99_spill] sm:$0xff] %v19294_v22  ;;  %v19298_v34 = vpop.f32.mrb[237].mxu1  ;;  %v24767_v52 = vld [vmem:[#allocation70_spill] sm:$0xff] }
 0x2d9   : > { %24746 = vst [vmem:[#allocation166_spill] sm:$0xff] %v19273_v23  ;;  %14133 = vmatmul.mubr.msk.bf16.vlgmr.msra.gmra.mrb[92].mxu0 %vm700_vm0, %v16212_v2  ;;  %24756 = vst [vmem:[#allocation200_spill] sm:$0xff] %v19298_v34  ;;  %v19300_v30 = vpop.f32.mrb[238].mxu1 }
 0x2da   : > { %24751 = vst [vmem:[#allocation199_spill] sm:$0xff] %v19282_v16  ;;  %14136 = vmatprep.mubr.msk.bf16.mxu0 %vm700_vm0, %v16213_v49  ;;  %24757 = vst [vmem:[#allocation130_spill] sm:$0xff] %v19300_v30  ;;  %v19307_v27 = vpop.f32.mrb[239].mxu1  ;;  %v24764_v49 = vld [vmem:[#allocation210_spill] sm:$0xff]  ;;  %v24769_v16 = vmax.f32 %v24767_v52, %v24768_v56  ;;  %v24794_v52 = vld [vmem:[#allocation219_spill] sm:$0xff] }
 0x2db   : > { %24762 = vst [vmem:[#allocation202_spill] sm:$0xff] %v19307_v27  ;;  %v24765_v23 = vmax.f32 %v24763_v61, %v24764_v49  ;;  %v24779_v61 = vld [vmem:[#allocation121_spill] sm:$0xff] }
 0x2dc   : > { %v13862_v14 = vpop.f32.mrb[244].mxu0 }
 0x2dd   : > { %v19305_v2 = vmax.f32 %v24760_v50, %v13862_v14  ;;  %v2767_v38 = vpop.f32.mrb[245].mxu0  ;;  %v24773_v14 = vld [vmem:[#allocation213_spill] sm:$0xff] }
 0x2de   : > { %v19312_v11 = vmax.f32 %v24765_v23, %v2767_v38  ;;  %v13863_v39 = vpop.f32.mrb[246].mxu0  ;;  %14267 = vmatmul.mubr.msk.bf16.gmra.mrb[88].mxu1 %vm700_vm0, %v18382_v43  ;;  %v24774_v27 = vmax.f32 %v24772_v46, %v24773_v14  ;;  %v24784_v46 = vld [vmem:[#allocation124_spill] sm:$0xff]  ;;  %v24785_v14 = vld [vmem:[#allocation217_spill] sm:$0xff] }
 0x2df   : > { %24761 = vst [vmem:[#allocation103_spill] sm:$0xff] %v19305_v2  ;;  %v19317_v34 = vmax.f32 %v24769_v16, %v13863_v39  ;;  %v2770_v30 = vpop.f32.mrb[247].mxu0  ;;  %14270 = vmatprep.mubr.msk.bf16.mxu1 %vm700_vm0, %v18394_v6  ;;  %v24777_v39 = vld [vmem:[#allocation73_spill] sm:$0xff]  ;;  %v24786_v38 = vmax.f32 %v24784_v46, %v24785_v14  ;;  %v24798_v46 = vld [vmem:[#allocation131_spill] sm:$0xff] }
 0x2e0   : > { %24766 = vst [vmem:[#allocation104_spill] sm:$0xff] %v19312_v11  ;;  %v19326_v22 = vmax.f32 %v24774_v27, %v2770_v30  ;;  %v24789_v16 = vld [vmem:[#allocation129_spill] sm:$0xff] }
 0x2e1   : > { %24770 = vst [vmem:[#allocation203_spill] sm:$0xff] %v19317_v34  ;;  %14137 = vmatmul.mubr.msk.bf16.gmra.mrb[96].mxu0 %vm700_vm0, %v24777_v39  ;;  %v19338_v56 = vpop.f32.mrb[240].mxu1  ;;  %v24793_v27 = vld [vmem:[#allocation81_spill] sm:$0xff] }
 0x2e2   : > { %24775 = vst [vmem:[#allocation62_spill] sm:$0xff] %v19326_v22  ;;  %14140 = vmatprep.mubr.msk.bf16.mxu0 %vm700_vm0, %v24779_v61  ;;  %24780 = vst [vmem:[#allocation204_spill] sm:$0xff] %v19338_v56  ;;  %v19342_v30 = vpop.f32.mrb[241].mxu1  ;;  %v24790_v61 = vld [vmem:[#allocation218_spill] sm:$0xff]  ;;  %v24795_v22 = vmax.f32 %v24793_v27, %v24794_v52  ;;  %v24799_v14 = vld [vmem:[#allocation221_spill] sm:$0xff] }
 0x2e3   : > { %24782 = vst [vmem:[#allocation109_spill] sm:$0xff] %v19342_v30  ;;  %v19344_v49 = vpop.f32.mrb[242].mxu1  ;;  %v24791_v34 = vmax.f32 %v24789_v16, %v24790_v61  ;;  %v24805_v16 = vld [vmem:[#allocation84_spill] sm:$0xff]  ;;  %v24819_v27 = vld [vmem:[#allocation90_spill] sm:$0xff] }
 0x2e4   : > { %v13866_v6 = vpop.f32.mrb[248].mxu0  ;;  %24783 = vst [vmem:[#allocation206_spill] sm:$0xff] %v19344_v49  ;;  %v19351_v43 = vpop.f32.mrb[243].mxu1 }
 0x2e5   : > { %v19349_v39 = vmax.f32 %v24786_v38, %v13866_v6  ;;  %v2783_v50 = vpop.f32.mrb[249].mxu0  ;;  %24788 = vst [vmem:[#allocation7_spill] sm:$0xff] %v19351_v43  ;;  %v24800_v43 = vmax.f32 %v24798_v46, %v24799_v14  ;;  %v24810_v46 = vld [vmem:[#allocation139_spill] sm:$0xff] }
 0x2e6   : > { %v19356_v23 = vmax.f32 %v24791_v34, %v2783_v50  ;;  %v13867_v11 = vpop.f32.mrb[250].mxu0  ;;  %14271 = vmatmul.mubr.msk.bf16.gmra.mrb[92].mxu1 %vm700_vm0, %v18438_v57  ;;  %v24811_v14 = vld [vmem:[#allocation31_spill] sm:$0xff] }
 0x2e7   : > { %24787 = vst [vmem:[#allocation113_spill] sm:$0xff] %v19349_v39  ;;  %v19361_v33 = vmax.f32 %v24795_v22, %v13867_v11  ;;  %v2786_v2 = vpop.f32.mrb[251].mxu0  ;;  %14274 = vmatprep.mubr.msk.bf16.mxu1 %vm700_vm0, %v24617_v26  ;;  %v24803_v11 = vld [vmem:[#allocation133_spill] sm:$0xff]  ;;  %v24816_v22 = vld [vmem:[#allocation30_spill] sm:$0xff] }
 0x2e8   : > { %24792 = vst [vmem:[#allocation114_spill] sm:$0xff] %v19356_v23  ;;  %v19370_v49 = vmax.f32 %v24800_v43, %v2786_v2 }
 0x2e9   : > { %24796 = vst [vmem:[#allocation210_spill] sm:$0xff] %v19361_v33  ;;  %14141 = vmatmul.mubr.msk.bf16.gmra.mrb[100].mxu0 %vm700_vm0, %v24803_v11  ;;  %v19382_v52 = vpop.f32.mrb[244].mxu1  ;;  %v24812_v11 = vmax.f32 %v24810_v46, %v24811_v14  ;;  %v24824_v14 = vld [vmem:[#allocation143_spill] sm:$0xff] }
 0x2ea   : > { %24801 = vst [vmem:[#allocation70_spill] sm:$0xff] %v19370_v49  ;;  %14144 = vmatprep.mubr.msk.bf16.mxu0 %vm700_vm0, %v24805_v16  ;;  %24806 = vst [vmem:[#allocation211_spill] sm:$0xff] %v19382_v52  ;;  %v19386_v43 = vpop.f32.mrb[245].mxu1  ;;  %v24815_v16 = vld [vmem:[#allocation141_spill] sm:$0xff]  ;;  %v24820_v49 = vld [vmem:[#allocation6_spill] sm:$0xff] }
 0x2eb   : > { %24808 = vst [vmem:[#allocation119_spill] sm:$0xff] %v19386_v43  ;;  %v19388_v61 = vpop.f32.mrb[246].mxu1  ;;  %v24817_v33 = vmax.f32 %v24815_v16, %v24816_v22  ;;  %v24821_v23 = vmax.f32 %v24819_v27, %v24820_v49  ;;  %v24839_v22 = vld [vmem:[#allocation189_spill] sm:$0xff] }
 0x2ec   : > { %v13870_v26 = vpop.f32.mrb[252].mxu0  ;;  %24809 = vst [vmem:[#allocation213_spill] sm:$0xff] %v19388_v61  ;;  %v19395_v6 = vpop.f32.mrb[247].mxu1 }
 0x2ed   : > { %v19393_v50 = vmax.f32 %v24812_v11, %v13870_v26  ;;  %v2799_v57 = vpop.f32.mrb[253].mxu0  ;;  %24814 = vst [vmem:[#allocation121_spill] sm:$0xff] %v19395_v6  ;;  %v24825_v11 = vld [vmem:[#allocation10_spill] sm:$0xff] }
 0x2ee   : > { %v19400_v34 = vmax.f32 %v24817_v33, %v2799_v57  ;;  %v13871_v2 = vpop.f32.mrb[254].mxu0  ;;  %14275 = vmatmul.mubr.msk.bf16.gmra.mrb[96].mxu1 %vm700_vm0, %v18492_v0  ;;  %v24826_v6 = vmax.f32 %v24824_v14, %v24825_v11  ;;  %v16215_v57 = vld [vmem:[%s16446_s29 + $0x40] sm:$0xff]   ;;  %v24835_v11 = vld [vmem:[#allocation39_spill] sm:$0xff] }
 0x2ef   : > { %24813 = vst [vmem:[#allocation73_spill] sm:$0xff] %v19393_v50  ;;  %v19405_v38 = vmax.f32 %v24821_v23, %v13871_v2  ;;  %v2802_v39 = vpop.f32.mrb[255].mxu0  ;;  %14278 = vmatprep.mubr.msk.bf16.mxu1 %vm700_vm0, %v18504_v44  ;;  %v16214_v23 = vld [vmem:[%s16446_s29 + $0x38] sm:$0xff]   ;;  %v24834_v14 = vld [vmem:[#allocation149_spill] sm:$0xff]  ;;  %v24842_v2 = vld [vmem:[#allocation98_spill] sm:$0xff] }
 0x2f0   : > { %24818 = vst [vmem:[#allocation124_spill] sm:$0xff] %v19400_v34  ;;  %v19414_v61 = vmax.f32 %v24826_v6, %v2802_v39 }
 0x2f1   : > { %24822 = vst [vmem:[#allocation217_spill] sm:$0xff] %v19405_v38  ;;  %14145 = vmatmul.mubr.msk.bf16.gmra.mrb[104].mxu0 %vm700_vm0, %v16214_v23  ;;  %v19426_v27 = vpop.f32.mrb[248].mxu1  ;;  %v24836_v23 = vmax.f32 %v24834_v14, %v24835_v11  ;;  %v24846_v14 = vld [vmem:[#allocation153_spill] sm:$0xff]  ;;  %v24847_v11 = vld [vmem:[#allocation223_spill] sm:$0xff] }
 0x2f2   : > { %24827 = vst [vmem:[#allocation129_spill] sm:$0xff] %v19414_v61  ;;  %14148 = vmatprep.mubr.msk.bf16.mxu0 %vm700_vm0, %v16215_v57  ;;  %24830 = vst [vmem:[#allocation218_spill] sm:$0xff] %v19426_v27  ;;  %v19430_v6 = vpop.f32.mrb[249].mxu1  ;;  %v24838_v57 = vld [vmem:[#allocation151_spill] sm:$0xff]  ;;  %v24843_v61 = vld [vmem:[#allocation13_spill] sm:$0xff] }
 0x2f3   : > { %24832 = vst [vmem:[#allocation81_spill] sm:$0xff] %v19430_v6  ;;  %v19432_v16 = vpop.f32.mrb[250].mxu1  ;;  %v24840_v38 = vmax.f32 %v24838_v57, %v24839_v22  ;;  %v24844_v34 = vmax.f32 %v24842_v2, %v24843_v61  ;;  %v16217_v61 = vld [vmem:[%s16446_s29 + $0x50] sm:$0xff]  }
 0x2f4   : > { %v13874_v44 = vpop.f32.mrb[0].mxu0  ;;  %24833 = vst [vmem:[#allocation219_spill] sm:$0xff] %v19432_v16  ;;  %v19439_v46 = vpop.f32.mrb[251].mxu1  ;;  %v24854_v57 = vld [vmem:[#allocation159_spill] sm:$0xff]  ;;  %v25106_v16 = vld [vmem:[#allocation154_spill] sm:$0xff] }
 0x2f5   : > { %v19437_v49 = vmax.f32 %v24836_v23, %v13874_v44  ;;  %v2815_v0 = vpop.f32.mrb[1].mxu0  ;;  %24837 = vst [vmem:[#allocation131_spill] sm:$0xff] %v19439_v46  ;;  %v24848_v23 = vmax.f32 %v24846_v14, %v24847_v11  ;;  %v24855_v14 = vld [vmem:[#allocation193_spill] sm:$0xff] }
 0x2f6   : > { %v19444_v33 = vmax.f32 %v24840_v38, %v2815_v0  ;;  %v13875_v39 = vpop.f32.mrb[2].mxu0  ;;  %14279 = vmatmul.mubr.msk.bf16.gmra.mrb[100].mxu1 %vm700_vm0, %v18542_v10  ;;  %v24856_v11 = vmax.f32 %v24854_v57, %v24855_v14  ;;  %v24860_v38 = vld [vmem:[#allocation47_spill] sm:$0xff]  ;;  %v24863_v0 = vld [vmem:[#allocation108_spill] sm:$0xff]  ;;  %v24868_v14 = vld [vmem:[#allocation106_spill] sm:$0xff] }
 0x2f7   : > { %v19449_v26 = vmax.f32 %v24844_v34, %v13875_v39  ;;  %v2818_v50 = vpop.f32.mrb[3].mxu0  ;;  %14282 = vmatprep.mubr.msk.bf16.mxu1 %vm700_vm0, %v18554_v1  ;;  %v16216_v34 = vld [vmem:[%s16446_s29 + $0x48] sm:$0xff]   ;;  %v24867_v57 = vld [vmem:[#allocation163_spill] sm:$0xff] }
 0x2f8   : > { %24841 = vst [vmem:[#allocation221_spill] sm:$0xff] %v19444_v33  ;;  %v19458_v46 = vmax.f32 %v24848_v23, %v2818_v50 }
 0x2f9   : > { %24845 = vst [vmem:[#allocation133_spill] sm:$0xff] %v19449_v26  ;;  %14149 = vmatmul.mubr.msk.bf16.gmra.mrb[108].mxu0 %vm700_vm0, %v16216_v34  ;;  %v19470_v22 = vpop.f32.mrb[252].mxu1 }
 0x2fa   : > { %24849 = vst [vmem:[#allocation84_spill] sm:$0xff] %v19458_v46  ;;  %14152 = vmatprep.mubr.msk.bf16.mxu0 %vm700_vm0, %v16217_v61  ;;  %24850 = vst [vmem:[#allocation139_spill] sm:$0xff] %v19470_v22  ;;  %v19474_v2 = vpop.f32.mrb[253].mxu1  ;;  %v24859_v61 = vld [vmem:[#allocation161_spill] sm:$0xff]  ;;  %v24864_v46 = vld [vmem:[#allocation194_spill] sm:$0xff] }
 0x2fb   : > { %24852 = vst [vmem:[#allocation31_spill] sm:$0xff] %v19474_v2  ;;  %v19476_v39 = vpop.f32.mrb[254].mxu1  ;;  %v24861_v44 = vmax.f32 %v24859_v61, %v24860_v38  ;;  %v24865_v26 = vmax.f32 %v24863_v0, %v24864_v46  ;;  %v16219_v38 = vld [vmem:[%s16446_s29 + $0x60] sm:$0xff]  }
 0x2fc   : > { %v13878_v1 = vpop.f32.mrb[4].mxu0  ;;  %24853 = vst [vmem:[#allocation141_spill] sm:$0xff] %v19476_v39  ;;  %v19483_v10 = vpop.f32.mrb[255].mxu1 }
 0x2fd   : > { %v19481_v23 = vmax.f32 %v24856_v11, %v13878_v1  ;;  %v2831_v34 = vpop.f32.mrb[5].mxu0  ;;  %24858 = vst [vmem:[#allocation90_spill] sm:$0xff] %v19483_v10  ;;  %v24869_v11 = vmax.f32 %v24867_v57, %v24868_v14  ;;  %v24876_v57 = vld [vmem:[#allocation169_spill] sm:$0xff]  ;;  %v24877_v14 = vld [vmem:[#allocation55_spill] sm:$0xff]  ;;  %v24881_v1 = vld [vmem:[#allocation196_spill] sm:$0xff] }
 0x2fe   : > { %v19488_v48 = vmax.f32 %v24861_v44, %v2831_v34  ;;  %v13879_v50 = vpop.f32.mrb[6].mxu0  ;;  %14283 = vmatmul.mubr.msk.bf16.gmra.mrb[104].mxu1 %vm700_vm0, %v18592_v7  ;;  %v25125_v10 = vld [vmem:[#allocation146_spill] sm:$0xff] }
 0x2ff   : > { %24857 = vst [vmem:[#allocation30_spill] sm:$0xff] %v19481_v23  ;;  %v19493_v40 = vmax.f32 %v24865_v26, %v13879_v50  ;;  %v2834_v33 = vpop.f32.mrb[7].mxu0  ;;  %14286 = vmatprep.mubr.msk.bf16.mxu1 %vm700_vm0, %v18604_v55  ;;  %v16218_v26 = vld [vmem:[%s16446_s29 + $0x58] sm:$0xff]   ;;  %v24884_v50 = vld [vmem:[#allocation118_spill] sm:$0xff] }
 0x300   : > { %24862 = vst [vmem:[#allocation6_spill] sm:$0xff] %v19488_v48  ;;  %v19502_v25 = vmax.f32 %v24869_v11, %v2834_v33  ;;  %v24878_v11 = vmax.f32 %v24876_v57, %v24877_v14  ;;  %v24888_v57 = vld [vmem:[#allocation173_spill] sm:$0xff]  ;;  %v24889_v14 = vld [vmem:[#allocation59_spill] sm:$0xff] }
 0x301   : > { %24866 = vst [vmem:[#allocation143_spill] sm:$0xff] %v19493_v40  ;;  %14153 = vmatmul.mubr.msk.bf16.gmra.mrb[112].mxu0 %vm700_vm0, %v16218_v26  ;;  %v19514_v0 = vpop.f32.mrb[0].mxu1 }
 0x302   : > { %24870 = vst [vmem:[#allocation10_spill] sm:$0xff] %v19502_v25  ;;  %14156 = vmatprep.mubr.msk.bf16.mxu0 %vm700_vm0, %v16219_v38  ;;  %24872 = vst [vmem:[#allocation149_spill] sm:$0xff] %v19514_v0  ;;  %v19518_v34 = vpop.f32.mrb[1].mxu1  ;;  %v24880_v38 = vld [vmem:[#allocation171_spill] sm:$0xff] }
 0x303   : > { %24874 = vst [vmem:[#allocation39_spill] sm:$0xff] %v19518_v34  ;;  %v19520_v61 = vpop.f32.mrb[2].mxu1  ;;  %v24882_v44 = vmax.f32 %v24880_v38, %v24881_v1  ;;  %v24885_v25 = vld [vmem:[#allocation115_spill] sm:$0xff] }
 0x304   : > { %v13882_v55 = vpop.f32.mrb[8].mxu0  ;;  %24875 = vst [vmem:[#allocation151_spill] sm:$0xff] %v19520_v61  ;;  %v19527_v46 = vpop.f32.mrb[3].mxu1  ;;  %v24886_v59 = vmax.f32 %v24884_v50, %v24885_v25  ;;  %v24895_v50 = vld [vmem:[#allocation226_spill] sm:$0xff] }
 0x305   : > { %v19525_v26 = vmax.f32 %v24878_v11, %v13882_v55  ;;  %v2847_v7 = vpop.f32.mrb[9].mxu0  ;;  %24879 = vst [vmem:[#allocation189_spill] sm:$0xff] %v19527_v46  ;;  %v24890_v11 = vmax.f32 %v24888_v57, %v24889_v14  ;;  %v24904_v55 = vld [vmem:[#allocation127_spill] sm:$0xff]  ;;  %v25142_v46 = vld [vmem:[#allocation122_spill] sm:$0xff] }
 0x306   : > { %v19532_v40 = vmax.f32 %v24882_v44, %v2847_v7  ;;  %v13883_v33 = vpop.f32.mrb[10].mxu0  ;;  %14287 = vmatmul.mubr.msk.bf16.gmra.mrb[108].mxu1 %vm700_vm0, %v18642_v51 }
 0x307   : > { %v19537_v48 = vmax.f32 %v24886_v59, %v13883_v33  ;;  %v2850_v58 = vpop.f32.mrb[11].mxu0  ;;  %14290 = vmatprep.mubr.msk.bf16.mxu1 %vm700_vm0, %v18654_v54  ;;  %v16220_v59 = vld [vmem:[%s16446_s29 + $0x70] sm:$0xff]  }
 0x308   : > { %24883 = vst [vmem:[#allocation98_spill] sm:$0xff] %v19532_v40  ;;  %v19546_v23 = vmax.f32 %v24890_v11, %v2850_v58  ;;  %v24900_v11 = vld [vmem:[#allocation128_spill] sm:$0xff] }
 0x309   : > { %24887 = vst [vmem:[#allocation13_spill] sm:$0xff] %v19537_v48  ;;  %14157 = vmatmul.mubr.msk.bf16.gmra.mrb[116].mxu0 %vm700_vm0, %v18661_v31  ;;  %v19558_v1 = vpop.f32.mrb[4].mxu1  ;;  %v24896_v31 = vld [vmem:[#allocation63_spill] sm:$0xff] }
 0x30a   : > { %24891 = vst [vmem:[#allocation153_spill] sm:$0xff] %v19546_v23  ;;  %14160 = vmatprep.mubr.msk.bf16.mxu0 %vm700_vm0, %v16220_v59  ;;  %24892 = vst [vmem:[#allocation223_spill] sm:$0xff] %v19558_v1  ;;  %v19562_v44 = vpop.f32.mrb[5].mxu1  ;;  %v24897_v33 = vmax.f32 %v24895_v50, %v24896_v31  ;;  %v24901_v59 = vld [vmem:[#allocation19_spill] sm:$0xff]  ;;  %v24906_v23 = vmax.f32 %v24904_v55, %v24905_v45  ;;  %v24908_v50 = vld [vmem:[#allocation201_spill] sm:$0xff] }
 0x30b   : > { %24893 = vst [vmem:[#allocation159_spill] sm:$0xff] %v19562_v44  ;;  %v19564_v7 = vpop.f32.mrb[6].mxu1  ;;  %v24902_v51 = vmax.f32 %v24900_v11, %v24901_v59  ;;  %v24909_v31 = vld [vmem:[#allocation21_spill] sm:$0xff]  ;;  %v24925_v55 = vld [vmem:[#allocation138_spill] sm:$0xff] }
 0x30c   : > { %v13970_v54 = vpop.f32.mrb[12].mxu0  ;;  %24894 = vst [vmem:[#allocation193_spill] sm:$0xff] %v19564_v7  ;;  %v19571_v14 = vpop.f32.mrb[7].mxu1  ;;  %v25160_v1 = vld [vmem:[#allocation69_spill] sm:$0xff] }
 0x30d   : > { %v19569_v38 = vmax.f32 %v24897_v33, %v13970_v54  ;;  %v3427_v57 = vpop.f32.mrb[13].mxu0  ;;  %24899 = vst [vmem:[#allocation47_spill] sm:$0xff] %v19571_v14  ;;  %v24910_v33 = vmax.f32 %v24908_v50, %v24909_v31  ;;  %v24916_v50 = vld [vmem:[#allocation205_spill] sm:$0xff]  ;;  %v24922_v54 = vld [vmem:[#allocation71_spill] sm:$0xff] }
 0x30e   : > { %v19576_v25 = vmax.f32 %v24902_v51, %v3427_v57  ;;  %v13971_v58 = vpop.f32.mrb[14].mxu0  ;;  %14291 = vmatmul.mubr.msk.bf16.gmra.mrb[112].mxu1 %vm700_vm0, %v24728_v35  ;;  %v16221_v57 = vld [vmem:[%s16446_s29 + $0x78] sm:$0xff]   ;;  %v24917_v31 = vld [vmem:[#allocation25_spill] sm:$0xff] }
 0x30f   : > { %24898 = vst [vmem:[#allocation161_spill] sm:$0xff] %v19569_v38  ;;  %v19581_v32 = vmax.f32 %v24906_v23, %v13971_v58  ;;  %v3430_v48 = vpop.f32.mrb[15].mxu0  ;;  %v16222_v23 = vld [vmem:[%s16446_s29 + $0x80] sm:$0xff]   ;;  %v25156_v14 = vld [vmem:[#allocation67_spill] sm:$0xff] }
 0x310   : > { %24903 = vst [vmem:[#allocation108_spill] sm:$0xff] %v19576_v25  ;;  %v19590_v29 = vmax.f32 %v24910_v33, %v3430_v48  ;;  %v24918_v33 = vmax.f32 %v24916_v50, %v24917_v31  ;;  %v24930_v31 = vld [vmem:[#allocation29_spill] sm:$0xff]  ;;  %v24942_v50 = vld [vmem:[#allocation79_spill] sm:$0xff] }
 0x311   : > { %24907 = vst [vmem:[#allocation194_spill] sm:$0xff] %v19581_v32  ;;  %14161 = vmatmul.mubr.msk.bf16.gmra.mrb[120].mxu0 %vm700_vm0, %v16221_v57  ;;  %v19600_v35 = vpop.f32.mrb[8].mxu1  ;;  %v25172_v44 = vld [vmem:[#allocation209_spill] sm:$0xff] }
 0x312   : > { %24911 = vst [vmem:[#allocation163_spill] sm:$0xff] %v19590_v29  ;;  %14164 = vmatprep.mubr.msk.bf16.mxu0 %vm700_vm0, %v16222_v23  ;;  %24912 = vst [vmem:[#allocation106_spill] sm:$0xff] %v19600_v35  ;;  %v19604_v48 = vpop.f32.mrb[9].mxu1  ;;  %v24921_v23 = vld [vmem:[#allocation207_spill] sm:$0xff] }
 0x313   : > { %24914 = vst [vmem:[#allocation169_spill] sm:$0xff] %v19604_v48  ;;  %v19606_v59 = vpop.f32.mrb[10].mxu1  ;;  %v24923_v17 = vmax.f32 %v24921_v23, %v24922_v54  ;;  %v24926_v29 = vld [vmem:[#allocation27_spill] sm:$0xff]  ;;  %v25176_v48 = vld [vmem:[#allocation142_spill] sm:$0xff] }
 0x314   : > { %v13974_v11 = vpop.f32.mrb[16].mxu0  ;;  %24915 = vst [vmem:[#allocation55_spill] sm:$0xff] %v19606_v59  ;;  %v19613_v51 = vpop.f32.mrb[11].mxu1  ;;  %v24927_v9 = vmax.f32 %v24925_v55, %v24926_v29 }
 0x315   : > { %v19611_v57 = vmax.f32 %v24918_v33, %v13974_v11  ;;  %v3443_v45 = vpop.f32.mrb[17].mxu0  ;;  %24920 = vst [vmem:[#allocation196_spill] sm:$0xff] %v19613_v51  ;;  %v24929_v11 = vld [vmem:[#allocation208_spill] sm:$0xff]  ;;  %v25188_v51 = vld [vmem:[#allocation215_spill] sm:$0xff] }
 0x316   : > { %v19618_v32 = vmax.f32 %v24923_v17, %v3443_v45  ;;  %v13975_v58 = vpop.f32.mrb[18].mxu0  ;;  %v24931_v33 = vmax.f32 %v24929_v11, %v24930_v31  ;;  %v16223_v17 = vld [vmem:[%s16446_s29 + $0x88] sm:$0xff]   ;;  %v24936_v11 = vld [vmem:[#allocation75_spill] sm:$0xff] }
 0x317   : > { %24919 = vst [vmem:[#allocation171_spill] sm:$0xff] %v19611_v57  ;;  %v19623_v25 = vmax.f32 %v24927_v9, %v13975_v58  ;;  %v3446_v15 = vpop.f32.mrb[19].mxu0  ;;  %v16224_v9 = vld [vmem:[%s16446_s29 + $0x90] sm:$0xff]   ;;  %v24937_v31 = vld [vmem:[#allocation33_spill] sm:$0xff] }
 0x318   : > { %24924 = vst [vmem:[#allocation118_spill] sm:$0xff] %v19618_v32  ;;  %v19630_v38 = vmax.f32 %v24931_v33, %v3446_v15  ;;  %v24938_v33 = vmax.f32 %v24936_v11, %v24937_v31  ;;  %v24950_v31 = vld [vmem:[#allocation37_spill] sm:$0xff]  ;;  %v24962_v11 = vld [vmem:[#allocation87_spill] sm:$0xff] }
 0x319   : > { %24928 = vst [vmem:[#allocation115_spill] sm:$0xff] %v19623_v25  ;;  %14165 = vmatmul.mubr.msk.bf16.gmra.mrb[124].mxu0 %vm700_vm0, %v16223_v17  ;;  %v19640_v45 = vpop.f32.mrb[12].mxu1 }
 0x31a   : > { %24932 = vst [vmem:[#allocation173_spill] sm:$0xff] %v19630_v38  ;;  %14168 = vmatprep.mubr.msk.bf16.mxu0 %vm700_vm0, %v16224_v9  ;;  %24933 = vst [vmem:[#allocation59_spill] sm:$0xff] %v19640_v45  ;;  %v19644_v15 = vpop.f32.mrb[13].mxu1  ;;  %v24941_v9 = vld [vmem:[#allocation212_spill] sm:$0xff]  ;;  %v24946_v38 = vld [vmem:[#allocation35_spill] sm:$0xff] }
 0x31b   : > { %24934 = vst [vmem:[#allocation226_spill] sm:$0xff] %v19644_v15  ;;  %v19646_v23 = vpop.f32.mrb[14].mxu1  ;;  %v24943_v63 = vmax.f32 %v24941_v9, %v24942_v50  ;;  %v24947_v8 = vmax.f32 %v24945_v60, %v24946_v38  ;;  %v25192_v15 = vld [vmem:[#allocation150_spill] sm:$0xff] }
 0x31c   : > { %v13978_v58 = vpop.f32.mrb[20].mxu0  ;;  %24935 = vst [vmem:[#allocation63_spill] sm:$0xff] %v19646_v23  ;;  %v19653_v54 = vpop.f32.mrb[15].mxu1 }
 0x31d   : > { %v19651_v17 = vmax.f32 %v24938_v33, %v13978_v58  ;;  %v3459_v29 = vpop.f32.mrb[21].mxu0  ;;  %24940 = vst [vmem:[#allocation19_spill] sm:$0xff] %v19653_v54  ;;  %v24949_v58 = vld [vmem:[#allocation214_spill] sm:$0xff] }
 0x31e   : > { %v19658_v25 = vmax.f32 %v24943_v63, %v3459_v29  ;;  %v13979_v55 = vpop.f32.mrb[22].mxu0  ;;  %v24951_v33 = vmax.f32 %v24949_v58, %v24950_v31  ;;  %v16225_v63 = vld [vmem:[%s16446_s29 + $0x98] sm:$0xff]   ;;  %v24957_v31 = vld [vmem:[#allocation41_spill] sm:$0xff]  ;;  %v25204_v54 = vld [vmem:[#allocation222_spill] sm:$0xff] }
 0x31f   : > { %24939 = vst [vmem:[#allocation128_spill] sm:$0xff] %v19651_v17  ;;  %v19663_v32 = vmax.f32 %v24947_v8, %v13979_v55  ;;  %v3462_v24 = vpop.f32.mrb[23].mxu0  ;;  %v16226_v8 = vld [vmem:[%s16446_s29 + $0xa0] sm:$0xff]  }
 0x320   : > { %24944 = vst [vmem:[#allocation127_spill] sm:$0xff] %v19658_v25  ;;  %v19670_v57 = vmax.f32 %v24951_v33, %v3462_v24  ;;  %v24956_v58 = vld [vmem:[#allocation216_spill] sm:$0xff] }
 0x321   : > { %24948 = vst [vmem:[#allocation56_spill] sm:$0xff] %v19663_v32  ;;  %14169 = vmatmul.mubr.msk.bf16.gmra.mrb[128].mxu0 %vm700_vm0, %v16225_v63  ;;  %v19680_v38 = vpop.f32.mrb[16].mxu1  ;;  %v24958_v33 = vmax.f32 %v24956_v58, %v24957_v31  ;;  %v24970_v31 = vld [vmem:[#allocation45_spill] sm:$0xff]  ;;  %v24982_v58 = vld [vmem:[#allocation95_spill] sm:$0xff] }
 0x322   : > { %24952 = vst [vmem:[#allocation201_spill] sm:$0xff] %v19670_v57  ;;  %14172 = vmatprep.mubr.msk.bf16.mxu0 %vm700_vm0, %v16226_v8  ;;  %24953 = vst [vmem:[#allocation21_spill] sm:$0xff] %v19680_v38  ;;  %v19684_v24 = vpop.f32.mrb[17].mxu1  ;;  %v24961_v8 = vld [vmem:[#allocation83_spill] sm:$0xff] }
 0x323   : > { %24954 = vst [vmem:[#allocation205_spill] sm:$0xff] %v19684_v24  ;;  %v19686_v9 = vpop.f32.mrb[18].mxu1  ;;  %v24963_v20 = vmax.f32 %v24961_v8, %v24962_v11  ;;  %v24966_v57 = vld [vmem:[#allocation43_spill] sm:$0xff]  ;;  %v25208_v24 = vld [vmem:[#allocation158_spill] sm:$0xff] }
 0x324   : > { %v13982_v55 = vpop.f32.mrb[24].mxu0  ;;  %24955 = vst [vmem:[#allocation25_spill] sm:$0xff] %v19686_v9  ;;  %v19693_v50 = vpop.f32.mrb[19].mxu1  ;;  %v24967_v4 = vmax.f32 %v24965_v37, %v24966_v57 }
 0x325   : > { %v19691_v63 = vmax.f32 %v24958_v33, %v13982_v55  ;;  %v3475_v60 = vpop.f32.mrb[25].mxu0  ;;  %24960 = vst [vmem:[#allocation71_spill] sm:$0xff] %v19693_v50  ;;  %v24969_v55 = vld [vmem:[#allocation220_spill] sm:$0xff] }
 0x326   : > { %v19698_v32 = vmax.f32 %v24963_v20, %v3475_v60  ;;  %v13983_v29 = vpop.f32.mrb[26].mxu0  ;;  %v24971_v33 = vmax.f32 %v24969_v55, %v24970_v31  ;;  %v16227_v20 = vld [vmem:[%s16446_s29 + $0xa8] sm:$0xff]   ;;  %v24976_v55 = vld [vmem:[#allocation28_spill] sm:$0xff] }
 0x327   : > { %24959 = vst [vmem:[#allocation207_spill] sm:$0xff] %v19691_v63  ;;  %v19703_v25 = vmax.f32 %v24967_v4, %v13983_v29  ;;  %v3478_v53 = vpop.f32.mrb[27].mxu0  ;;  %v16228_v4 = vld [vmem:[%s16446_s29 + $0xb0] sm:$0xff]   ;;  %v24977_v31 = vld [vmem:[#allocation49_spill] sm:$0xff] }
 0x328   : > { %24964 = vst [vmem:[#allocation138_spill] sm:$0xff] %v19698_v32  ;;  %v19710_v17 = vmax.f32 %v24971_v33, %v3478_v53  ;;  %v24978_v33 = vmax.f32 %v24976_v55, %v24977_v31  ;;  %v24990_v31 = vld [vmem:[#allocation53_spill] sm:$0xff]  ;;  %v25001_v55 = vld [vmem:[#allocation38_spill] sm:$0xff] }
 0x329   : > { %24968 = vst [vmem:[#allocation27_spill] sm:$0xff] %v19703_v25  ;;  %14173 = vmatmul.mubr.msk.bf16.gmra.mrb[132].mxu0 %vm700_vm0, %v16227_v20  ;;  %v19720_v57 = vpop.f32.mrb[20].mxu1 }
 0x32a   : > { %24972 = vst [vmem:[#allocation208_spill] sm:$0xff] %v19710_v17  ;;  %14176 = vmatprep.mubr.msk.bf16.mxu0 %vm700_vm0, %v16228_v4  ;;  %24973 = vst [vmem:[#allocation29_spill] sm:$0xff] %v19720_v57  ;;  %v19724_v53 = vpop.f32.mrb[21].mxu1  ;;  %v24981_v4 = vld [vmem:[#allocation5_spill] sm:$0xff]  ;;  %v24986_v17 = vld [vmem:[#allocation51_spill] sm:$0xff] }
 0x32b   : > { %24974 = vst [vmem:[#allocation75_spill] sm:$0xff] %v19724_v53  ;;  %v19726_v8 = vpop.f32.mrb[22].mxu1  ;;  %v24983_v21 = vmax.f32 %v24981_v4, %v24982_v58  ;;  %v24987_v19 = vmax.f32 %v24985_v12, %v24986_v17 }
 0x32c   : > { %v13986_v29 = vpop.f32.mrb[28].mxu0  ;;  %24975 = vst [vmem:[#allocation33_spill] sm:$0xff] %v19726_v8  ;;  %v19733_v11 = vpop.f32.mrb[23].mxu1 }
 0x32d   : > { %v19731_v20 = vmax.f32 %v24978_v33, %v13986_v29  ;;  %v3491_v37 = vpop.f32.mrb[29].mxu0  ;;  %24980 = vst [vmem:[#allocation79_spill] sm:$0xff] %v19733_v11  ;;  %v24989_v29 = vld [vmem:[#allocation91_spill] sm:$0xff]  ;;  %v25235_v11 = vld [vmem:[#allocation14_spill] sm:$0xff] }
 0x32e   : > { %v19738_v25 = vmax.f32 %v24983_v21, %v3491_v37  ;;  %v13987_v60 = vpop.f32.mrb[30].mxu0  ;;  %v24991_v33 = vmax.f32 %v24989_v29, %v24990_v31  ;;  %v16229_v21 = vld [vmem:[%s16446_s29 + $0xb8] sm:$0xff]   ;;  %v24996_v29 = vld [vmem:[#allocation34_spill] sm:$0xff]  ;;  %v24997_v31 = vld [vmem:[#allocation57_spill] sm:$0xff] }
 0x32f   : > { %24979 = vst [vmem:[#allocation212_spill] sm:$0xff] %v19731_v20  ;;  %v19743_v32 = vmax.f32 %v24987_v19, %v13987_v60  ;;  %v3494_v36 = vpop.f32.mrb[31].mxu0  ;;  %v16230_v19 = vld [vmem:[%s16446_s29 + $0xc0] sm:$0xff]   ;;  %v25005_v37 = vld [vmem:[#allocation170_spill] sm:$0xff]  ;;  %v23587_v20 = vmov 0  }
 0x330   : > { %24984 = vst [vmem:[#allocation147_spill] sm:$0xff] %v19738_v25  ;;  %v19750_v63 = vmax.f32 %v24991_v33, %v3494_v36  ;;  %v24998_v33 = vmax.f32 %v24996_v29, %v24997_v31  ;;  %7071 = vmatprep.subr.bf16.mxu0 %v23587_v20  ;;  %15570 = vset.pattern.permute.xlu0 %v23587_v20  ;;  %v25009_v29 = vld [vmem:[#allocation36_spill] sm:$0xff]  ;;  %v25024_v20 = vld [vmem:[#allocation111_spill] sm:$0xff] }
 0x331   : > { %24988 = vst [vmem:[#allocation35_spill] sm:$0xff] %v19743_v32  ;;  %14177 = vmatmul.mubr.msk.bf16.gmra.mrb[136].mxu0 %vm700_vm0, %v16229_v21  ;;  %v19760_v17 = vpop.f32.mrb[24].mxu1  ;;  %v25010_v31 = vld [vmem:[#allocation60_spill] sm:$0xff] }
 0x332   : > { %24992 = vst [vmem:[#allocation214_spill] sm:$0xff] %v19750_v63  ;;  %14180 = vmatprep.mubr.msk.bf16.mxu0 %vm700_vm0, %v16230_v19  ;;  %24993 = vst [vmem:[#allocation37_spill] sm:$0xff] %v19760_v17  ;;  %v19764_v60 = vpop.f32.mrb[25].mxu1  ;;  %v25002_v19 = vld [vmem:[#allocation101_spill] sm:$0xff]  ;;  %v25007_v63 = vmax.f32 %v25005_v37, %v25006_v42 }
 0x333   : > { %24994 = vst [vmem:[#allocation216_spill] sm:$0xff] %v19764_v60  ;;  %v19766_v4 = vpop.f32.mrb[26].mxu1  ;;  %v25003_v28 = vmax.f32 %v25001_v55, %v25002_v19  ;;  %v25011_v55 = vmax.f32 %v25009_v29, %v25010_v31  ;;  %v25018_v31 = vld [vmem:[#allocation44_spill] sm:$0xff]  ;;  %v25027_v37 = vld [vmem:[#allocation177_spill] sm:$0xff]  ;;  %v25239_v60 = vld [vmem:[#allocation175_spill] sm:$0xff] }
 0x334   : > { %v13990_v36 = vpop.f32.mrb[32].mxu0  ;;  %24995 = vst [vmem:[#allocation41_spill] sm:$0xff] %v19766_v4  ;;  %v19773_v12 = vpop.f32.mrb[27].mxu1 }
 0x335   : > { %v19771_v21 = vmax.f32 %v24998_v33, %v13990_v36  ;;  %v3507_v58 = vpop.f32.mrb[33].mxu0  ;;  %25000 = vst [vmem:[#allocation87_spill] sm:$0xff] %v19773_v12 }
 0x336   : > { %v19778_v32 = vmax.f32 %v25003_v28, %v3507_v58  ;;  %v13991_v62 = vpop.f32.mrb[34].mxu0 }
 0x337   : > { %24999 = vst [vmem:[#allocation83_spill] sm:$0xff] %v19771_v21  ;;  %v19783_v25 = vmax.f32 %v25007_v63, %v13991_v62  ;;  %v3510_v5 = vpop.f32.mrb[35].mxu0 }
 0x338   : > { %25004 = vst [vmem:[#allocation85_spill] sm:$0xff] %v19778_v32  ;;  %v19792_v28 = vmax.f32 %v25011_v55, %v3510_v5 }
 0x339   : > { %25008 = vst [vmem:[#allocation43_spill] sm:$0xff] %v19783_v25  ;;  %14181 = vmatmul.mubr.msk.bf16.gmra.mrb[140].mxu0 %vm700_vm0, %v18931_v41  ;;  %v19802_v63 = vpop.f32.mrb[28].mxu1  ;;  %v25019_v41 = vld [vmem:[#allocation65_spill] sm:$0xff] }
 0x33a   : > { %25012 = vst [vmem:[#allocation220_spill] sm:$0xff] %v19792_v28  ;;  %14184 = vmatprep.mubr.msk.bf16.mxu0 %vm700_vm0, %v18938_v47  ;;  %25014 = vst [vmem:[#allocation45_spill] sm:$0xff] %v19802_v63  ;;  %v19806_v5 = vpop.f32.mrb[29].mxu1  ;;  %v25020_v55 = vmax.f32 %v25018_v31, %v25019_v41  ;;  %v25023_v47 = vld [vmem:[#allocation42_spill] sm:$0xff]  ;;  %v25033_v41 = vld [vmem:[#allocation68_spill] sm:$0xff] }
 0x33b   : > { %25016 = vst [vmem:[#allocation28_spill] sm:$0xff] %v19806_v5  ;;  %v19808_v29 = vpop.f32.mrb[30].mxu1  ;;  %v25025_v42 = vmax.f32 %v25023_v47, %v25024_v20  ;;  %v25028_v28 = vld [vmem:[#allocation66_spill] sm:$0xff] }
 0x33c   : > { %v13994_v19 = vpop.f32.mrb[36].mxu0  ;;  %25017 = vst [vmem:[#allocation49_spill] sm:$0xff] %v19808_v29  ;;  %v19815_v36 = vpop.f32.mrb[31].mxu1  ;;  %v25029_v18 = vmax.f32 %v25027_v37, %v25028_v28 }
 0x33d   : > { %v19813_v58 = vmax.f32 %v25020_v55, %v13994_v19  ;;  %v3523_v62 = vpop.f32.mrb[37].mxu0  ;;  %25022 = vst [vmem:[#allocation95_spill] sm:$0xff] %v19815_v36  ;;  %v25032_v19 = vld [vmem:[#allocation46_spill] sm:$0xff] }
 0x33e   : > { %v19820_v25 = vmax.f32 %v25025_v42, %v3523_v62  ;;  %v13995_v33 = vpop.f32.mrb[38].mxu0  ;;  %v25034_v55 = vmax.f32 %v25032_v19, %v25033_v41  ;;  %v16231_v42 = vld [vmem:[%s16446_s29 + $0xd8] sm:$0xff]  }
 0x33f   : > { %25021 = vst [vmem:[#allocation5_spill] sm:$0xff] %v19813_v58  ;;  %v19825_v32 = vmax.f32 %v25029_v18, %v13995_v33  ;;  %v3526_v3 = vpop.f32.mrb[39].mxu0  ;;  %v16232_v18 = vld [vmem:[%s16446_s29 + $0xe0] sm:$0xff]  }
 0x340   : > { %25026 = vst [vmem:[#allocation162_spill] sm:$0xff] %v19820_v25  ;;  %v19832_v40 = vmax.f32 %v25034_v55, %v3526_v3  ;;  %v25042_v55 = vld [vmem:[#allocation224_spill] sm:$0xff]  ;;  %v25051_v33 = vld [vmem:[#allocation181_spill] sm:$0xff] }
 0x341   : > { %25030 = vst [vmem:[#allocation51_spill] sm:$0xff] %v19825_v32  ;;  %14185 = vmatmul.mubr.msk.bf16.gmra.mrb[144].mxu0 %vm700_vm0, %v16231_v42  ;;  %v19842_v37 = vpop.f32.mrb[32].mxu1  ;;  %v25043_v42 = vld [vmem:[#allocation74_spill] sm:$0xff]  ;;  %v25048_v32 = vld [vmem:[#allocation123_spill] sm:$0xff] }
 0x342   : > { %25035 = vst [vmem:[#allocation91_spill] sm:$0xff] %v19832_v40  ;;  %14188 = vmatprep.mubr.msk.bf16.mxu0 %vm700_vm0, %v16232_v18  ;;  %25038 = vst [vmem:[#allocation53_spill] sm:$0xff] %v19842_v37  ;;  %v19846_v3 = vpop.f32.mrb[33].mxu1  ;;  %v25044_v20 = vmax.f32 %v25042_v55, %v25043_v42  ;;  %v25047_v18 = vld [vmem:[#allocation54_spill] sm:$0xff]  ;;  %v25052_v40 = vld [vmem:[#allocation76_spill] sm:$0xff] }
 0x343   : > { %25040 = vst [vmem:[#allocation34_spill] sm:$0xff] %v19846_v3  ;;  %v19848_v41 = vpop.f32.mrb[34].mxu1  ;;  %v25049_v13 = vmax.f32 %v25047_v18, %v25048_v32  ;;  %v25053_v21 = vmax.f32 %v25051_v33, %v25052_v40 }
 0x344   : > { %v13998_v19 = vpop.f32.mrb[40].mxu0  ;;  %25041 = vst [vmem:[#allocation57_spill] sm:$0xff] %v19848_v41  ;;  %v19855_v62 = vpop.f32.mrb[35].mxu1 }
 0x345   : > { %v19853_v31 = vmax.f32 %v25044_v20, %v13998_v19  ;;  %v3539_v28 = vpop.f32.mrb[41].mxu0  ;;  %25046 = vst [vmem:[#allocation101_spill] sm:$0xff] %v19855_v62  ;;  %v25055_v20 = vld [vmem:[#allocation52_spill] sm:$0xff]  ;;  %v25056_v19 = vld [vmem:[#allocation78_spill] sm:$0xff]  ;;  %v25276_v62 = vld [vmem:[#allocation15_spill] sm:$0xff] }
 0x346   : > { %v19860_v25 = vmax.f32 %v25049_v13, %v3539_v28  ;;  %v13999_v47 = vpop.f32.mrb[42].mxu0  ;;  %v25057_v42 = vmax.f32 %v25055_v20, %v25056_v19  ;;  %v16233_v13 = vld [vmem:[%s16446_s29 + $0xe8] sm:$0xff]  }
 0x347   : > { %25045 = vst [vmem:[#allocation38_spill] sm:$0xff] %v19853_v31  ;;  %v19865_v58 = vmax.f32 %v25053_v21, %v13999_v47  ;;  %v3542_v41 = vpop.f32.mrb[43].mxu0  ;;  %v16234_v21 = vld [vmem:[%s16446_s29 + $0xf0] sm:$0xff]   ;;  %v25071_v47 = vld [vmem:[#allocation184_spill] sm:$0xff] }
 0x348   : > { %25050 = vst [vmem:[#allocation170_spill] sm:$0xff] %v19860_v25  ;;  %v19872_v3 = vmax.f32 %v25057_v42, %v3542_v41  ;;  %v25063_v42 = vld [vmem:[#allocation16_spill] sm:$0xff] }
 0x349   : > { %25054 = vst [vmem:[#allocation58_spill] sm:$0xff] %v19865_v58  ;;  %14189 = vmatmul.mubr.msk.bf16.gmra.mrb[148].mxu0 %vm700_vm0, %v16233_v13  ;;  %v19882_v33 = vpop.f32.mrb[36].mxu1  ;;  %v25064_v13 = vld [vmem:[#allocation134_spill] sm:$0xff] }
 0x34a   : > { %25058 = vst [vmem:[#allocation36_spill] sm:$0xff] %v19872_v3  ;;  %14192 = vmatprep.mubr.msk.bf16.mxu0 %vm700_vm0, %v16234_v21  ;;  %v19886_v41 = vpop.f32.mrb[37].mxu1  ;;  %v25065_v32 = vmax.f32 %v25063_v42, %v25064_v13  ;;  %v25067_v21 = vld [vmem:[#allocation61_spill] sm:$0xff]  ;;  %v25068_v58 = vld [vmem:[#allocation86_spill] sm:$0xff] }
 0x34b   : > { %25061 = vst [vmem:[#allocation60_spill] sm:$0xff] %v19886_v41  ;;  %v19888_v19 = vpop.f32.mrb[38].mxu1  ;;  %v25069_v30 = vmax.f32 %v25067_v21, %v25068_v58  ;;  %v25072_v3 = vld [vmem:[#allocation225_spill] sm:$0xff] }
 0x34c   : > { %v14002_v20 = vpop.f32.mrb[44].mxu0  ;;  %25062 = vst [vmem:[#allocation44_spill] sm:$0xff] %v19888_v19  ;;  %v19895_v28 = vpop.f32.mrb[39].mxu1  ;;  %v25073_v56 = vmax.f32 %v25071_v47, %v25072_v3 }
 0x34d   : > { %v19893_v55 = vmax.f32 %v25065_v32, %v14002_v20  ;;  %v3555_v40 = vpop.f32.mrb[45].mxu0  ;;  %v25075_v32 = vld [vmem:[#allocation17_spill] sm:$0xff] }
 0x34e   : > { %v19900_v25 = vmax.f32 %v25069_v30, %v3555_v40  ;;  %v14003_v18 = vpop.f32.mrb[46].mxu0  ;;  %v25076_v20 = vld [vmem:[#allocation89_spill] sm:$0xff]  ;;  %v16235_v30 = vld [vmem:[%s16446_s29 + $0xf8] sm:$0xff]  }
 0x34f   : > { %25066 = vst [vmem:[#allocation65_spill] sm:$0xff] %v19893_v55  ;;  %v19905_v31 = vmax.f32 %v25073_v56, %v14003_v18  ;;  %v3558_v19 = vpop.f32.mrb[47].mxu0  ;;  %v25077_v13 = vmax.f32 %v25075_v32, %v25076_v20  ;;  %v16236_v56 = vld [vmem:[%s16446_s29 + $0x100] sm:$0xff]   ;;  %v25091_v18 = vld [vmem:[#allocation126_spill] sm:$0xff] }
 0x350   : > { %25070 = vst [vmem:[#allocation42_spill] sm:$0xff] %v19900_v25 }
 0x351   : > { %25074 = vst [vmem:[#allocation111_spill] sm:$0xff] %v19905_v31  ;;  %v19912_v41 = vmax.f32 %v25077_v13, %v3558_v19  ;;  %14193 = vmatmul.mubr.msk.bf16.gmra.mrb[152].mxu0 %vm700_vm0, %v16235_v30  ;;  %v19922_v47 = vpop.f32.mrb[40].mxu1  ;;  %v25083_v13 = vld [vmem:[#allocation20_spill] sm:$0xff] }
 0x352   : > { %14196 = vmatprep.mubr.msk.bf16.mxu0 %vm700_vm0, %v16236_v56  ;;  %v19926_v19 = vpop.f32.mrb[41].mxu1  ;;  %v25084_v30 = vld [vmem:[#allocation92_spill] sm:$0xff]  ;;  %v25087_v56 = vld [vmem:[#allocation22_spill] sm:$0xff] }
 0x353   : > { %25078 = vst [vmem:[#allocation177_spill] sm:$0xff] %v19912_v41  ;;  %25081 = vst [vmem:[#allocation66_spill] sm:$0xff] %v19926_v19  ;;  %v19928_v20 = vpop.f32.mrb[42].mxu1  ;;  %v25085_v58 = vmax.f32 %v25083_v13, %v25084_v30  ;;  %v25088_v31 = vld [vmem:[#allocation144_spill] sm:$0xff]  ;;  %v25092_v41 = vld [vmem:[#allocation94_spill] sm:$0xff] }
 0x354   : > { %v14006_v32 = vpop.f32.mrb[48].mxu0  ;;  %25082 = vst [vmem:[#allocation46_spill] sm:$0xff] %v19928_v20  ;;  %v19935_v40 = vpop.f32.mrb[43].mxu1  ;;  %v25089_v43 = vmax.f32 %v25087_v56, %v25088_v31  ;;  %v25093_v52 = vmax.f32 %v25091_v18, %v25092_v41  ;;  %v25109_v18 = vld [vmem:[#allocation136_spill] sm:$0xff] }
 0x355   : > { %v19933_v42 = vmax.f32 %v25085_v58, %v14006_v32  ;;  %v3571_v3 = vpop.f32.mrb[49].mxu0  ;;  %v25095_v58 = vld [vmem:[#allocation23_spill] sm:$0xff]  ;;  %v25096_v32 = vld [vmem:[#allocation97_spill] sm:$0xff] }
 0x356   : > { %v19940_v25 = vmax.f32 %v25089_v43, %v3571_v3  ;;  %v14007_v21 = vpop.f32.mrb[50].mxu0  ;;  %v25097_v30 = vmax.f32 %v25095_v58, %v25096_v32  ;;  %v16237_v43 = vld [vmem:[%s16446_s29 + $0x108] sm:$0xff]  }
 0x357   : > { %25086 = vst [vmem:[#allocation68_spill] sm:$0xff] %v19933_v42  ;;  %v19945_v55 = vmax.f32 %v25093_v52, %v14007_v21  ;;  %v3574_v20 = vpop.f32.mrb[51].mxu0  ;;  %v16238_v52 = vld [vmem:[%s16446_s29 + $0x110] sm:$0xff]   ;;  %v25101_v32 = vld [vmem:[#allocation185_spill] sm:$0xff] }
 0x358   : > { %25090 = vst [vmem:[#allocation224_spill] sm:$0xff] %v19940_v25  ;;  %v19952_v19 = vmax.f32 %v25097_v30, %v3574_v20  ;;  %v25102_v30 = vld [vmem:[#allocation100_spill] sm:$0xff] }
 0x359   : > { %25094 = vst [vmem:[#allocation74_spill] sm:$0xff] %v19945_v55  ;;  %14197 = vmatmul.mubr.msk.bf16.gmra.mrb[156].mxu0 %vm700_vm0, %v16237_v43  ;;  %v19962_v3 = vpop.f32.mrb[44].mxu1  ;;  %v25103_v43 = vmax.f32 %v25101_v32, %v25102_v30  ;;  %v25114_v30 = vld [vmem:[#allocation107_spill] sm:$0xff]  ;;  %v25122_v32 = vld [vmem:[#allocation164_spill] sm:$0xff] }
 0x35a   : > { %25098 = vst [vmem:[#allocation54_spill] sm:$0xff] %v19952_v19  ;;  %14200 = vmatprep.mubr.msk.bf16.mxu0 %vm700_vm0, %v16238_v52  ;;  %v19966_v20 = vpop.f32.mrb[45].mxu1  ;;  %v25105_v52 = vld [vmem:[#allocation186_spill] sm:$0xff] }
 0x35b   : > { %v19968_v58 = vpop.f32.mrb[46].mxu1  ;;  %v25107_v55 = vmax.f32 %v25105_v52, %v25106_v16  ;;  %v25110_v19 = vld [vmem:[#allocation102_spill] sm:$0xff] }
 0x35c   : > { %v14010_v56 = vpop.f32.mrb[52].mxu0  ;;  %25100 = vst [vmem:[#allocation123_spill] sm:$0xff] %v19968_v58  ;;  %v19975_v13 = vpop.f32.mrb[47].mxu1  ;;  %v25111_v25 = vmax.f32 %v25109_v18, %v25110_v19 }
 0x35d   : > { %v19973_v31 = vmax.f32 %v25103_v43, %v14010_v56  ;;  %v3587_v41 = vpop.f32.mrb[53].mxu0  ;;  %v25113_v56 = vld [vmem:[#allocation187_spill] sm:$0xff] }
 0x35e   : > { %v19980_v6 = vmax.f32 %v25107_v55, %v3587_v41  ;;  %v14011_v21 = vpop.f32.mrb[54].mxu0  ;;  %v25115_v43 = vmax.f32 %v25113_v56, %v25114_v30  ;;  %v16239_v55 = vld [vmem:[%s16446_s29 + $0x118] sm:$0xff]   ;;  %v25118_v30 = vld [vmem:[#allocation110_spill] sm:$0xff] }
 0x35f   : > { %25104 = vst [vmem:[#allocation181_spill] sm:$0xff] %v19973_v31  ;;  %v19985_v27 = vmax.f32 %v25111_v25, %v14011_v21  ;;  %v3590_v42 = vpop.f32.mrb[55].mxu0  ;;  %v16240_v25 = vld [vmem:[%s16446_s29 + $0x120] sm:$0xff]  }
 0x360   : > { %25108 = vst [vmem:[#allocation76_spill] sm:$0xff] %v19980_v6  ;;  %v19992_v58 = vmax.f32 %v25115_v43, %v3590_v42  ;;  %v25117_v56 = vld [vmem:[#allocation8_spill] sm:$0xff] }
 0x361   : > { %25112 = vst [vmem:[#allocation52_spill] sm:$0xff] %v19985_v27  ;;  %14201 = vmatmul.mubr.msk.bf16.gmra.mrb[160].mxu0 %vm700_vm0, %v16239_v55  ;;  %v20002_v41 = vpop.f32.mrb[48].mxu1  ;;  %v25119_v43 = vmax.f32 %v25117_v56, %v25118_v30  ;;  %v25130_v30 = vld [vmem:[#allocation117_spill] sm:$0xff]  ;;  %v25138_v56 = vld [vmem:[#allocation174_spill] sm:$0xff] }
 0x362   : > { %25116 = vst [vmem:[#allocation78_spill] sm:$0xff] %v19992_v58  ;;  %14204 = vmatprep.mubr.msk.bf16.mxu0 %vm700_vm0, %v16240_v25  ;;  %v20006_v42 = vpop.f32.mrb[49].mxu1  ;;  %v25121_v25 = vld [vmem:[#allocation190_spill] sm:$0xff]  ;;  %v25126_v58 = vld [vmem:[#allocation112_spill] sm:$0xff] }
 0x363   : > { %v20008_v52 = vpop.f32.mrb[50].mxu1  ;;  %v25123_v39 = vmax.f32 %v25121_v25, %v25122_v32  ;;  %v25127_v2 = vmax.f32 %v25125_v10, %v25126_v58 }
 0x364   : > { %v14014_v21 = vpop.f32.mrb[56].mxu0  ;;  %v20015_v16 = vpop.f32.mrb[51].mxu1 }
 0x365   : > { %v20013_v55 = vmax.f32 %v25119_v43, %v14014_v21  ;;  %v3603_v19 = vpop.f32.mrb[57].mxu0  ;;  %v25129_v21 = vld [vmem:[#allocation191_spill] sm:$0xff] }
 0x366   : > { %v20020_v27 = vmax.f32 %v25123_v39, %v3603_v19  ;;  %v14015_v18 = vpop.f32.mrb[58].mxu0  ;;  %v25131_v43 = vmax.f32 %v25129_v21, %v25130_v30  ;;  %v16241_v39 = vld [vmem:[%s16446_s29 + $0x128] sm:$0xff]   ;;  %v25133_v21 = vld [vmem:[#allocation11_spill] sm:$0xff]  ;;  %v25134_v30 = vld [vmem:[#allocation120_spill] sm:$0xff] }
 0x367   : > { %25120 = vst [vmem:[#allocation16_spill] sm:$0xff] %v20013_v55  ;;  %v20025_v6 = vmax.f32 %v25127_v2, %v14015_v18  ;;  %v3606_v22 = vpop.f32.mrb[59].mxu0  ;;  %v16242_v2 = vld [vmem:[%s16446_s29 + $0x130] sm:$0xff]   ;;  %v25141_v19 = vld [vmem:[#allocation156_spill] sm:$0xff] }
 0x368   : > { %25124 = vst [vmem:[#allocation134_spill] sm:$0xff] %v20020_v27  ;;  %v20032_v31 = vmax.f32 %v25131_v43, %v3606_v22  ;;  %v25135_v43 = vmax.f32 %v25133_v21, %v25134_v30  ;;  %v25146_v30 = vld [vmem:[#allocation227_spill] sm:$0xff] }
 0x369   : > { %25128 = vst [vmem:[#allocation61_spill] sm:$0xff] %v20025_v6  ;;  %14205 = vmatmul.mubr.msk.bf16.gmra.mrb[164].mxu0 %vm700_vm0, %v16241_v39  ;;  %v20042_v58 = vpop.f32.mrb[52].mxu1 }
 0x36a   : > { %25132 = vst [vmem:[#allocation86_spill] sm:$0xff] %v20032_v31  ;;  %14208 = vmatprep.mubr.msk.bf16.mxu0 %vm700_vm0, %v16242_v2  ;;  %v20046_v22 = vpop.f32.mrb[53].mxu1  ;;  %v25137_v2 = vld [vmem:[#allocation12_spill] sm:$0xff]  ;;  %v25143_v31 = vmax.f32 %v25141_v19, %v25142_v46 }
 0x36b   : > { %v20048_v25 = vpop.f32.mrb[54].mxu1  ;;  %v25139_v61 = vmax.f32 %v25137_v2, %v25138_v56 }
 0x36c   : > { %v14018_v18 = vpop.f32.mrb[60].mxu0  ;;  %v20055_v32 = vpop.f32.mrb[55].mxu1 }
 0x36d   : > { %v20053_v39 = vmax.f32 %v25135_v43, %v14018_v18  ;;  %v3619_v10 = vpop.f32.mrb[61].mxu0  ;;  %v25145_v18 = vld [vmem:[#allocation195_spill] sm:$0xff] }
 0x36e   : > { %v20060_v6 = vmax.f32 %v25139_v61, %v3619_v10  ;;  %v14019_v34 = vpop.f32.mrb[62].mxu0  ;;  %v25147_v43 = vmax.f32 %v25145_v18, %v25146_v30  ;;  %v16243_v61 = vld [vmem:[%s16446_s29 + $0x138] sm:$0xff]   ;;  %s16248_s29 = sshll.u32 %s16321_s25, 4  ;;  %s16249_s29 = int_to_ptr.vmem [resolvable:$false] %s16248_s29 }
 0x36f   : > { %25136 = vst [vmem:[#allocation184_spill] sm:$0xff] %v20053_v39  ;;  %v20065_v27 = vmax.f32 %v25143_v31, %v14019_v34  ;;  %v3622_v0 = vpop.f32.mrb[63].mxu0  ;;  %v25155_v31 = vld [vmem:[#allocation198_spill] sm:$0xff]  ;;  %p16251_p0 = scmp.lt.s32.totalorder %s22983_s19, %s16249_s29 }
 0x370   : > { %25140 = vst [vmem:[#allocation225_spill] sm:$0xff] %v20060_v6  ;;  %v20072_v55 = vmax.f32 %v25147_v43, %v3622_v0  ;;  %v15701_v0 = vld [vmem:[%s25149_s1 + $0x4] ss:$20 sps:$4 sm:$0xff]   ;;  %v25159_v6 = vld [vmem:[#allocation166_spill] sm:$0xff] }
 0x371   : > { %25144 = vst [vmem:[#allocation17_spill] sm:$0xff] %v20065_v27  ;;  %14209 = vmatmul.mubr.msk.bf16.gmra.mrb[168].mxu0 %vm700_vm0, %v16243_v61  ;;  %v20080_v34 = vpop.f32.mrb[56].mxu1  ;;  %v25151_v43 = vld [vmem:[#allocation197_spill] sm:$0xff]  ;;  %v25152_v61 = vld [vmem:[#allocation132_spill] sm:$0xff]  ;;  %v25161_v39 = vmax.f32 %v25159_v6, %v25160_v1 }
 0x372   : > { %25148 = vst [vmem:[#allocation89_spill] sm:$0xff] %v20072_v55  ;;  %v20084_v10 = vpop.f32.mrb[57].mxu1  ;;  %v25153_v46 = vmax.f32 %v25151_v43, %v25152_v61  ;;  %7103 = vmatprep.mubr.bf16.mxu0 %v15701_v0  ;;  %v25157_v55 = vmax.f32 %v25155_v31, %v25156_v14  ;;  %v25164_v43 = vld [vmem:[#allocation137_spill] sm:$0xff]  ;;  %v25171_v14 = vld [vmem:[#allocation104_spill] sm:$0xff] }
 0x373   : > { %v20086_v2 = vpop.f32.mrb[58].mxu1  ;;  %v25173_v59 = vmax.f32 %v25171_v14, %v25172_v44  ;;  %v25187_v44 = vld [vmem:[#allocation114_spill] sm:$0xff] }
 0x374   : > { %v14022_v19 = vpop.f32.mrb[64].mxu0  ;;  %v20091_v30 = vpop.f32.mrb[59].mxu1  ;;  %v25189_v23 = vmax.f32 %v25187_v44, %v25188_v51  ;;  %v25203_v51 = vld [vmem:[#allocation124_spill] sm:$0xff] }
 0x375   : > { %v3635_v18 = vpop.f32.mrb[65].mxu0  ;;  %25150 = vst [vmem:[#allocation20_spill] sm:$0xff] %v20091_v30  ;;  %v20096_v56 = vmax.f32 %v25153_v46, %v14022_v19  ;;  %v25163_v19 = vld [vmem:[#allocation199_spill] sm:$0xff]  ;;  %v25205_v9 = vmax.f32 %v25203_v51, %v25204_v54  ;;  %v25218_v54 = vld [vmem:[#allocation221_spill] sm:$0xff] }
 0x376   : > { %v14023_v21 = vpop.f32.mrb[66].mxu0  ;;  %v20101_v7 = vmax.f32 %v25157_v55, %v3635_v18  ;;  %v25165_v0 = vmax.f32 %v25163_v19, %v25164_v43  ;;  %v25167_v46 = vld [vmem:[#allocation103_spill] sm:$0xff]  ;;  %v25168_v19 = vld [vmem:[#allocation140_spill] sm:$0xff] }
 0x377   : > { %25154 = vst [vmem:[#allocation92_spill] sm:$0xff] %v20096_v56  ;;  %v3638_v27 = vpop.f32.mrb[67].mxu0  ;;  %v20108_v30 = vmax.f32 %v25161_v39, %v14023_v21 }
 0x378   : > { %25158 = vst [vmem:[#allocation22_spill] sm:$0xff] %v20101_v7  ;;  %v20115_v61 = vmax.f32 %v25165_v0, %v3638_v27  ;;  %v25169_v27 = vmax.f32 %v25167_v46, %v25168_v19  ;;  %v25180_v19 = vld [vmem:[#allocation77_spill] sm:$0xff] }
 0x379   : > { %25162 = vst [vmem:[#allocation144_spill] sm:$0xff] %v20108_v30  ;;  %v20119_v55 = vpop.f32.mrb[60].mxu1  ;;  %v25183_v46 = vld [vmem:[#allocation113_spill] sm:$0xff] }
 0x37a   : > { %25166 = vst [vmem:[#allocation126_spill] sm:$0xff] %v20115_v61  ;;  %v20123_v18 = vpop.f32.mrb[61].mxu1  ;;  %v25175_v61 = vld [vmem:[#allocation203_spill] sm:$0xff] }
 0x37b   : > { %v20125_v1 = vpop.f32.mrb[62].mxu1  ;;  %v25177_v7 = vmax.f32 %v25175_v61, %v25176_v48 }
 0x37c   : > { %v14026_v6 = vpop.f32.mrb[68].mxu0  ;;  %v20127_v21 = vpop.f32.mrb[63].mxu1 }
 0x37d   : > { %v3651_v39 = vpop.f32.mrb[69].mxu0  ;;  %v20132_v43 = vmax.f32 %v25169_v27, %v14026_v6  ;;  %v25179_v6 = vld [vmem:[#allocation62_spill] sm:$0xff] }
 0x37e   : > { %v14027_v0 = vpop.f32.mrb[70].mxu0  ;;  %v20137_v30 = vmax.f32 %v25173_v59, %v3651_v39  ;;  %v25181_v27 = vmax.f32 %v25179_v6, %v25180_v19  ;;  %v25184_v6 = vld [vmem:[#allocation148_spill] sm:$0xff] }
 0x37f   : > { %25170 = vst [vmem:[#allocation94_spill] sm:$0xff] %v20132_v43  ;;  %v3654_v31 = vpop.f32.mrb[71].mxu0  ;;  %v20144_v35 = vmax.f32 %v25177_v7, %v14027_v0 }
 0x380   : > { %25174 = vst [vmem:[#allocation23_spill] sm:$0xff] %v20137_v30  ;;  %v20151_v56 = vmax.f32 %v25181_v27, %v3654_v31  ;;  %v25185_v31 = vmax.f32 %v25183_v46, %v25184_v6  ;;  %v25196_v6 = vld [vmem:[#allocation152_spill] sm:$0xff]  ;;  %v25199_v46 = vld [vmem:[#allocation73_spill] sm:$0xff] }
 0x381   : > { %25178 = vst [vmem:[#allocation97_spill] sm:$0xff] %v20144_v35  ;;  %v20155_v59 = vpop.f32.mrb[64].mxu1 }
 0x382   : > { %25182 = vst [vmem:[#allocation185_spill] sm:$0xff] %v20151_v56  ;;  %v20159_v39 = vpop.f32.mrb[65].mxu1  ;;  %v25191_v56 = vld [vmem:[#allocation210_spill] sm:$0xff] }
 0x383   : > { %v20161_v48 = vpop.f32.mrb[66].mxu1  ;;  %v25193_v30 = vmax.f32 %v25191_v56, %v25192_v15 }
 0x384   : > { %v14030_v7 = vpop.f32.mrb[72].mxu0  ;;  %v20163_v0 = vpop.f32.mrb[67].mxu1 }
 0x385   : > { %v3667_v61 = vpop.f32.mrb[73].mxu0  ;;  %v20168_v19 = vmax.f32 %v25185_v31, %v14030_v7  ;;  %v25195_v7 = vld [vmem:[#allocation70_spill] sm:$0xff] }
 0x386   : > { %v14031_v27 = vpop.f32.mrb[74].mxu0  ;;  %v20173_v35 = vmax.f32 %v25189_v23, %v3667_v61  ;;  %v25197_v31 = vmax.f32 %v25195_v7, %v25196_v6  ;;  %v25200_v7 = vld [vmem:[#allocation157_spill] sm:$0xff] }
 0x387   : > { %25186 = vst [vmem:[#allocation100_spill] sm:$0xff] %v20168_v19  ;;  %v3670_v14 = vpop.f32.mrb[75].mxu0  ;;  %v20180_v45 = vmax.f32 %v25193_v30, %v14031_v27 }
 0x388   : > { %25190 = vst [vmem:[#allocation186_spill] sm:$0xff] %v20173_v35  ;;  %v20187_v43 = vmax.f32 %v25197_v31, %v3670_v14  ;;  %v25201_v14 = vmax.f32 %v25199_v46, %v25200_v7  ;;  %v25212_v7 = vld [vmem:[#allocation160_spill] sm:$0xff]  ;;  %v25219_v46 = vld [vmem:[#allocation9_spill] sm:$0xff] }
 0x389   : > { %25194 = vst [vmem:[#allocation154_spill] sm:$0xff] %v20180_v45  ;;  %v20191_v23 = vpop.f32.mrb[68].mxu1  ;;  %v25220_v50 = vmax.f32 %v25218_v54, %v25219_v46 }
 0x38a   : > { %25198 = vst [vmem:[#allocation136_spill] sm:$0xff] %v20187_v43  ;;  %v20195_v61 = vpop.f32.mrb[69].mxu1  ;;  %v25207_v43 = vld [vmem:[#allocation217_spill] sm:$0xff] }
 0x38b   : > { %v20197_v56 = vpop.f32.mrb[70].mxu1  ;;  %v25209_v35 = vmax.f32 %v25207_v43, %v25208_v24 }
 0x38c   : > { %v14034_v15 = vpop.f32.mrb[76].mxu0  ;;  %v20199_v27 = vpop.f32.mrb[71].mxu1 }
 0x38d   : > { %v3683_v30 = vpop.f32.mrb[77].mxu0  ;;  %v20204_v6 = vmax.f32 %v25201_v14, %v14034_v15  ;;  %v25211_v15 = vld [vmem:[#allocation129_spill] sm:$0xff] }
 0x38e   : > { %v14035_v31 = vpop.f32.mrb[78].mxu0  ;;  %v20209_v45 = vmax.f32 %v25205_v9, %v3683_v30  ;;  %v25213_v14 = vmax.f32 %v25211_v15, %v25212_v7  ;;  %v25215_v15 = vld [vmem:[#allocation93_spill] sm:$0xff] }
 0x38f   : > { %25202 = vst [vmem:[#allocation102_spill] sm:$0xff] %v20204_v6  ;;  %v3686_v44 = vpop.f32.mrb[79].mxu0  ;;  %v20216_v38 = vmax.f32 %v25209_v35, %v14035_v31  ;;  %v25278_v6 = vld [vmem:[#allocation60_spill] sm:$0xff] }
 0x390   : > { %25206 = vst [vmem:[#allocation187_spill] sm:$0xff] %v20209_v45  ;;  %v20223_v19 = vmax.f32 %v25213_v14, %v3686_v44  ;;  %v25216_v44 = vmax.f32 %v19437_v49, %v25215_v15  ;;  %v25227_v15 = vld [vmem:[#allocation168_spill] sm:$0xff]  ;;  %v25230_v49 = vld [vmem:[#allocation30_spill] sm:$0xff] }
 0x391   : > { %25210 = vst [vmem:[#allocation107_spill] sm:$0xff] %v20216_v38  ;;  %v20227_v9 = vpop.f32.mrb[72].mxu1  ;;  %v25223_v38 = vld [vmem:[#allocation167_spill] sm:$0xff] }
 0x392   : > { %25214 = vst [vmem:[#allocation8_spill] sm:$0xff] %v20223_v19  ;;  %v20231_v30 = vpop.f32.mrb[73].mxu1  ;;  %v25222_v19 = vld [vmem:[#allocation133_spill] sm:$0xff] }
 0x393   : > { %v20233_v24 = vpop.f32.mrb[74].mxu1  ;;  %v25224_v53 = vmax.f32 %v25222_v19, %v25223_v38 }
 0x394   : > { %v14038_v35 = vpop.f32.mrb[80].mxu0  ;;  %v20235_v31 = vpop.f32.mrb[75].mxu1 }
 0x395   : > { %v3699_v43 = vpop.f32.mrb[81].mxu0  ;;  %v20240_v7 = vmax.f32 %v25216_v44, %v14038_v35  ;;  %v25226_v35 = vld [vmem:[#allocation84_spill] sm:$0xff] }
 0x396   : > { %v14039_v14 = vpop.f32.mrb[82].mxu0  ;;  %v20245_v8 = vmax.f32 %v25220_v50, %v3699_v43  ;;  %v25228_v44 = vmax.f32 %v25226_v35, %v25227_v15  ;;  %v25231_v35 = vld [vmem:[#allocation172_spill] sm:$0xff]  ;;  %v25234_v50 = vld [vmem:[#allocation6_spill] sm:$0xff] }
 0x397   : > { %25217 = vst [vmem:[#allocation110_spill] sm:$0xff] %v20240_v7  ;;  %v3702_v51 = vpop.f32.mrb[83].mxu0  ;;  %v20252_v45 = vmax.f32 %v25224_v53, %v14039_v14  ;;  %v25236_v4 = vmax.f32 %v25234_v50, %v25235_v11  ;;  %v25251_v11 = vld [vmem:[#allocation98_spill] sm:$0xff] }
 0x398   : > { %25221 = vst [vmem:[#allocation190_spill] sm:$0xff] %v20245_v8  ;;  %v20259_v57 = vmax.f32 %v25228_v44, %v3702_v51  ;;  %v25232_v51 = vmax.f32 %v25230_v49, %v25231_v35  ;;  %v25243_v35 = vld [vmem:[#allocation176_spill] sm:$0xff]  ;;  %v25252_v49 = vld [vmem:[#allocation105_spill] sm:$0xff] }
 0x399   : > { %25225 = vst [vmem:[#allocation164_spill] sm:$0xff] %v20252_v45  ;;  %v20263_v46 = vpop.f32.mrb[76].mxu1  ;;  %v25253_v12 = vmax.f32 %v25251_v11, %v25252_v49 }
 0x39a   : > { %25229 = vst [vmem:[#allocation146_spill] sm:$0xff] %v20259_v57  ;;  %v20267_v43 = vpop.f32.mrb[77].mxu1  ;;  %v25238_v57 = vld [vmem:[#allocation143_spill] sm:$0xff] }
 0x39b   : > { %v20269_v53 = vpop.f32.mrb[78].mxu1  ;;  %v25240_v8 = vmax.f32 %v25238_v57, %v25239_v60 }
 0x39c   : > { %v14042_v38 = vpop.f32.mrb[84].mxu0  ;;  %v20271_v14 = vpop.f32.mrb[79].mxu1 }
 0x39d   : > { %v3715_v19 = vpop.f32.mrb[85].mxu0  ;;  %v20276_v15 = vmax.f32 %v25232_v51, %v14042_v38  ;;  %v25242_v38 = vld [vmem:[#allocation10_spill] sm:$0xff] }
 0x39e   : > { %v14043_v44 = vpop.f32.mrb[86].mxu0  ;;  %v20281_v45 = vmax.f32 %v25236_v4, %v3715_v19  ;;  %v25244_v51 = vmax.f32 %v25242_v38, %v25243_v35  ;;  %v25248_v38 = vld [vmem:[#allocation178_spill] sm:$0xff] }
 0x39f   : > { %25233 = vst [vmem:[#allocation112_spill] sm:$0xff] %v20276_v15  ;;  %v3718_v54 = vpop.f32.mrb[87].mxu0  ;;  %v20288_v17 = vmax.f32 %v25240_v8, %v14043_v44 }
 0x3a0   : > { %25237 = vst [vmem:[#allocation191_spill] sm:$0xff] %v20281_v45  ;;  %v20295_v7 = vmax.f32 %v25244_v51, %v3718_v54  ;;  %v25249_v54 = vmax.f32 %v19525_v26, %v25248_v38  ;;  %v25261_v38 = vld [vmem:[#allocation180_spill] sm:$0xff] }
 0x3a1   : > { %25241 = vst [vmem:[#allocation117_spill] sm:$0xff] %v20288_v17  ;;  %v20299_v4 = vpop.f32.mrb[80].mxu1  ;;  %v25256_v17 = vld [vmem:[#allocation179_spill] sm:$0xff] }
 0x3a2   : > { %25245 = vst [vmem:[#allocation11_spill] sm:$0xff] %v20295_v7  ;;  %v20303_v19 = vpop.f32.mrb[81].mxu1  ;;  %v25255_v7 = vld [vmem:[#allocation13_spill] sm:$0xff] }
 0x3a3   : > { %v20305_v8 = vpop.f32.mrb[82].mxu1  ;;  %v25257_v5 = vmax.f32 %v25255_v7, %v25256_v17  ;;  %v25268_v7 = vld [vmem:[#allocation161_spill] sm:$0xff] }
 0x3a4   : > { %v14046_v57 = vpop.f32.mrb[88].mxu0  ;;  %25246 = vst [vmem:[#allocation120_spill] sm:$0xff] %v20305_v8  ;;  %v20307_v44 = vpop.f32.mrb[83].mxu1  ;;  %v25295_v8 = vld [vmem:[#allocation173_spill] sm:$0xff] }
 0x3a5   : > { %v3731_v60 = vpop.f32.mrb[89].mxu0  ;;  %25247 = vst [vmem:[#allocation12_spill] sm:$0xff] %v20307_v44  ;;  %v20312_v35 = vmax.f32 %v25249_v54, %v14046_v57  ;;  %v25260_v57 = vld [vmem:[#allocation153_spill] sm:$0xff] }
 0x3a6   : > { %v14047_v51 = vpop.f32.mrb[90].mxu0  ;;  %v20317_v29 = vmax.f32 %v25253_v12, %v3731_v60  ;;  %v25262_v54 = vmax.f32 %v25260_v57, %v25261_v38  ;;  %v25272_v38 = vld [vmem:[#allocation108_spill] sm:$0xff]  ;;  %v25275_v60 = vld [vmem:[#allocation194_spill] sm:$0xff] }
 0x3a7   : > { %25250 = vst [vmem:[#allocation174_spill] sm:$0xff] %v20312_v35  ;;  %v3734_v50 = vpop.f32.mrb[91].mxu0  ;;  %v20324_v45 = vmax.f32 %v25257_v5, %v14047_v51  ;;  %v25269_v51 = vld [vmem:[#allocation182_spill] sm:$0xff] }
 0x3a8   : > { %25254 = vst [vmem:[#allocation156_spill] sm:$0xff] %v20317_v29  ;;  %v20331_v15 = vmax.f32 %v25262_v54, %v3734_v50  ;;  %v25270_v26 = vmax.f32 %v25268_v7, %v25269_v51  ;;  %v25273_v54 = vld [vmem:[#allocation116_spill] sm:$0xff]  ;;  %v25280_v7 = vld [vmem:[#allocation183_spill] sm:$0xff] }
 0x3a9   : > { %25258 = vst [vmem:[#allocation122_spill] sm:$0xff] %v20324_v45  ;;  %v20335_v11 = vpop.f32.mrb[84].mxu1  ;;  %v25274_v12 = vmax.f32 %v25272_v38, %v25273_v54  ;;  %v20362_v51 = vld [vmem:[%s23026_s3] ss:$0 sm:$0xff]  ;;  %v25287_v38 = vld [vmem:[#allocation18_spill] sm:$0xff] }
 0x3aa   : > { %25263 = vst [vmem:[#allocation195_spill] sm:$0xff] %v20331_v15  ;;  %25265 = vst [vmem:[#allocation227_spill] sm:$0xff] %v20335_v11  ;;  %v20339_v36 = vpop.f32.mrb[85].mxu1  ;;  %v25277_v15 = vmax.f32 %v25275_v60, %v25276_v62  ;;  %v25286_v60 = vld [vmem:[#allocation171_spill] sm:$0xff] }
 0x3ab   : > { %25266 = vst [vmem:[#allocation197_spill] sm:$0xff] %v20339_v36  ;;  %v20341_v5 = vpop.f32.mrb[86].mxu1  ;;  %v25279_v36 = vld [vmem:[#allocation163_spill] sm:$0xff] }
 0x3ac   : > { %v14134_v17 = vpop.f32.mrb[92].mxu0  ;;  %25267 = vst [vmem:[#allocation132_spill] sm:$0xff] %v20341_v5  ;;  %v20346_v50 = vpop.f32.mrb[87].mxu1 }
 0x3ad   : > { %v4632_v63 = vmax.f32 %v25270_v26, %v14134_v17  ;;  %v4311_v57 = vpop.f32.mrb[93].mxu0  ;;  %25271 = vst [vmem:[#allocation198_spill] sm:$0xff] %v20346_v50  ;;  %v25281_v26 = vmax.f32 %v25279_v36, %v25280_v7  ;;  %v25292_v50 = vld [vmem:[#allocation115_spill] sm:$0xff] }
 0x3ae   : > { %v4630_v49 = vmax.f32 %v25274_v12, %v4311_v57  ;;  %v14135_v45 = vpop.f32.mrb[94].mxu0  ;;  %v25282_v12 = vld [vmem:[#allocation44_spill] sm:$0xff] }
 0x3af   : > { %v5074_v29 = vmax.f32 %v4632_v63, %v19882_v33  ;;  %v4633_v37 = vmax.f32 %v25277_v15, %v14135_v45  ;;  %v4314_v35 = vpop.f32.mrb[95].mxu0 }
 0x3b0   : > { %v5072_v5 = vmax.f32 %v4630_v49, %v25278_v6  ;;  %v4631_v17 = vmax.f32 %v25281_v26, %v4314_v35 }
 0x3b1   : > { %v5075_v57 = vmax.f32 %v4633_v37, %v25282_v12  ;;  %v20366_v33 = vpop.f32.mrb[88].mxu1  ;;  %v5161_v45 = vadd.f32 %v20362_v51, %v5074_v29  ;;  %v25288_v37 = vmax.f32 %v25286_v60, %v25287_v38  ;;  %v25289_v29 = vld [vmem:[#allocation118_spill] sm:$0xff]  ;;  %v25296_v60 = vld [vmem:[#allocation125_spill] sm:$0xff] }
 0x3b2   : > { %v5073_v63 = vmax.f32 %v4631_v17, %v19895_v28  ;;  %25283 = vst [vmem:[#allocation67_spill] sm:$0xff] %v20366_v33  ;;  %v20370_v6 = vpop.f32.mrb[89].mxu1  ;;  %v5159_v36 = vadd.f32 %v20362_v51, %v5072_v5  ;;  %v25290_v17 = vld [vmem:[#allocation82_spill] sm:$0xff]  ;;  %v25293_v5 = vld [vmem:[#allocation64_spill] sm:$0xff] }
 0x3b3   : > { %v5162_v62 = vadd.f32 %v20362_v51, %v5075_v57  ;;  %25284 = vst [vmem:[#allocation166_spill] sm:$0xff] %v20370_v6  ;;  %v20374_v49 = vpop.f32.mrb[90].mxu1  ;;  %v25291_v12 = vmax.f32 %v25289_v29, %v25290_v17  ;;  %v25294_v11 = vmax.f32 %v25292_v50, %v25293_v5  ;;  %v25300_v29 = vld [vmem:[#allocation46_spill] sm:$0xff]  ;;  %v25304_v17 = vld [vmem:[#allocation24_spill] sm:$0xff] }
 0x3b4   : > { %v14138_v15 = vpop.f32.mrb[96].mxu0  ;;  %v5160_v35 = vadd.f32 %v20362_v51, %v5073_v63  ;;  %25285 = vst [vmem:[#allocation69_spill] sm:$0xff] %v20374_v49  ;;  %v20379_v26 = vpop.f32.mrb[91].mxu1 }
 0x3b5   : > { %v4636_v54 = vmax.f32 %v25288_v37, %v14138_v15  ;;  %v4327_v28 = vpop.f32.mrb[97].mxu0  ;;  %v5240_v7 = vpack.c.bf16 %v5162_v62, %v5161_v45  ;;  %v25297_v15 = vmax.f32 %v25295_v8, %v25296_v60  ;;  %v25298_v45 = vld [vmem:[#allocation66_spill] sm:$0xff]  ;;  %v25299_v37 = vmov 0  }
 0x3b6   : > { %v4634_v57 = vmax.f32 %v25291_v12, %v4327_v28  ;;  %v14139_v6 = vpop.f32.mrb[98].mxu0  ;;  %v5239_v33 = vpack.c.bf16 %v5160_v35, %v5159_v36  ;;  %v25307_v60 = vld [vmem:[#allocation26_spill] sm:$0xff] }
 0x3b7   : > { %v4637_v63 = vmax.f32 %v25294_v11, %v14139_v6  ;;  %v4330_v44 = vpop.f32.mrb[99].mxu0  ;;  %v5078_v49 = vmax.f32 %v4636_v54, %v19922_v47  ;;  %v25303_v54 = vld [vmem:[#allocation128_spill] sm:$0xff] }
 0x3b8   : > { %v4635_v38 = vmax.f32 %v25297_v15, %v4330_v44  ;;  %7072 = vmatpush1.bf16.msra.mxu0 %v5239_v33  ;;  %v5076_v62 = vmax.f32 %v4634_v57, %v25298_v45  ;;  %v25305_v12 = vmax.f32 %v25303_v54, %v25304_v17  ;;  %v25313_v17 = vld [vmem:[#allocation135_spill] sm:$0xff] }
 0x3b9   : > { %7073 = vmatprep.subr.bf16.mxu0 %v25299_v37  ;;  %v5079_v28 = vmax.f32 %v4637_v63, %v25300_v29  ;;  %v20395_v35 = vpop.f32.mrb[92].mxu1  ;;  %v5165_v11 = vadd.f32 %v20362_v51, %v5078_v49  ;;  %v25306_v63 = vld [vmem:[#allocation127_spill] sm:$0xff]  ;;  %v25310_v29 = vld [vmem:[#allocation72_spill] sm:$0xff] }
 0x3ba   : > { %v5077_v36 = vmax.f32 %v4635_v38, %v19935_v40  ;;  %v20399_v47 = vpop.f32.mrb[93].mxu1  ;;  %v5163_v8 = vadd.f32 %v20362_v51, %v5076_v62  ;;  %v25308_v15 = vmax.f32 %v25306_v63, %v25307_v60  ;;  %v25309_v62 = vld [vmem:[#allocation56_spill] sm:$0xff] }
 0x3bb   : > { %v5166_v50 = vadd.f32 %v20362_v51, %v5079_v28  ;;  %25301 = vst [vmem:[#allocation199_spill] sm:$0xff] %v20399_v47  ;;  %v20403_v33 = vpop.f32.mrb[94].mxu1  ;;  %v25311_v28 = vmax.f32 %v25309_v62, %v25310_v29 }
 0x3bc   : > { %v14142_v6 = vpop.f32.mrb[100].mxu0  ;;  %7074 = vmatpush1.bf16.msra.mxu0 %v5240_v7  ;;  %v5164_v44 = vadd.f32 %v20362_v51, %v5077_v36  ;;  %25302 = vst [vmem:[#allocation137_spill] sm:$0xff] %v20403_v33  ;;  %v20409_v5 = vpop.f32.mrb[95].mxu1 }
 0x3bd   : > { %v4640_v40 = vmax.f32 %v25305_v12, %v14142_v6  ;;  %v4343_v57 = vpop.f32.mrb[101].mxu0  ;;  %7075 = vmatprep.subr.bf16.mxu0 %v25299_v37  ;;  %v5242_v49 = vpack.c.bf16 %v5166_v50, %v5165_v11  ;;  %v25312_v6 = vld [vmem:[#allocation201_spill] sm:$0xff]  ;;  %v25315_v50 = vld [vmem:[#allocation123_spill] sm:$0xff] }
 0x3be   : > { %v4638_v7 = vmax.f32 %v25308_v15, %v4343_v57  ;;  %v14143_v38 = vpop.f32.mrb[102].mxu0  ;;  %v5241_v45 = vpack.c.bf16 %v5164_v44, %v5163_v8  ;;  %v25314_v12 = vmax.f32 %v25312_v6, %v25313_v17 }
 0x3bf   : > { %v4641_v36 = vmax.f32 %v25311_v28, %v14143_v38  ;;  %v4346_v33 = vpop.f32.mrb[103].mxu0  ;;  %v5082_v54 = vmax.f32 %v4640_v40, %v19962_v3  ;;  %v25318_v38 = vld [vmem:[#allocation32_spill] sm:$0xff]  ;;  %v25320_v28 = vld [vmem:[#allocation138_spill] sm:$0xff] }
 0x3c0   : > { %v4639_v47 = vmax.f32 %v25314_v12, %v4346_v33  ;;  %7076 = vmatpush1.bf16.msra.mxu0 %v5241_v45  ;;  %v5080_v11 = vmax.f32 %v4638_v7, %v19966_v20  ;;  %v25317_v7 = vld [vmem:[#allocation207_spill] sm:$0xff] }
 0x3c1   : > { %7077 = vmatprep.subr.bf16.mxu0 %v25299_v37  ;;  %v5083_v57 = vmax.f32 %v4641_v36, %v25315_v50  ;;  %v20425_v44 = vpop.f32.mrb[96].mxu1  ;;  %v5169_v63 = vadd.f32 %v20362_v51, %v5082_v54  ;;  %v25319_v45 = vmax.f32 %v25317_v7, %v25318_v38  ;;  %v25321_v36 = vld [vmem:[#allocation188_spill] sm:$0xff]  ;;  %v25323_v12 = vld [vmem:[#allocation27_spill] sm:$0xff]  ;;  %v25327_v38 = vld [vmem:[#allocation145_spill] sm:$0xff] }
 0x3c2   : > { %v5081_v8 = vmax.f32 %v4639_v47, %v19975_v13  ;;  %v20429_v3 = vpop.f32.mrb[97].mxu1  ;;  %v5167_v33 = vadd.f32 %v20362_v51, %v5080_v11  ;;  %v25322_v54 = vmax.f32 %v25320_v28, %v25321_v36  ;;  %v25324_v11 = vld [vmem:[#allocation80_spill] sm:$0xff] }
 0x3c3   : > { %v5170_v60 = vadd.f32 %v20362_v51, %v5083_v57  ;;  %v20433_v15 = vpop.f32.mrb[98].mxu1  ;;  %v25325_v50 = vmax.f32 %v25323_v12, %v25324_v11 }
 0x3c4   : > { %v14146_v40 = vpop.f32.mrb[104].mxu0  ;;  %7078 = vmatpush1.bf16.msra.mxu0 %v5242_v49  ;;  %v5168_v20 = vadd.f32 %v20362_v51, %v5081_v8  ;;  %25316 = vst [vmem:[#allocation103_spill] sm:$0xff] %v20433_v15  ;;  %v20439_v29 = vpop.f32.mrb[99].mxu1 }
 0x3c5   : > { %v4644_v13 = vmax.f32 %v25319_v45, %v14146_v40  ;;  %v4359_v47 = vpop.f32.mrb[105].mxu0  ;;  %7079 = vmatprep.subr.bf16.mxu0 %v25299_v37  ;;  %v5244_v62 = vpack.c.bf16 %v5170_v60, %v5169_v63  ;;  %v25326_v40 = vld [vmem:[#allocation208_spill] sm:$0xff] }
 0x3c6   : > { %v4642_v49 = vmax.f32 %v25322_v54, %v4359_v47  ;;  %v14147_v6 = vpop.f32.mrb[106].mxu0  ;;  %v5243_v17 = vpack.c.bf16 %v5168_v20, %v5167_v33  ;;  %v25328_v45 = vmax.f32 %v25326_v40, %v25327_v38 }
 0x3c7   : > { %v4645_v57 = vmax.f32 %v25325_v50, %v14147_v6  ;;  %v4362_v8 = vpop.f32.mrb[107].mxu0  ;;  %v5086_v7 = vmax.f32 %v4644_v13, %v20002_v41  ;;  %v25330_v6 = vld [vmem:[#allocation40_spill] sm:$0xff]  ;;  %v25332_v50 = vld [vmem:[#allocation147_spill] sm:$0xff] }
 0x3c8   : > { %v4643_v15 = vmax.f32 %v25328_v45, %v4362_v8  ;;  %7080 = vmatpush1.bf16.msra.mxu0 %v5243_v17  ;;  %v5084_v63 = vmax.f32 %v4642_v49, %v20006_v42  ;;  %v25335_v45 = vld [vmem:[#allocation35_spill] sm:$0xff] }
 0x3c9   : > { %7081 = vmatprep.subr.bf16.mxu0 %v25299_v37  ;;  %v5087_v60 = vmax.f32 %v4645_v57, %v20008_v52  ;;  %v20455_v20 = vpop.f32.mrb[100].mxu1  ;;  %v5173_v47 = vadd.f32 %v20362_v51, %v5086_v7  ;;  %v25329_v52 = vld [vmem:[#allocation212_spill] sm:$0xff] }
 0x3ca   : > { %v5085_v33 = vmax.f32 %v4643_v15, %v20015_v16  ;;  %v20459_v41 = vpop.f32.mrb[101].mxu1  ;;  %v5171_v36 = vadd.f32 %v20362_v51, %v5084_v63  ;;  %v25331_v16 = vmax.f32 %v25329_v52, %v25330_v6  ;;  %v25333_v57 = vld [vmem:[#allocation192_spill] sm:$0xff]  ;;  %v25338_v52 = vld [vmem:[#allocation214_spill] sm:$0xff] }
 0x3cb   : > { %v5174_v28 = vadd.f32 %v20362_v51, %v5087_v60  ;;  %v20463_v54 = vpop.f32.mrb[102].mxu1  ;;  %v25336_v63 = vld [vmem:[#allocation88_spill] sm:$0xff] }
 0x3cc   : > { %v14150_v13 = vpop.f32.mrb[108].mxu0  ;;  %7082 = vmatpush1.bf16.msra.mxu0 %v5244_v62  ;;  %v5172_v42 = vadd.f32 %v20362_v51, %v5085_v33  ;;  %v20469_v12 = vpop.f32.mrb[103].mxu1  ;;  %v25334_v62 = vmax.f32 %v25332_v50, %v25333_v57  ;;  %v25337_v60 = vmax.f32 %v25335_v45, %v25336_v63 }
 0x3cd   : > { %v4375_v49 = vpop.f32.mrb[109].mxu0  ;;  %v4648_v15 = vmax.f32 %v25331_v16, %v14150_v13  ;;  %7083 = vmatprep.subr.bf16.mxu0 %v25299_v37  ;;  %v5246_v17 = vpack.c.bf16 %v5174_v28, %v5173_v47  ;;  %v25339_v47 = vld [vmem:[#allocation155_spill] sm:$0xff] }
 0x3ce   : > { %v14151_v11 = vpop.f32.mrb[110].mxu0  ;;  %v4646_v8 = vmax.f32 %v25334_v62, %v4375_v49  ;;  %v5245_v7 = vpack.c.bf16 %v5172_v42, %v5171_v36  ;;  %v25340_v28 = vmax.f32 %v25338_v52, %v25339_v47 }
 0x3cf   : > { %v5090_v40 = vmax.f32 %v4648_v15, %v20042_v58  ;;  %v4378_v38 = vpop.f32.mrb[111].mxu0  ;;  %v4649_v33 = vmax.f32 %v25337_v60, %v14151_v11  ;;  %v25344_v60 = vld [vmem:[#allocation85_spill] sm:$0xff] }
 0x3d0   : > { %v5088_v13 = vmax.f32 %v4646_v8, %v20046_v22  ;;  %7084 = vmatpush1.bf16.msra.mxu0 %v5245_v7  ;;  %v4647_v6 = vmax.f32 %v25340_v28, %v4378_v38  ;;  %v25341_v8 = vld [vmem:[#allocation83_spill] sm:$0xff] }
 0x3d1   : > { %v5091_v16 = vmax.f32 %v4649_v33, %v20048_v25  ;;  %7085 = vmatprep.subr.bf16.mxu0 %v25299_v37  ;;  %v20485_v42 = vpop.f32.mrb[104].mxu1  ;;  %v5177_v58 = vadd.f32 %v20362_v51, %v5090_v40  ;;  %v25345_v33 = vld [vmem:[#allocation50_spill] sm:$0xff]  ;;  %v25347_v28 = vld [vmem:[#allocation43_spill] sm:$0xff] }
 0x3d2   : > { %v5089_v36 = vmax.f32 %v4647_v6, %v20055_v32  ;;  %v20489_v15 = vpop.f32.mrb[105].mxu1  ;;  %v5175_v22 = vadd.f32 %v20362_v51, %v5088_v13  ;;  %v25342_v32 = vld [vmem:[#allocation48_spill] sm:$0xff]  ;;  %v25346_v13 = vmax.f32 %v25344_v60, %v25345_v33 }
 0x3d3   : > { %v5178_v49 = vadd.f32 %v20362_v51, %v5091_v16  ;;  %v20493_v57 = vpop.f32.mrb[106].mxu1  ;;  %v25343_v7 = vmax.f32 %v25341_v8, %v25342_v32  ;;  %v25348_v6 = vld [vmem:[#allocation96_spill] sm:$0xff] }
 0x3d4   : > { %v5176_v11 = vadd.f32 %v20362_v51, %v5089_v36  ;;  %v14154_v50 = vpop.f32.mrb[112].mxu0  ;;  %7086 = vmatpush1.bf16.msra.mxu0 %v5246_v17  ;;  %v20499_v40 = vpop.f32.mrb[107].mxu1  ;;  %v25349_v16 = vmax.f32 %v25347_v28, %v25348_v6 }
 0x3d5   : > { %v5248_v25 = vpack.c.bf16 %v5178_v49, %v5177_v58  ;;  %v4391_v62 = vpop.f32.mrb[113].mxu0  ;;  %v4652_v38 = vmax.f32 %v25343_v7, %v14154_v50  ;;  %7087 = vmatprep.subr.bf16.mxu0 %v25299_v37  ;;  %v25350_v49 = vld [vmem:[#allocation220_spill] sm:$0xff]  ;;  %v25351_v50 = vld [vmem:[#allocation165_spill] sm:$0xff] }
 0x3d6   : > { %v5247_v45 = vpack.c.bf16 %v5176_v11, %v5175_v22  ;;  %v14155_v63 = vpop.f32.mrb[114].mxu0  ;;  %v4650_v52 = vmax.f32 %v25346_v13, %v4391_v62  ;;  %v25352_v8 = vmax.f32 %v25350_v49, %v25351_v50  ;;  %v25353_v11 = vld [vmem:[#allocation20_spill] sm:$0xff]  ;;  %v25357_v49 = vld [vmem:[#allocation162_spill] sm:$0xff] }
 0x3d7   : > { %v5094_v17 = vmax.f32 %v4652_v38, %v20080_v34  ;;  %v4394_v47 = vpop.f32.mrb[115].mxu0  ;;  %v4653_v36 = vmax.f32 %v25349_v16, %v14155_v63 }
 0x3d8   : > { %v5092_v58 = vmax.f32 %v4650_v52, %v20084_v10  ;;  %7088 = vmatpush1.bf16.msra.mxu0 %v5247_v45  ;;  %v4651_v32 = vmax.f32 %v25352_v8, %v4394_v47  ;;  %v25354_v52 = vld [vmem:[#allocation5_spill] sm:$0xff]  ;;  %v25355_v47 = vld [vmem:[#allocation99_spill] sm:$0xff] }
 0x3d9   : > { %v5095_v22 = vmax.f32 %v4653_v36, %v20086_v2  ;;  %7089 = vmatprep.subr.bf16.mxu0 %v25299_v37  ;;  %v20515_v7 = vpop.f32.mrb[108].mxu1  ;;  %v5181_v34 = vadd.f32 %v20362_v51, %v5094_v17  ;;  %v25356_v28 = vmax.f32 %v25354_v52, %v25355_v47  ;;  %v25364_v52 = vld [vmem:[#allocation202_spill] sm:$0xff] }
 0x3da   : > { %v5093_v62 = vmax.f32 %v4651_v32, %v25353_v11  ;;  %v20519_v63 = vpop.f32.mrb[109].mxu1  ;;  %v5179_v10 = vadd.f32 %v20362_v51, %v5092_v58  ;;  %v25358_v58 = vld [vmem:[#allocation200_spill] sm:$0xff]  ;;  %v25361_v11 = vld [vmem:[#allocation130_spill] sm:$0xff] }
 0x3db   : > { %v5182_v38 = vadd.f32 %v20362_v51, %v5095_v22  ;;  %v20523_v33 = vpop.f32.mrb[110].mxu1  ;;  %v25359_v50 = vmax.f32 %v25357_v49, %v25358_v58  ;;  %v25360_v22 = vld [vmem:[#allocation51_spill] sm:$0xff] }
 0x3dc   : > { %v5180_v45 = vadd.f32 %v20362_v51, %v5093_v62  ;;  %v14158_v60 = vpop.f32.mrb[116].mxu0  ;;  %7090 = vmatpush1.bf16.msra.mxu0 %v5248_v25  ;;  %v20529_v17 = vpop.f32.mrb[111].mxu1  ;;  %v25362_v62 = vmax.f32 %v25360_v22, %v25361_v11 }
 0x3dd   : > { %v5250_v2 = vpack.c.bf16 %v5182_v38, %v5181_v34  ;;  %v4407_v13 = vpop.f32.mrb[117].mxu0  ;;  %v4656_v6 = vmax.f32 %v25356_v28, %v14158_v60  ;;  %7091 = vmatprep.subr.bf16.mxu0 %v25299_v37  ;;  %v25363_v60 = vld [vmem:[#allocation91_spill] sm:$0xff] }
 0x3de   : > { %v5249_v16 = vpack.c.bf16 %v5180_v45, %v5179_v10  ;;  %v14159_v36 = vpop.f32.mrb[118].mxu0  ;;  %v4654_v8 = vmax.f32 %v25359_v50, %v4407_v13  ;;  %v25365_v47 = vmax.f32 %v25363_v60, %v25364_v52 }
 0x3df   : > { %v5098_v25 = vmax.f32 %v4656_v6, %v20119_v55  ;;  %v4410_v32 = vpop.f32.mrb[119].mxu0  ;;  %v4657_v34 = vmax.f32 %v25362_v62, %v14159_v36 }
 0x3e0   : > { %v5096_v38 = vmax.f32 %v4654_v8, %v20123_v18  ;;  %7092 = vmatpush1.bf16.msra.mxu0 %v5249_v16  ;;  %v4655_v28 = vmax.f32 %v25365_v47, %v4410_v32  ;;  %v25366_v8 = vld [vmem:[#allocation38_spill] sm:$0xff] }
 0x3e1   : > { %v5099_v10 = vmax.f32 %v4657_v34, %v20125_v1  ;;  %7093 = vmatprep.subr.bf16.mxu0 %v25299_v37  ;;  %v20545_v13 = vpop.f32.mrb[112].mxu1  ;;  %v5185_v55 = vadd.f32 %v20362_v51, %v5098_v25  ;;  %v25369_v34 = vld [vmem:[#allocation170_spill] sm:$0xff] }
 0x3e2   : > { %v5097_v45 = vmax.f32 %v4655_v28, %v20127_v21  ;;  %v20549_v36 = vpop.f32.mrb[113].mxu1  ;;  %v5183_v18 = vadd.f32 %v20362_v51, %v5096_v38  ;;  %v25367_v21 = vld [vmem:[#allocation204_spill] sm:$0xff]  ;;  %v25370_v38 = vld [vmem:[#allocation109_spill] sm:$0xff]  ;;  %v25372_v28 = vld [vmem:[#allocation58_spill] sm:$0xff] }
 0x3e3   : > { %v5186_v6 = vadd.f32 %v20362_v51, %v5099_v10  ;;  %v20553_v58 = vpop.f32.mrb[114].mxu1  ;;  %v25368_v32 = vmax.f32 %v25366_v8, %v25367_v21  ;;  %v25371_v60 = vmax.f32 %v25369_v34, %v25370_v38  ;;  %v25373_v10 = vld [vmem:[#allocation206_spill] sm:$0xff]  ;;  %v25376_v8 = vld [vmem:[#allocation7_spill] sm:$0xff]  ;;  %v25378_v38 = vld [vmem:[#allocation65_spill] sm:$0xff] }
 0x3e4   : > { %v5184_v16 = vadd.f32 %v20362_v51, %v5097_v45  ;;  %v14162_v49 = vpop.f32.mrb[120].mxu0  ;;  %7094 = vmatpush1.bf16.msra.mxu0 %v5250_v2  ;;  %v20559_v25 = vpop.f32.mrb[115].mxu1  ;;  %v25374_v45 = vmax.f32 %v25372_v28, %v25373_v10  ;;  %v25381_v28 = vld [vmem:[#allocation42_spill] sm:$0xff] }
 0x3e5   : > { %v5252_v1 = vpack.c.bf16 %v5186_v6, %v5185_v55  ;;  %v4423_v50 = vpop.f32.mrb[121].mxu0  ;;  %v4660_v22 = vmax.f32 %v25368_v32, %v14162_v49  ;;  %7095 = vmatprep.subr.bf16.mxu0 %v25299_v37  ;;  %v25375_v49 = vld [vmem:[#allocation36_spill] sm:$0xff] }
 0x3e6   : > { %v5251_v11 = vpack.c.bf16 %v5184_v16, %v5183_v18  ;;  %v14163_v62 = vpop.f32.mrb[122].mxu0  ;;  %v4658_v52 = vmax.f32 %v25371_v60, %v4423_v50  ;;  %v25377_v21 = vmax.f32 %v25375_v49, %v25376_v8  ;;  %v25379_v60 = vld [vmem:[#allocation211_spill] sm:$0xff]  ;;  %v25385_v8 = vld [vmem:[#allocation213_spill] sm:$0xff] }
 0x3e7   : > { %v5102_v2 = vmax.f32 %v4660_v22, %v20155_v59  ;;  %v4426_v47 = vpop.f32.mrb[123].mxu0  ;;  %v4661_v55 = vmax.f32 %v25374_v45, %v14163_v62  ;;  %v25384_v49 = vld [vmem:[#allocation111_spill] sm:$0xff] }
 0x3e8   : > { %v5100_v6 = vmax.f32 %v4658_v52, %v20159_v39  ;;  %7096 = vmatpush1.bf16.msra.mxu0 %v5251_v11  ;;  %v4659_v32 = vmax.f32 %v25377_v21, %v4426_v47  ;;  %v25380_v52 = vmax.f32 %v25378_v38, %v25379_v60 }
 0x3e9   : > { %v5103_v18 = vmax.f32 %v4661_v55, %v20161_v48  ;;  %7097 = vmatprep.subr.bf16.mxu0 %v25299_v37  ;;  %v5189_v59 = vadd.f32 %v20362_v51, %v5102_v2  ;;  %v25382_v2 = vld [vmem:[#allocation119_spill] sm:$0xff] }
 0x3ea   : > { %v5101_v16 = vmax.f32 %v4659_v32, %v20163_v0  ;;  %v5187_v22 = vadd.f32 %v20362_v51, %v5100_v6  ;;  %v25383_v10 = vmax.f32 %v25381_v28, %v25382_v2 }
 0x3eb   : > { %v5190_v50 = vadd.f32 %v20362_v51, %v5103_v18  ;;  %v25387_v18 = vld [vmem:[#allocation177_spill] sm:$0xff] }
 0x3ec   : > { %v5188_v62 = vadd.f32 %v20362_v51, %v5101_v16  ;;  %v14166_v39 = vpop.f32.mrb[124].mxu0  ;;  %7098 = vmatpush1.bf16.msra.mxu0 %v5252_v1  ;;  %v25386_v1 = vmax.f32 %v25384_v49, %v25385_v8  ;;  %v25388_v16 = vld [vmem:[#allocation121_spill] sm:$0xff] }
 0x3ed   : > { %v5254_v11 = vpack.c.bf16 %v5190_v50, %v5189_v59  ;;  %v4439_v34 = vpop.f32.mrb[125].mxu0  ;;  %v4664_v48 = vmax.f32 %v25380_v52, %v14166_v39  ;;  %7099 = vmatprep.subr.bf16.mxu0 %v25299_v37  ;;  %v25389_v59 = vmax.f32 %v25387_v18, %v25388_v16 }
 0x3ee   : > { %v5253_v47 = vpack.c.bf16 %v5188_v62, %v5187_v22  ;;  %v14167_v0 = vpop.f32.mrb[126].mxu0  ;;  %v4662_v45 = vmax.f32 %v25383_v10, %v4439_v34  ;;  %v15699_v34 = vld [vmem:[%s25149_s1] ss:$20 sps:$4 sm:$0xff]  }
 0x3ef   : > { %v5106_v55 = vmax.f32 %v4664_v48, %v20191_v23  ;;  %v4442_v6 = vpop.f32.mrb[127].mxu0  ;;  %v4665_v21 = vmax.f32 %v25386_v1, %v14167_v0  ;;  %v25390_v48 = vld [vmem:[#allocation68_spill] sm:$0xff]  ;;  %v25396_v1 = vld [vmem:[#allocation74_spill] sm:$0xff] }
 0x3f0   : > { %v5104_v32 = vmax.f32 %v4662_v45, %v20195_v61  ;;  %7100 = vmatpush1.bf16.msra.mxu0 %v5253_v47  ;;  %v4663_v50 = vmax.f32 %v25389_v59, %v4442_v6  ;;  %v25391_v47 = vld [vmem:[#allocation218_spill] sm:$0xff]  ;;  %v25393_v45 = vld [vmem:[#allocation224_spill] sm:$0xff] }
 0x3f1   : > { %v5107_v22 = vmax.f32 %v4665_v21, %v20197_v56  ;;  %7101 = vmatprep.subr.bf16.mxu0 %v25299_v37  ;;  %v5193_v23 = vadd.f32 %v20362_v51, %v5106_v55  ;;  %v15704_v56 = vld [vmem:[%s25149_s1 + $0x2c] ss:$20 sps:$4 sm:$0xff]   ;;  %v25392_v0 = vmax.f32 %v25390_v48, %v25391_v47  ;;  %v25397_v21 = vld [vmem:[#allocation219_spill] sm:$0xff] }
 0x3f2   : > { %v5105_v62 = vmax.f32 %v4663_v50, %v20199_v27  ;;  %v5191_v61 = vadd.f32 %v20362_v51, %v5104_v32  ;;  %v25394_v55 = vld [vmem:[#allocation81_spill] sm:$0xff]  ;;  %v25398_v32 = vmax.f32 %v25396_v1, %v25397_v21  ;;  %v25399_v59 = vld [vmem:[#allocation54_spill] sm:$0xff]  ;;  %v25400_v50 = vld [vmem:[#allocation131_spill] sm:$0xff] }
 0x3f3   : > { %v5194_v39 = vadd.f32 %v20362_v51, %v5107_v22  ;;  %v25395_v6 = vmax.f32 %v25393_v45, %v25394_v55  ;;  %v25401_v22 = vmax.f32 %v25399_v59, %v25400_v50  ;;  %v25403_v48 = vld [vmem:[#allocation139_spill] sm:$0xff] }
 0x3f4   : > { %v5192_v38 = vadd.f32 %v20362_v51, %v5105_v62  ;;  %v14170_v60 = vpop.f32.mrb[128].mxu0  ;;  %7102 = vmatpush1.bf16.msra.mxu0 %v5254_v11  ;;  %v25406_v45 = vld [vmem:[#allocation31_spill] sm:$0xff] }
 0x3f5   : > { %v5256_v52 = vpack.c.bf16 %v5194_v39, %v5193_v23  ;;  %v4455_v27 = vpop.f32.mrb[129].mxu0  ;;  %v4668_v28 = vmax.f32 %v25392_v0, %v14170_v60  ;;  %7552 = vmatprep.subr.bf16.mxu0 %v25299_v37 }
 0x3f6   : > { %v5255_v2 = vpack.c.bf16 %v5192_v38, %v5191_v61  ;;  %v14171_v10 = vpop.f32.mrb[130].mxu0  ;;  %v4666_v49 = vmax.f32 %v25395_v6, %v4455_v27  ;;  %v25402_v27 = vld [vmem:[#allocation181_spill] sm:$0xff] }
 0x3f7   : > { %v5110_v11 = vmax.f32 %v4668_v28, %v20227_v9  ;;  %v4458_v8 = vpop.f32.mrb[131].mxu0  ;;  %7104 = vmatmul.mubr.bf16.vlgmr.msra.gmra.mrb[172].mxu0 %v15699_v34  ;;  %v4669_v18 = vmax.f32 %v25398_v32, %v14171_v10  ;;  %v25404_v47 = vmax.f32 %v25402_v27, %v25403_v48  ;;  %v25405_v10 = vld [vmem:[#allocation76_spill] sm:$0xff]  ;;  %v25417_v48 = vld [vmem:[#allocation134_spill] sm:$0xff] }
 0x3f8   : > { %v5108_v16 = vmax.f32 %v4666_v49, %v20231_v30  ;;  %7553 = vmatpush1.bf16.msra.mxu0 %v5255_v2  ;;  %v4667_v62 = vmax.f32 %v25401_v22, %v4458_v8  ;;  %7111 = vmatprep.mubr.bf16.mxu0 %v15704_v56  ;;  %v15702_v30 = vld [vmem:[%s25149_s1 + $0x28] ss:$20 sps:$4 sm:$0xff]   ;;  %v25407_v55 = vmax.f32 %v25405_v10, %v25406_v45  ;;  %v25421_v45 = vld [vmem:[#allocation151_spill] sm:$0xff] }
 0x3f9   : > { %v5111_v23 = vmax.f32 %v4669_v18, %v20233_v24  ;;  %7554 = vmatprep.subr.bf16.mxu0 %v25299_v37  ;;  %v5197_v39 = vadd.f32 %v20362_v51, %v5110_v11  ;;  %v15707_v24 = vld [vmem:[%s25149_s1 + $0x54] ss:$20 sps:$4 sm:$0xff]   ;;  %v25408_v11 = vld [vmem:[#allocation52_spill] sm:$0xff] }
 0x3fa   : > { %v5109_v9 = vmax.f32 %v4667_v62, %v20235_v31  ;;  %v5195_v61 = vadd.f32 %v20362_v51, %v5108_v16  ;;  %v25409_v8 = vld [vmem:[#allocation141_spill] sm:$0xff]  ;;  %v25411_v18 = vld [vmem:[#allocation78_spill] sm:$0xff] }
 0x3fb   : > { %v5198_v34 = vadd.f32 %v20362_v51, %v5111_v23  ;;  %v25410_v1 = vmax.f32 %v25408_v11, %v25409_v8  ;;  %v25412_v16 = vld [vmem:[#allocation90_spill] sm:$0xff]  ;;  %v25420_v10 = vld [vmem:[#allocation61_spill] sm:$0xff] }
 0x3fc   : > { %v5196_v38 = vadd.f32 %v20362_v51, %v5109_v9  ;;  %v14174_v60 = vpop.f32.mrb[132].mxu0  ;;  %7555 = vmatpush1.bf16.msra.mxu0 %v5256_v52  ;;  %v25413_v59 = vmax.f32 %v25411_v18, %v25412_v16  ;;  %v25424_v11 = vld [vmem:[#allocation189_spill] sm:$0xff]  ;;  %v25427_v18 = vld [vmem:[#allocation12_spill] sm:$0xff] }
 0x3fd   : > { %v5258_v56 = vpack.c.bf16 %v5198_v34, %v5197_v39  ;;  %v4471_v31 = vpop.f32.mrb[133].mxu0  ;;  %v4672_v0 = vmax.f32 %v25404_v47, %v14174_v60  ;;  %7556 = vmatprep.subr.bf16.mxu0 %v25299_v37  ;;  %v25418_v47 = vld [vmem:[#allocation39_spill] sm:$0xff] }
 0x3fe   : > { %v5257_v28 = vpack.c.bf16 %v5196_v38, %v5195_v61  ;;  %v14175_v2 = vpop.f32.mrb[134].mxu0  ;;  %v4670_v6 = vmax.f32 %v25407_v55, %v4471_v31  ;;  %v25414_v61 = vld [vmem:[#allocation16_spill] sm:$0xff]  ;;  %v25415_v38 = vld [vmem:[#allocation149_spill] sm:$0xff]  ;;  %v25422_v55 = vmax.f32 %v25420_v10, %v25421_v45 }
 0x3ff   : > { %v5114_v52 = vmax.f32 %v4672_v0, %v20263_v46  ;;  %v4474_v49 = vpop.f32.mrb[135].mxu0  ;;  %7112 = vmatmul.mubr.bf16.gmra.mrb[176].mxu0 %v15702_v30  ;;  %v4673_v21 = vmax.f32 %v25410_v1, %v14175_v2  ;;  %v25416_v60 = vmax.f32 %v25414_v61, %v25415_v38  ;;  %v25419_v0 = vmax.f32 %v25417_v48, %v25418_v47  ;;  %v25431_v38 = vld [vmem:[#allocation225_spill] sm:$0xff] }
 0x400   : > { %v5112_v32 = vmax.f32 %v4670_v6, %v20267_v43  ;;  %7557 = vmatpush1.bf16.msra.mxu0 %v5257_v28  ;;  %v4671_v50 = vmax.f32 %v25413_v59, %v4474_v49  ;;  %7119 = vmatprep.mubr.bf16.mxu0 %v15707_v24  ;;  %v15705_v43 = vld [vmem:[%s25149_s1 + $0x50] ss:$20 sps:$4 sm:$0xff]  }
 0x401   : > { %v5115_v22 = vmax.f32 %v4673_v21, %v20269_v53  ;;  %7558 = vmatprep.subr.bf16.mxu0 %v25299_v37  ;;  %v5201_v62 = vadd.f32 %v20362_v51, %v5114_v52  ;;  %v15710_v53 = vld [vmem:[%s25149_s1 + $0x7c] ss:$20 sps:$4 sm:$0xff]   ;;  %v25435_v47 = vld [vmem:[#allocation17_spill] sm:$0xff] }
 0x402   : > { %v5113_v46 = vmax.f32 %v4671_v50, %v20271_v14  ;;  %v5199_v9 = vadd.f32 %v20362_v51, %v5112_v32  ;;  %v25423_v49 = vld [vmem:[#allocation86_spill] sm:$0xff]  ;;  %v25426_v21 = vld [vmem:[#allocation120_spill] sm:$0xff]  ;;  %v25439_v45 = vld [vmem:[#allocation89_spill] sm:$0xff] }
 0x403   : > { %v5202_v23 = vadd.f32 %v20362_v51, %v5115_v22  ;;  %v25425_v8 = vmax.f32 %v25423_v49, %v25424_v11  ;;  %v25442_v49 = vld [vmem:[#allocation132_spill] sm:$0xff] }
 0x404   : > { %v5200_v39 = vadd.f32 %v20362_v51, %v5113_v46  ;;  %v14178_v34 = vpop.f32.mrb[136].mxu0  ;;  %7559 = vmatpush1.bf16.msra.mxu0 %v5258_v56 }
 0x405   : > { %v5260_v30 = vpack.c.bf16 %v5202_v23, %v5201_v62  ;;  %v4487_v14 = vpop.f32.mrb[137].mxu0  ;;  %v4676_v24 = vmax.f32 %v25416_v60, %v14178_v34  ;;  %7560 = vmatprep.subr.bf16.mxu0 %v25299_v37  ;;  %v15713_v62 = vld [vmem:[%s25149_s1 + $0xa4] ss:$20 sps:$4 sm:$0xff]  }
 0x406   : > { %v5259_v31 = vpack.c.bf16 %v5200_v39, %v5199_v9  ;;  %v14179_v27 = vpop.f32.mrb[138].mxu0  ;;  %v4674_v28 = vmax.f32 %v25419_v0, %v4487_v14  ;;  %v25428_v9 = vld [vmem:[#allocation184_spill] sm:$0xff]  ;;  %v25429_v39 = vld [vmem:[#allocation223_spill] sm:$0xff]  ;;  %v25436_v0 = vld [vmem:[#allocation193_spill] sm:$0xff] }
 0x407   : > { %v5118_v56 = vmax.f32 %v4676_v24, %v20299_v4  ;;  %v4490_v2 = vpop.f32.mrb[139].mxu0  ;;  %7120 = vmatmul.mubr.bf16.gmra.mrb[180].mxu0 %v15705_v43  ;;  %v4677_v6 = vmax.f32 %v25422_v55, %v14179_v27  ;;  %v25430_v34 = vmax.f32 %v25428_v9, %v25429_v39  ;;  %v25432_v60 = vld [vmem:[#allocation159_spill] sm:$0xff] }
 0x408   : > { %v5116_v52 = vmax.f32 %v4674_v28, %v20303_v19  ;;  %7561 = vmatpush1.bf16.msra.mxu0 %v5259_v31  ;;  %v4675_v1 = vmax.f32 %v25425_v8, %v4490_v2  ;;  %7127 = vmatprep.mubr.bf16.mxu0 %v15710_v53  ;;  %v15708_v19 = vld [vmem:[%s25149_s1 + $0x78] ss:$20 sps:$4 sm:$0xff]   ;;  %v25433_v24 = vmax.f32 %v25431_v38, %v25432_v60  ;;  %v25438_v2 = vld [vmem:[#allocation197_spill] sm:$0xff] }
 0x409   : > { %v5119_v32 = vmax.f32 %v4677_v6, %v25426_v21  ;;  %7562 = vmatprep.subr.bf16.mxu0 %v25299_v37  ;;  %v5205_v16 = vadd.f32 %v20362_v51, %v5118_v56  ;;  %v25434_v27 = vld [vmem:[#allocation227_spill] sm:$0xff]  ;;  %v25437_v28 = vmax.f32 %v25435_v47, %v25436_v0  ;;  %v25443_v8 = vld [vmem:[#allocation198_spill] sm:$0xff]  ;;  %v25450_v60 = vld [vmem:[#allocation144_spill] sm:$0xff] }
 0x40a   : > { %v5117_v4 = vmax.f32 %v4675_v1, %v25427_v18  ;;  %v5203_v50 = vadd.f32 %v20362_v51, %v5116_v52  ;;  %v25440_v55 = vld [vmem:[#allocation47_spill] sm:$0xff]  ;;  %v25454_v47 = vld [vmem:[#allocation126_spill] sm:$0xff]  ;;  %v25455_v0 = vld [vmem:[#allocation196_spill] sm:$0xff] }
 0x40b   : > { %v5206_v59 = vadd.f32 %v20362_v51, %v5119_v32  ;;  %v25441_v6 = vmax.f32 %v25439_v45, %v25440_v55  ;;  %v15711_v18 = vld [vmem:[%s25149_s1 + $0xa0] ss:$20 sps:$4 sm:$0xff]  }
 0x40c   : > { %v5204_v22 = vadd.f32 %v20362_v51, %v5117_v4  ;;  %v14182_v46 = vpop.f32.mrb[140].mxu0  ;;  %7563 = vmatpush1.bf16.msra.mxu0 %v5260_v30  ;;  %v25458_v45 = vld [vmem:[#allocation69_spill] sm:$0xff] }
 0x40d   : > { %v5262_v23 = vpack.c.bf16 %v5206_v59, %v5205_v16  ;;  %v4503_v43 = vpop.f32.mrb[141].mxu0  ;;  %v4680_v53 = vmax.f32 %v25430_v34, %v14182_v46  ;;  %7564 = vmatprep.subr.bf16.mxu0 %v25299_v37  ;;  %v25445_v46 = vld [vmem:[#allocation106_spill] sm:$0xff] }
 0x40e   : > { %v5261_v14 = vpack.c.bf16 %v5204_v22, %v5203_v50  ;;  %v14183_v61 = vpop.f32.mrb[142].mxu0  ;;  %v4678_v31 = vmax.f32 %v25433_v24, %v4503_v43  ;;  %v25444_v22 = vld [vmem:[#allocation92_spill] sm:$0xff]  ;;  %v25447_v34 = vld [vmem:[#allocation22_spill] sm:$0xff] }
 0x40f   : > { %v5122_v30 = vmax.f32 %v4680_v53, %v25434_v27  ;;  %v4506_v48 = vpop.f32.mrb[143].mxu0  ;;  %7128 = vmatmul.mubr.bf16.gmra.mrb[184].mxu0 %v15708_v19  ;;  %v4681_v56 = vmax.f32 %v25437_v28, %v14183_v61  ;;  %v15716_v19 = vld [vmem:[%s25149_s1 + $0xcc] ss:$20 sps:$4 sm:$0xff]   ;;  %v25453_v27 = vld [vmem:[#allocation67_spill] sm:$0xff]  ;;  %v25456_v28 = vmax.f32 %v25454_v47, %v25455_v0 }
 0x410   : > { %v5120_v10 = vmax.f32 %v4678_v31, %v25438_v2  ;;  %7565 = vmatpush1.bf16.msra.mxu0 %v5261_v14  ;;  %v4679_v52 = vmax.f32 %v25441_v6, %v4506_v48  ;;  %7135 = vmatprep.mubr.bf16.mxu0 %v15713_v62  ;;  %v25446_v62 = vmax.f32 %v25444_v22, %v25445_v46  ;;  %v25448_v53 = vld [vmem:[#allocation169_spill] sm:$0xff]  ;;  %v25457_v2 = vld [vmem:[#allocation166_spill] sm:$0xff]  ;;  %v25462_v46 = vld [vmem:[#allocation23_spill] sm:$0xff] }
 0x411   : > { %v5123_v11 = vmax.f32 %v4681_v56, %v25442_v49  ;;  %7566 = vmatprep.subr.bf16.mxu0 %v25299_v37  ;;  %v5209_v21 = vadd.f32 %v20362_v51, %v5122_v30  ;;  %v25449_v14 = vmax.f32 %v25447_v34, %v25448_v53  ;;  %v25465_v34 = vld [vmem:[#allocation97_spill] sm:$0xff] }
 0x412   : > { %v5121_v1 = vmax.f32 %v4679_v52, %v25443_v8  ;;  %v5207_v4 = vadd.f32 %v20362_v51, %v5120_v10 }
 0x413   : > { %v5210_v32 = vadd.f32 %v20362_v51, %v5123_v11  ;;  %v15714_v11 = vld [vmem:[%s25149_s1 + $0xc8] ss:$20 sps:$4 sm:$0xff]  }
 0x414   : > { %v5208_v16 = vadd.f32 %v20362_v51, %v5121_v1  ;;  %v14186_v59 = vpop.f32.mrb[144].mxu0  ;;  %7567 = vmatpush1.bf16.msra.mxu0 %v5262_v23  ;;  %v25451_v23 = vld [vmem:[#allocation55_spill] sm:$0xff] }
 0x415   : > { %v5264_v50 = vpack.c.bf16 %v5210_v32, %v5209_v21  ;;  %v4684_v43 = vmax.f32 %v25446_v62, %v14186_v59  ;;  %v4519_v9 = vpop.f32.mrb[145].mxu0  ;;  %7568 = vmatprep.subr.bf16.mxu0 %v25299_v37  ;;  %v25452_v24 = vmax.f32 %v25450_v60, %v25451_v23  ;;  %v15719_v32 = vld [vmem:[%s25149_s1 + $0xf4] ss:$20 sps:$4 sm:$0xff]  }
 0x416   : > { %v5263_v39 = vpack.c.bf16 %v5208_v16, %v5207_v4  ;;  %v4682_v61 = vmax.f32 %v25449_v14, %v4519_v9  ;;  %v14187_v38 = vpop.f32.mrb[146].mxu0  ;;  %v25460_v4 = vld [vmem:[#allocation59_spill] sm:$0xff]  ;;  %v25463_v62 = vld [vmem:[#allocation226_spill] sm:$0xff]  ;;  %v25468_v60 = vld [vmem:[#allocation185_spill] sm:$0xff] }
 0x417   : > { %v4685_v31 = vmax.f32 %v25452_v24, %v14187_v38  ;;  %v5126_v30 = vmax.f32 %v4684_v43, %v25453_v27  ;;  %v4522_v48 = vpop.f32.mrb[147].mxu0  ;;  %7136 = vmatmul.mubr.bf16.gmra.mrb[188].mxu0 %v15711_v18  ;;  %v25464_v43 = vmax.f32 %v25462_v46, %v25463_v62  ;;  %v25469_v23 = vld [vmem:[#allocation19_spill] sm:$0xff] }
 0x418   : > { %v4683_v56 = vmax.f32 %v25456_v28, %v4522_v48  ;;  %v5124_v10 = vmax.f32 %v4682_v61, %v25457_v2  ;;  %7569 = vmatpush1.bf16.msra.mxu0 %v5263_v39  ;;  %7143 = vmatprep.mubr.bf16.mxu0 %v15716_v19  ;;  %v25470_v24 = vmax.f32 %v25468_v60, %v25469_v23  ;;  %v25471_v27 = vld [vmem:[#allocation199_spill] sm:$0xff]  ;;  %v25472_v48 = vld [vmem:[#allocation137_spill] sm:$0xff] }
 0x419   : > { %v5127_v55 = vmax.f32 %v4685_v31, %v25458_v45  ;;  %7570 = vmatprep.subr.bf16.mxu0 %v25299_v37  ;;  %v5213_v52 = vadd.f32 %v20362_v51, %v5126_v30  ;;  %v15720_v60 = vld [vmem:[%s25149_s1 + $0x118] ss:$20 sps:$4 sm:$0xff]  }
 0x41a   : > { %v5125_v6 = vmax.f32 %v4683_v56, %v20379_v26  ;;  %v5211_v8 = vadd.f32 %v20362_v51, %v5124_v10  ;;  %v25459_v26 = vld [vmem:[#allocation94_spill] sm:$0xff] }
 0x41b   : > { %v5214_v49 = vadd.f32 %v20362_v51, %v5127_v55  ;;  %v25461_v16 = vmax.f32 %v25459_v26, %v25460_v4  ;;  %v15717_v56 = vld [vmem:[%s25149_s1 + $0xf0] ss:$20 sps:$4 sm:$0xff]  }
 0x41c   : > { %v5212_v1 = vadd.f32 %v20362_v51, %v5125_v6  ;;  %v14190_v21 = vpop.f32.mrb[148].mxu0  ;;  %7571 = vmatpush1.bf16.msra.mxu0 %v5264_v50  ;;  %v25466_v50 = vld [vmem:[#allocation63_spill] sm:$0xff] }
 0x41d   : > { %v5266_v18 = vpack.c.bf16 %v5214_v49, %v5213_v52  ;;  %v4688_v59 = vmax.f32 %v25461_v16, %v14190_v21  ;;  %v4535_v19 = vpop.f32.mrb[149].mxu0  ;;  %7572 = vmatprep.subr.bf16.mxu0 %v25299_v37  ;;  %v25467_v53 = vmax.f32 %v25465_v34, %v25466_v50  ;;  %v15722_v55 = vld [vmem:[%s25149_s1 + $0x11c] ss:$20 sps:$4 sm:$0xff]   ;;  %v25474_v52 = vld [vmem:[#allocation21_spill] sm:$0xff] }
 0x41e   : > { %v5265_v22 = vpack.c.bf16 %v5212_v1, %v5211_v8  ;;  %v4686_v9 = vmax.f32 %v25464_v43, %v4535_v19  ;;  %v14191_v39 = vpop.f32.mrb[150].mxu0  ;;  %v25476_v21 = vld [vmem:[#allocation186_spill] sm:$0xff]  ;;  %v25482_v43 = vld [vmem:[#allocation136_spill] sm:$0xff] }
 0x41f   : > { %v4689_v14 = vmax.f32 %v25467_v53, %v14191_v39  ;;  %v5130_v61 = vmax.f32 %v4688_v59, %v20395_v35  ;;  %v4538_v38 = vpop.f32.mrb[151].mxu0  ;;  %7144 = vmatmul.mubr.bf16.gmra.mrb[192].mxu0 %v15714_v11  ;;  %v25479_v59 = vld [vmem:[#allocation154_spill] sm:$0xff]  ;;  %v25485_v53 = vld [vmem:[#allocation103_spill] sm:$0xff] }
 0x420   : > { %v4687_v31 = vmax.f32 %v25470_v24, %v4538_v38  ;;  %v5128_v30 = vmax.f32 %v4686_v9, %v25471_v27  ;;  %7573 = vmatpush1.bf16.msra.mxu0 %v5265_v22  ;;  %7151 = vmatprep.mubr.bf16.mxu0 %v15719_v32  ;;  %v25477_v32 = vld [vmem:[#allocation205_spill] sm:$0xff]  ;;  %v25483_v9 = vld [vmem:[#allocation71_spill] sm:$0xff] }
 0x421   : > { %v5131_v47 = vmax.f32 %v4689_v14, %v25472_v48  ;;  %7574 = vmatprep.subr.bf16.mxu0 %v25299_v37  ;;  %v5217_v28 = vadd.f32 %v20362_v51, %v5130_v61  ;;  %v25478_v26 = vmax.f32 %v25476_v21, %v25477_v32  ;;  %v25484_v39 = vmax.f32 %v25482_v43, %v25483_v9 }
 0x422   : > { %v5129_v0 = vmax.f32 %v4687_v31, %v20409_v5  ;;  %v5215_v2 = vadd.f32 %v20362_v51, %v5128_v30  ;;  %v25473_v5 = vld [vmem:[#allocation100_spill] sm:$0xff]  ;;  %v25487_v30 = vld [vmem:[#allocation29_spill] sm:$0xff] }
 0x423   : > { %v5218_v35 = vadd.f32 %v20362_v51, %v5131_v47  ;;  %v25475_v49 = vmax.f32 %v25473_v5, %v25474_v52  ;;  %v15725_v31 = vld [vmem:[%s25149_s1 + $0x144] ss:$20 sps:$4 sm:$0xff]  }
 0x424   : > { %v5216_v10 = vadd.f32 %v20362_v51, %v5129_v0  ;;  %v14194_v45 = vpop.f32.mrb[152].mxu0  ;;  %7575 = vmatpush1.bf16.msra.mxu0 %v5266_v18  ;;  %v25480_v18 = vld [vmem:[#allocation25_spill] sm:$0xff] }
 0x425   : > { %v5268_v6 = vpack.c.bf16 %v5218_v35, %v5217_v28  ;;  %v4692_v11 = vmax.f32 %v25475_v49, %v14194_v45  ;;  %v4551_v8 = vpop.f32.mrb[153].mxu0  ;;  %7576 = vmatprep.subr.bf16.mxu0 %v25299_v37  ;;  %v25481_v19 = vmax.f32 %v25479_v59, %v25480_v18  ;;  %v25489_v35 = vld [vmem:[#allocation187_spill] sm:$0xff] }
 0x426   : > { %v5267_v1 = vpack.c.bf16 %v5216_v10, %v5215_v2  ;;  %v4690_v4 = vmax.f32 %v25478_v26, %v4551_v8  ;;  %v14195_v16 = vpop.f32.mrb[154].mxu0  ;;  %v25495_v8 = vld [vmem:[#allocation8_spill] sm:$0xff] }
 0x427   : > { %v4693_v22 = vmax.f32 %v25481_v19, %v14195_v16  ;;  %v5134_v46 = vmax.f32 %v4692_v11, %v20425_v44  ;;  %v4554_v62 = vpop.f32.mrb[155].mxu0  ;;  %7152 = vmatmul.mubr.bf16.gmra.mrb[196].mxu0 %v15717_v56  ;;  %v25490_v56 = vld [vmem:[#allocation75_spill] sm:$0xff] }
 0x428   : > { %v4691_v34 = vmax.f32 %v25484_v39, %v4554_v62  ;;  %v5132_v50 = vmax.f32 %v4690_v4, %v20429_v3  ;;  %7577 = vmatpush1.bf16.msra.mxu0 %v5267_v1  ;;  %7159 = vmatprep.mubr.bf16.mxu0 %v15722_v55  ;;  %v25491_v2 = vmax.f32 %v25489_v35, %v25490_v56  ;;  %v25492_v55 = vld [vmem:[#allocation107_spill] sm:$0xff]  ;;  %v15726_v56 = vld [vmem:[%s25149_s1 + $0x168] ss:$20 sps:$4 sm:$0xff]  }
 0x429   : > { %v5135_v14 = vmax.f32 %v4693_v22, %v25485_v53  ;;  %7578 = vmatprep.subr.bf16.mxu0 %v25299_v37  ;;  %v5221_v38 = vadd.f32 %v20362_v51, %v5134_v46  ;;  %v25496_v1 = vld [vmem:[#allocation79_spill] sm:$0xff]  ;;  %v25498_v46 = vld [vmem:[#allocation110_spill] sm:$0xff] }
 0x42a   : > { %v5133_v61 = vmax.f32 %v4691_v34, %v20439_v29  ;;  %v5219_v23 = vadd.f32 %v20362_v51, %v5132_v50  ;;  %v25486_v29 = vld [vmem:[#allocation102_spill] sm:$0xff]  ;;  %v25497_v21 = vmax.f32 %v25495_v8, %v25496_v1  ;;  %v15723_v18 = vld [vmem:[%s25149_s1 + $0x140] ss:$20 sps:$4 sm:$0xff]  }
 0x42b   : > { %v5222_v44 = vadd.f32 %v20362_v51, %v5135_v14  ;;  %v25488_v48 = vmax.f32 %v25486_v29, %v25487_v30  ;;  %v25501_v34 = vld [vmem:[#allocation190_spill] sm:$0xff]  ;;  %v25502_v50 = vld [vmem:[#allocation216_spill] sm:$0xff]  ;;  %v25508_v29 = vld [vmem:[#allocation87_spill] sm:$0xff] }
 0x42c   : > { %v5220_v3 = vadd.f32 %v20362_v51, %v5133_v61  ;;  %v14198_v24 = vpop.f32.mrb[156].mxu0  ;;  %7579 = vmatpush1.bf16.msra.mxu0 %v5268_v6  ;;  %v25493_v6 = vld [vmem:[#allocation33_spill] sm:$0xff]  ;;  %v25503_v53 = vmax.f32 %v25501_v34, %v25502_v50  ;;  %v25522_v50 = vld [vmem:[#allocation174_spill] sm:$0xff] }
 0x42d   : > { %v5270_v27 = vpack.c.bf16 %v5222_v44, %v5221_v38  ;;  %v4696_v47 = vmax.f32 %v25488_v48, %v14198_v24  ;;  %v4567_v0 = vpop.f32.mrb[157].mxu0  ;;  %7580 = vmatprep.subr.bf16.mxu0 %v25299_v37  ;;  %v25494_v5 = vmax.f32 %v25492_v55, %v25493_v6  ;;  %v25504_v44 = vld [vmem:[#allocation164_spill] sm:$0xff] }
 0x42e   : > { %v5269_v28 = vpack.c.bf16 %v5220_v3, %v5219_v23  ;;  %v4694_v10 = vmax.f32 %v25491_v2, %v4567_v0  ;;  %v14199_v45 = vpop.f32.mrb[158].mxu0 }
 0x42f   : > { %v4697_v52 = vmax.f32 %v25494_v5, %v14199_v45  ;;  %v5138_v49 = vmax.f32 %v4696_v47, %v20455_v20  ;;  %v4570_v11 = vpop.f32.mrb[159].mxu0  ;;  %7160 = vmatmul.mubr.bf16.gmra.mrb[200].mxu0 %v15720_v60  ;;  %v25505_v60 = vld [vmem:[#allocation41_spill] sm:$0xff]  ;;  %v25510_v45 = vld [vmem:[#allocation112_spill] sm:$0xff] }
 0x430   : > { %v4695_v32 = vmax.f32 %v25497_v21, %v4570_v11  ;;  %v5136_v26 = vmax.f32 %v4694_v10, %v20459_v41  ;;  %7581 = vmatpush1.bf16.msra.mxu0 %v5269_v28  ;;  %7167 = vmatprep.mubr.bf16.mxu0 %v15725_v31  ;;  %v25506_v23 = vmax.f32 %v25504_v44, %v25505_v60  ;;  %v25514_v11 = vld [vmem:[#allocation28_spill] sm:$0xff]  ;;  %v25526_v60 = vld [vmem:[#allocation34_spill] sm:$0xff] }
 0x431   : > { %v5139_v4 = vmax.f32 %v4697_v52, %v20463_v54  ;;  %7582 = vmatprep.subr.bf16.mxu0 %v25299_v37  ;;  %v5225_v59 = vadd.f32 %v20362_v51, %v5138_v49  ;;  %v15728_v54 = vld [vmem:[%s25149_s1 + $0x16c] ss:$20 sps:$4 sm:$0xff]   ;;  %v25513_v49 = vld [vmem:[#allocation191_spill] sm:$0xff] }
 0x432   : > { %v5137_v16 = vmax.f32 %v4695_v32, %v20469_v12  ;;  %v5223_v19 = vadd.f32 %v20362_v51, %v5136_v26  ;;  %v25499_v12 = vld [vmem:[#allocation37_spill] sm:$0xff]  ;;  %v25515_v8 = vmax.f32 %v25513_v49, %v25514_v11  ;;  %v25525_v44 = vld [vmem:[#allocation156_spill] sm:$0xff] }
 0x433   : > { %v5226_v20 = vadd.f32 %v20362_v51, %v5139_v4  ;;  %v25500_v62 = vmax.f32 %v25498_v46, %v25499_v12  ;;  %v25516_v26 = vld [vmem:[#allocation117_spill] sm:$0xff]  ;;  %v15746_v11 = vld [vmem:[%s25149_s1 + $0x25c] ss:$20 sps:$4 sm:$0xff]   ;;  %v16057_v37 = vld [vmem:[%s25149_s1 + $0x698] ss:$20 sps:$4 sm:$0xff]  }
 0x434   : > { %v5224_v41 = vadd.f32 %v20362_v51, %v5137_v16  ;;  %v14202_v22 = vpop.f32.mrb[160].mxu0  ;;  %7583 = vmatpush1.bf16.msra.mxu0 %v5270_v27  ;;  %v25507_v27 = vld [vmem:[#allocation146_spill] sm:$0xff]  ;;  %v25517_v4 = vld [vmem:[#allocation49_spill] sm:$0xff] }
 0x435   : > { %v4700_v43 = vmax.f32 %v25500_v62, %v14202_v22  ;;  %v4583_v9 = vpop.f32.mrb[161].mxu0  ;;  %v5272_v39 = vpack.c.bf16 %v5226_v20, %v5225_v59  ;;  %v25509_v30 = vmax.f32 %v25507_v27, %v25508_v29  ;;  %v25518_v16 = vmax.f32 %v25516_v26, %v25517_v4  ;;  %v25528_v27 = vld [vmem:[#allocation122_spill] sm:$0xff]  ;;  %v25529_v29 = vld [vmem:[#allocation57_spill] sm:$0xff] }
 0x436   : > { %v4698_v14 = vmax.f32 %v25503_v53, %v4583_v9  ;;  %v14203_v61 = vpop.f32.mrb[162].mxu0  ;;  %v5271_v38 = vpack.c.bf16 %v5224_v41, %v5223_v19  ;;  %v25519_v19 = vld [vmem:[#allocation11_spill] sm:$0xff]  ;;  %v15750_v26 = vld [vmem:[%s25149_s1 + $0x2a8] ss:$20 sps:$4 sm:$0xff]  }
 0x437   : > { %v4701_v3 = vmax.f32 %v25506_v23, %v14203_v61  ;;  %v5142_v24 = vmax.f32 %v4700_v43, %v20485_v42  ;;  %v4586_v31 = vpop.f32.mrb[163].mxu0  ;;  %7168 = vmatmul.mubr.bf16.gmra.mrb[204].mxu0 %v15723_v18  ;;  %v25520_v41 = vld [vmem:[#allocation95_spill] sm:$0xff]  ;;  %v25527_v23 = vmax.f32 %v25525_v44, %v25526_v60 }
 0x438   : > { %v4699_v48 = vmax.f32 %v25509_v30, %v4586_v31  ;;  %v5140_v47 = vmax.f32 %v4698_v14, %v20489_v15  ;;  %14294 = vmatprep.subr.bf16.mxu1 %v5271_v38  ;;  %7175 = vmatprep.mubr.bf16.mxu0 %v15728_v54  ;;  %v25521_v22 = vmax.f32 %v25519_v19, %v25520_v41  ;;  %v15729_v9 = vld [vmem:[%s25149_s1 + $0x190] ss:$20 sps:$4 sm:$0xff]   ;;  %v15755_v4 = vld [vmem:[%s25149_s1 + $0x2d4] ss:$20 sps:$4 sm:$0xff]   ;;  %v15764_v41 = vld [vmem:[%s25149_s1 + $0x34c] ss:$20 sps:$4 sm:$0xff]  }
 0x439   : > { %v5143_v0 = vmax.f32 %v4701_v3, %v20493_v57  ;;  %14295 = vmatpush3.bf16.msra.mxu1 %v5271_v38  ;;  %v5229_v35 = vadd.f32 %v20362_v51, %v5142_v24  ;;  %v15731_v57 = vld [vmem:[%s25149_s1 + $0x194] ss:$20 sps:$4 sm:$0xff]   ;;  %v25530_v30 = vmax.f32 %v25528_v27, %v25529_v29  ;;  %v15741_v49 = vld [vmem:[%s25149_s1 + $0x230] ss:$20 sps:$4 sm:$0xff]  }
 0x43a   : > { %v5141_v28 = vmax.f32 %v4699_v48, %v20499_v40  ;;  %14296 = vmatprep.subr.bf16.mxu1 %v5272_v39  ;;  %v5227_v2 = vadd.f32 %v20362_v51, %v5140_v47  ;;  %v25511_v40 = vld [vmem:[#allocation45_spill] sm:$0xff]  ;;  %v15794_v60 = vld [vmem:[%s25149_s1 + $0x4dc] ss:$20 sps:$4 sm:$0xff]  }
 0x43b   : > { %v5230_v42 = vadd.f32 %v20362_v51, %v5143_v0  ;;  %v25512_v55 = vmax.f32 %v25510_v45, %v25511_v40  ;;  %v15732_v45 = vld [vmem:[%s25149_s1 + $0x1b8] ss:$20 sps:$4 sm:$0xff]   ;;  %v15759_v19 = vld [vmem:[%s25149_s1 + $0x320] ss:$20 sps:$4 sm:$0xff]   ;;  %v15789_v44 = vld [vmem:[%s25149_s1 + $0x4b0] ss:$20 sps:$4 sm:$0xff]  }
 0x43c   : > { %v5228_v15 = vadd.f32 %v20362_v51, %v5141_v28  ;;  %v14206_v10 = vpop.f32.mrb[164].mxu0  ;;  %v25531_v28 = vld [vmem:[#allocation195_spill] sm:$0xff]  ;;  %v15798_v27 = vld [vmem:[%s25149_s1 + $0x528] ss:$20 sps:$4 sm:$0xff]  }
 0x43d   : > { %v4704_v6 = vmax.f32 %v25512_v55, %v14206_v10  ;;  %v4599_v5 = vpop.f32.mrb[165].mxu0  ;;  %14297 = vmatpush3.bf16.msra.mxu1 %v5272_v39  ;;  %v5274_v52 = vpack.c.bf16 %v5230_v42, %v5229_v35  ;;  %v25532_v35 = vld [vmem:[#allocation101_spill] sm:$0xff] }
 0x43e   : > { %v4702_v1 = vmax.f32 %v25515_v8, %v4599_v5  ;;  %v14207_v21 = vpop.f32.mrb[166].mxu0  ;;  %v5273_v32 = vpack.c.bf16 %v5228_v15, %v5227_v2  ;;  %v25533_v42 = vmax.f32 %v25531_v28, %v25532_v35  ;;  %v15738_v5 = vld [vmem:[%s25149_s1 + $0x208] ss:$20 sps:$4 sm:$0xff]   ;;  %v15744_v8 = vld [vmem:[%s25149_s1 + $0x258] ss:$20 sps:$4 sm:$0xff]  }
 0x43f   : > { %v4705_v59 = vmax.f32 %v25518_v16, %v14207_v21  ;;  %v5146_v20 = vmax.f32 %v4704_v6, %v20515_v7  ;;  %v4602_v18 = vpop.f32.mrb[167].mxu0  ;;  %7176 = vmatmul.mubr.bf16.gmra.mrb[208].mxu0 %v15726_v56  ;;  %v15735_v6 = vld [vmem:[%s25149_s1 + $0x1e0] ss:$20 sps:$4 sm:$0xff]   ;;  %v15753_v16 = vld [vmem:[%s25149_s1 + $0x2d0] ss:$20 sps:$4 sm:$0xff]  }
 0x440   : > { %v4703_v54 = vmax.f32 %v25521_v22, %v4602_v18  ;;  %v5144_v46 = vmax.f32 %v4702_v1, %v20519_v63  ;;  %14298 = vmatprep.subr.bf16.mxu1 %v5273_v32  ;;  %7183 = vmatprep.mubr.bf16.mxu0 %v15731_v57  ;;  %v15749_v1 = vld [vmem:[%s25149_s1 + $0x284] ss:$20 sps:$4 sm:$0xff]   ;;  %v15747_v21 = vld [vmem:[%s25149_s1 + $0x280] ss:$20 sps:$4 sm:$0xff]   ;;  %v15762_v22 = vld [vmem:[%s25149_s1 + $0x348] ss:$20 sps:$4 sm:$0xff]  }
 0x441   : > { %v5147_v12 = vmax.f32 %v4705_v59, %v20523_v33  ;;  %14299 = vmatpush3.bf16.msra.mxu1 %v5273_v32  ;;  %v5233_v43 = vadd.f32 %v20362_v51, %v5146_v20  ;;  %v15734_v33 = vld [vmem:[%s25149_s1 + $0x1bc] ss:$20 sps:$4 sm:$0xff]   ;;  %v15752_v32 = vld [vmem:[%s25149_s1 + $0x2ac] ss:$20 sps:$4 sm:$0xff]   ;;  %v15761_v18 = vld [vmem:[%s25149_s1 + $0x324] ss:$20 sps:$4 sm:$0xff]  }
 0x442   : > { %v5145_v62 = vmax.f32 %v4703_v54, %v20529_v17  ;;  %14300 = vmatprep.subr.bf16.mxu1 %v5274_v52  ;;  %v5231_v39 = vadd.f32 %v20362_v51, %v5144_v46  ;;  %v25523_v17 = vld [vmem:[#allocation53_spill] sm:$0xff]  ;;  %v15758_v59 = vld [vmem:[%s25149_s1 + $0x2fc] ss:$20 sps:$4 sm:$0xff]   ;;  %v15756_v20 = vld [vmem:[%s25149_s1 + $0x2f8] ss:$20 sps:$4 sm:$0xff]  }
 0x443   : > { %v5234_v7 = vadd.f32 %v20362_v51, %v5147_v12  ;;  %v25524_v53 = vmax.f32 %v25522_v50, %v25523_v17  ;;  %v15767_v54 = vld [vmem:[%s25149_s1 + $0x374] ss:$20 sps:$4 sm:$0xff]   ;;  %v15765_v46 = vld [vmem:[%s25149_s1 + $0x370] ss:$20 sps:$4 sm:$0xff]   ;;  %v15780_v50 = vld [vmem:[%s25149_s1 + $0x438] ss:$20 sps:$4 sm:$0xff]  }
 0x444   : > { %v5232_v63 = vadd.f32 %v20362_v51, %v5145_v62  ;;  %v14210_v34 = vpop.f32.mrb[168].mxu0  ;;  %v15770_v12 = vld [vmem:[%s25149_s1 + $0x39c] ss:$20 sps:$4 sm:$0xff]   ;;  %v15768_v62 = vld [vmem:[%s25149_s1 + $0x398] ss:$20 sps:$4 sm:$0xff]  }
 0x445   : > { %v4708_v14 = vmax.f32 %v25524_v53, %v14210_v34  ;;  %v4615_v61 = vpop.f32.mrb[169].mxu0  ;;  %14301 = vmatpush3.bf16.msra.mxu1 %v5274_v52  ;;  %v5276_v38 = vpack.c.bf16 %v5234_v7, %v5233_v43  ;;  %v15743_v52 = vld [vmem:[%s25149_s1 + $0x234] ss:$20 sps:$4 sm:$0xff]   ;;  %v15773_v43 = vld [vmem:[%s25149_s1 + $0x3c4] ss:$20 sps:$4 sm:$0xff]  }
 0x446   : > { %v4706_v3 = vmax.f32 %v25527_v23, %v4615_v61  ;;  %v14211_v24 = vpop.f32.mrb[170].mxu0  ;;  %v5275_v31 = vpack.c.bf16 %v5232_v63, %v5231_v39  ;;  %v15771_v7 = vld [vmem:[%s25149_s1 + $0x3c0] ss:$20 sps:$4 sm:$0xff]   ;;  %v15774_v39 = vld [vmem:[%s25149_s1 + $0x3e8] ss:$20 sps:$4 sm:$0xff]  }
 0x447   : > { %v4709_v48 = vmax.f32 %v25530_v30, %v14211_v24  ;;  %v5150_v47 = vmax.f32 %v4708_v14, %v20545_v13  ;;  %v4618_v0 = vpop.f32.mrb[171].mxu0  ;;  %7184 = vmatmul.mubr.bf16.gmra.mrb[212].mxu0 %v15729_v9  ;;  %v15776_v9 = vld [vmem:[%s25149_s1 + $0x3ec] ss:$20 sps:$4 sm:$0xff]   ;;  %v15779_v63 = vld [vmem:[%s25149_s1 + $0x414] ss:$20 sps:$4 sm:$0xff]  }
 0x448   : > { %v4707_v56 = vmax.f32 %v25533_v42, %v4618_v0  ;;  %v5148_v2 = vmax.f32 %v4706_v3, %v20549_v36  ;;  %14302 = vmatprep.subr.bf16.mxu1 %v5275_v31  ;;  %7191 = vmatprep.mubr.bf16.mxu0 %v15734_v33  ;;  %v15777_v34 = vld [vmem:[%s25149_s1 + $0x410] ss:$20 sps:$4 sm:$0xff]   ;;  %v15783_v53 = vld [vmem:[%s25149_s1 + $0x460] ss:$20 sps:$4 sm:$0xff]   ;;  %v15786_v61 = vld [vmem:[%s25149_s1 + $0x488] ss:$20 sps:$4 sm:$0xff]  }
 0x449   : > { %v5151_v15 = vmax.f32 %v4709_v48, %v20553_v58  ;;  %14303 = vmatpush3.bf16.msra.mxu1 %v5275_v31  ;;  %v5237_v57 = vadd.f32 %v20362_v51, %v5150_v47  ;;  %v15737_v58 = vld [vmem:[%s25149_s1 + $0x1e4] ss:$20 sps:$4 sm:$0xff]   ;;  %v15782_v33 = vld [vmem:[%s25149_s1 + $0x43c] ss:$20 sps:$4 sm:$0xff]   ;;  %v15788_v14 = vld [vmem:[%s25149_s1 + $0x48c] ss:$20 sps:$4 sm:$0xff]  }
 0x44a   : > { %v5149_v10 = vmax.f32 %v4707_v56, %v20559_v25  ;;  %14304 = vmatprep.subr.bf16.mxu1 %v5276_v38  ;;  %v5235_v40 = vadd.f32 %v20362_v51, %v5148_v2  ;;  %v15785_v17 = vld [vmem:[%s25149_s1 + $0x464] ss:$20 sps:$4 sm:$0xff]   ;;  %v15795_v24 = vld [vmem:[%s25149_s1 + $0x500] ss:$20 sps:$4 sm:$0xff]   ;;  %v15806_v48 = vld [vmem:[%s25149_s1 + $0x57c] ss:$20 sps:$4 sm:$0xff]  }
 0x44b   : > { %v5238_v13 = vadd.f32 %v20362_v51, %v5151_v15  ;;  %v15792_v23 = vld [vmem:[%s25149_s1 + $0x4d8] ss:$20 sps:$4 sm:$0xff]   ;;  %v15803_v29 = vld [vmem:[%s25149_s1 + $0x554] ss:$20 sps:$4 sm:$0xff]   ;;  %v15801_v30 = vld [vmem:[%s25149_s1 + $0x550] ss:$20 sps:$4 sm:$0xff]  }
 0x44c   : > { %v5236_v36 = vadd.f32 %v20362_v51, %v5149_v10  ;;  %v15740_v51 = vld [vmem:[%s25149_s1 + $0x20c] ss:$20 sps:$4 sm:$0xff]   ;;  %v15797_v3 = vld [vmem:[%s25149_s1 + $0x504] ss:$20 sps:$4 sm:$0xff]   ;;  %v15810_v42 = vld [vmem:[%s25149_s1 + $0x5c8] ss:$20 sps:$4 sm:$0xff]  }
 0x44d   : > { %14305 = vmatpush3.bf16.msra.mxu1 %v5276_v38  ;;  %v5278_v55 = vpack.c.bf16 %v5238_v13, %v5237_v57  ;;  %v15791_v38 = vld [vmem:[%s25149_s1 + $0x4b4] ss:$20 sps:$4 sm:$0xff]   ;;  %v15800_v31 = vld [vmem:[%s25149_s1 + $0x52c] ss:$20 sps:$4 sm:$0xff]   ;;  %v15809_v0 = vld [vmem:[%s25149_s1 + $0x5a4] ss:$20 sps:$4 sm:$0xff]  }
 0x44e   : > { %v5277_v25 = vpack.c.bf16 %v5236_v36, %v5235_v40  ;;  %v15804_v47 = vld [vmem:[%s25149_s1 + $0x578] ss:$20 sps:$4 sm:$0xff]   ;;  %v15807_v28 = vld [vmem:[%s25149_s1 + $0x5a0] ss:$20 sps:$4 sm:$0xff]   ;;  %v15813_v2 = vld [vmem:[%s25149_s1 + $0x5f0] ss:$20 sps:$4 sm:$0xff]  }
 0x44f   : > { %7192 = vmatmul.mubr.bf16.gmra.mrb[216].mxu0 %v15732_v45  ;;  %v15812_v35 = vld [vmem:[%s25149_s1 + $0x5cc] ss:$20 sps:$4 sm:$0xff]   ;;  %v15815_v56 = vld [vmem:[%s25149_s1 + $0x5f4] ss:$20 sps:$4 sm:$0xff]   ;;  %v15818_v15 = vld [vmem:[%s25149_s1 + $0x61c] ss:$20 sps:$4 sm:$0xff]  }
 0x450   : > { %14306 = vmatprep.subr.bf16.mxu1 %v5277_v25  ;;  %7199 = vmatprep.mubr.bf16.mxu0 %v15737_v58  ;;  %v15816_v10 = vld [vmem:[%s25149_s1 + $0x618] ss:$20 sps:$4 sm:$0xff]   ;;  %v15867_v13 = vld [vmem:[%s25149_s1 + $0x10] ss:$20 sps:$4 sm:$0xff]   ;;  %v15819_v40 = vld [vmem:[%s25149_s1 + $0x640] ss:$20 sps:$4 sm:$0xff]  }
 0x451   : > { %14307 = vmatpush3.bf16.msra.mxu1 %v5277_v25  ;;  %v15821_v57 = vld [vmem:[%s25149_s1 + $0x644] ss:$20 sps:$4 sm:$0xff]   ;;  %14310 = vmatprep.mubr.bf16.mxu1 %v15867_v13  ;;  %v15824_v36 = vld [vmem:[%s25149_s1 + $0x66c] ss:$20 sps:$4 sm:$0xff]   ;;  %v15822_v58 = vld [vmem:[%s25149_s1 + $0x668] ss:$20 sps:$4 sm:$0xff]  }
 0x452   : > { %14308 = vmatprep.subr.bf16.mxu1 %v5278_v55  ;;  %v15871_v45 = vld [vmem:[%s25149_s1 + $0x38] ss:$20 sps:$4 sm:$0xff]   ;;  %v15875_v25 = vld [vmem:[%s25149_s1 + $0x60] ss:$20 sps:$4 sm:$0xff]   ;;  %v15948_v13 = vld [vmem:[%s25149_s1 + $0x448] ss:$20 sps:$4 sm:$0xff]  }
 0x455   : > { %14309 = vmatpush3.bf16.msra.mxu1 %v5278_v55  ;;  %v15827_v55 = vld [vmem:[%s25149_s1 + $0x694] ss:$20 sps:$4 sm:$0xff]  }
 0x457   : > { %7200 = vmatmul.mubr.bf16.gmra.mrb[220].mxu0 %v15735_v6  ;;  %v15879_v6 = vld [vmem:[%s25149_s1 + $0x88] ss:$20 sps:$4 sm:$0xff]  }
 0x458   : > { %7207 = vmatprep.mubr.bf16.mxu0 %v15740_v51  ;;  %14311 = vmatmul.mubr.bf16.vlgmr.msra.gmra.mrb[116].mxu1 %v15871_v45  ;;  %v15825_v51 = vld [vmem:[%s25149_s1 + $0x690] ss:$20 sps:$4 sm:$0xff]   ;;  %v15876_v45 = vld [vmem:[%s25149_s1 + $0x58] ss:$20 sps:$4 sm:$0xff]  }
 0x459   : > { %14314 = vmatprep.mubr.bf16.mxu1 %v15875_v25  ;;  %v15886_v25 = vld [vmem:[%s25149_s1 + $0xac] ss:$20 sps:$4 sm:$0xff]  }
 0x45f   : > { %7208 = vmatmul.mubr.bf16.gmra.mrb[224].mxu0 %v15738_v5  ;;  %v15830_v5 = vld [vmem:[%s25149_s1 + $0x6bc] ss:$20 sps:$4 sm:$0xff]  }
 0x460   : > { %7215 = vmatprep.mubr.bf16.mxu0 %v15743_v52  ;;  %14315 = vmatmul.mubr.bf16.gmra.mrb[120].mxu1 %v15879_v6  ;;  %v15828_v52 = vld [vmem:[%s25149_s1 + $0x6b8] ss:$20 sps:$4 sm:$0xff]   ;;  %v15957_v6 = vld [vmem:[%s25149_s1 + $0x4c0] ss:$20 sps:$4 sm:$0xff]  }
 0x467   : > { %7216 = vmatmul.mubr.bf16.gmra.mrb[228].mxu0 %v15741_v49  ;;  %v15833_v49 = vld [vmem:[%s25149_s1 + $0x6e4] ss:$20 sps:$4 sm:$0xff]  }
 0x468   : > { %7223 = vmatprep.mubr.bf16.mxu0 %v15746_v11  ;;  %v15883_v11 = vld [vmem:[%s25149_s1 + $0xb0] ss:$20 sps:$4 sm:$0xff]  }
 0x469   : > { %14318 = vmatprep.mubr.bf16.mxu1 %v15883_v11  ;;  %v15963_v11 = vld [vmem:[%s25149_s1 + $0x538] ss:$20 sps:$4 sm:$0xff]  }
 0x46f   : > { %7224 = vmatmul.mubr.bf16.gmra.mrb[232].mxu0 %v15744_v8  ;;  %v15887_v8 = vld [vmem:[%s25149_s1 + $0xd8] ss:$20 sps:$4 sm:$0xff]  }
 0x470   : > { %7231 = vmatprep.mubr.bf16.mxu0 %v15749_v1  ;;  %14319 = vmatmul.mubr.bf16.gmra.mrb[124].mxu1 %v15887_v8  ;;  %v15831_v1 = vld [vmem:[%s25149_s1 + $0x6e0] ss:$20 sps:$4 sm:$0xff]   ;;  %v15888_v8 = vld [vmem:[%s25149_s1 + $0xd0] ss:$20 sps:$4 sm:$0xff]  }
 0x477   : > { %7232 = vmatmul.mubr.bf16.gmra.mrb[236].mxu0 %v15747_v21  ;;  %v15836_v21 = vld [vmem:[%s25149_s1 + $0x70c] ss:$20 sps:$4 sm:$0xff]  }
 0x478   : > { %7239 = vmatprep.mubr.bf16.mxu0 %v15752_v32  ;;  %v15834_v32 = vld [vmem:[%s25149_s1 + $0x708] ss:$20 sps:$4 sm:$0xff]  }
 0x47f   : > { %7240 = vmatmul.mubr.bf16.gmra.mrb[240].mxu0 %v15750_v26  ;;  %v15839_v26 = vld [vmem:[%s25149_s1 + $0x734] ss:$20 sps:$4 sm:$0xff]  }
 0x480   : > { %7247 = vmatprep.mubr.bf16.mxu0 %v15755_v4  ;;  %v15891_v4 = vld [vmem:[%s25149_s1 + $0x100] ss:$20 sps:$4 sm:$0xff]  }
 0x481   : > { %14322 = vmatprep.mubr.bf16.mxu1 %v15891_v4  ;;  %v15898_v4 = vld [vmem:[%s25149_s1 + $0x124] ss:$20 sps:$4 sm:$0xff]  }
 0x487   : > { %7248 = vmatmul.mubr.bf16.gmra.mrb[244].mxu0 %v15753_v16  ;;  %v15895_v16 = vld [vmem:[%s25149_s1 + $0x128] ss:$20 sps:$4 sm:$0xff]  }
 0x488   : > { %7255 = vmatprep.mubr.bf16.mxu0 %v15758_v59  ;;  %14323 = vmatmul.mubr.bf16.gmra.mrb[128].mxu1 %v15895_v16  ;;  %v15837_v59 = vld [vmem:[%s25149_s1 + $0x730] ss:$20 sps:$4 sm:$0xff]  }
 0x489   : > { %v15972_v16 = vld [vmem:[%s25149_s1 + $0x5b0] ss:$20 sps:$4 sm:$0xff]  }
 0x48f   : > { %7256 = vmatmul.mubr.bf16.gmra.mrb[248].mxu0 %v15756_v20  ;;  %v15842_v20 = vld [vmem:[%s25149_s1 + $0x75c] ss:$20 sps:$4 sm:$0xff]  }
 0x490   : > { %7263 = vmatprep.mubr.bf16.mxu0 %v15761_v18  ;;  %v15840_v18 = vld [vmem:[%s25149_s1 + $0x758] ss:$20 sps:$4 sm:$0xff]  }
 0x497   : > { %7264 = vmatmul.mubr.bf16.gmra.mrb[252].mxu0 %v15759_v19  ;;  %v15845_v19 = vld [vmem:[%s25149_s1 + $0x784] ss:$20 sps:$4 sm:$0xff]  }
 0x498   : > { %7271 = vmatprep.mubr.bf16.mxu0 %v15764_v41  ;;  %v15899_v41 = vld [vmem:[%s25149_s1 + $0x150] ss:$20 sps:$4 sm:$0xff]  }
 0x499   : > { %14326 = vmatprep.mubr.bf16.mxu1 %v15899_v41  ;;  %v15978_v41 = vld [vmem:[%s25149_s1 + $0x628] ss:$20 sps:$4 sm:$0xff]  }
 0x49f   : > { %7272 = vmatmul.mubr.bf16.gmra.mrb[0].mxu0 %v15762_v22  ;;  %v15903_v22 = vld [vmem:[%s25149_s1 + $0x178] ss:$20 sps:$4 sm:$0xff]  }
 0x4a0   : > { %7279 = vmatprep.mubr.bf16.mxu0 %v15767_v54  ;;  %14327 = vmatmul.mubr.bf16.gmra.mrb[132].mxu1 %v15903_v22  ;;  %v15843_v54 = vld [vmem:[%s25149_s1 + $0x780] ss:$20 sps:$4 sm:$0xff]   ;;  %v15900_v22 = vld [vmem:[%s25149_s1 + $0x148] ss:$20 sps:$4 sm:$0xff]  }
 0x4a7   : > { %7280 = vmatmul.mubr.bf16.gmra.mrb[4].mxu0 %v15765_v46  ;;  %v15848_v46 = vld [vmem:[%s25149_s1 + $0x7ac] ss:$20 sps:$4 sm:$0xff]  }
 0x4a8   : > { %7287 = vmatprep.mubr.bf16.mxu0 %v15770_v12  ;;  %v15846_v12 = vld [vmem:[%s25149_s1 + $0x7a8] ss:$20 sps:$4 sm:$0xff]  }
 0x4af   : > { %7288 = vmatmul.mubr.bf16.gmra.mrb[8].mxu0 %v15768_v62  ;;  %v15851_v62 = vld [vmem:[%s25149_s1 + $0x7d4] ss:$20 sps:$4 sm:$0xff]  }
 0x4b0   : > { %7295 = vmatprep.mubr.bf16.mxu0 %v15773_v43  ;;  %v15907_v43 = vld [vmem:[%s25149_s1 + $0x1a0] ss:$20 sps:$4 sm:$0xff]  }
 0x4b1   : > { %14330 = vmatprep.mubr.bf16.mxu1 %v15907_v43  ;;  %v15911_v43 = vld [vmem:[%s25149_s1 + $0x19c] ss:$20 sps:$4 sm:$0xff]  }
 0x4b7   : > { %7296 = vmatmul.mubr.bf16.gmra.mrb[12].mxu0 %v15771_v7  ;;  %v15908_v7 = vld [vmem:[%s25149_s1 + $0x1c8] ss:$20 sps:$4 sm:$0xff]  }
 0x4b8   : > { %7303 = vmatprep.mubr.bf16.mxu0 %v15776_v9  ;;  %14331 = vmatmul.mubr.bf16.gmra.mrb[136].mxu1 %v15908_v7  ;;  %v15849_v9 = vld [vmem:[%s25149_s1 + $0x7d0] ss:$20 sps:$4 sm:$0xff]   ;;  %v15987_v7 = vld [vmem:[%s25149_s1 + $0x6a0] ss:$20 sps:$4 sm:$0xff]  }
 0x4bf   : > { %7304 = vmatmul.mubr.bf16.gmra.mrb[16].mxu0 %v15774_v39  ;;  %v15854_v39 = vld [vmem:[%s25149_s1 + $0x7fc] ss:$20 sps:$4 sm:$0xff]  }
 0x4c0   : > { %7311 = vmatprep.mubr.bf16.mxu0 %v15779_v63  ;;  %v15912_v63 = vld [vmem:[%s25149_s1 + $0x1f0] ss:$20 sps:$4 sm:$0xff]  }
 0x4c1   : > { %14334 = vmatprep.mubr.bf16.mxu1 %v15912_v63  ;;  %v15916_v63 = vld [vmem:[%s25149_s1 + $0x1c4] ss:$20 sps:$4 sm:$0xff]  }
 0x4c7   : > { %7312 = vmatmul.mubr.bf16.gmra.mrb[20].mxu0 %v15777_v34  ;;  %v15913_v34 = vld [vmem:[%s25149_s1 + $0x218] ss:$20 sps:$4 sm:$0xff]  }
 0x4c8   : > { %7319 = vmatprep.mubr.bf16.mxu0 %v15782_v33  ;;  %14335 = vmatmul.mubr.bf16.gmra.mrb[140].mxu1 %v15913_v34  ;;  %v15852_v33 = vld [vmem:[%s25149_s1 + $0x7f8] ss:$20 sps:$4 sm:$0xff]   ;;  %v15992_v34 = vld [vmem:[%s25149_s1 + $0x6f0] ss:$20 sps:$4 sm:$0xff]  }
 0x4cf   : > { %7320 = vmatmul.mubr.bf16.gmra.mrb[24].mxu0 %v15780_v50  ;;  %v15857_v50 = vld [vmem:[%s25149_s1 + $0x824] ss:$20 sps:$4 sm:$0xff]  }
 0x4d0   : > { %7327 = vmatprep.mubr.bf16.mxu0 %v15785_v17  ;;  %v15917_v17 = vld [vmem:[%s25149_s1 + $0x240] ss:$20 sps:$4 sm:$0xff]  }
 0x4d1   : > { %14338 = vmatprep.mubr.bf16.mxu1 %v15917_v17 }
 0x4d7   : > { %7328 = vmatmul.mubr.bf16.gmra.mrb[28].mxu0 %v15783_v53  ;;  %v15918_v53 = vld [vmem:[%s25149_s1 + $0x268] ss:$20 sps:$4 sm:$0xff]  }
 0x4d8   : > { %7335 = vmatprep.mubr.bf16.mxu0 %v15788_v14  ;;  %14339 = vmatmul.mubr.bf16.gmra.mrb[144].mxu1 %v15918_v53  ;;  %v15855_v14 = vld [vmem:[%s25149_s1 + $0x820] ss:$20 sps:$4 sm:$0xff]  }
 0x4d9   : > { %v15914_v53 = vld [vmem:[%s25149_s1 + $0x1c0] ss:$20 sps:$4 sm:$0xff]  }
 0x4df   : > { %7336 = vmatmul.mubr.bf16.gmra.mrb[32].mxu0 %v15786_v61  ;;  %v15860_v61 = vld [vmem:[%s25149_s1 + $0x84c] ss:$20 sps:$4 sm:$0xff]  }
 0x4e0   : > { %7343 = vmatprep.mubr.bf16.mxu0 %v15791_v38  ;;  %v15922_v38 = vld [vmem:[%s25149_s1 + $0x290] ss:$20 sps:$4 sm:$0xff]  }
 0x4e1   : > { %14342 = vmatprep.mubr.bf16.mxu1 %v15922_v38 }
 0x4e7   : > { %7344 = vmatmul.mubr.bf16.gmra.mrb[36].mxu0 %v15789_v44  ;;  %v15923_v44 = vld [vmem:[%s25149_s1 + $0x2b8] ss:$20 sps:$4 sm:$0xff]  }
 0x4e8   : > { %7351 = vmatprep.mubr.bf16.mxu0 %v15794_v60  ;;  %14343 = vmatmul.mubr.bf16.gmra.mrb[148].mxu1 %v15923_v44  ;;  %v15858_v60 = vld [vmem:[%s25149_s1 + $0x848] ss:$20 sps:$4 sm:$0xff]   ;;  %v15997_v44 = vld [vmem:[%s25149_s1 + $0x740] ss:$20 sps:$4 sm:$0xff]  }
 0x4ef   : > { %7352 = vmatmul.mubr.bf16.gmra.mrb[40].mxu0 %v15792_v23  ;;  %v15863_v23 = vld [vmem:[%s25149_s1 + $0x874] ss:$20 sps:$4 sm:$0xff]  }
 0x4f0   : > { %7359 = vmatprep.mubr.bf16.mxu0 %v15797_v3  ;;  %v15927_v3 = vld [vmem:[%s25149_s1 + $0x2e0] ss:$20 sps:$4 sm:$0xff]  }
 0x4f1   : > { %14346 = vmatprep.mubr.bf16.mxu1 %v15927_v3  ;;  %v15926_v3 = vld [vmem:[%s25149_s1 + $0x214] ss:$20 sps:$4 sm:$0xff]  }
 0x4f7   : > { %7360 = vmatmul.mubr.bf16.gmra.mrb[44].mxu0 %v15795_v24  ;;  %v15928_v24 = vld [vmem:[%s25149_s1 + $0x308] ss:$20 sps:$4 sm:$0xff]  }
 0x4f8   : > { %7367 = vmatprep.mubr.bf16.mxu0 %v15800_v31  ;;  %14347 = vmatmul.mubr.bf16.gmra.mrb[152].mxu1 %v15928_v24  ;;  %v15861_v31 = vld [vmem:[%s25149_s1 + $0x870] ss:$20 sps:$4 sm:$0xff]  }
 0x4f9   : > { %v16002_v24 = vld [vmem:[%s25149_s1 + $0x790] ss:$20 sps:$4 sm:$0xff]  }
 0x4ff   : > { %7368 = vmatmul.mubr.bf16.gmra.mrb[48].mxu0 %v15798_v27  ;;  %v15866_v27 = vld [vmem:[%s25149_s1 + $0x89c] ss:$20 sps:$4 sm:$0xff]  }
 0x500   : > { %7375 = vmatprep.mubr.bf16.mxu0 %v15803_v29  ;;  %v15932_v29 = vld [vmem:[%s25149_s1 + $0x330] ss:$20 sps:$4 sm:$0xff]  }
 0x501   : > { %14350 = vmatprep.mubr.bf16.mxu1 %v15932_v29  ;;  %v16004_v29 = vld [vmem:[%s23027_s4 + $0x40] sm:$0xff]  }
 0x502   : > { %14422 = vmatprep.subr.bf16.mxu1 %v16004_v29 }
 0x503   : > { %14423 = vmatpush3.bf16.msra.mxu1 %v16004_v29 }
 0x507   : > { %7376 = vmatmul.mubr.bf16.gmra.mrb[52].mxu0 %v15801_v30  ;;  %v15933_v30 = vld [vmem:[%s25149_s1 + $0x358] ss:$20 sps:$4 sm:$0xff]  }
 0x508   : > { %7383 = vmatprep.mubr.bf16.mxu0 %v15806_v48  ;;  %14351 = vmatmul.mubr.bf16.gmra.mrb[156].mxu1 %v15933_v30  ;;  %v15864_v48 = vld [vmem:[%s25149_s1 + $0x898] ss:$20 sps:$4 sm:$0xff]  }
 0x50f   : > { %7384 = vmatmul.mubr.bf16.gmra.mrb[56].mxu0 %v15804_v47  ;;  %v15870_v47 = vld [vmem:[%s25149_s1 + $0xc] ss:$20 sps:$4 sm:$0xff]  }
 0x510   : > { %7391 = vmatprep.mubr.bf16.mxu0 %v15809_v0  ;;  %v15937_v0 = vld [vmem:[%s25149_s1 + $0x380] ss:$20 sps:$4 sm:$0xff]  }
 0x511   : > { %14354 = vmatprep.mubr.bf16.mxu1 %v15937_v0  ;;  %v16005_v0 = vld [vmem:[%s23027_s4 + $0x48] sm:$0xff]  }
 0x512   : > { %14424 = vmatprep.subr.bf16.mxu1 %v16005_v0 }
 0x513   : > { %14425 = vmatpush3.bf16.msra.mxu1 %v16005_v0  ;;  %v15986_v0 = vld [vmem:[%s25149_s1 + $0x3f4] ss:$20 sps:$4 sm:$0xff]  }
 0x517   : > { %7392 = vmatmul.mubr.bf16.gmra.mrb[60].mxu0 %v15807_v28  ;;  %v15938_v28 = vld [vmem:[%s25149_s1 + $0x3a8] ss:$20 sps:$4 sm:$0xff]  }
 0x518   : > { %7399 = vmatprep.mubr.bf16.mxu0 %v15812_v35  ;;  %14355 = vmatmul.mubr.bf16.gmra.mrb[160].mxu1 %v15938_v28  ;;  %v15868_v35 = vld [vmem:[%s25149_s1 + $0x8] ss:$20 sps:$4 sm:$0xff]  }
 0x519   : > { %v15931_v28 = vld [vmem:[%s25149_s1 + $0x23c] ss:$20 sps:$4 sm:$0xff]  }
 0x51f   : > { %7400 = vmatmul.mubr.bf16.gmra.mrb[64].mxu0 %v15810_v42  ;;  %v15874_v42 = vld [vmem:[%s25149_s1 + $0x34] ss:$20 sps:$4 sm:$0xff]  }
 0x520   : > { %7407 = vmatprep.mubr.bf16.mxu0 %v15815_v56  ;;  %v15942_v56 = vld [vmem:[%s25149_s1 + $0x3d0] ss:$20 sps:$4 sm:$0xff]  }
 0x521   : > { %14358 = vmatprep.mubr.bf16.mxu1 %v15942_v56  ;;  %v16010_v56 = vld [vmem:[%s25149_s1 + $0x808] ss:$20 sps:$4 sm:$0xff]  }
 0x527   : > { %7408 = vmatmul.mubr.bf16.gmra.mrb[68].mxu0 %v15813_v2  ;;  %v15943_v2 = vld [vmem:[%s25149_s1 + $0x3f8] ss:$20 sps:$4 sm:$0xff]  }
 0x528   : > { %7415 = vmatprep.mubr.bf16.mxu0 %v15818_v15  ;;  %14359 = vmatmul.mubr.bf16.gmra.mrb[164].mxu1 %v15943_v2  ;;  %v15872_v15 = vld [vmem:[%s25149_s1 + $0x30] ss:$20 sps:$4 sm:$0xff]  }
 0x529   : > { %v16011_v2 = vld [vmem:[%s23027_s4 + $0x50] sm:$0xff]  }
 0x52a   : > { %14426 = vmatprep.subr.bf16.mxu1 %v16011_v2 }
 0x52b   : > { %14427 = vmatpush3.bf16.msra.mxu1 %v16011_v2 }
 0x52f   : > { %7416 = vmatmul.mubr.bf16.gmra.mrb[72].mxu0 %v15816_v10  ;;  %v15878_v10 = vld [vmem:[%s25149_s1 + $0x5c] ss:$20 sps:$4 sm:$0xff]  }
 0x530   : > { %7423 = vmatprep.mubr.bf16.mxu0 %v15821_v57  ;;  %v15947_v57 = vld [vmem:[%s25149_s1 + $0x420] ss:$20 sps:$4 sm:$0xff]  }
 0x531   : > { %14362 = vmatprep.mubr.bf16.mxu1 %v15947_v57  ;;  %v15936_v57 = vld [vmem:[%s25149_s1 + $0x264] ss:$20 sps:$4 sm:$0xff]  }
 0x532   : > { %14363 = vmatmul.mubr.bf16.gmra.mrb[168].mxu1 %v15948_v13  ;;  %v16016_v13 = vld [vmem:[%s25149_s1 + $0x830] ss:$20 sps:$4 sm:$0xff]  }
 0x537   : > { %7424 = vmatmul.mubr.bf16.gmra.mrb[76].mxu0 %v15819_v40  ;;  %v15882_v40 = vld [vmem:[%s25149_s1 + $0x84] ss:$20 sps:$4 sm:$0xff]  }
 0x538   : > { %7431 = vmatprep.mubr.bf16.mxu0 %v15824_v36  ;;  %v15952_v36 = vld [vmem:[%s25149_s1 + $0x470] ss:$20 sps:$4 sm:$0xff]  }
 0x539   : > { %14366 = vmatprep.mubr.bf16.mxu1 %v15952_v36  ;;  %v16018_v36 = vld [vmem:[%s23027_s4 + $0x60] sm:$0xff]  }
 0x53f   : > { %7432 = vmatmul.mubr.bf16.gmra.mrb[80].mxu0 %v15822_v58  ;;  %v15953_v58 = vld [vmem:[%s25149_s1 + $0x498] ss:$20 sps:$4 sm:$0xff]  }
 0x540   : > { %7439 = vmatprep.mubr.bf16.mxu0 %v15827_v55  ;;  %14367 = vmatmul.mubr.bf16.gmra.mrb[172].mxu1 %v15953_v58  ;;  %v15880_v55 = vld [vmem:[%s25149_s1 + $0x80] ss:$20 sps:$4 sm:$0xff]  }
 0x541   : > { %14370 = vmatprep.mubr.bf16.mxu1 %v15957_v6  ;;  %v16019_v6 = vld [vmem:[%s23027_s4 + $0x68] sm:$0xff]  }
 0x547   : > { %7440 = vmatmul.mubr.bf16.gmra.mrb[84].mxu0 %v15825_v51  ;;  %v15958_v51 = vld [vmem:[%s25149_s1 + $0x4e8] ss:$20 sps:$4 sm:$0xff]  }
 0x548   : > { %7447 = vmatprep.mubr.bf16.mxu0 %v15830_v5  ;;  %14371 = vmatmul.mubr.bf16.gmra.mrb[176].mxu1 %v15958_v51  ;;  %v15884_v5 = vld [vmem:[%s25149_s1 + $0xa8] ss:$20 sps:$4 sm:$0xff]   ;;  %v15941_v51 = vld [vmem:[%s25149_s1 + $0x28c] ss:$20 sps:$4 sm:$0xff]  }
 0x54f   : > { %7448 = vmatmul.mubr.bf16.gmra.mrb[88].mxu0 %v15828_v52  ;;  %v15890_v52 = vld [vmem:[%s25149_s1 + $0xd4] ss:$20 sps:$4 sm:$0xff]  }
 0x550   : > { %7455 = vmatprep.mubr.bf16.mxu0 %v15833_v49  ;;  %v15962_v49 = vld [vmem:[%s25149_s1 + $0x510] ss:$20 sps:$4 sm:$0xff]  }
 0x551   : > { %14374 = vmatprep.mubr.bf16.mxu1 %v15962_v49  ;;  %v16024_v49 = vld [vmem:[%s25149_s1 + $0x8a8] ss:$20 sps:$4 sm:$0xff]  }
 0x552   : > { %14375 = vmatmul.mubr.bf16.gmra.mrb[180].mxu1 %v15963_v11  ;;  %v16025_v11 = vld [vmem:[%s23027_s4 + $0x70] sm:$0xff]  }
 0x557   : > { %7456 = vmatmul.mubr.bf16.gmra.mrb[92].mxu0 %v15831_v1  ;;  %v15894_v1 = vld [vmem:[%s25149_s1 + $0xfc] ss:$20 sps:$4 sm:$0xff]  }
 0x558   : > { %7463 = vmatprep.mubr.bf16.mxu0 %v15836_v21  ;;  %v15967_v21 = vld [vmem:[%s25149_s1 + $0x560] ss:$20 sps:$4 sm:$0xff]  }
 0x559   : > { %14378 = vmatprep.mubr.bf16.mxu1 %v15967_v21  ;;  %v15946_v21 = vld [vmem:[%s25149_s1 + $0x2b4] ss:$20 sps:$4 sm:$0xff]  }
 0x55f   : > { %7464 = vmatmul.mubr.bf16.gmra.mrb[96].mxu0 %v15834_v32  ;;  %v15968_v32 = vld [vmem:[%s25149_s1 + $0x588] ss:$20 sps:$4 sm:$0xff]  }
 0x560   : > { %7471 = vmatprep.mubr.bf16.mxu0 %v15839_v26  ;;  %14379 = vmatmul.mubr.bf16.gmra.mrb[184].mxu1 %v15968_v32  ;;  %v15892_v26 = vld [vmem:[%s25149_s1 + $0xf8] ss:$20 sps:$4 sm:$0xff]  }
 0x561   : > { %14382 = vmatprep.mubr.bf16.mxu1 %v15972_v16 }
 0x567   : > { %7472 = vmatmul.mubr.bf16.gmra.mrb[100].mxu0 %v15837_v59  ;;  %v15973_v59 = vld [vmem:[%s25149_s1 + $0x5d8] ss:$20 sps:$4 sm:$0xff]  }
 0x568   : > { %7479 = vmatprep.mubr.bf16.mxu0 %v15842_v20  ;;  %14383 = vmatmul.mubr.bf16.gmra.mrb[188].mxu1 %v15973_v59  ;;  %v15896_v20 = vld [vmem:[%s25149_s1 + $0x120] ss:$20 sps:$4 sm:$0xff]   ;;  %v15951_v59 = vld [vmem:[%s25149_s1 + $0x2dc] ss:$20 sps:$4 sm:$0xff]  }
 0x56f   : > { %7480 = vmatmul.mubr.bf16.gmra.mrb[104].mxu0 %v15840_v18  ;;  %v15902_v18 = vld [vmem:[%s25149_s1 + $0x14c] ss:$20 sps:$4 sm:$0xff]  }
 0x570   : > { %7487 = vmatprep.mubr.bf16.mxu0 %v15845_v19  ;;  %v15977_v19 = vld [vmem:[%s25149_s1 + $0x600] ss:$20 sps:$4 sm:$0xff]  }
 0x571   : > { %14386 = vmatprep.mubr.bf16.mxu1 %v15977_v19  ;;  %v15956_v19 = vld [vmem:[%s25149_s1 + $0x304] ss:$20 sps:$4 sm:$0xff]  }
 0x572   : > { %14387 = vmatmul.mubr.bf16.gmra.mrb[192].mxu1 %v15978_v41 }
 0x577   : > { %7488 = vmatmul.mubr.bf16.gmra.mrb[108].mxu0 %v15843_v54  ;;  %v15906_v54 = vld [vmem:[%s25149_s1 + $0x174] ss:$20 sps:$4 sm:$0xff]  }
 0x578   : > { %7495 = vmatprep.mubr.bf16.mxu0 %v15848_v46  ;;  %v15982_v46 = vld [vmem:[%s25149_s1 + $0x650] ss:$20 sps:$4 sm:$0xff]  }
 0x579   : > { %14390 = vmatprep.mubr.bf16.mxu1 %v15982_v46 }
 0x57f   : > { %7496 = vmatmul.mubr.bf16.gmra.mrb[112].mxu0 %v15846_v12  ;;  %v15983_v12 = vld [vmem:[%s25149_s1 + $0x678] ss:$20 sps:$4 sm:$0xff]  }
 0x580   : > { %7503 = vmatprep.mubr.bf16.mxu0 %v15851_v62  ;;  %14391 = vmatmul.mubr.bf16.gmra.mrb[196].mxu1 %v15983_v12  ;;  %v15904_v62 = vld [vmem:[%s25149_s1 + $0x170] ss:$20 sps:$4 sm:$0xff]   ;;  %v15961_v12 = vld [vmem:[%s25149_s1 + $0x32c] ss:$20 sps:$4 sm:$0xff]  }
 0x581   : > { %14394 = vmatprep.mubr.bf16.mxu1 %v15987_v7  ;;  %v15966_v7 = vld [vmem:[%s25149_s1 + $0x354] ss:$20 sps:$4 sm:$0xff]  }
 0x587   : > { %7504 = vmatmul.mubr.bf16.gmra.mrb[116].mxu0 %v15849_v9  ;;  %v15988_v9 = vld [vmem:[%s25149_s1 + $0x6c8] ss:$20 sps:$4 sm:$0xff]  }
 0x588   : > { %7511 = vmatprep.mubr.bf16.mxu0 %v15854_v39  ;;  %14395 = vmatmul.mubr.bf16.gmra.mrb[200].mxu1 %v15988_v9  ;;  %v15909_v39 = vld [vmem:[%s25149_s1 + $0x198] ss:$20 sps:$4 sm:$0xff]  }
 0x589   : > { %14398 = vmatprep.mubr.bf16.mxu1 %v15992_v34 }
 0x58f   : > { %7512 = vmatmul.mubr.bf16.gmra.mrb[120].mxu0 %v15852_v33  ;;  %v15993_v33 = vld [vmem:[%s25149_s1 + $0x718] ss:$20 sps:$4 sm:$0xff]  }
 0x590   : > { %7519 = vmatprep.mubr.bf16.mxu0 %v15857_v50  ;;  %v21377_v50 = vpop.f32.mrb[116].mxu1  ;;  %14399 = vmatmul.mubr.bf16.gmra.mrb[204].mxu1 %v15993_v33  ;;  %v15971_v33 = vld [vmem:[%s25149_s1 + $0x37c] ss:$20 sps:$4 sm:$0xff]  }
 0x591   : > { %v21379_v17 = vpop.f32.mrb[117].mxu1  ;;  %14402 = vmatprep.mubr.bf16.mxu1 %v15997_v44  ;;  %v15976_v44 = vld [vmem:[%s25149_s1 + $0x3a4] ss:$20 sps:$4 sm:$0xff]  }
 0x597   : > { %7520 = vmatmul.mubr.bf16.gmra.mrb[124].mxu0 %v15855_v14  ;;  %v21384_v14 = vpop.f32.mrb[118].mxu1 }
 0x598   : > { %7527 = vmatprep.mubr.bf16.mxu0 %v15860_v61  ;;  %v15921_v61 = vld [vmem:[%s25149_s1 + $0x1ec] ss:$20 sps:$4 sm:$0xff]   ;;  %v21389_v38 = vpop.f32.mrb[119].mxu1 }
 0x59f   : > { %7528 = vmatmul.mubr.bf16.gmra.mrb[128].mxu0 %v15858_v60  ;;  %v15998_v60 = vld [vmem:[%s25149_s1 + $0x768] ss:$20 sps:$4 sm:$0xff]  }
 0x5a0   : > { %7535 = vmatprep.mubr.bf16.mxu0 %v15863_v23  ;;  %14403 = vmatmul.mubr.bf16.gmra.mrb[208].mxu1 %v15998_v60  ;;  %v15919_v23 = vld [vmem:[%s25149_s1 + $0x1e8] ss:$20 sps:$4 sm:$0xff]  }
 0x5a1   : > { %14406 = vmatprep.mubr.bf16.mxu1 %v16002_v24 }
 0x5a7   : > { %7536 = vmatmul.mubr.bf16.gmra.mrb[132].mxu0 %v15861_v31  ;;  %v16003_v31 = vld [vmem:[%s25149_s1 + $0x7b8] ss:$20 sps:$4 sm:$0xff]  }
 0x5a8   : > { %7543 = vmatprep.mubr.bf16.mxu0 %v15866_v27  ;;  %v21409_v27 = vpop.f32.mrb[120].mxu1  ;;  %14407 = vmatmul.mubr.bf16.gmra.mrb[212].mxu1 %v16003_v31  ;;  %v15981_v31 = vld [vmem:[%s25149_s1 + $0x3cc] ss:$20 sps:$4 sm:$0xff]  }
 0x5a9   : > { %v21414_v30 = vpop.f32.mrb[121].mxu1 }
 0x5af   : > { %7544 = vmatmul.mubr.bf16.gmra.mrb[136].mxu0 %v15864_v48  ;;  %v15924_v48 = vld [vmem:[%s25149_s1 + $0x210] ss:$20 sps:$4 sm:$0xff]  }
 0x5b0   : > { %7584 = vmatprep.mubr.bf16.mxu0 %v15870_v47  ;;  %v21419_v47 = vpop.f32.mrb[122].mxu1 }
 0x5b7   : > { %7585 = vmatmul.mubr.bf16.vlgmr.msra.gmra.mrb[172].mxu0 %v15868_v35  ;;  %v21427_v35 = vpop.f32.mrb[123].mxu1 }
 0x5b8   : > { %7592 = vmatprep.mubr.bf16.mxu0 %v15874_v42  ;;  %v16009_v42 = vld [vmem:[%s25149_s1 + $0x7e0] ss:$20 sps:$4 sm:$0xff]  }
 0x5b9   : > { %14410 = vmatprep.mubr.bf16.mxu1 %v16009_v42 }
 0x5ba   : > { %14411 = vmatmul.mubr.bf16.gmra.mrb[216].mxu1 %v16010_v56  ;;  %v15984_v56 = vld [vmem:[%s25149_s1 + $0x3f0] ss:$20 sps:$4 sm:$0xff]  }
 0x5bb   : > { %14414 = vmatprep.mubr.bf16.mxu1 %v16016_v13  ;;  %v15996_v13 = vld [vmem:[%s25149_s1 + $0x444] ss:$20 sps:$4 sm:$0xff]  }
 0x5bf   : > { %7593 = vmatmul.mubr.bf16.gmra.mrb[176].mxu0 %v15872_v15  ;;  %v15929_v15 = vld [vmem:[%s25149_s1 + $0x238] ss:$20 sps:$4 sm:$0xff]  }
 0x5c0   : > { %7600 = vmatprep.mubr.bf16.mxu0 %v15878_v10  ;;  %v16012_v10 = vld [vmem:[%s23027_s4 + $0x58] sm:$0xff]  }
 0x5c1   : > { %14428 = vmatprep.subr.bf16.mxu1 %v16012_v10 }
 0x5c2   : > { %14429 = vmatpush3.bf16.msra.mxu1 %v16012_v10 }
 0x5c3   : > { %14430 = vmatprep.subr.bf16.mxu1 %v16018_v36 }
 0x5c6   : > { %14431 = vmatpush3.bf16.msra.mxu1 %v16018_v36 }
 0x5c7   : > { %7601 = vmatmul.mubr.bf16.gmra.mrb[180].mxu0 %v15876_v45  ;;  %v16017_v45 = vld [vmem:[%s25149_s1 + $0x858] ss:$20 sps:$4 sm:$0xff]   ;;  %14432 = vmatprep.subr.bf16.mxu1 %v16019_v6 }
 0x5c8   : > { %7608 = vmatprep.mubr.bf16.mxu0 %v15882_v40  ;;  %v21453_v40 = vpop.f32.mrb[124].mxu1  ;;  %14415 = vmatmul.mubr.bf16.gmra.mrb[220].mxu1 %v16017_v45 }
 0x5c9   : > { %v21458_v58 = vpop.f32.mrb[125].mxu1 }
 0x5ca   : > { %14433 = vmatpush3.bf16.msra.mxu1 %v16019_v6 }
 0x5cb   : > { %14434 = vmatprep.subr.bf16.mxu1 %v16025_v11 }
 0x5ce   : > { %14435 = vmatpush3.bf16.msra.mxu1 %v16025_v11 }
 0x5cf   : > { %7609 = vmatmul.mubr.bf16.gmra.mrb[184].mxu0 %v15880_v55  ;;  %v15934_v55 = vld [vmem:[%s25149_s1 + $0x260] ss:$20 sps:$4 sm:$0xff]  }
 0x5d0   : > { %7616 = vmatprep.mubr.bf16.mxu0 %v15886_v25  ;;  %v21463_v25 = vpop.f32.mrb[126].mxu1 }
 0x5d7   : > { %7617 = vmatmul.mubr.bf16.gmra.mrb[188].mxu0 %v15884_v5  ;;  %v21471_v5 = vpop.f32.mrb[127].mxu1 }
 0x5d8   : > { %7624 = vmatprep.mubr.bf16.mxu0 %v15890_v52  ;;  %v16023_v52 = vld [vmem:[%s25149_s1 + $0x880] ss:$20 sps:$4 sm:$0xff]   ;;  %v21491_v32 = vpop.f32.mrb[128].mxu1 }
 0x5d9   : > { %14418 = vmatprep.mubr.bf16.mxu1 %v16023_v52  ;;  %v15994_v52 = vld [vmem:[%s25149_s1 + $0x440] ss:$20 sps:$4 sm:$0xff]  }
 0x5da   : > { %14419 = vmatmul.mubr.bf16.gmra.mrb[224].mxu1 %v16024_v49 }
 0x5df   : > { %7625 = vmatmul.mubr.bf16.gmra.mrb[192].mxu0 %v15888_v8  ;;  %v15939_v8 = vld [vmem:[%s25149_s1 + $0x288] ss:$20 sps:$4 sm:$0xff]  }
 0x5e0   : > { %7632 = vmatprep.mubr.bf16.mxu0 %v15894_v1  ;;  %v16026_v1 = vld [vmem:[%s23027_s4 + $0x78] sm:$0xff]  }
 0x5e1   : > { %14436 = vmatprep.subr.bf16.mxu1 %v16026_v1 }
 0x5e2   : > { %14437 = vmatpush3.bf16.msra.mxu1 %v16026_v1 }
 0x5e7   : > { %7633 = vmatmul.mubr.bf16.gmra.mrb[196].mxu0 %v15892_v26  ;;  %v21493_v26 = vpop.f32.mrb[129].mxu1 }
 0x5e8   : > { %7640 = vmatprep.mubr.bf16.mxu0 %v15898_v4  ;;  %v15944_v4 = vld [vmem:[%s25149_s1 + $0x2b0] ss:$20 sps:$4 sm:$0xff]   ;;  %v21498_v16 = vpop.f32.mrb[130].mxu1 }
 0x5ef   : > { %7641 = vmatmul.mubr.bf16.gmra.mrb[200].mxu0 %v15896_v20  ;;  %v21503_v20 = vpop.f32.mrb[131].mxu1 }
 0x5f0   : > { %7648 = vmatprep.mubr.bf16.mxu0 %v15902_v18  ;;  %v15949_v18 = vld [vmem:[%s25149_s1 + $0x2d8] ss:$20 sps:$4 sm:$0xff]   ;;  %v21511_v41 = vpop.f32.mrb[132].mxu1 }
 0x5f7   : > { %7649 = vmatmul.mubr.bf16.gmra.mrb[204].mxu0 %v15900_v22  ;;  %v21513_v22 = vpop.f32.mrb[133].mxu1 }
 0x5f8   : > { %7656 = vmatprep.mubr.bf16.mxu0 %v15906_v54  ;;  %v15954_v54 = vld [vmem:[%s25149_s1 + $0x300] ss:$20 sps:$4 sm:$0xff]   ;;  %v21518_v46 = vpop.f32.mrb[134].mxu1 }
 0x5ff   : > { %7657 = vmatmul.mubr.bf16.gmra.mrb[208].mxu0 %v15904_v62  ;;  %v21523_v62 = vpop.f32.mrb[135].mxu1 }
 0x600   : > { %7664 = vmatprep.mubr.bf16.mxu0 %v15911_v43  ;;  %v15959_v43 = vld [vmem:[%s25149_s1 + $0x328] ss:$20 sps:$4 sm:$0xff]   ;;  %v21531_v9 = vpop.f32.mrb[136].mxu1 }
 0x607   : > { %7665 = vmatmul.mubr.bf16.gmra.mrb[212].mxu0 %v15909_v39  ;;  %v21533_v39 = vpop.f32.mrb[137].mxu1 }
 0x608   : > { %7672 = vmatprep.mubr.bf16.mxu0 %v15916_v63  ;;  %v15964_v63 = vld [vmem:[%s25149_s1 + $0x350] ss:$20 sps:$4 sm:$0xff]   ;;  %v21538_v34 = vpop.f32.mrb[138].mxu1 }
 0x60f   : > { %7673 = vmatmul.mubr.bf16.gmra.mrb[216].mxu0 %v15914_v53  ;;  %v21543_v53 = vpop.f32.mrb[139].mxu1 }
 0x610   : > { %7680 = vmatprep.mubr.bf16.mxu0 %v15921_v61  ;;  %v15969_v61 = vld [vmem:[%s25149_s1 + $0x378] ss:$20 sps:$4 sm:$0xff]   ;;  %v21551_v60 = vpop.f32.mrb[140].mxu1 }
 0x617   : > { %7681 = vmatmul.mubr.bf16.gmra.mrb[220].mxu0 %v15919_v23  ;;  %v21553_v23 = vpop.f32.mrb[141].mxu1 }
 0x618   : > { %7688 = vmatprep.mubr.bf16.mxu0 %v15926_v3  ;;  %v15974_v3 = vld [vmem:[%s25149_s1 + $0x3a0] ss:$20 sps:$4 sm:$0xff]   ;;  %v21558_v24 = vpop.f32.mrb[142].mxu1 }
 0x619   : > { %v21563_v29 = vpop.f32.mrb[143].mxu1 }
 0x61f   : > { %7689 = vmatmul.mubr.bf16.gmra.mrb[224].mxu0 %v15924_v48  ;;  %v15979_v48 = vld [vmem:[%s25149_s1 + $0x3c8] ss:$20 sps:$4 sm:$0xff]  }
 0x620   : > { %7696 = vmatprep.mubr.bf16.mxu0 %v15931_v28  ;;  %v21571_v28 = vpop.f32.mrb[144].mxu1 }
 0x621   : > { %v21573_v42 = vpop.f32.mrb[145].mxu1 }
 0x622   : > { %v21578_v2 = vpop.f32.mrb[146].mxu1 }
 0x623   : > { %v21583_v10 = vpop.f32.mrb[147].mxu1 }
 0x624   : > { %v21591_v45 = vpop.f32.mrb[148].mxu1 }
 0x627   : > { %7697 = vmatmul.mubr.bf16.gmra.mrb[228].mxu0 %v15929_v15  ;;  %v15991_v15 = vld [vmem:[%s25149_s1 + $0x41c] ss:$20 sps:$4 sm:$0xff]  }
 0x628   : > { %7704 = vmatprep.mubr.bf16.mxu0 %v15936_v57  ;;  %v15989_v57 = vld [vmem:[%s25149_s1 + $0x418] ss:$20 sps:$4 sm:$0xff]  }
 0x62f   : > { %7705 = vmatmul.mubr.bf16.gmra.mrb[232].mxu0 %v15934_v55  ;;  %v21593_v55 = vpop.f32.mrb[149].mxu1 }
 0x630   : > { %7712 = vmatprep.mubr.bf16.mxu0 %v15941_v51  ;;  %v21601_v49 = vpop.f32.mrb[150].mxu1 }
 0x631   : > { %v21606_v1 = vpop.f32.mrb[151].mxu1 }
 0x637   : > { %7713 = vmatmul.mubr.bf16.gmra.mrb[236].mxu0 %v15939_v8  ;;  %v16001_v8 = vld [vmem:[%s25149_s1 + $0x46c] ss:$20 sps:$4 sm:$0xff]  }
 0x638   : > { %7720 = vmatprep.mubr.bf16.mxu0 %v15946_v21 }
 0x63f   : > { %7721 = vmatmul.mubr.bf16.gmra.mrb[240].mxu0 %v15944_v4 }
 0x640   : > { %7728 = vmatprep.mubr.bf16.mxu0 %v15951_v59 }
 0x647   : > { %7729 = vmatmul.mubr.bf16.gmra.mrb[244].mxu0 %v15949_v18 }
 0x648   : > { %7736 = vmatprep.mubr.bf16.mxu0 %v15956_v19 }
 0x64f   : > { %7737 = vmatmul.mubr.bf16.gmra.mrb[248].mxu0 %v15954_v54  ;;  %v15999_v54 = vld [vmem:[%s25149_s1 + $0x468] ss:$20 sps:$4 sm:$0xff]  }
 0x650   : > { %7744 = vmatprep.mubr.bf16.mxu0 %v15961_v12 }
 0x657   : > { %7745 = vmatmul.mubr.bf16.gmra.mrb[252].mxu0 %v15959_v43 }
 0x658   : > { %7752 = vmatprep.mubr.bf16.mxu0 %v15966_v7 }
 0x65f   : > { %7753 = vmatmul.mubr.bf16.gmra.mrb[0].mxu0 %v15964_v63  ;;  %v16051_v63 = vld [vmem:[%s25149_s1 + $0x648] ss:$20 sps:$4 sm:$0xff]  }
 0x660   : > { %7760 = vmatprep.mubr.bf16.mxu0 %v15971_v33 }
 0x667   : > { %7761 = vmatmul.mubr.bf16.gmra.mrb[4].mxu0 %v15969_v61 }
 0x668   : > { %7768 = vmatprep.mubr.bf16.mxu0 %v15976_v44 }
 0x66f   : > { %7769 = vmatmul.mubr.bf16.gmra.mrb[8].mxu0 %v15974_v3 }
 0x670   : > { %7776 = vmatprep.mubr.bf16.mxu0 %v15981_v31 }
 0x677   : > { %7777 = vmatmul.mubr.bf16.gmra.mrb[12].mxu0 %v15979_v48 }
 0x678   : > { %7784 = vmatprep.mubr.bf16.mxu0 %v15986_v0  ;;  %v16015_v0 = vld [vmem:[%s25149_s1 + $0x4bc] ss:$20 sps:$4 sm:$0xff]  }
 0x67f   : > { %7785 = vmatmul.mubr.bf16.gmra.mrb[16].mxu0 %v15984_v56 }
 0x680   : > { %7792 = vmatprep.mubr.bf16.mxu0 %v15991_v15 }
 0x687   : > { %7793 = vmatmul.mubr.bf16.gmra.mrb[20].mxu0 %v15989_v57 }
 0x688   : > { %7800 = vmatprep.mubr.bf16.mxu0 %v15996_v13 }
 0x68a   : > { %v7586_v36 = vpop.f32.mrb[172].mxu0 }
 0x68b   : > { %v21596_v6 = vadd.f32 %v21379_v17, %v7586_v36  ;;  %v7588_v51 = vpop.f32.mrb[173].mxu0 }
 0x68c   : > { %v7589_v11 = vpop.f32.mrb[174].mxu0 }
 0x68d   : > { %v21609_v21 = vadd.f32 %v21389_v38, %v7589_v11  ;;  %v7591_v4 = vpop.f32.mrb[175].mxu0  ;;  %v16008_v38 = vld [vmem:[%s25149_s1 + $0x494] ss:$20 sps:$4 sm:$0xff]  }
 0x68f   : > { %7801 = vmatmul.mubr.bf16.gmra.mrb[24].mxu0 %v15994_v52  ;;  %v16013_v52 = vld [vmem:[%s25149_s1 + $0x4b8] ss:$20 sps:$4 sm:$0xff]  }
 0x690   : > { %7808 = vmatprep.mubr.bf16.mxu0 %v16001_v8 }
 0x692   : > { %v7594_v59 = vpop.f32.mrb[176].mxu0 }
 0x693   : > { %v21614_v18 = vadd.f32 %v21377_v50, %v7594_v59  ;;  %v7596_v19 = vpop.f32.mrb[177].mxu0  ;;  %v21627_v50 = vpop.f32.mrb[152].mxu1  ;;  %v16045_v59 = vld [vmem:[%s25149_s1 + $0x5f8] ss:$20 sps:$4 sm:$0xff]  }
 0x694   : > { %v7597_v12 = vpop.f32.mrb[178].mxu0  ;;  %v21629_v61 = vpop.f32.mrb[153].mxu1 }
 0x695   : > { %v21623_v43 = vadd.f32 %v21384_v14, %v7597_v12  ;;  %v7599_v7 = vpop.f32.mrb[179].mxu0  ;;  %v16006_v14 = vld [vmem:[%s25149_s1 + $0x490] ss:$20 sps:$4 sm:$0xff]   ;;  %v21637_v31 = vpop.f32.mrb[154].mxu1 }
 0x696   : > { %v21642_v56 = vpop.f32.mrb[155].mxu1  ;;  %v16020_v7 = vld [vmem:[%s25149_s1 + $0x4e0] ss:$20 sps:$4 sm:$0xff]  }
 0x697   : > { %7809 = vmatmul.mubr.bf16.gmra.mrb[28].mxu0 %v15999_v54 }
 0x698   : > { %7816 = vmatprep.mubr.bf16.mxu0 %v16008_v38 }
 0x69a   : > { %v7602_v33 = vpop.f32.mrb[180].mxu0 }
 0x69b   : > { %v21632_v44 = vadd.f32 %v21414_v30, %v7602_v33  ;;  %v7604_v3 = vpop.f32.mrb[181].mxu0 }
 0x69c   : > { %v7605_v48 = vpop.f32.mrb[182].mxu0  ;;  %v16029_v3 = vld [vmem:[%s25149_s1 + $0x50c] ss:$20 sps:$4 sm:$0xff]  }
 0x69d   : > { %v21645_v15 = vadd.f32 %v21427_v35, %v7605_v48  ;;  %v7607_v57 = vpop.f32.mrb[183].mxu0  ;;  %v16022_v35 = vld [vmem:[%s25149_s1 + $0x4e4] ss:$20 sps:$4 sm:$0xff]  }
 0x69f   : > { %7817 = vmatmul.mubr.bf16.gmra.mrb[32].mxu0 %v16006_v14 }
 0x6a0   : > { %7824 = vmatprep.mubr.bf16.mxu0 %v16015_v0 }
 0x6a2   : > { %v7610_v13 = vpop.f32.mrb[184].mxu0 }
 0x6a3   : > { %v21650_v36 = vadd.f32 %v21409_v27, %v7610_v13  ;;  %v7612_v51 = vpop.f32.mrb[185].mxu0  ;;  %v21663_v27 = vpop.f32.mrb[156].mxu1 }
 0x6a4   : > { %v7613_v11 = vpop.f32.mrb[186].mxu0  ;;  %v21665_v54 = vpop.f32.mrb[157].mxu1 }
 0x6a5   : > { %v21659_v8 = vadd.f32 %v21419_v47, %v7613_v11  ;;  %v7615_v4 = vpop.f32.mrb[187].mxu0  ;;  %v21671_v47 = vpop.f32.mrb[158].mxu1 }
 0x6a6   : > { %v21676_v14 = vpop.f32.mrb[159].mxu1 }
 0x6a7   : > { %7825 = vmatmul.mubr.bf16.gmra.mrb[36].mxu0 %v16013_v52  ;;  %v16027_v52 = vld [vmem:[%s25149_s1 + $0x508] ss:$20 sps:$4 sm:$0xff]  }
 0x6a8   : > { %7832 = vmatprep.mubr.bf16.mxu0 %v16022_v35 }
 0x6aa   : > { %v7618_v19 = vpop.f32.mrb[188].mxu0 }
 0x6ab   : > { %v8100_v12 = vadd.f32 %v21458_v58, %v7618_v19  ;;  %v7620_v38 = vpop.f32.mrb[189].mxu0 }
 0x6ac   : > { %v7621_v33 = vpop.f32.mrb[190].mxu0 }
 0x6ad   : > { %v8103_v48 = vadd.f32 %v21471_v5, %v7621_v33  ;;  %v7623_v0 = vpop.f32.mrb[191].mxu0  ;;  %v16032_v5 = vld [vmem:[%s25149_s1 + $0x534] ss:$20 sps:$4 sm:$0xff]  }
 0x6ae   : > { %v16035_v0 = vld [vmem:[%s25149_s1 + $0x55c] ss:$20 sps:$4 sm:$0xff]  }
 0x6af   : > { %v21679_v57 = vpack.c.bf16 %v8103_v48, %v8100_v12  ;;  %7833 = vmatmul.mubr.bf16.gmra.mrb[40].mxu0 %v16020_v7  ;;  %v21692_v12 = vpop.f32.mrb[160].mxu1 }
 0x6b0   : > { %7840 = vmatprep.mubr.bf16.mxu0 %v16029_v3  ;;  %v21695_v38 = vpop.f32.mrb[161].mxu1  ;;  %v16030_v3 = vld [vmem:[%s25149_s1 + $0x530] ss:$20 sps:$4 sm:$0xff]  }
 0x6b1   : > { %14438 = vmatprep.mubr.bf16.mxu1 %v21679_v57 }
 0x6b2   : > { %v7626_v58 = vpop.f32.mrb[192].mxu0 }
 0x6b3   : > { %v8108_v13 = vadd.f32 %v21453_v40, %v7626_v58  ;;  %v7628_v51 = vpop.f32.mrb[193].mxu0 }
 0x6b4   : > { %v7629_v11 = vpop.f32.mrb[194].mxu0 }
 0x6b5   : > { %v8111_v35 = vadd.f32 %v21463_v25, %v7629_v11  ;;  %v7631_v4 = vpop.f32.mrb[195].mxu0  ;;  %v21701_v25 = vpop.f32.mrb[162].mxu1 }
 0x6b6   : > { %v21706_v58 = vpop.f32.mrb[163].mxu1 }
 0x6b7   : > { %v21690_v19 = vpack.c.bf16 %v8111_v35, %v8108_v13  ;;  %7841 = vmatmul.mubr.bf16.gmra.mrb[44].mxu0 %v16027_v52  ;;  %v16033_v35 = vld [vmem:[%s25149_s1 + $0x558] ss:$20 sps:$4 sm:$0xff]  }
 0x6b8   : > { %7848 = vmatprep.mubr.bf16.mxu0 %v16032_v5 }
 0x6b9   : > { %14439 = vmatmul.mubr.bf16.vlgmr.msra.gmra.mrb[228].mxu1 %v21690_v19 }
 0x6ba   : > { %v7634_v40 = vpop.f32.mrb[196].mxu0 }
 0x6bb   : > { %v8116_v7 = vadd.f32 %v21493_v26, %v7634_v40  ;;  %v7636_v33 = vpop.f32.mrb[197].mxu0 }
 0x6bc   : > { %v7637_v48 = vpop.f32.mrb[198].mxu0 }
 0x6bd   : > { %v8119_v13 = vadd.f32 %v21503_v20, %v7637_v48  ;;  %v7639_v51 = vpop.f32.mrb[199].mxu0  ;;  %v16038_v20 = vld [vmem:[%s25149_s1 + $0x584] ss:$20 sps:$4 sm:$0xff]  }
 0x6be   : > { %v16036_v51 = vld [vmem:[%s25149_s1 + $0x580] ss:$20 sps:$4 sm:$0xff]  }
 0x6bf   : > { %v21709_v52 = vpack.c.bf16 %v8119_v13, %v8116_v7  ;;  %7849 = vmatmul.mubr.bf16.gmra.mrb[48].mxu0 %v16030_v3  ;;  %v21722_v3 = vpop.f32.mrb[164].mxu1 }
 0x6c0   : > { %7856 = vmatprep.mubr.bf16.mxu0 %v16035_v0  ;;  %v21725_v48 = vpop.f32.mrb[165].mxu1 }
 0x6c1   : > { %14442 = vmatprep.mubr.bf16.mxu1 %v21709_v52 }
 0x6c2   : > { %v7642_v26 = vpop.f32.mrb[200].mxu0 }
 0x6c3   : > { %v8124_v11 = vadd.f32 %v21491_v32, %v7642_v26  ;;  %v7644_v5 = vpop.f32.mrb[201].mxu0 }
 0x6c4   : > { %v7645_v4 = vpop.f32.mrb[202].mxu0 }
 0x6c5   : > { %v8127_v40 = vadd.f32 %v21498_v16, %v7645_v4  ;;  %v7647_v7 = vpop.f32.mrb[203].mxu0  ;;  %v21731_v16 = vpop.f32.mrb[166].mxu1 }
 0x6c6   : > { %v21736_v5 = vpop.f32.mrb[167].mxu1 }
 0x6c7   : > { %v21720_v33 = vpack.c.bf16 %v8127_v40, %v8124_v11  ;;  %7857 = vmatmul.mubr.bf16.gmra.mrb[52].mxu0 %v16033_v35  ;;  %v16041_v11 = vld [vmem:[%s25149_s1 + $0x5ac] ss:$20 sps:$4 sm:$0xff]  }
 0x6c8   : > { %7864 = vmatprep.mubr.bf16.mxu0 %v16038_v20 }
 0x6c9   : > { %14443 = vmatmul.mubr.bf16.gmra.mrb[232].mxu1 %v21720_v33 }
 0x6ca   : > { %v7650_v32 = vpop.f32.mrb[204].mxu0 }
 0x6cb   : > { %v8132_v0 = vadd.f32 %v21513_v22, %v7650_v32  ;;  %v7652_v13 = vpop.f32.mrb[205].mxu0  ;;  %v16039_v32 = vld [vmem:[%s25149_s1 + $0x5a8] ss:$20 sps:$4 sm:$0xff]  }
 0x6cc   : > { %v7653_v26 = vpop.f32.mrb[206].mxu0 }
 0x6cd   : > { %v8135_v35 = vadd.f32 %v21523_v62, %v7653_v26  ;;  %v7655_v4 = vpop.f32.mrb[207].mxu0  ;;  %v16044_v62 = vld [vmem:[%s25149_s1 + $0x5d4] ss:$20 sps:$4 sm:$0xff]  }
 0x6cf   : > { %v21739_v20 = vpack.c.bf16 %v8135_v35, %v8132_v0  ;;  %7865 = vmatmul.mubr.bf16.gmra.mrb[56].mxu0 %v16036_v51 }
 0x6d0   : > { %7872 = vmatprep.mubr.bf16.mxu0 %v16041_v11  ;;  %v21752_v11 = vpop.f32.mrb[168].mxu1 }
 0x6d1   : > { %14446 = vmatprep.mubr.bf16.mxu1 %v21739_v20  ;;  %v21755_v35 = vpop.f32.mrb[169].mxu1 }
 0x6d2   : > { %v7658_v22 = vpop.f32.mrb[208].mxu0 }
 0x6d3   : > { %v8140_v40 = vadd.f32 %v21511_v41, %v7658_v22  ;;  %v7660_v7 = vpop.f32.mrb[209].mxu0 }
 0x6d4   : > { %v7661_v13 = vpop.f32.mrb[210].mxu0  ;;  %v16042_v7 = vld [vmem:[%s25149_s1 + $0x5d0] ss:$20 sps:$4 sm:$0xff]  }
 0x6d5   : > { %v8143_v0 = vadd.f32 %v21518_v46, %v7661_v13  ;;  %v7663_v26 = vpop.f32.mrb[211].mxu0  ;;  %v21761_v46 = vpop.f32.mrb[170].mxu1 }
 0x6d6   : > { %v21766_v13 = vpop.f32.mrb[171].mxu1 }
 0x6d7   : > { %v21750_v51 = vpack.c.bf16 %v8143_v0, %v8140_v40  ;;  %7873 = vmatmul.mubr.bf16.gmra.mrb[60].mxu0 %v16039_v32  ;;  %v16047_v32 = vld [vmem:[%s25149_s1 + $0x5fc] ss:$20 sps:$4 sm:$0xff]  }
 0x6d8   : > { %7880 = vmatprep.mubr.bf16.mxu0 %v16044_v62 }
 0x6d9   : > { %14447 = vmatmul.mubr.bf16.gmra.mrb[236].mxu1 %v21750_v51 }
 0x6da   : > { %v7666_v41 = vpop.f32.mrb[212].mxu0 }
 0x6db   : > { %v8148_v4 = vadd.f32 %v21533_v39, %v7666_v41  ;;  %v7668_v22 = vpop.f32.mrb[213].mxu0 }
 0x6dc   : > { %v7669_v40 = vpop.f32.mrb[214].mxu0 }
 0x6dd   : > { %v8151_v62 = vadd.f32 %v21543_v53, %v7669_v40  ;;  %v7671_v0 = vpop.f32.mrb[215].mxu0  ;;  %v16050_v53 = vld [vmem:[%s25149_s1 + $0x624] ss:$20 sps:$4 sm:$0xff]  }
 0x6df   : > { %v21769_v26 = vpack.c.bf16 %v8151_v62, %v8148_v4  ;;  %7881 = vmatmul.mubr.bf16.gmra.mrb[64].mxu0 %v16042_v7 }
 0x6e0   : > { %7888 = vmatprep.mubr.bf16.mxu0 %v16047_v32  ;;  %v21782_v32 = vpop.f32.mrb[172].mxu1 }
 0x6e1   : > { %25534 = vst [vmem:[#allocation140_spill] sm:$0xff] %v21769_v26  ;;  %14450 = vmatprep.mubr.bf16.mxu1 %v21769_v26  ;;  %v21785_v62 = vpop.f32.mrb[173].mxu1 }
 0x6e2   : > { %v7674_v39 = vpop.f32.mrb[216].mxu0 }
 0x6e3   : > { %v8156_v41 = vadd.f32 %v21531_v9, %v7674_v39  ;;  %v7676_v22 = vpop.f32.mrb[217].mxu0 }
 0x6e4   : > { %v7677_v30 = vpop.f32.mrb[218].mxu0  ;;  %v16048_v22 = vld [vmem:[%s25149_s1 + $0x620] ss:$20 sps:$4 sm:$0xff]  }
 0x6e5   : > { %v8159_v4 = vadd.f32 %v21538_v34, %v7677_v30  ;;  %v7679_v40 = vpop.f32.mrb[219].mxu0  ;;  %v21791_v34 = vpop.f32.mrb[174].mxu1 }
 0x6e7   : > { %v21780_v7 = vpack.c.bf16 %v8159_v4, %v8156_v41  ;;  %7889 = vmatmul.mubr.bf16.gmra.mrb[68].mxu0 %v16045_v59  ;;  %v16053_v59 = vld [vmem:[%s25149_s1 + $0x64c] ss:$20 sps:$4 sm:$0xff]   ;;  %v21796_v41 = vpop.f32.mrb[175].mxu1 }
 0x6e8   : > { %7896 = vmatprep.mubr.bf16.mxu0 %v16050_v53 }
 0x6e9   : > { %25535 = vst [vmem:[#allocation104_spill] sm:$0xff] %v21780_v7  ;;  %14451 = vmatmul.mubr.bf16.gmra.mrb[240].mxu1 %v21780_v7 }
 0x6ea   : > { %v7682_v9 = vpop.f32.mrb[220].mxu0 }
 0x6eb   : > { %v8164_v0 = vadd.f32 %v21553_v23, %v7682_v9  ;;  %v7684_v39 = vpop.f32.mrb[221].mxu0 }
 0x6ec   : > { %v7685_v30 = vpop.f32.mrb[222].mxu0 }
 0x6ed   : > { %v8167_v53 = vadd.f32 %v21563_v29, %v7685_v30  ;;  %v7687_v4 = vpop.f32.mrb[223].mxu0  ;;  %v16056_v29 = vld [vmem:[%s25149_s1 + $0x674] ss:$20 sps:$4 sm:$0xff]  }
 0x6ef   : > { %v21799_v40 = vpack.c.bf16 %v8167_v53, %v8164_v0  ;;  %7897 = vmatmul.mubr.bf16.gmra.mrb[72].mxu0 %v16048_v22 }
 0x6f0   : > { %7904 = vmatprep.mubr.bf16.mxu0 %v16053_v59  ;;  %v21812_v59 = vpop.f32.mrb[176].mxu1 }
 0x6f1   : > { %25536 = vst [vmem:[#allocation209_spill] sm:$0xff] %v21799_v40  ;;  %14454 = vmatprep.mubr.bf16.mxu1 %v21799_v40  ;;  %v21815_v53 = vpop.f32.mrb[177].mxu1 }
 0x6f2   : > { %v7690_v23 = vpop.f32.mrb[224].mxu0 }
 0x6f3   : > { %v8172_v9 = vadd.f32 %v21551_v60, %v7690_v23  ;;  %v7692_v39 = vpop.f32.mrb[225].mxu0 }
 0x6f4   : > { %v7693_v17 = vpop.f32.mrb[226].mxu0  ;;  %v16054_v39 = vld [vmem:[%s25149_s1 + $0x670] ss:$20 sps:$4 sm:$0xff]  }
 0x6f5   : > { %v8175_v0 = vadd.f32 %v21558_v24, %v7693_v17  ;;  %v7695_v30 = vpop.f32.mrb[227].mxu0  ;;  %v21821_v24 = vpop.f32.mrb[178].mxu1 }
 0x6f7   : > { %v21810_v22 = vpack.c.bf16 %v8175_v0, %v8172_v9  ;;  %7905 = vmatmul.mubr.bf16.gmra.mrb[76].mxu0 %v16051_v63  ;;  %v16059_v63 = vld [vmem:[%s25149_s1 + $0x69c] ss:$20 sps:$4 sm:$0xff]   ;;  %v21826_v9 = vpop.f32.mrb[179].mxu1 }
 0x6f8   : > { %7912 = vmatprep.mubr.bf16.mxu0 %v16056_v29 }
 0x6f9   : > { %25537 = vst [vmem:[#allocation203_spill] sm:$0xff] %v21810_v22  ;;  %14455 = vmatmul.mubr.bf16.gmra.mrb[244].mxu1 %v21810_v22 }
 0x6fa   : > { %v7698_v60 = vpop.f32.mrb[228].mxu0 }
 0x6fb   : > { %v8180_v4 = vadd.f32 %v21573_v42, %v7698_v60  ;;  %v7700_v23 = vpop.f32.mrb[229].mxu0 }
 0x6fc   : > { %v7701_v17 = vpop.f32.mrb[230].mxu0 }
 0x6fd   : > { %v8183_v29 = vadd.f32 %v21583_v10, %v7701_v17  ;;  %v7703_v0 = vpop.f32.mrb[231].mxu0  ;;  %v16062_v10 = vld [vmem:[%s25149_s1 + $0x6c4] ss:$20 sps:$4 sm:$0xff]  }
 0x6ff   : > { %v21829_v30 = vpack.c.bf16 %v8183_v29, %v8180_v4  ;;  %7913 = vmatmul.mubr.bf16.gmra.mrb[80].mxu0 %v16054_v39 }
 0x700   : > { %7920 = vmatprep.mubr.bf16.mxu0 %v16059_v63  ;;  %v21842_v63 = vpop.f32.mrb[180].mxu1 }
 0x701   : > { %25538 = vst [vmem:[#allocation142_spill] sm:$0xff] %v21829_v30  ;;  %14458 = vmatprep.mubr.bf16.mxu1 %v21829_v30  ;;  %v21845_v29 = vpop.f32.mrb[181].mxu1 }
 0x702   : > { %v7706_v42 = vpop.f32.mrb[232].mxu0 }
 0x703   : > { %v8188_v60 = vadd.f32 %v21571_v28, %v7706_v42  ;;  %v7708_v23 = vpop.f32.mrb[233].mxu0 }
 0x704   : > { %v7709_v22 = vpop.f32.mrb[234].mxu0  ;;  %v16060_v23 = vld [vmem:[%s25149_s1 + $0x6c0] ss:$20 sps:$4 sm:$0xff]  }
 0x705   : > { %v8191_v4 = vadd.f32 %v21578_v2, %v7709_v22  ;;  %v7711_v17 = vpop.f32.mrb[235].mxu0  ;;  %v21851_v2 = vpop.f32.mrb[182].mxu1 }
 0x707   : > { %v21840_v39 = vpack.c.bf16 %v8191_v4, %v8188_v60  ;;  %7921 = vmatmul.mubr.bf16.gmra.mrb[84].mxu0 %v16057_v37  ;;  %v16065_v37 = vld [vmem:[%s25149_s1 + $0x6ec] ss:$20 sps:$4 sm:$0xff]   ;;  %v21856_v60 = vpop.f32.mrb[183].mxu1 }
 0x708   : > { %7928 = vmatprep.mubr.bf16.mxu0 %v16062_v10 }
 0x709   : > { %25539 = vst [vmem:[#allocation62_spill] sm:$0xff] %v21840_v39  ;;  %14459 = vmatmul.mubr.bf16.gmra.mrb[248].mxu1 %v21840_v39  ;;  %v16063_v39 = vld [vmem:[%s25149_s1 + $0x6e8] ss:$20 sps:$4 sm:$0xff]  }
 0x70a   : > { %v7714_v28 = vpop.f32.mrb[236].mxu0 }
 0x70b   : > { %v8196_v0 = vadd.f32 %v21593_v55, %v7714_v28  ;;  %v7716_v42 = vpop.f32.mrb[237].mxu0 }
 0x70c   : > { %v7717_v22 = vpop.f32.mrb[238].mxu0 }
 0x70d   : > { %v8199_v10 = vadd.f32 %v21606_v1, %v7717_v22  ;;  %v7719_v4 = vpop.f32.mrb[239].mxu0  ;;  %v16068_v1 = vld [vmem:[%s25149_s1 + $0x714] ss:$20 sps:$4 sm:$0xff]  }
 0x70f   : > { %v21859_v17 = vpack.c.bf16 %v8199_v10, %v8196_v0  ;;  %7929 = vmatmul.mubr.bf16.gmra.mrb[88].mxu0 %v16060_v23 }
 0x710   : > { %7936 = vmatprep.mubr.bf16.mxu0 %v16065_v37  ;;  %v21872_v37 = vpop.f32.mrb[184].mxu1 }
 0x711   : > { %25540 = vst [vmem:[#allocation77_spill] sm:$0xff] %v21859_v17  ;;  %14462 = vmatprep.mubr.bf16.mxu1 %v21859_v17  ;;  %v21875_v10 = vpop.f32.mrb[185].mxu1 }
 0x712   : > { %v7722_v55 = vpop.f32.mrb[240].mxu0 }
 0x713   : > { %v8204_v28 = vadd.f32 %v21591_v45, %v7722_v55  ;;  %v7724_v42 = vpop.f32.mrb[241].mxu0 }
 0x714   : > { %v7725_v30 = vpop.f32.mrb[242].mxu0  ;;  %v16066_v42 = vld [vmem:[%s25149_s1 + $0x710] ss:$20 sps:$4 sm:$0xff]  }
 0x715   : > { %v8207_v0 = vadd.f32 %v21601_v49, %v7725_v30  ;;  %v7727_v22 = vpop.f32.mrb[243].mxu0  ;;  %v21881_v49 = vpop.f32.mrb[186].mxu1 }
 0x717   : > { %v21870_v23 = vpack.c.bf16 %v8207_v0, %v8204_v28  ;;  %7937 = vmatmul.mubr.bf16.gmra.mrb[92].mxu0 %v16063_v39  ;;  %v16071_v39 = vld [vmem:[%s25149_s1 + $0x73c] ss:$20 sps:$4 sm:$0xff]   ;;  %v21886_v28 = vpop.f32.mrb[187].mxu1 }
 0x718   : > { %7944 = vmatprep.mubr.bf16.mxu0 %v16068_v1 }
 0x719   : > { %25541 = vst [vmem:[#allocation113_spill] sm:$0xff] %v21870_v23  ;;  %14463 = vmatmul.mubr.bf16.gmra.mrb[252].mxu1 %v21870_v23  ;;  %v16069_v23 = vld [vmem:[%s25149_s1 + $0x738] ss:$20 sps:$4 sm:$0xff]  }
 0x71a   : > { %v7730_v45 = vpop.f32.mrb[244].mxu0 }
 0x71b   : > { %v8212_v4 = vadd.f32 %v21629_v61, %v7730_v45  ;;  %v7732_v55 = vpop.f32.mrb[245].mxu0 }
 0x71c   : > { %v7733_v30 = vpop.f32.mrb[246].mxu0 }
 0x71d   : > { %v8215_v1 = vadd.f32 %v21642_v56, %v7733_v30  ;;  %v7735_v0 = vpop.f32.mrb[247].mxu0  ;;  %v16074_v56 = vld [vmem:[%s25149_s1 + $0x764] ss:$20 sps:$4 sm:$0xff]  }
 0x71f   : > { %v21889_v22 = vpack.c.bf16 %v8215_v1, %v8212_v4  ;;  %7945 = vmatmul.mubr.bf16.gmra.mrb[96].mxu0 %v16066_v42 }
 0x720   : > { %7952 = vmatprep.mubr.bf16.mxu0 %v16071_v39  ;;  %v21902_v39 = vpop.f32.mrb[188].mxu1 }
 0x721   : > { %25542 = vst [vmem:[#allocation148_spill] sm:$0xff] %v21889_v22  ;;  %14466 = vmatprep.mubr.bf16.mxu1 %v21889_v22  ;;  %v21905_v1 = vpop.f32.mrb[189].mxu1  ;;  %v16075_v22 = vld [vmem:[%s25149_s1 + $0x788] ss:$20 sps:$4 sm:$0xff]  }
 0x722   : > { %v7738_v61 = vpop.f32.mrb[248].mxu0 }
 0x723   : > { %v8220_v45 = vadd.f32 %v21627_v50, %v7738_v61  ;;  %v7740_v55 = vpop.f32.mrb[249].mxu0 }
 0x724   : > { %v7741_v17 = vpop.f32.mrb[250].mxu0  ;;  %v16072_v55 = vld [vmem:[%s25149_s1 + $0x760] ss:$20 sps:$4 sm:$0xff]  }
 0x725   : > { %v8223_v4 = vadd.f32 %v21637_v31, %v7741_v17  ;;  %v7743_v30 = vpop.f32.mrb[251].mxu0  ;;  %v21911_v31 = vpop.f32.mrb[190].mxu1 }
 0x727   : > { %v21900_v42 = vpack.c.bf16 %v8223_v4, %v8220_v45  ;;  %7953 = vmatmul.mubr.bf16.gmra.mrb[100].mxu0 %v16069_v23  ;;  %v16077_v23 = vld [vmem:[%s25149_s1 + $0x78c] ss:$20 sps:$4 sm:$0xff]   ;;  %v21916_v45 = vpop.f32.mrb[191].mxu1 }
 0x728   : > { %7960 = vmatprep.mubr.bf16.mxu0 %v16074_v56 }
 0x729   : > { %25543 = vst [vmem:[#allocation114_spill] sm:$0xff] %v21900_v42  ;;  %14467 = vmatmul.mubr.bf16.gmra.mrb[0].mxu1 %v21900_v42 }
 0x72a   : > { %v7746_v50 = vpop.f32.mrb[252].mxu0 }
 0x72b   : > { %v8228_v0 = vadd.f32 %v21665_v54, %v7746_v50  ;;  %v7748_v61 = vpop.f32.mrb[253].mxu0  ;;  %v16099_v54 = vld [vmem:[%s23027_s4] sm:$0xff]  }
 0x72c   : > { %v7749_v17 = vpop.f32.mrb[254].mxu0  ;;  %14518 = vmatprep.subr.bf16.mxu1 %v16099_v54 }
 0x72d   : > { %v8231_v56 = vadd.f32 %v21676_v14, %v7749_v17  ;;  %v7751_v4 = vpop.f32.mrb[255].mxu0  ;;  %14519 = vmatpush3.bf16.msra.mxu1 %v16099_v54  ;;  %v16078_v54 = vld [vmem:[%s25149_s1 + $0x7b0] ss:$20 sps:$4 sm:$0xff]  }
 0x72f   : > { %v21919_v30 = vpack.c.bf16 %v8231_v56, %v8228_v0  ;;  %7961 = vmatmul.mubr.bf16.gmra.mrb[104].mxu0 %v16072_v55  ;;  %v16080_v0 = vld [vmem:[%s25149_s1 + $0x7b4] ss:$20 sps:$4 sm:$0xff]   ;;  %v21935_v56 = vpop.f32.mrb[192].mxu1 }
 0x730   : > { %7968 = vmatprep.mubr.bf16.mxu0 %v16077_v23 }
 0x731   : > { %25544 = vst [vmem:[#allocation215_spill] sm:$0xff] %v21919_v30  ;;  %14470 = vmatprep.mubr.bf16.mxu1 %v21919_v30 }
 0x732   : > { %v7754_v50 = vpop.f32.mrb[0].mxu0 }
 0x733   : > { %v8236_v61 = vadd.f32 %v21663_v27, %v7754_v50  ;;  %v7756_v42 = vpop.f32.mrb[1].mxu0 }
 0x734   : > { %v7757_v14 = vpop.f32.mrb[2].mxu0  ;;  %v21938_v42 = vpop.f32.mrb[193].mxu1 }
 0x735   : > { %v8239_v55 = vadd.f32 %v21671_v47, %v7757_v14  ;;  %v7759_v17 = vpop.f32.mrb[3].mxu0  ;;  %v21944_v47 = vpop.f32.mrb[194].mxu1 }
 0x736   : > { %v21949_v14 = vpop.f32.mrb[195].mxu1 }
 0x737   : > { %v21933_v23 = vpack.c.bf16 %v8239_v55, %v8236_v61  ;;  %7969 = vmatmul.mubr.bf16.gmra.mrb[108].mxu0 %v16075_v22  ;;  %v16083_v22 = vld [vmem:[%s25149_s1 + $0x7dc] ss:$20 sps:$4 sm:$0xff]  }
 0x738   : > { %7976 = vmatprep.mubr.bf16.mxu0 %v16080_v0 }
 0x739   : > { %25545 = vst [vmem:[#allocation210_spill] sm:$0xff] %v21933_v23  ;;  %14471 = vmatmul.mubr.bf16.gmra.mrb[4].mxu1 %v21933_v23  ;;  %v16081_v23 = vld [vmem:[%s25149_s1 + $0x7d8] ss:$20 sps:$4 sm:$0xff]  }
 0x73a   : > { %v7762_v27 = vpop.f32.mrb[4].mxu0 }
 0x73b   : > { %v8244_v4 = vadd.f32 %v21695_v38, %v7762_v27  ;;  %v7764_v50 = vpop.f32.mrb[5].mxu0 }
 0x73c   : > { %v7765_v61 = vpop.f32.mrb[6].mxu0 }
 0x73d   : > { %v8247_v0 = vadd.f32 %v21706_v58, %v7765_v61  ;;  %v7767_v55 = vpop.f32.mrb[7].mxu0  ;;  %v16086_v58 = vld [vmem:[%s25149_s1 + $0x804] ss:$20 sps:$4 sm:$0xff]  }
 0x73f   : > { %v21952_v17 = vpack.c.bf16 %v8247_v0, %v8244_v4  ;;  %7977 = vmatmul.mubr.bf16.gmra.mrb[112].mxu0 %v16078_v54 }
 0x740   : > { %7984 = vmatprep.mubr.bf16.mxu0 %v16083_v22  ;;  %v21968_v22 = vpop.f32.mrb[196].mxu1 }
 0x741   : > { %25546 = vst [vmem:[#allocation150_spill] sm:$0xff] %v21952_v17  ;;  %14474 = vmatprep.mubr.bf16.mxu1 %v21952_v17  ;;  %v21971_v55 = vpop.f32.mrb[197].mxu1 }
 0x742   : > { %v7770_v38 = vpop.f32.mrb[8].mxu0 }
 0x743   : > { %v8252_v27 = vadd.f32 %v21692_v12, %v7770_v38  ;;  %v7772_v50 = vpop.f32.mrb[9].mxu0  ;;  %v16100_v12 = vld [vmem:[%s23027_s4 + $0x8] sm:$0xff]   ;;  %v21977_v38 = vpop.f32.mrb[198].mxu1 }
 0x744   : > { %v7773_v30 = vpop.f32.mrb[10].mxu0  ;;  %14520 = vmatprep.subr.bf16.mxu1 %v16100_v12  ;;  %v16089_v50 = vld [vmem:[%s25149_s1 + $0x82c] ss:$20 sps:$4 sm:$0xff]  }
 0x745   : > { %v8255_v4 = vadd.f32 %v21701_v25, %v7773_v30  ;;  %v7775_v61 = vpop.f32.mrb[11].mxu0  ;;  %14521 = vmatpush3.bf16.msra.mxu1 %v16100_v12 }
 0x747   : > { %v21963_v54 = vpack.c.bf16 %v8255_v4, %v8252_v27  ;;  %7985 = vmatmul.mubr.bf16.gmra.mrb[116].mxu0 %v16081_v23  ;;  %v16084_v23 = vld [vmem:[%s25149_s1 + $0x800] ss:$20 sps:$4 sm:$0xff]  }
 0x748   : > { %7992 = vmatprep.mubr.bf16.mxu0 %v16086_v58  ;;  %v21982_v58 = vpop.f32.mrb[199].mxu1 }
 0x749   : > { %25547 = vst [vmem:[#allocation70_spill] sm:$0xff] %v21963_v54  ;;  %14475 = vmatmul.mubr.bf16.gmra.mrb[8].mxu1 %v21963_v54  ;;  %v16087_v54 = vld [vmem:[%s25149_s1 + $0x828] ss:$20 sps:$4 sm:$0xff]  }
 0x74a   : > { %v7778_v0 = vpop.f32.mrb[12].mxu0 }
 0x74b   : > { %v8260_v25 = vadd.f32 %v21725_v48, %v7778_v0  ;;  %v7780_v30 = vpop.f32.mrb[13].mxu0 }
 0x74c   : > { %v7781_v27 = vpop.f32.mrb[14].mxu0 }
 0x74d   : > { %v8263_v4 = vadd.f32 %v21736_v5, %v7781_v27  ;;  %v7783_v61 = vpop.f32.mrb[15].mxu0  ;;  %v16092_v5 = vld [vmem:[%s25149_s1 + $0x854] ss:$20 sps:$4 sm:$0xff]  }
 0x74f   : > { %v21985_v12 = vpack.c.bf16 %v8263_v4, %v8260_v25  ;;  %7993 = vmatmul.mubr.bf16.gmra.mrb[120].mxu0 %v16084_v23 }
 0x750   : > { %8000 = vmatprep.mubr.bf16.mxu0 %v16089_v50  ;;  %v21998_v50 = vpop.f32.mrb[200].mxu1 }
 0x751   : > { %25548 = vst [vmem:[#allocation152_spill] sm:$0xff] %v21985_v12  ;;  %14478 = vmatprep.mubr.bf16.mxu1 %v21985_v12  ;;  %v22004_v61 = vpop.f32.mrb[201].mxu1 }
 0x752   : > { %v7786_v48 = vpop.f32.mrb[16].mxu0 }
 0x753   : > { %v8268_v0 = vadd.f32 %v21722_v3, %v7786_v48  ;;  %v7788_v30 = vpop.f32.mrb[17].mxu0  ;;  %v16101_v3 = vld [vmem:[%s23027_s4 + $0x10] sm:$0xff]   ;;  %v22010_v48 = vpop.f32.mrb[202].mxu1 }
 0x754   : > { %v7789_v17 = vpop.f32.mrb[18].mxu0  ;;  %14522 = vmatprep.subr.bf16.mxu1 %v16101_v3 }
 0x755   : > { %v8271_v25 = vadd.f32 %v21731_v16, %v7789_v17  ;;  %v7791_v27 = vpop.f32.mrb[19].mxu0  ;;  %14523 = vmatpush3.bf16.msra.mxu1 %v16101_v3 }
 0x757   : > { %v21996_v23 = vpack.c.bf16 %v8271_v25, %v8268_v0  ;;  %8001 = vmatmul.mubr.bf16.gmra.mrb[124].mxu0 %v16087_v54  ;;  %v16090_v54 = vld [vmem:[%s25149_s1 + $0x850] ss:$20 sps:$4 sm:$0xff]   ;;  %v16102_v0 = vld [vmem:[%s23027_s4 + $0x18] sm:$0xff]   ;;  %v22018_v25 = vpop.f32.mrb[203].mxu1 }
 0x758   : > { %8008 = vmatprep.mubr.bf16.mxu0 %v16092_v5  ;;  %v16095_v5 = vld [vmem:[%s25149_s1 + $0x87c] ss:$20 sps:$4 sm:$0xff]   ;;  %14524 = vmatprep.subr.bf16.mxu1 %v16102_v0 }
 0x759   : > { %25549 = vst [vmem:[#allocation73_spill] sm:$0xff] %v21996_v23  ;;  %14479 = vmatmul.mubr.bf16.gmra.mrb[12].mxu1 %v21996_v23 }
 0x75a   : > { %v7794_v4 = vpop.f32.mrb[20].mxu0  ;;  %14525 = vmatpush3.bf16.msra.mxu1 %v16102_v0  ;;  %v16098_v0 = vld [vmem:[%s25149_s1 + $0x8a4] ss:$20 sps:$4 sm:$0xff]  }
 0x75b   : > { %v8276_v16 = vadd.f32 %v21755_v35, %v7794_v4  ;;  %v7796_v17 = vpop.f32.mrb[21].mxu0  ;;  %v16103_v4 = vld [vmem:[%s23027_s4 + $0x20] sm:$0xff]  }
 0x75c   : > { %v7797_v30 = vpop.f32.mrb[22].mxu0  ;;  %14526 = vmatprep.subr.bf16.mxu1 %v16103_v4 }
 0x75d   : > { %v8279_v35 = vadd.f32 %v21766_v13, %v7797_v30  ;;  %v7799_v27 = vpop.f32.mrb[23].mxu0  ;;  %v16093_v13 = vld [vmem:[%s25149_s1 + $0x878] ss:$20 sps:$4 sm:$0xff]  }
 0x75e   : > { %14527 = vmatpush3.bf16.msra.mxu1 %v16103_v4 }
 0x75f   : > { %v22021_v3 = vpack.c.bf16 %v8279_v35, %v8276_v16  ;;  %8009 = vmatmul.mubr.bf16.gmra.mrb[128].mxu0 %v16090_v54  ;;  %v16104_v16 = vld [vmem:[%s23027_s4 + $0x28] sm:$0xff]   ;;  %v16105_v35 = vld [vmem:[%s23027_s4 + $0x30] sm:$0xff]  }
 0x760   : > { %8016 = vmatprep.mubr.bf16.mxu0 %v16095_v5  ;;  %14528 = vmatprep.subr.bf16.mxu1 %v16104_v16 }
 0x761   : > { %25550 = vst [vmem:[#allocation157_spill] sm:$0xff] %v22021_v3  ;;  %14482 = vmatprep.mubr.bf16.mxu1 %v22021_v3 }
 0x762   : > { %v7802_v17 = vpop.f32.mrb[24].mxu0  ;;  %14529 = vmatpush3.bf16.msra.mxu1 %v16104_v16  ;;  %v16106_v16 = vld [vmem:[%s23027_s4 + $0x38] sm:$0xff]  }
 0x763   : > { %v8284_v23 = vadd.f32 %v21752_v11, %v7802_v17  ;;  %v7804_v12 = vpop.f32.mrb[25].mxu0  ;;  %14530 = vmatprep.subr.bf16.mxu1 %v16105_v35 }
 0x764   : > { %v7805_v54 = vpop.f32.mrb[26].mxu0  ;;  %v22040_v12 = vpop.f32.mrb[204].mxu1 }
 0x765   : > { %v8287_v30 = vadd.f32 %v21761_v46, %v7805_v54  ;;  %v7807_v5 = vpop.f32.mrb[27].mxu0  ;;  %v22046_v4 = vpop.f32.mrb[205].mxu1 }
 0x766   : > { %14531 = vmatpush3.bf16.msra.mxu1 %v16105_v35 }
 0x767   : > { %v22038_v11 = vpack.c.bf16 %v8287_v30, %v8284_v23  ;;  %8017 = vmatmul.mubr.bf16.gmra.mrb[132].mxu0 %v16093_v13  ;;  %v16096_v23 = vld [vmem:[%s25149_s1 + $0x8a0] ss:$20 sps:$4 sm:$0xff]   ;;  %v22052_v13 = vpop.f32.mrb[206].mxu1  ;;  %14532 = vmatprep.subr.bf16.mxu1 %v16106_v16  ;;  %s16250_s1 = scalar_lea.vmem %s16249_s29, 32 }
 0x768   : > { %8024 = vmatprep.mubr.bf16.mxu0 %v16098_v0  ;;  %v22057_v0 = vpop.f32.mrb[207].mxu1  ;;  %p16252_p1 = scmp.lt.s32.totalorder %s16250_s1, %s16244_s16 }
 0x769   : > { %25551 = vst [vmem:[#allocation124_spill] sm:$0xff] %v22038_v11  ;;  %14483 = vmatmul.mubr.bf16.gmra.mrb[16].mxu1 %v22038_v11  ;;  %v22067_v26 = vpop.f32.mrb[208].mxu1 }
 0x76a   : > { %v7810_v27 = vpop.f32.mrb[28].mxu0  ;;  %14533 = vmatpush3.bf16.msra.mxu1 %v16106_v16  ;;  %p16253_p2 = por %p16252_p1, %p16251_p0 }
 0x76b   : > { %v8292_v46 = vadd.f32 %v21785_v62, %v7810_v27  ;;  %v7812_v17 = vpop.f32.mrb[29].mxu0 }
 0x76c   : > { %v7813_v54 = vpop.f32.mrb[30].mxu0  ;;  %p16254_p3 = pnand %p16253_p2, %p16247_p13 }
 0x76d   : > { %v8295_v30 = vadd.f32 %v21796_v41, %v7813_v54  ;;  %v7815_v5 = vpop.f32.mrb[31].mxu0 }
 0x76f   : > { %v22060_v62 = vpack.c.bf16 %v8295_v30, %v8292_v46  ;;  %8025 = vmatmul.mubr.bf16.gmra.mrb[136].mxu0 %v16096_v23  ;;  %v22070_v46 = vpop.f32.mrb[209].mxu1 }
 0x770   : > { %v22073_v54 = vpop.f32.mrb[210].mxu1 }
 0x771   : > { %25552 = vst [vmem:[#allocation222_spill] sm:$0xff] %v22060_v62  ;;  %14486 = vmatprep.mubr.bf16.mxu1 %v22060_v62  ;;  %v22075_v30 = vpop.f32.mrb[211].mxu1 }
 0x772   : > { %v7818_v35 = vpop.f32.mrb[32].mxu0 }
 0x773   : > { %v8300_v27 = vadd.f32 %v21782_v32, %v7818_v35  ;;  %v7820_v17 = vpop.f32.mrb[33].mxu0 }
 0x774   : > { %v7821_v11 = vpop.f32.mrb[34].mxu0 }
 0x775   : > { %v8303_v3 = vadd.f32 %v21791_v34, %v7821_v11  ;;  %v7823_v40 = vpop.f32.mrb[35].mxu0  ;;  %v22081_v11 = vpop.f32.mrb[212].mxu1 }
 0x776   : > { %v22083_v35 = vpop.f32.mrb[213].mxu1 }
 0x777   : > { %v22065_v7 = vpack.c.bf16 %v8303_v3, %v8300_v27  ;;  %v22086_v17 = vpop.f32.mrb[214].mxu1 }
 0x779   : > { %25553 = vst [vmem:[#allocation217_spill] sm:$0xff] %v22065_v7  ;;  %14487 = vmatmul.mubr.bf16.gmra.mrb[20].mxu1 %v22065_v7 }
 0x77a   : > { %v7826_v41 = vpop.f32.mrb[36].mxu0 }
 0x77b   : > { %v8308_v23 = vadd.f32 %v21815_v53, %v7826_v41  ;;  %v7828_v16 = vpop.f32.mrb[37].mxu0 }
 0x77c   : > { %v7829_v32 = vpop.f32.mrb[38].mxu0  ;;  %v22088_v16 = vpop.f32.mrb[215].mxu1 }
 0x77d   : > { %v8311_v34 = vadd.f32 %v21826_v9, %v7829_v32  ;;  %v7831_v40 = vpop.f32.mrb[39].mxu0 }
 0x77f   : > { %v22078_v3 = vpack.c.bf16 %v8311_v34, %v8308_v23  ;;  %v22094_v34 = vpop.f32.mrb[216].mxu1 }
 0x780   : > { %25556 = vst [vmem:[#allocation160_spill] sm:$0xff] %v22094_v34 }
 0x781   : > { %25554 = vst [vmem:[#allocation158_spill] sm:$0xff] %v22078_v3  ;;  %14490 = vmatprep.mubr.bf16.mxu1 %v22078_v3  ;;  %v22096_v3 = vpop.f32.mrb[217].mxu1 }
 0x782   : > { %v7834_v5 = vpop.f32.mrb[40].mxu0 }
 0x783   : > { %v8316_v53 = vadd.f32 %v21812_v59, %v7834_v5  ;;  %v7836_v27 = vpop.f32.mrb[41].mxu0 }
 0x784   : > { %v7837_v41 = vpop.f32.mrb[42].mxu0  ;;  %v22099_v27 = vpop.f32.mrb[218].mxu1 }
 0x785   : > { %v8319_v9 = vadd.f32 %v21821_v24, %v7837_v41  ;;  %v7839_v32 = vpop.f32.mrb[43].mxu0  ;;  %25557 = vst [vmem:[#allocation93_spill] sm:$0xff] %v22099_v27  ;;  %v22101_v62 = vpop.f32.mrb[219].mxu1 }
 0x787   : > { %v22091_v23 = vpack.c.bf16 %v8319_v9, %v8316_v53  ;;  %v22107_v9 = vpop.f32.mrb[220].mxu1 }
 0x788   : > { %25559 = vst [vmem:[#allocation9_spill] sm:$0xff] %v22107_v9 }
 0x789   : > { %25555 = vst [vmem:[#allocation129_spill] sm:$0xff] %v22091_v23  ;;  %14491 = vmatmul.mubr.bf16.gmra.mrb[24].mxu1 %v22091_v23  ;;  %v22109_v23 = vpop.f32.mrb[221].mxu1 }
 0x78a   : > { %v7842_v40 = vpop.f32.mrb[44].mxu0 }
 0x78b   : > { %v8324_v59 = vadd.f32 %v21845_v29, %v7842_v40  ;;  %v7844_v5 = vpop.f32.mrb[45].mxu0 }
 0x78c   : > { %v7845_v7 = vpop.f32.mrb[46].mxu0  ;;  %v22112_v5 = vpop.f32.mrb[222].mxu1 }
 0x78d   : > { %v8327_v24 = vadd.f32 %v21856_v60, %v7845_v7  ;;  %v7847_v41 = vpop.f32.mrb[47].mxu0  ;;  %25560 = vst [vmem:[#allocation133_spill] sm:$0xff] %v22112_v5  ;;  %v22114_v34 = vpop.f32.mrb[223].mxu1 }
 0x78f   : > { %v22104_v53 = vpack.c.bf16 %v8327_v24, %v8324_v59  ;;  %v22120_v24 = vpop.f32.mrb[224].mxu1 }
 0x790   : > { %25562 = vst [vmem:[#allocation84_spill] sm:$0xff] %v22120_v24 }
 0x791   : > { %25558 = vst [vmem:[#allocation221_spill] sm:$0xff] %v22104_v53  ;;  %14494 = vmatprep.mubr.bf16.mxu1 %v22104_v53  ;;  %v22122_v53 = vpop.f32.mrb[225].mxu1 }
 0x792   : > { %v7850_v32 = vpop.f32.mrb[48].mxu0 }
 0x793   : > { %v8332_v29 = vadd.f32 %v21842_v63, %v7850_v32  ;;  %v7852_v40 = vpop.f32.mrb[49].mxu0 }
 0x794   : > { %v7853_v27 = vpop.f32.mrb[50].mxu0  ;;  %v22125_v40 = vpop.f32.mrb[226].mxu1 }
 0x795   : > { %v8335_v7 = vadd.f32 %v21851_v2, %v7853_v27  ;;  %v7855_v60 = vpop.f32.mrb[51].mxu0  ;;  %25563 = vst [vmem:[#allocation168_spill] sm:$0xff] %v22125_v40  ;;  %v22127_v9 = vpop.f32.mrb[227].mxu1 }
 0x797   : > { %v22117_v59 = vpack.c.bf16 %v8335_v7, %v8332_v29 }
 0x799   : > { %25561 = vst [vmem:[#allocation167_spill] sm:$0xff] %v22117_v59  ;;  %14495 = vmatmul.mubr.bf16.gmra.mrb[28].mxu1 %v22117_v59 }
 0x79a   : > { %v7858_v41 = vpop.f32.mrb[52].mxu0 }
 0x79b   : > { %v8340_v63 = vadd.f32 %v21875_v10, %v7858_v41  ;;  %v7860_v32 = vpop.f32.mrb[53].mxu0 }
 0x79c   : > { %v7861_v5 = vpop.f32.mrb[54].mxu0 }
 0x79d   : > { %v8343_v2 = vadd.f32 %v21886_v28, %v7861_v5  ;;  %v7863_v27 = vpop.f32.mrb[55].mxu0 }
 0x79f   : > { %v22130_v29 = vpack.c.bf16 %v8343_v2, %v8340_v63 }
 0x7a1   : > { %25564 = vst [vmem:[#allocation30_spill] sm:$0xff] %v22130_v29  ;;  %14498 = vmatprep.mubr.bf16.mxu1 %v22130_v29 }
 0x7a2   : > { %v7866_v7 = vpop.f32.mrb[56].mxu0 }
 0x7a3   : > { %v8348_v60 = vadd.f32 %v21872_v37, %v7866_v7  ;;  %v7868_v59 = vpop.f32.mrb[57].mxu0 }
 0x7a4   : > { %v7869_v24 = vpop.f32.mrb[58].mxu0 }
 0x7a5   : > { %v8351_v10 = vadd.f32 %v21881_v49, %v7869_v24  ;;  %v7871_v41 = vpop.f32.mrb[59].mxu0 }
 0x7a7   : > { %v22135_v32 = vpack.c.bf16 %v8351_v10, %v8348_v60 }
 0x7a9   : > { %14499 = vmatmul.mubr.bf16.gmra.mrb[32].mxu1 %v22135_v32 }
 0x7aa   : > { %v7874_v40 = vpop.f32.mrb[60].mxu0 }
 0x7ab   : > { %v8356_v28 = vadd.f32 %v21905_v1, %v7874_v40  ;;  %v7876_v5 = vpop.f32.mrb[61].mxu0 }
 0x7ac   : > { %v7877_v63 = vpop.f32.mrb[62].mxu0 }
 0x7ad   : > { %v8359_v2 = vadd.f32 %v21916_v45, %v7877_v63  ;;  %v7879_v27 = vpop.f32.mrb[63].mxu0 }
 0x7af   : > { %v22140_v29 = vpack.c.bf16 %v8359_v2, %v8356_v28 }
 0x7b1   : > { %14502 = vmatprep.mubr.bf16.mxu1 %v22140_v29 }
 0x7b2   : > { %v7882_v37 = vpop.f32.mrb[64].mxu0 }
 0x7b3   : > { %v8364_v49 = vadd.f32 %v21902_v39, %v7882_v37  ;;  %v7884_v59 = vpop.f32.mrb[65].mxu0 }
 0x7b4   : > { %v7885_v24 = vpop.f32.mrb[66].mxu0 }
 0x7b5   : > { %v8367_v7 = vadd.f32 %v21911_v31, %v7885_v24  ;;  %v7887_v60 = vpop.f32.mrb[67].mxu0 }
 0x7b7   : > { %v22145_v10 = vpack.c.bf16 %v8367_v7, %v8364_v49 }
 0x7b9   : > { %14503 = vmatmul.mubr.bf16.gmra.mrb[36].mxu1 %v22145_v10 }
 0x7ba   : > { %v7890_v1 = vpop.f32.mrb[68].mxu0 }
 0x7bb   : > { %v8372_v45 = vadd.f32 %v21938_v42, %v7890_v1  ;;  %v7892_v40 = vpop.f32.mrb[69].mxu0 }
 0x7bc   : > { %v7893_v41 = vpop.f32.mrb[70].mxu0 }
 0x7bd   : > { %v8375_v28 = vadd.f32 %v21949_v14, %v7893_v41  ;;  %v7895_v5 = vpop.f32.mrb[71].mxu0 }
 0x7bf   : > { %v22150_v63 = vpack.c.bf16 %v8375_v28, %v8372_v45 }
 0x7c1   : > { %14506 = vmatprep.mubr.bf16.mxu1 %v22150_v63 }
 0x7c2   : > { %v7898_v39 = vpop.f32.mrb[72].mxu0 }
 0x7c3   : > { %v8380_v31 = vadd.f32 %v21935_v56, %v7898_v39  ;;  %v7900_v2 = vpop.f32.mrb[73].mxu0  ;;  %v16107_v56 = vld [vmem:[%s23027_s4 + $0x80] sm:$0xff]  }
 0x7c4   : > { %v7901_v27 = vpop.f32.mrb[74].mxu0  ;;  %14614 = vmatprep.subr.bf16.mxu1 %v16107_v56 }
 0x7c5   : > { %v8383_v37 = vadd.f32 %v21944_v47, %v7901_v27  ;;  %v7903_v49 = vpop.f32.mrb[75].mxu0 }
 0x7c7   : > { %v22155_v59 = vpack.c.bf16 %v8383_v37, %v8380_v31 }
 0x7c9   : > { %14507 = vmatmul.mubr.bf16.gmra.mrb[40].mxu1 %v22155_v59 }
 0x7ca   : > { %v7906_v42 = vpop.f32.mrb[76].mxu0 }
 0x7cb   : > { %v8388_v14 = vadd.f32 %v21971_v55, %v7906_v42  ;;  %v7908_v24 = vpop.f32.mrb[77].mxu0 }
 0x7cc   : > { %v7909_v7 = vpop.f32.mrb[78].mxu0 }
 0x7cd   : > { %v8391_v60 = vadd.f32 %v21982_v58, %v7909_v7  ;;  %v7911_v1 = vpop.f32.mrb[79].mxu0 }
 0x7cf   : > { %v22160_v45 = vpack.c.bf16 %v8391_v60, %v8388_v14 }
 0x7d1   : > { %14510 = vmatprep.mubr.bf16.mxu1 %v22160_v45 }
 0x7d2   : > { %v7914_v47 = vpop.f32.mrb[80].mxu0 }
 0x7d3   : > { %v8396_v40 = vadd.f32 %v21968_v22, %v7914_v47  ;;  %v7916_v41 = vpop.f32.mrb[81].mxu0 }
 0x7d4   : > { %v7917_v28 = vpop.f32.mrb[82].mxu0 }
 0x7d5   : > { %v8399_v55 = vadd.f32 %v21977_v38, %v7917_v28  ;;  %v7919_v5 = vpop.f32.mrb[83].mxu0 }
 0x7d6   : > { %v25566_v5 = vpack.c.bf16 %v21623_v43, %v21614_v18  ;;  %v16109_v18 = vld [vmem:[%s23027_s4 + $0x90] sm:$0xff]   ;;  %v25568_v43 = vpack.c.bf16 %v21659_v8, %v21650_v36  ;;  %v16111_v8 = vld [vmem:[%s23027_s4 + $0xa0] sm:$0xff]  }
 0x7d7   : > { %v22168_v39 = vpack.c.bf16 %v8399_v55, %v8396_v40 }
 0x7d9   : > { %14511 = vmatmul.mubr.bf16.gmra.mrb[44].mxu1 %v22168_v39 }
 0x7da   : > { %v7922_v58 = vpop.f32.mrb[84].mxu0 }
 0x7db   : > { %v8404_v31 = vadd.f32 %v22004_v61, %v7922_v58  ;;  %v7924_v2 = vpop.f32.mrb[85].mxu0 }
 0x7dc   : > { %v7925_v27 = vpop.f32.mrb[86].mxu0 }
 0x7dd   : > { %v8407_v37 = vadd.f32 %v22018_v25, %v7925_v27  ;;  %v7927_v49 = vpop.f32.mrb[87].mxu0  ;;  %v25565_v25 = vpack.c.bf16 %v21609_v21, %v21596_v6  ;;  %v25567_v6 = vpack.c.bf16 %v21645_v15, %v21632_v44  ;;  %v16110_v15 = vld [vmem:[%s23027_s4 + $0x98] sm:$0xff]  }
 0x7df   : > { %v22173_v42 = vpack.c.bf16 %v8407_v37, %v8404_v31 }
 0x7e1   : > { %14514 = vmatprep.mubr.bf16.mxu1 %v22173_v42 }
 0x7e2   : > { %v7930_v22 = vpop.f32.mrb[88].mxu0 }
 0x7e3   : > { %v8412_v38 = vadd.f32 %v21998_v50, %v7930_v22  ;;  %v7932_v14 = vpop.f32.mrb[89].mxu0 }
 0x7e4   : > { %v7933_v24 = vpop.f32.mrb[90].mxu0 }
 0x7e5   : > { %v8415_v7 = vadd.f32 %v22010_v48, %v7933_v24  ;;  %v7935_v60 = vpop.f32.mrb[91].mxu0  ;;  %v16108_v48 = vld [vmem:[%s23027_s4 + $0x88] sm:$0xff]  }
 0x7e7   : > { %v22178_v1 = vpack.c.bf16 %v8415_v7, %v8412_v38 }
 0x7e9   : > { %14515 = vmatmul.mubr.bf16.gmra.mrb[48].mxu1 %v22178_v1 }
 0x7ea   : > { %v7938_v61 = vpop.f32.mrb[92].mxu0  ;;  %14534 = vmatprep.mubr.bf16.mxu1 %v25565_v25 }
 0x7eb   : > { %v8420_v47 = vadd.f32 %v22046_v4, %v7938_v61  ;;  %v7940_v40 = vpop.f32.mrb[93].mxu0 }
 0x7ec   : > { %v7941_v41 = vpop.f32.mrb[94].mxu0 }
 0x7ed   : > { %v8423_v50 = vadd.f32 %v22057_v0, %v7941_v41  ;;  %v7943_v28 = vpop.f32.mrb[95].mxu0  ;;  %v25569_v41 = vld [vmem:[#allocation140_spill] sm:$0xff] }
 0x7ef   : > { %v22186_v55 = vpack.c.bf16 %v8423_v50, %v8420_v47 }
 0x7f1   : > { %14535 = vmatmul.mubr.bf16.vlgmr.msra.gmra.mrb[228].mxu1 %v25566_v5 }
 0x7f2   : > { %v7946_v58 = vpop.f32.mrb[96].mxu0  ;;  %14538 = vmatprep.mubr.bf16.mxu1 %v25567_v6  ;;  %14615 = vmatpush3.bf16.msra.mxu1 %v16107_v56  ;;  %v25570_v6 = vld [vmem:[#allocation104_spill] sm:$0xff] }
 0x7f3   : > { %v8428_v21 = vadd.f32 %v22040_v12, %v7946_v58  ;;  %v7948_v4 = vpop.f32.mrb[97].mxu0  ;;  %14616 = vmatprep.subr.bf16.mxu1 %v16108_v48 }
 0x7f4   : > { %v7949_v0 = vpop.f32.mrb[98].mxu0 }
 0x7f5   : > { %v8431_v31 = vadd.f32 %v22052_v13, %v7949_v0  ;;  %v7951_v2 = vpop.f32.mrb[99].mxu0 }
 0x7f6   : > { %14617 = vmatpush3.bf16.msra.mxu1 %v16108_v48 }
 0x7f7   : > { %v22199_v27 = vpack.c.bf16 %v8431_v31, %v8428_v21  ;;  %14618 = vmatprep.subr.bf16.mxu1 %v16109_v18  ;;  %v25571_v21 = vld [vmem:[#allocation209_spill] sm:$0xff] }
 0x7f9   : > { %14539 = vmatmul.mubr.bf16.gmra.mrb[232].mxu1 %v25568_v43  ;;  %v25572_v43 = vld [vmem:[#allocation203_spill] sm:$0xff] }
 0x7fa   : > { %v7954_v44 = vpop.f32.mrb[100].mxu0  ;;  %14542 = vmatprep.mubr.bf16.mxu1 %v21679_v57  ;;  %14619 = vmatpush3.bf16.msra.mxu1 %v16109_v18 }
 0x7fb   : > { %v8436_v12 = vadd.f32 %v22070_v46, %v7954_v44  ;;  %v7956_v13 = vpop.f32.mrb[101].mxu0  ;;  %14620 = vmatprep.subr.bf16.mxu1 %v16110_v15  ;;  %v16112_v46 = vld [vmem:[%s23027_s4 + $0xa8] sm:$0xff]  }
 0x7fc   : > { %v7957_v56 = vpop.f32.mrb[102].mxu0  ;;  %v25573_v44 = vld [vmem:[#allocation142_spill] sm:$0xff] }
 0x7fd   : > { %v8439_v37 = vadd.f32 %v22075_v30, %v7957_v56  ;;  %v7959_v49 = vpop.f32.mrb[103].mxu0 }
 0x7fe   : > { %14621 = vmatpush3.bf16.msra.mxu1 %v16110_v15  ;;  %v25574_v15 = vld [vmem:[#allocation160_spill] sm:$0xff] }
 0x7ff   : > { %v22213_v36 = vpack.c.bf16 %v8439_v37, %v8436_v12  ;;  %14622 = vmatprep.subr.bf16.mxu1 %v16111_v8  ;;  %v25575_v37 = vld [vmem:[#allocation93_spill] sm:$0xff] }
 0x801   : > { %14543 = vmatmul.mubr.bf16.gmra.mrb[236].mxu1 %v21690_v19  ;;  %v16113_v19 = vld [vmem:[%s23027_s4 + $0xb0] sm:$0xff]  }
 0x802   : > { %v7962_v57 = vpop.f32.mrb[104].mxu0  ;;  %14546 = vmatprep.mubr.bf16.mxu1 %v21709_v52  ;;  %14623 = vmatpush3.bf16.msra.mxu1 %v16111_v8 }
 0x803   : > { %v8444_v30 = vadd.f32 %v22067_v26, %v7962_v57  ;;  %v7964_v22 = vpop.f32.mrb[105].mxu0  ;;  %14624 = vmatprep.subr.bf16.mxu1 %v16112_v46  ;;  %v16114_v26 = vld [vmem:[%s23027_s4 + $0xb8] sm:$0xff]   ;;  %v25576_v57 = vld [vmem:[#allocation62_spill] sm:$0xff] }
 0x804   : > { %v7965_v38 = vpop.f32.mrb[106].mxu0 }
 0x805   : > { %v8447_v14 = vadd.f32 %v22073_v54, %v7965_v38  ;;  %v7967_v24 = vpop.f32.mrb[107].mxu0 }
 0x806   : > { %14625 = vmatpush3.bf16.msra.mxu1 %v16112_v46  ;;  %v25577_v46 = vld [vmem:[#allocation77_spill] sm:$0xff] }
 0x807   : > { %v22225_v7 = vpack.c.bf16 %v8447_v14, %v8444_v30  ;;  %14626 = vmatprep.subr.bf16.mxu1 %v16113_v19 }
 0x809   : > { %14547 = vmatmul.mubr.bf16.gmra.mrb[240].mxu1 %v21720_v33 }
 0x80a   : > { %v7970_v52 = vpop.f32.mrb[108].mxu0  ;;  %14550 = vmatprep.mubr.bf16.mxu1 %v21739_v20  ;;  %14627 = vmatpush3.bf16.msra.mxu1 %v16113_v19 }
 0x80b   : > { %v8452_v54 = vadd.f32 %v22083_v35, %v7970_v52  ;;  %v7972_v60 = vpop.f32.mrb[109].mxu0  ;;  %14628 = vmatprep.subr.bf16.mxu1 %v16114_v26  ;;  %v25578_v52 = vld [vmem:[#allocation113_spill] sm:$0xff] }
 0x80c   : > { %v7973_v61 = vpop.f32.mrb[110].mxu0  ;;  %v25580_v60 = vld [vmem:[#allocation9_spill] sm:$0xff] }
 0x80d   : > { %v8455_v25 = vadd.f32 %v22088_v16, %v7973_v61  ;;  %v7975_v47 = vpop.f32.mrb[111].mxu0 }
 0x80e   : > { %14629 = vmatpush3.bf16.msra.mxu1 %v16114_v26  ;;  %v25581_v47 = vld [vmem:[#allocation133_spill] sm:$0xff] }
 0x80f   : > { %v22237_v40 = vpack.c.bf16 %v8455_v25, %v8452_v54  ;;  %v25579_v54 = vld [vmem:[#allocation148_spill] sm:$0xff] }
 0x811   : > { %14551 = vmatmul.mubr.bf16.gmra.mrb[244].mxu1 %v21750_v51 }
 0x812   : > { %v7978_v33 = vpop.f32.mrb[112].mxu0  ;;  %14554 = vmatprep.mubr.bf16.mxu1 %v25569_v41 }
 0x813   : > { %v8460_v50 = vadd.f32 %v22081_v11, %v7978_v33  ;;  %v7980_v28 = vpop.f32.mrb[113].mxu0 }
 0x814   : > { %v7981_v48 = vpop.f32.mrb[114].mxu0  ;;  %v25582_v28 = vld [vmem:[#allocation114_spill] sm:$0xff] }
 0x815   : > { %v8463_v35 = vadd.f32 %v22086_v17, %v7981_v48  ;;  %v7983_v5 = vpop.f32.mrb[115].mxu0 }
 0x817   : > { %v22243_v58 = vpack.c.bf16 %v8463_v35, %v8460_v50  ;;  %v25583_v35 = vld [vmem:[#allocation215_spill] sm:$0xff] }
 0x819   : > { %14555 = vmatmul.mubr.bf16.gmra.mrb[248].mxu1 %v25570_v6 }
 0x81a   : > { %v7986_v16 = vpop.f32.mrb[116].mxu0  ;;  %14558 = vmatprep.mubr.bf16.mxu1 %v25571_v21 }
 0x81b   : > { %v8468_v4 = vadd.f32 %v22096_v3, %v7986_v16  ;;  %v7988_v0 = vpop.f32.mrb[117].mxu0 }
 0x81c   : > { %v7989_v31 = vpop.f32.mrb[118].mxu0 }
 0x81d   : > { %v8471_v2 = vadd.f32 %v22101_v62, %v7989_v31  ;;  %v7991_v18 = vpop.f32.mrb[119].mxu0 }
 0x81e   : > { %v25584_v18 = vld [vmem:[#allocation210_spill] sm:$0xff] }
 0x81f   : > { %v22249_v11 = vpack.c.bf16 %v8471_v2, %v8468_v4 }
 0x821   : > { %14559 = vmatmul.mubr.bf16.gmra.mrb[252].mxu1 %v25572_v43 }
 0x822   : > { %v7994_v17 = vpop.f32.mrb[120].mxu0  ;;  %14562 = vmatprep.mubr.bf16.mxu1 %v25573_v44 }
 0x823   : > { %v8476_v12 = vadd.f32 %v25574_v15, %v7994_v17  ;;  %v7996_v13 = vpop.f32.mrb[121].mxu0  ;;  %v25585_v15 = vld [vmem:[#allocation150_spill] sm:$0xff] }
 0x824   : > { %v7997_v56 = vpop.f32.mrb[122].mxu0 }
 0x825   : > { %v8479_v49 = vadd.f32 %v25575_v37, %v7997_v56  ;;  %v7999_v8 = vpop.f32.mrb[123].mxu0  ;;  %v25587_v37 = vld [vmem:[#allocation168_spill] sm:$0xff] }
 0x827   : > { %v22255_v3 = vpack.c.bf16 %v8479_v49, %v8476_v12  ;;  %v25586_v12 = vld [vmem:[#allocation84_spill] sm:$0xff] }
 0x829   : > { %14563 = vmatmul.mubr.bf16.gmra.mrb[0].mxu1 %v25576_v57 }
 0x82a   : > { %v8002_v62 = vpop.f32.mrb[124].mxu0  ;;  %14566 = vmatprep.mubr.bf16.mxu1 %v25577_v46 }
 0x82b   : > { %v22260_v30 = vadd.f32 %v22109_v23, %v8002_v62  ;;  %v8004_v22 = vpop.f32.mrb[125].mxu0  ;;  %v25588_v62 = vld [vmem:[#allocation70_spill] sm:$0xff] }
 0x82c   : > { %v8005_v38 = vpop.f32.mrb[126].mxu0  ;;  %v25589_v22 = vld [vmem:[#allocation152_spill] sm:$0xff] }
 0x82d   : > { %v22263_v14 = vadd.f32 %v22114_v34, %v8005_v38  ;;  %v8007_v24 = vpop.f32.mrb[127].mxu0  ;;  %v25590_v38 = vld [vmem:[#allocation73_spill] sm:$0xff] }
 0x82e   : > { %v25591_v24 = vld [vmem:[#allocation157_spill] sm:$0xff] }
 0x82f   : > { %v8566_v19 = vpack.c.bf16 %v22263_v14, %v22260_v30 }
 0x831   : > { %14567 = vmatmul.mubr.bf16.gmra.mrb[4].mxu1 %v25578_v52 }
 0x832   : > { %v8010_v26 = vpop.f32.mrb[128].mxu0  ;;  %14570 = vmatprep.mubr.bf16.mxu1 %v25579_v54 }
 0x833   : > { %v22270_v61 = vadd.f32 %v25580_v60, %v8010_v26  ;;  %v8012_v25 = vpop.f32.mrb[129].mxu0  ;;  %v25592_v26 = vld [vmem:[#allocation124_spill] sm:$0xff]  ;;  %v25593_v60 = vld [vmem:[#allocation222_spill] sm:$0xff] }
 0x834   : > { %v8013_v23 = vpop.f32.mrb[130].mxu0  ;;  %v25594_v25 = vld [vmem:[#allocation217_spill] sm:$0xff] }
 0x835   : > { %v22273_v33 = vadd.f32 %v25581_v47, %v8013_v23  ;;  %v8015_v50 = vpop.f32.mrb[131].mxu0  ;;  %v25595_v23 = vld [vmem:[#allocation158_spill] sm:$0xff]  ;;  %v25596_v47 = vld [vmem:[#allocation129_spill] sm:$0xff] }
 0x836   : > { %v25597_v50 = vld [vmem:[#allocation221_spill] sm:$0xff] }
 0x837   : > { %v8567_v34 = vpack.c.bf16 %v22273_v33, %v22270_v61 }
 0x839   : > { %14571 = vmatmul.mubr.bf16.gmra.mrb[8].mxu1 %v25582_v28 }
 0x83a   : > { %v8018_v48 = vpop.f32.mrb[132].mxu0  ;;  %14574 = vmatprep.mubr.bf16.mxu1 %v25583_v35 }
 0x83b   : > { %v22280_v5 = vadd.f32 %v22122_v53, %v8018_v48  ;;  %v8020_v16 = vpop.f32.mrb[133].mxu0  ;;  %v25598_v48 = vld [vmem:[#allocation167_spill] sm:$0xff] }
 0x83c   : > { %v8021_v4 = vpop.f32.mrb[134].mxu0  ;;  %v16115_v16 = vld [vmem:[%s23027_s4 + $0xc0] sm:$0xff]  }
 0x83d   : > { %v22283_v0 = vadd.f32 %v22127_v9, %v8021_v4  ;;  %v8023_v31 = vpop.f32.mrb[135].mxu0  ;;  %v25599_v4 = vld [vmem:[#allocation30_spill] sm:$0xff]  ;;  %14710 = vmatprep.subr.bf16.mxu1 %v16115_v16 }
 0x83e   : > { %v16116_v31 = vld [vmem:[%s23027_s4 + $0xc8] sm:$0xff]  }
 0x83f   : > { %v8568_v2 = vpack.c.bf16 %v22283_v0, %v22280_v5 }
 0x841   : > { %14575 = vmatmul.mubr.bf16.gmra.mrb[12].mxu1 %v25584_v18 }
 0x842   : > { %v8026_v17 = vpop.f32.mrb[136].mxu0  ;;  %14578 = vmatprep.mubr.bf16.mxu1 %v25585_v15 }
 0x843   : > { %v22290_v13 = vadd.f32 %v25586_v12, %v8026_v17  ;;  %v8028_v56 = vpop.f32.mrb[137].mxu0  ;;  %v16117_v17 = vld [vmem:[%s23027_s4 + $0xd0] sm:$0xff]   ;;  %v16122_v12 = vld [vmem:[%s23027_s4 + $0xf8] sm:$0xff]  }
 0x844   : > { %v8029_v53 = vpop.f32.mrb[138].mxu0  ;;  %v16123_v56 = vld [vmem:[%s23027_s4 + $0x100] sm:$0xff]  }
 0x845   : > { %v22293_v49 = vadd.f32 %v25587_v37, %v8029_v53  ;;  %v8031_v8 = vpop.f32.mrb[139].mxu0  ;;  %v16124_v53 = vld [vmem:[%s23027_s4 + $0x108] sm:$0xff]   ;;  %v16125_v37 = vld [vmem:[%s23027_s4 + $0x110] sm:$0xff]  }
 0x846   : > { %v16130_v8 = vld [vmem:[%s23027_s4 + $0x138] sm:$0xff]  }
 0x847   : > { %v8569_v9 = vpack.c.bf16 %v22293_v49, %v22290_v13 }
 0x849   : > { %14579 = vmatmul.mubr.bf16.gmra.mrb[16].mxu1 %v25588_v62 }
 0x84a   : > { %14582 = vmatprep.mubr.bf16.mxu1 %v25589_v22 }
 0x851   : > { %14583 = vmatmul.mubr.bf16.gmra.mrb[20].mxu1 %v25590_v38 }
 0x852   : > { %14586 = vmatprep.mubr.bf16.mxu1 %v25591_v24 }
 0x859   : > { %14587 = vmatmul.mubr.bf16.gmra.mrb[24].mxu1 %v25592_v26 }
 0x85a   : > { %14590 = vmatprep.mubr.bf16.mxu1 %v25593_v60 }
 0x861   : > { %14591 = vmatmul.mubr.bf16.gmra.mrb[28].mxu1 %v25594_v25 }
 0x862   : > { %14594 = vmatprep.mubr.bf16.mxu1 %v25595_v23 }
 0x869   : > { %14595 = vmatmul.mubr.bf16.gmra.mrb[32].mxu1 %v25596_v47 }
 0x86a   : > { %14598 = vmatprep.mubr.bf16.mxu1 %v25597_v50 }
 0x871   : > { %14599 = vmatmul.mubr.bf16.gmra.mrb[36].mxu1 %v25598_v48 }
 0x872   : > { %14602 = vmatprep.mubr.bf16.mxu1 %v25599_v4 }
 0x879   : > { %14603 = vmatmul.mubr.bf16.gmra.mrb[40].mxu1 %v22135_v32 }
 0x87a   : > { %14606 = vmatprep.mubr.bf16.mxu1 %v22140_v29 }
 0x881   : > { %14607 = vmatmul.mubr.bf16.gmra.mrb[44].mxu1 %v22145_v10 }
 0x882   : > { %14610 = vmatprep.mubr.bf16.mxu1 %v22150_v63 }
 0x889   : > { %14611 = vmatmul.mubr.bf16.gmra.mrb[48].mxu1 %v22155_v59 }
 0x88a   : > { %14630 = vmatprep.mubr.bf16.mxu1 %v21739_v20  ;;  %v16118_v20 = vld [vmem:[%s23027_s4 + $0xd8] sm:$0xff]  }
 0x891   : > { %14631 = vmatmul.mubr.bf16.vlgmr.msra.gmra.mrb[228].mxu1 %v21750_v51  ;;  %v16119_v51 = vld [vmem:[%s23027_s4 + $0xe0] sm:$0xff]  }
 0x892   : > { %14634 = vmatprep.mubr.bf16.mxu1 %v25569_v41  ;;  %14711 = vmatpush3.bf16.msra.mxu1 %v16115_v16  ;;  %v16120_v41 = vld [vmem:[%s23027_s4 + $0xe8] sm:$0xff]  }
 0x893   : > { %14712 = vmatprep.subr.bf16.mxu1 %v16116_v31 }
 0x896   : > { %14713 = vmatpush3.bf16.msra.mxu1 %v16116_v31 }
 0x897   : > { %14714 = vmatprep.subr.bf16.mxu1 %v16117_v17 }
 0x899   : > { %14635 = vmatmul.mubr.bf16.gmra.mrb[232].mxu1 %v25570_v6  ;;  %v16121_v6 = vld [vmem:[%s23027_s4 + $0xf0] sm:$0xff]  }
 0x89a   : > { %14638 = vmatprep.mubr.bf16.mxu1 %v25571_v21  ;;  %14715 = vmatpush3.bf16.msra.mxu1 %v16117_v17 }
 0x89b   : > { %14716 = vmatprep.subr.bf16.mxu1 %v16118_v20 }
 0x89e   : > { %14717 = vmatpush3.bf16.msra.mxu1 %v16118_v20 }
 0x89f   : > { %14718 = vmatprep.subr.bf16.mxu1 %v16119_v51 }
 0x8a1   : > { %14639 = vmatmul.mubr.bf16.gmra.mrb[236].mxu1 %v25572_v43 }
 0x8a2   : > { %14642 = vmatprep.mubr.bf16.mxu1 %v25573_v44  ;;  %14719 = vmatpush3.bf16.msra.mxu1 %v16119_v51 }
 0x8a3   : > { %14720 = vmatprep.subr.bf16.mxu1 %v16120_v41 }
 0x8a6   : > { %14721 = vmatpush3.bf16.msra.mxu1 %v16120_v41 }
 0x8a7   : > { %14722 = vmatprep.subr.bf16.mxu1 %v16121_v6 }
 0x8a9   : > { %14643 = vmatmul.mubr.bf16.gmra.mrb[240].mxu1 %v25576_v57 }
 0x8aa   : > { %14646 = vmatprep.mubr.bf16.mxu1 %v25577_v46  ;;  %14723 = vmatpush3.bf16.msra.mxu1 %v16121_v6 }
 0x8ab   : > { %14724 = vmatprep.subr.bf16.mxu1 %v16122_v12 }
 0x8ae   : > { %14725 = vmatpush3.bf16.msra.mxu1 %v16122_v12 }
 0x8af   : > { %14806 = vmatprep.subr.bf16.mxu1 %v16123_v56 }
 0x8b1   : > { %14647 = vmatmul.mubr.bf16.gmra.mrb[244].mxu1 %v25578_v52 }
 0x8b2   : > { %14650 = vmatprep.mubr.bf16.mxu1 %v25579_v54 }
 0x8b9   : > { %14651 = vmatmul.mubr.bf16.gmra.mrb[248].mxu1 %v25582_v28 }
 0x8ba   : > { %14654 = vmatprep.mubr.bf16.mxu1 %v25583_v35 }
 0x8c1   : > { %14655 = vmatmul.mubr.bf16.gmra.mrb[252].mxu1 %v25584_v18 }
 0x8c2   : > { %14658 = vmatprep.mubr.bf16.mxu1 %v25585_v15 }
 0x8c9   : > { %14659 = vmatmul.mubr.bf16.gmra.mrb[0].mxu1 %v25588_v62 }
 0x8ca   : > { %14662 = vmatprep.mubr.bf16.mxu1 %v25589_v22 }
 0x8d1   : > { %14663 = vmatmul.mubr.bf16.gmra.mrb[4].mxu1 %v25590_v38 }
 0x8d2   : > { %14666 = vmatprep.mubr.bf16.mxu1 %v25591_v24 }
 0x8d9   : > { %14667 = vmatmul.mubr.bf16.gmra.mrb[8].mxu1 %v25592_v26 }
 0x8da   : > { %14670 = vmatprep.mubr.bf16.mxu1 %v25593_v60 }
 0x8e1   : > { %14671 = vmatmul.mubr.bf16.gmra.mrb[12].mxu1 %v25594_v25 }
 0x8e2   : > { %14674 = vmatprep.mubr.bf16.mxu1 %v25595_v23 }
 0x8e9   : > { %14675 = vmatmul.mubr.bf16.gmra.mrb[16].mxu1 %v25596_v47 }
 0x8ea   : > { %14678 = vmatprep.mubr.bf16.mxu1 %v25597_v50 }
 0x8f1   : > { %14679 = vmatmul.mubr.bf16.gmra.mrb[20].mxu1 %v25598_v48 }
 0x8f2   : > { %14682 = vmatprep.mubr.bf16.mxu1 %v25599_v4 }
 0x8f9   : > { %14683 = vmatmul.mubr.bf16.gmra.mrb[24].mxu1 %v22135_v32 }
 0x8fa   : > { %14686 = vmatprep.mubr.bf16.mxu1 %v22140_v29 }
 0x901   : > { %14687 = vmatmul.mubr.bf16.gmra.mrb[28].mxu1 %v22145_v10 }
 0x902   : > { %14690 = vmatprep.mubr.bf16.mxu1 %v22150_v63 }
 0x909   : > { %14691 = vmatmul.mubr.bf16.gmra.mrb[32].mxu1 %v22155_v59 }
 0x90a   : > { %14694 = vmatprep.mubr.bf16.mxu1 %v22160_v45 }
 0x911   : > { %14695 = vmatmul.mubr.bf16.gmra.mrb[36].mxu1 %v22168_v39 }
 0x912   : > { %14698 = vmatprep.mubr.bf16.mxu1 %v22173_v42 }
 0x919   : > { %14699 = vmatmul.mubr.bf16.gmra.mrb[40].mxu1 %v22178_v1 }
 0x91a   : > { %14702 = vmatprep.mubr.bf16.mxu1 %v22186_v55 }
 0x921   : > { %14703 = vmatmul.mubr.bf16.gmra.mrb[44].mxu1 %v22199_v27 }
 0x922   : > { %14706 = vmatprep.mubr.bf16.mxu1 %v22213_v36 }
 0x929   : > { %14707 = vmatmul.mubr.bf16.gmra.mrb[48].mxu1 %v22225_v7 }
 0x92a   : > { %14726 = vmatprep.mubr.bf16.mxu1 %v25571_v21  ;;  %v16126_v21 = vld [vmem:[%s23027_s4 + $0x118] sm:$0xff]  }
 0x931   : > { %14727 = vmatmul.mubr.bf16.vlgmr.msra.gmra.mrb[228].mxu1 %v25572_v43  ;;  %v16127_v43 = vld [vmem:[%s23027_s4 + $0x120] sm:$0xff]  }
 0x932   : > { %14730 = vmatprep.mubr.bf16.mxu1 %v25573_v44  ;;  %14807 = vmatpush3.bf16.msra.mxu1 %v16123_v56  ;;  %v16128_v44 = vld [vmem:[%s23027_s4 + $0x128] sm:$0xff]  }
 0x933   : > { %14808 = vmatprep.subr.bf16.mxu1 %v16124_v53 }
 0x936   : > { %14809 = vmatpush3.bf16.msra.mxu1 %v16124_v53 }
 0x937   : > { %14810 = vmatprep.subr.bf16.mxu1 %v16125_v37 }
 0x939   : > { %14731 = vmatmul.mubr.bf16.gmra.mrb[232].mxu1 %v25576_v57  ;;  %v16129_v57 = vld [vmem:[%s23027_s4 + $0x130] sm:$0xff]  }
 0x93a   : > { %14734 = vmatprep.mubr.bf16.mxu1 %v25577_v46  ;;  %14811 = vmatpush3.bf16.msra.mxu1 %v16125_v37 }
 0x93b   : > { %14812 = vmatprep.subr.bf16.mxu1 %v16126_v21 }
 0x93e   : > { %14813 = vmatpush3.bf16.msra.mxu1 %v16126_v21 }
 0x93f   : > { %14814 = vmatprep.subr.bf16.mxu1 %v16127_v43 }
 0x941   : > { %14735 = vmatmul.mubr.bf16.gmra.mrb[236].mxu1 %v25578_v52 }
 0x942   : > { %14738 = vmatprep.mubr.bf16.mxu1 %v25579_v54  ;;  %14815 = vmatpush3.bf16.msra.mxu1 %v16127_v43 }
 0x943   : > { %14816 = vmatprep.subr.bf16.mxu1 %v16128_v44 }
 0x946   : > { %14817 = vmatpush3.bf16.msra.mxu1 %v16128_v44 }
 0x947   : > { %14818 = vmatprep.subr.bf16.mxu1 %v16129_v57 }
 0x949   : > { %14739 = vmatmul.mubr.bf16.gmra.mrb[240].mxu1 %v25582_v28 }
 0x94a   : > { %14742 = vmatprep.mubr.bf16.mxu1 %v25583_v35  ;;  %14819 = vmatpush3.bf16.msra.mxu1 %v16129_v57 }
 0x94b   : > { %14820 = vmatprep.subr.bf16.mxu1 %v16130_v8 }
 0x94e   : > { %14821 = vmatpush3.bf16.msra.mxu1 %v16130_v8 }
 0x951   : > { %14743 = vmatmul.mubr.bf16.gmra.mrb[244].mxu1 %v25584_v18 }
 0x952   : > { %14746 = vmatprep.mubr.bf16.mxu1 %v25585_v15 }
 0x959   : > { %14747 = vmatmul.mubr.bf16.gmra.mrb[248].mxu1 %v25588_v62 }
 0x95a   : > { %14750 = vmatprep.mubr.bf16.mxu1 %v25589_v22 }
 0x961   : > { %14751 = vmatmul.mubr.bf16.gmra.mrb[252].mxu1 %v25590_v38 }
 0x962   : > { %14754 = vmatprep.mubr.bf16.mxu1 %v25591_v24 }
 0x969   : > { %14755 = vmatmul.mubr.bf16.gmra.mrb[0].mxu1 %v25592_v26 }
 0x96a   : > { %14758 = vmatprep.mubr.bf16.mxu1 %v25593_v60 }
 0x971   : > { %14759 = vmatmul.mubr.bf16.gmra.mrb[4].mxu1 %v25594_v25 }
 0x972   : > { %14762 = vmatprep.mubr.bf16.mxu1 %v25595_v23 }
 0x979   : > { %14763 = vmatmul.mubr.bf16.gmra.mrb[8].mxu1 %v25596_v47 }
 0x97a   : > { %14766 = vmatprep.mubr.bf16.mxu1 %v25597_v50 }
 0x981   : > { %14767 = vmatmul.mubr.bf16.gmra.mrb[12].mxu1 %v25598_v48 }
 0x982   : > { %14770 = vmatprep.mubr.bf16.mxu1 %v25599_v4 }
 0x989   : > { %14771 = vmatmul.mubr.bf16.gmra.mrb[16].mxu1 %v22135_v32 }
 0x98a   : > { %14774 = vmatprep.mubr.bf16.mxu1 %v22140_v29 }
 0x991   : > { %14775 = vmatmul.mubr.bf16.gmra.mrb[20].mxu1 %v22145_v10 }
 0x992   : > { %14778 = vmatprep.mubr.bf16.mxu1 %v22150_v63 }
 0x999   : > { %14779 = vmatmul.mubr.bf16.gmra.mrb[24].mxu1 %v22155_v59 }
 0x99a   : > { %14782 = vmatprep.mubr.bf16.mxu1 %v22160_v45 }
 0x9a1   : > { %14783 = vmatmul.mubr.bf16.gmra.mrb[28].mxu1 %v22168_v39 }
 0x9a2   : > { %14786 = vmatprep.mubr.bf16.mxu1 %v22173_v42 }
 0x9a9   : > { %14787 = vmatmul.mubr.bf16.gmra.mrb[32].mxu1 %v22178_v1 }
 0x9aa   : > { %14790 = vmatprep.mubr.bf16.mxu1 %v22186_v55 }
 0x9b1   : > { %14791 = vmatmul.mubr.bf16.gmra.mrb[36].mxu1 %v22199_v27 }
 0x9b2   : > { %14794 = vmatprep.mubr.bf16.mxu1 %v22213_v36 }
 0x9b9   : > { %14795 = vmatmul.mubr.bf16.gmra.mrb[40].mxu1 %v22225_v7 }
 0x9ba   : > { %14798 = vmatprep.mubr.bf16.mxu1 %v22237_v40 }
 0x9c1   : > { %14799 = vmatmul.mubr.bf16.gmra.mrb[44].mxu1 %v22243_v58 }
 0x9c2   : > { %14802 = vmatprep.mubr.bf16.mxu1 %v22249_v11 }
 0x9c9   : > { %14803 = vmatmul.mubr.bf16.gmra.mrb[48].mxu1 %v22255_v3 }
 0x9ca   : > { %14822 = vmatprep.mubr.bf16.mxu1 %v25577_v46 }
 0x9d1   : > { %14823 = vmatmul.mubr.bf16.vlgmr.msra.gmra.mrb[228].mxu1 %v25578_v52 }
 0x9d2   : > { %14826 = vmatprep.mubr.bf16.mxu1 %v25579_v54 }
 0x9d9   : > { %14827 = vmatmul.mubr.bf16.gmra.mrb[232].mxu1 %v25582_v28 }
 0x9da   : > { %14830 = vmatprep.mubr.bf16.mxu1 %v25583_v35 }
 0x9e1   : > { %14831 = vmatmul.mubr.bf16.gmra.mrb[236].mxu1 %v25584_v18 }
 0x9e2   : > { %14834 = vmatprep.mubr.bf16.mxu1 %v25585_v15 }
 0x9e9   : > { %14835 = vmatmul.mubr.bf16.gmra.mrb[240].mxu1 %v25588_v62 }
 0x9ea   : > { %14838 = vmatprep.mubr.bf16.mxu1 %v25589_v22 }
 0x9f1   : > { %14839 = vmatmul.mubr.bf16.gmra.mrb[244].mxu1 %v25590_v38 }
 0x9f2   : > { %14842 = vmatprep.mubr.bf16.mxu1 %v25591_v24 }
 0x9f9   : > { %14843 = vmatmul.mubr.bf16.gmra.mrb[248].mxu1 %v25592_v26 }
 0x9fa   : > { %14846 = vmatprep.mubr.bf16.mxu1 %v25593_v60 }
 0xa01   : > { %14847 = vmatmul.mubr.bf16.gmra.mrb[252].mxu1 %v25594_v25 }
 0xa02   : > { %14850 = vmatprep.mubr.bf16.mxu1 %v25595_v23 }
 0xa09   : > { %14851 = vmatmul.mubr.bf16.gmra.mrb[0].mxu1 %v25596_v47 }
 0xa0a   : > { %14854 = vmatprep.mubr.bf16.mxu1 %v25597_v50 }
 0xa11   : > { %14855 = vmatmul.mubr.bf16.gmra.mrb[4].mxu1 %v25598_v48 }
 0xa12   : > { %14858 = vmatprep.mubr.bf16.mxu1 %v25599_v4 }
 0xa19   : > { %14859 = vmatmul.mubr.bf16.gmra.mrb[8].mxu1 %v22135_v32 }
 0xa1a   : > { %14862 = vmatprep.mubr.bf16.mxu1 %v22140_v29 }
 0xa21   : > { %14863 = vmatmul.mubr.bf16.gmra.mrb[12].mxu1 %v22145_v10 }
 0xa22   : > { %14866 = vmatprep.mubr.bf16.mxu1 %v22150_v63 }
 0xa29   : > { %14867 = vmatmul.mubr.bf16.gmra.mrb[16].mxu1 %v22155_v59 }
 0xa2a   : > { %14870 = vmatprep.mubr.bf16.mxu1 %v22160_v45 }
 0xa31   : > { %14871 = vmatmul.mubr.bf16.gmra.mrb[20].mxu1 %v22168_v39 }
 0xa32   : > { %14874 = vmatprep.mubr.bf16.mxu1 %v22173_v42 }
 0xa39   : > { %14875 = vmatmul.mubr.bf16.gmra.mrb[24].mxu1 %v22178_v1 }
 0xa3a   : > { %14878 = vmatprep.mubr.bf16.mxu1 %v22186_v55 }
 0xa41   : > { %14879 = vmatmul.mubr.bf16.gmra.mrb[28].mxu1 %v22199_v27 }
 0xa42   : > { %14882 = vmatprep.mubr.bf16.mxu1 %v22213_v36 }
 0xa49   : > { %14883 = vmatmul.mubr.bf16.gmra.mrb[32].mxu1 %v22225_v7 }
 0xa4a   : > { %14886 = vmatprep.mubr.bf16.mxu1 %v22237_v40 }
 0xa51   : > { %14887 = vmatmul.mubr.bf16.gmra.mrb[36].mxu1 %v22243_v58 }
 0xa52   : > { %14890 = vmatprep.mubr.bf16.mxu1 %v22249_v11 }
 0xa59   : > { %14891 = vmatmul.mubr.bf16.gmra.mrb[40].mxu1 %v22255_v3  ;;  %v16309_v3 = vmov 1  }
 0xa5a   : > { %14894 = vmatprep.mubr.bf16.mxu1 %v8566_v19  ;;  %15571 = vset.pattern.permute.xlu1 %v16309_v3 }
 0xa61   : > { %14895 = vmatmul.mubr.bf16.gmra.mrb[44].mxu1 %v8567_v34 }
 0xa62   : > { %14898 = vmatprep.mubr.bf16.mxu1 %v8568_v2 }
 0xa69   : > { %14899 = vmatmul.mubr.bf16.gmra.mrb[48].mxu1 %v8569_v9 }
 0xaa4   : > { %v14824_v29 = vpop.f32.mrb[228].mxu1 }
 0xaa5   : > { %v10500_v32 = vpop.f32.mrb[229].mxu1 }
 0xaa6   : > { %v14825_v10 = vpop.f32.mrb[230].mxu1 }
 0xaa7   : > { %v10503_v63 = vpop.f32.mrb[231].mxu1 }
 0xaac   : > { %v14828_v59 = vpop.f32.mrb[232].mxu1 }
 0xaad   : > { %v10516_v45 = vpop.f32.mrb[233].mxu1 }
 0xaae   : > { %v14829_v39 = vpop.f32.mrb[234].mxu1 }
 0xaaf   : > { %v10519_v42 = vpop.f32.mrb[235].mxu1 }
 0xab4   : > { %v14832_v1 = vpop.f32.mrb[236].mxu1 }
 0xab5   : > { %v10901_v55 = vmax.f32 %v14824_v29, %v14832_v1  ;;  %v10532_v27 = vpop.f32.mrb[237].mxu1  ;;  %v16310_v29 = vmov 0.0|0.0  }
 0xab6   : > { %v10899_v36 = vmax.f32 %v10500_v32, %v10532_v27  ;;  %v14833_v7 = vpop.f32.mrb[238].mxu1  ;;  %14944 = vmatprep.subr.bf16.mxu0 %v16310_v29 }
 0xab7   : > { %v10902_v40 = vmax.f32 %v14825_v10, %v14833_v7  ;;  %v10535_v58 = vpop.f32.mrb[239].mxu1  ;;  %v11571_v10 = vld [vmem:[%s23031_s8] sm:$0xff] }
 0xab8   : > { %v10900_v11 = vmax.f32 %v10503_v63, %v10535_v58  ;;  %v11572_v63 = vld [vmem:[%s23031_s8 + $0x8] sm:$0xff] }
 0xabc   : > { %v14836_v46 = vpop.f32.mrb[240].mxu1 }
 0xabd   : > { %v10905_v30 = vmax.f32 %v14828_v59, %v14836_v46  ;;  %v10548_v14 = vpop.f32.mrb[241].mxu1  ;;  %v14945_v59 = vpack.c.bf16 %v11572_v63, %v11571_v10 }
 0xabe   : > { %v10903_v19 = vmax.f32 %v10516_v45, %v10548_v14  ;;  %v14837_v52 = vpop.f32.mrb[242].mxu1 }
 0xabf   : > { %v10906_v54 = vmax.f32 %v14829_v39, %v14837_v52  ;;  %v10551_v61 = vpop.f32.mrb[243].mxu1  ;;  %14946 = vmatpush3.bf16.msra.mxu0 %v14945_v59 }
 0xac0   : > { %v10904_v33 = vmax.f32 %v10519_v42, %v10551_v61  ;;  %14947 = vmatprep.subr.bf16.mxu0 %v16310_v29 }
 0xac4   : > { %v14840_v34 = vpop.f32.mrb[244].mxu1 }
 0xac5   : > { %v10909_v28 = vmax.f32 %v10901_v55, %v14840_v34  ;;  %v10564_v35 = vpop.f32.mrb[245].mxu1 }
 0xac6   : > { %v10907_v5 = vmax.f32 %v10899_v36, %v10564_v35  ;;  %v14841_v0 = vpop.f32.mrb[246].mxu1 }
 0xac7   : > { %v10910_v2 = vmax.f32 %v10902_v40, %v14841_v0  ;;  %v10567_v18 = vpop.f32.mrb[247].mxu1 }
 0xac8   : > { %v10908_v15 = vmax.f32 %v10900_v11, %v10567_v18 }
 0xacc   : > { %v14844_v13 = vpop.f32.mrb[248].mxu1 }
 0xacd   : > { %v10913_v49 = vmax.f32 %v10905_v30, %v14844_v13  ;;  %v10580_v9 = vpop.f32.mrb[249].mxu1 }
 0xace   : > { %v10911_v62 = vmax.f32 %v10903_v19, %v10580_v9  ;;  %v14845_v22 = vpop.f32.mrb[250].mxu1 }
 0xacf   : > { %v10914_v38 = vmax.f32 %v10906_v54, %v14845_v22  ;;  %v10583_v24 = vpop.f32.mrb[251].mxu1 }
 0xad0   : > { %v10912_v26 = vmax.f32 %v10904_v33, %v10583_v24 }
 0xad4   : > { %v14848_v60 = vpop.f32.mrb[252].mxu1 }
 0xad5   : > { %v10917_v25 = vmax.f32 %v10909_v28, %v14848_v60  ;;  %v10596_v23 = vpop.f32.mrb[253].mxu1 }
 0xad6   : > { %v10915_v47 = vmax.f32 %v10907_v5, %v10596_v23  ;;  %v14849_v50 = vpop.f32.mrb[254].mxu1 }
 0xad7   : > { %v10918_v48 = vmax.f32 %v10910_v2, %v14849_v50  ;;  %v10599_v16 = vpop.f32.mrb[255].mxu1 }
 0xad8   : > { %v10916_v4 = vmax.f32 %v10908_v15, %v10599_v16 }
 0xadc   : > { %v14852_v31 = vpop.f32.mrb[0].mxu1 }
 0xadd   : > { %v10921_v17 = vmax.f32 %v10913_v49, %v14852_v31  ;;  %v10612_v20 = vpop.f32.mrb[1].mxu1 }
 0xade   : > { %v10919_v51 = vmax.f32 %v10911_v62, %v10612_v20  ;;  %v14853_v41 = vpop.f32.mrb[2].mxu1 }
 0xadf   : > { %v10922_v6 = vmax.f32 %v10914_v38, %v14853_v41  ;;  %v10615_v12 = vpop.f32.mrb[3].mxu1 }
 0xae0   : > { %v10920_v56 = vmax.f32 %v10912_v26, %v10615_v12 }
 0xae4   : > { %v14856_v53 = vpop.f32.mrb[4].mxu1 }
 0xae5   : > { %v10925_v37 = vmax.f32 %v10917_v25, %v14856_v53  ;;  %v10628_v21 = vpop.f32.mrb[5].mxu1 }
 0xae6   : > { %v10923_v43 = vmax.f32 %v10915_v47, %v10628_v21  ;;  %v14857_v44 = vpop.f32.mrb[6].mxu1 }
 0xae7   : > { %v10926_v57 = vmax.f32 %v10918_v48, %v14857_v44  ;;  %v10631_v8 = vpop.f32.mrb[7].mxu1 }
 0xae8   : > { %v10924_v32 = vmax.f32 %v10916_v4, %v10631_v8  ;;  %v11574_v8 = vld [vmem:[%s23031_s8 + $0x18] sm:$0xff] }
 0xaec   : > { %v14860_v45 = vpop.f32.mrb[8].mxu1 }
 0xaed   : > { %v10929_v39 = vmax.f32 %v10921_v17, %v14860_v45  ;;  %v10644_v42 = vpop.f32.mrb[9].mxu1 }
 0xaee   : > { %v10927_v1 = vmax.f32 %v10919_v51, %v10644_v42  ;;  %v14861_v55 = vpop.f32.mrb[10].mxu1 }
 0xaef   : > { %v10930_v27 = vmax.f32 %v10922_v6, %v14861_v55  ;;  %v10647_v36 = vpop.f32.mrb[11].mxu1 }
 0xaf0   : > { %v10928_v7 = vmax.f32 %v10920_v56, %v10647_v36 }
 0xaf4   : > { %v14864_v40 = vpop.f32.mrb[12].mxu1 }
 0xaf5   : > { %v10933_v58 = vmax.f32 %v10925_v37, %v14864_v40  ;;  %v10660_v11 = vpop.f32.mrb[13].mxu1 }
 0xaf6   : > { %v10931_v46 = vmax.f32 %v10923_v43, %v10660_v11  ;;  %v14865_v30 = vpop.f32.mrb[14].mxu1 }
 0xaf7   : > { %v10934_v14 = vmax.f32 %v10926_v57, %v14865_v30  ;;  %v10663_v19 = vpop.f32.mrb[15].mxu1  ;;  %v11573_v57 = vld [vmem:[%s23031_s8 + $0x10] sm:$0xff] }
 0xaf8   : > { %v10932_v52 = vmax.f32 %v10924_v32, %v10663_v19  ;;  %v14948_v32 = vpack.c.bf16 %v11574_v8, %v11573_v57  ;;  %v22513_v19 = vld [vmem:[%s23028_s5] ss:$0 sm:$0xff]  ;;  %v12674_v8 = vld [vmem:[%s23029_s6 + $0x90] sm:$0xff] }
 0xafa   : > { %14949 = vmatpush3.bf16.msra.mxu0 %v14948_v32 }
 0xafb   : > { %14950 = vmatprep.subr.bf16.mxu0 %v16310_v29 }
 0xafc   : > { %v14868_v54 = vpop.f32.mrb[16].mxu1 }
 0xafd   : > { %v10937_v61 = vmax.f32 %v10929_v39, %v14868_v54  ;;  %v10676_v33 = vpop.f32.mrb[17].mxu1 }
 0xafe   : > { %v10935_v34 = vmax.f32 %v10927_v1, %v10676_v33  ;;  %v14869_v28 = vpop.f32.mrb[18].mxu1 }
 0xaff   : > { %v10938_v35 = vmax.f32 %v10930_v27, %v14869_v28  ;;  %v10679_v5 = vpop.f32.mrb[19].mxu1 }
 0xb00   : > { %v10936_v0 = vmax.f32 %v10928_v7, %v10679_v5 }
 0xb04   : > { %v14872_v2 = vpop.f32.mrb[20].mxu1 }
 0xb05   : > { %v10941_v18 = vmax.f32 %v10933_v58, %v14872_v2  ;;  %v10692_v15 = vpop.f32.mrb[21].mxu1 }
 0xb06   : > { %v10939_v13 = vmax.f32 %v10931_v46, %v10692_v15  ;;  %v14873_v49 = vpop.f32.mrb[22].mxu1  ;;  %v16312_v15 = vmov 7  }
 0xb07   : > { %v10942_v9 = vmax.f32 %v10934_v14, %v14873_v49  ;;  %v10695_v62 = vpop.f32.mrb[23].mxu1 }
 0xb08   : > { %v10940_v22 = vmax.f32 %v10932_v52, %v10695_v62 }
 0xb0c   : > { %v14876_v38 = vpop.f32.mrb[24].mxu1 }
 0xb0d   : > { %v10945_v24 = vmax.f32 %v10937_v61, %v14876_v38  ;;  %v10708_v26 = vpop.f32.mrb[25].mxu1 }
 0xb0e   : > { %v10943_v60 = vmax.f32 %v10935_v34, %v10708_v26  ;;  %v14877_v25 = vpop.f32.mrb[26].mxu1 }
 0xb0f   : > { %v10946_v23 = vmax.f32 %v10938_v35, %v14877_v25  ;;  %v10711_v47 = vpop.f32.mrb[27].mxu1 }
 0xb10   : > { %v10944_v50 = vmax.f32 %v10936_v0, %v10711_v47  ;;  %v16313_v47 = vmov 3  }
 0xb14   : > { %v14880_v48 = vpop.f32.mrb[28].mxu1 }
 0xb15   : > { %v10949_v16 = vmax.f32 %v10941_v18, %v14880_v48  ;;  %v10724_v4 = vpop.f32.mrb[29].mxu1  ;;  %v16311_v18 = vmov 2   ;;  %v16314_v48 = vmov 4  }
 0xb16   : > { %v10947_v31 = vmax.f32 %v10939_v13, %v10724_v4  ;;  %v14881_v17 = vpop.f32.mrb[30].mxu1  ;;  %v16316_v4 = vmov 6  }
 0xb17   : > { %v10950_v20 = vmax.f32 %v10942_v9, %v14881_v17  ;;  %v10727_v51 = vpop.f32.mrb[31].mxu1 }
 0xb18   : > { %v10948_v41 = vmax.f32 %v10940_v22, %v10727_v51  ;;  %v11575_v51 = vld [vmem:[%s23031_s8 + $0x20] sm:$0xff] }
 0xb1c   : > { %v14884_v6 = vpop.f32.mrb[32].mxu1 }
 0xb1d   : > { %v10953_v12 = vmax.f32 %v10945_v24, %v14884_v6  ;;  %v10740_v56 = vpop.f32.mrb[33].mxu1 }
 0xb1e   : > { %v10951_v53 = vmax.f32 %v10943_v60, %v10740_v56  ;;  %v14885_v37 = vpop.f32.mrb[34].mxu1  ;;  %v11577_v56 = vld [vmem:[%s23031_s8 + $0x30] sm:$0xff] }
 0xb1f   : > { %v10954_v21 = vmax.f32 %v10946_v23, %v14885_v37  ;;  %v10743_v43 = vpop.f32.mrb[35].mxu1 }
 0xb20   : > { %v10952_v44 = vmax.f32 %v10944_v50, %v10743_v43  ;;  %v25600_v50 = vmov 0   ;;  %v12666_v43 = vld [vmem:[%s23029_s6 + $0x50] sm:$0xff] }
 0xb24   : > { %v14888_v10 = vpop.f32.mrb[36].mxu1 }
 0xb25   : > { %v10957_v63 = vmax.f32 %v10949_v16, %v14888_v10  ;;  %v10756_v59 = vpop.f32.mrb[37].mxu1  ;;  %v16315_v16 = vmov 5  }
 0xb26   : > { %v10955_v45 = vmax.f32 %v10947_v31, %v10756_v59  ;;  %v14889_v39 = vpop.f32.mrb[38].mxu1  ;;  %v16317_v31 = vmov 9  }
 0xb27   : > { %v22506_v42 = vmax.f32 %v10950_v20, %v14889_v39  ;;  %v10759_v1 = vpop.f32.mrb[39].mxu1  ;;  %v16318_v20 = vmov 8  }
 0xb28   : > { %v22508_v55 = vmax.f32 %v10948_v41, %v10759_v1  ;;  %v11576_v41 = vld [vmem:[%s23031_s8 + $0x28] sm:$0xff] }
 0xb29   : > { %v14951_v6 = vpack.c.bf16 %v11576_v41, %v11575_v51 }
 0xb2b   : > { %14952 = vmatpush3.bf16.msra.mxu0 %v14951_v6 }
 0xb2c   : > { %v14892_v27 = vpop.f32.mrb[40].mxu1  ;;  %14953 = vmatprep.subr.bf16.mxu0 %v16310_v29 }
 0xb2d   : > { %v10961_v36 = vmax.f32 %v10953_v12, %v14892_v27  ;;  %v10772_v7 = vpop.f32.mrb[41].mxu1 }
 0xb2e   : > { %v10959_v40 = vmax.f32 %v10951_v53, %v10772_v7  ;;  %v14893_v58 = vpop.f32.mrb[42].mxu1  ;;  %v11578_v53 = vld [vmem:[%s23031_s8 + $0x38] sm:$0xff]  ;;  %v12690_v7 = vld [vmem:[%s23029_s6 + $0x110] sm:$0xff] }
 0xb2f   : > { %v10962_v11 = vmax.f32 %v10954_v21, %v14893_v58  ;;  %v10775_v46 = vpop.f32.mrb[43].mxu1  ;;  %v14954_v37 = vpack.c.bf16 %v11578_v53, %v11577_v56  ;;  %v12664_v53 = vld [vmem:[%s23029_s6 + $0x40] sm:$0xff] }
 0xb30   : > { %v10960_v30 = vmax.f32 %v10952_v44, %v10775_v46  ;;  %v10988_v44 = vld [vmem:[%s23029_s6 + $0x10] sm:$0xff] }
 0xb31   : > { %14955 = vmatpush3.bf16.msra.mxu0 %v14954_v37  ;;  %v12698_v46 = vld [vmem:[%s23029_s6 + $0x150] sm:$0xff]  ;;  %v12672_v37 = vld [vmem:[%s23029_s6 + $0x80] sm:$0xff] }
 0xb32   : > { %14956 = vmatprep.subr.bf16.mxu0 %v16310_v29 }
 0xb34   : > { %v14896_v14 = vpop.f32.mrb[44].mxu1 }
 0xb35   : > { %v10965_v52 = vmax.f32 %v10957_v63, %v14896_v14  ;;  %v10788_v54 = vpop.f32.mrb[45].mxu1 }
 0xb36   : > { %v10963_v61 = vmax.f32 %v10955_v45, %v10788_v54  ;;  %v14897_v33 = vpop.f32.mrb[46].mxu1  ;;  %v12682_v45 = vld [vmem:[%s23029_s6 + $0xd0] sm:$0xff] }
 0xb37   : > { %v10980_v34 = vadd.f32 %v22513_v19, %v10965_v52  ;;  %v10966_v28 = vmax.f32 %v22506_v42, %v14897_v33  ;;  %v22517_v35 = vpop.f32.mrb[47].mxu1  ;;  %v11580_v52 = vld [vmem:[%s23031_s8 + $0x48] sm:$0xff] }
 0xb38   : > { %v10964_v5 = vmax.f32 %v22508_v55, %v22517_v35  ;;  %v10978_v60 = vadd.f32 %v22513_v19, %v10963_v61 }
 0xb39   : > { %11060 = vperm.xlu1 %15571, %v10980_v34   ;;  %11006 = vperm.xlu0 %15570, %v10980_v34   ;;  %v10981_v17 = vadd.f32 %v22513_v19, %v10966_v28  ;;  %v12714_v28 = vld [vmem:[%s23029_s6 + $0x1d0] sm:$0xff] }
 0xb3a   : > { %v10979_v12 = vadd.f32 %v22513_v19, %v10964_v5 }
 0xb3c   : > { %v14900_v0 = vpop.f32.mrb[48].mxu1 }
 0xb3d   : > { %v10969_v2 = vmax.f32 %v10961_v36, %v14900_v0  ;;  %15572 = vset.pattern.permute.xlu1 %v16311_v18  ;;  %15577 = vset.pattern.permute.xlu0 %v16312_v15  ;;  %v10804_v13 = vpop.f32.mrb[49].mxu1 }
 0xb3e   : > { %v10967_v49 = vmax.f32 %v10959_v40, %v10804_v13  ;;  %11117 = vperm.xlu1 %15572, %v10980_v34   ;;  %11402 = vperm.xlu0 %15577, %v10980_v34   ;;  %v14901_v9 = vpop.f32.mrb[50].mxu1 }
 0xb3f   : > { %v22524_v62 = vadd.f32 %v22513_v19, %v10969_v2  ;;  %v10970_v22 = vmax.f32 %v10962_v11, %v14901_v9  ;;  %v10807_v38 = vpop.f32.mrb[51].mxu1 }
 0xb40   : > { %v22527_v24 = vadd.f32 %v22513_v19, %v10967_v49  ;;  %v10968_v26 = vmax.f32 %v10960_v30, %v10807_v38  ;;  %v12722_v49 = vld [vmem:[%s23029_s6 + $0x210] sm:$0xff] }
 0xb41   : > { %v22531_v25 = vadd.f32 %v22513_v19, %v10970_v22 }
 0xb42   : > { %v22534_v23 = vadd.f32 %v22513_v19, %v10968_v26  ;;  %15573 = vset.pattern.permute.xlu1 %v16313_v47  ;;  %15580 = vset.pattern.permute.xlu0 %v25600_v50  ;;  %v11579_v19 = vld [vmem:[%s23031_s8 + $0x40] sm:$0xff] }
 0xb43   : > { %11174 = vperm.xlu1 %15573, %v10980_v34   ;;  %10996 = vperm.xlu0 %15580, %v10978_v60   ;;  %v14957_v61 = vpack.c.bf16 %v11580_v52, %v11579_v19 }
 0xb45   : > { %14958 = vmatpush3.bf16.msra.mxu0 %v14957_v61 }
 0xb46   : > { %14959 = vmatprep.subr.bf16.mxu0 %v16310_v29 }
 0xb47   : > { %15574 = vset.pattern.permute.xlu1 %v16314_v48  ;;  %15582 = vset.pattern.permute.xlu0 %v16311_v18 }
 0xb48   : > { %11231 = vperm.xlu1 %15574, %v10980_v34   ;;  %11109 = vperm.xlu0 %15582, %v10978_v60  }
 0xb4c   : > { %15575 = vset.pattern.permute.xlu1 %v16315_v16  ;;  %15585 = vset.pattern.permute.xlu0 %v16315_v16 }
 0xb4d   : > { %11288 = vperm.xlu1 %15575, %v10980_v34   ;;  %11280 = vperm.xlu0 %15585, %v10978_v60  }
 0xb51   : > { %15576 = vset.pattern.permute.xlu1 %v16316_v4  ;;  %15589 = vset.pattern.permute.xlu0 %v16317_v31 }
 0xb52   : > { %11345 = vperm.xlu1 %15576, %v10980_v34   ;;  %11508 = vperm.xlu0 %15589, %v10978_v60  }
 0xb56   : > { %15578 = vset.pattern.permute.xlu1 %v16318_v20  ;;  %15591 = vset.pattern.permute.xlu0 %v16309_v3 }
 0xb57   : > { %11459 = vperm.xlu1 %15578, %v10980_v34   ;;  %11064 = vperm.xlu0 %15591, %v10981_v17  }
 0xb5b   : > { %15579 = vset.pattern.permute.xlu1 %v16317_v31  ;;  %15592 = vset.pattern.permute.xlu0 %v16311_v18 }
 0xb5c   : > { %11516 = vperm.xlu1 %15579, %v10980_v34   ;;  %11121 = vperm.xlu0 %15592, %v10981_v17   ;;  %v12706_v34 = vld [vmem:[%s23029_s6 + $0x190] sm:$0xff] }
 0xb60   : > { %15581 = vset.pattern.permute.xlu1 %v16309_v3  ;;  %15594 = vset.pattern.permute.xlu0 %v16314_v48 }
 0xb61   : > { %11052 = vperm.xlu1 %15581, %v10978_v60   ;;  %11235 = vperm.xlu0 %15594, %v10981_v17  }
 0xb65   : > { %15583 = vset.pattern.permute.xlu1 %v16313_v47  ;;  %15595 = vset.pattern.permute.xlu0 %v16315_v16 }
 0xb66   : > { %11166 = vperm.xlu1 %15583, %v10978_v60   ;;  %11292 = vperm.xlu0 %15595, %v10981_v17  }
 0xb6a   : > { %15584 = vset.pattern.permute.xlu1 %v16314_v48  ;;  %15598 = vset.pattern.permute.xlu0 %v16318_v20 }
 0xb6b   : > { %11223 = vperm.xlu1 %15584, %v10978_v60   ;;  %11463 = vperm.xlu0 %15598, %v10981_v17  }
 0xb6f   : > { %15586 = vset.pattern.permute.xlu1 %v16316_v4  ;;  %15599 = vset.pattern.permute.xlu0 %v16317_v31 }
 0xb70   : > { %11337 = vperm.xlu1 %15586, %v10978_v60   ;;  %11520 = vperm.xlu0 %15599, %v10981_v17  }
 0xb74   : > { %15587 = vset.pattern.permute.xlu1 %v16312_v15  ;;  %15600 = vset.pattern.permute.xlu0 %v25600_v50 }
 0xb75   : > { %11394 = vperm.xlu1 %15587, %v10978_v60   ;;  %11001 = vperm.xlu0 %15600, %v10979_v12  }
 0xb79   : > { %15588 = vset.pattern.permute.xlu1 %v16318_v20  ;;  %15603 = vset.pattern.permute.xlu0 %v16313_v47 }
 0xb7a   : > { %11451 = vperm.xlu1 %15588, %v10978_v60   ;;  %11170 = vperm.xlu0 %15603, %v10979_v12  }
 0xb7e   : > { %15590 = vset.pattern.permute.xlu1 %v25600_v50  ;;  %15604 = vset.pattern.permute.xlu0 %v16314_v48 }
 0xb7f   : > { %11011 = vperm.xlu1 %15590, %v10981_v17   ;;  %11227 = vperm.xlu0 %15604, %v10979_v12  }
 0xb83   : > { %15593 = vset.pattern.permute.xlu1 %v16313_v47  ;;  %15606 = vset.pattern.permute.xlu0 %v16316_v4 }
 0xb84   : > { %11178 = vperm.xlu1 %15593, %v10981_v17   ;;  %11341 = vperm.xlu0 %15606, %v10979_v12  }
 0xb88   : > { %15596 = vset.pattern.permute.xlu1 %v16316_v4  ;;  %15607 = vset.pattern.permute.xlu0 %v16312_v15 }
 0xb89   : > { %11349 = vperm.xlu1 %15596, %v10981_v17   ;;  %11398 = vperm.xlu0 %15607, %v10979_v12  }
 0xb8d   : > { %15597 = vset.pattern.permute.xlu1 %v16312_v15  ;;  %15611 = vset.pattern.permute.xlu0 %v16309_v3 }
 0xb8e   : > { %11406 = vperm.xlu1 %15597, %v10981_v17   ;;  %11076 = vperm.xlu0 %15611, %v22524_v62   ;;  %v12730_v17 = vld [vmem:[%s23029_s6 + $0x250] sm:$0xff] }
 0xb92   : > { %15601 = vset.pattern.permute.xlu1 %v16309_v3  ;;  %15612 = vset.pattern.permute.xlu0 %v16311_v18 }
 0xb93   : > { %11056 = vperm.xlu1 %15601, %v10979_v12   ;;  %11133 = vperm.xlu0 %15612, %v22524_v62  }
 0xb97   : > { %15602 = vset.pattern.permute.xlu1 %v16311_v18  ;;  %15615 = vset.pattern.permute.xlu0 %v16315_v16 }
 0xb98   : > { %11113 = vperm.xlu1 %15602, %v10979_v12   ;;  %11304 = vperm.xlu0 %15615, %v22524_v62  }
 0xb9c   : > { %15605 = vset.pattern.permute.xlu1 %v16315_v16  ;;  %15616 = vset.pattern.permute.xlu0 %v16316_v4 }
 0xb9d   : > { %11284 = vperm.xlu1 %15605, %v10979_v12   ;;  %11361 = vperm.xlu0 %15616, %v22524_v62  }
 0xba1   : > { %15608 = vset.pattern.permute.xlu1 %v16318_v20  ;;  %15618 = vset.pattern.permute.xlu0 %v16318_v20 }
 0xba2   : > { %11455 = vperm.xlu1 %15608, %v10979_v12   ;;  %11475 = vperm.xlu0 %15618, %v22524_v62  }
 0xba6   : > { %15609 = vset.pattern.permute.xlu1 %v16317_v31  ;;  %15621 = vset.pattern.permute.xlu0 %v16311_v18 }
 0xba7   : > { %11512 = vperm.xlu1 %15609, %v10979_v12   ;;  %11125 = vperm.xlu0 %15621, %v22527_v24   ;;  %v10986_v12 = vld [vmem:[%s23029_s6] sm:$0xff] }
 0xbab   : > { %15610 = vset.pattern.permute.xlu1 %v25600_v50  ;;  %15625 = vset.pattern.permute.xlu0 %v16316_v4 }
 0xbac   : > { %11026 = vperm.xlu1 %15610, %v22524_v62   ;;  %11353 = vperm.xlu0 %15625, %v22527_v24  }
 0xbb0   : > { %15613 = vset.pattern.permute.xlu1 %v16313_v47  ;;  %15632 = vset.pattern.permute.xlu0 %v16313_v47 }
 0xbb1   : > { %11190 = vperm.xlu1 %15613, %v22524_v62   ;;  %11194 = vperm.xlu0 %15632, %v22531_v25  }
 0xbb5   : > { %15614 = vset.pattern.permute.xlu1 %v16314_v48  ;;  %15637 = vset.pattern.permute.xlu0 %v16318_v20 }
 0xbb6   : > { %11247 = vperm.xlu1 %15614, %v22524_v62   ;;  %11479 = vperm.xlu0 %15637, %v22531_v25  }
 0xbb8   : > { %v11061_v21 = vpop.permute.xlu1 %11060  ;;  %v11007_v57 = vpop.permute.xlu0 %11006 }
 0xbb9   : > { %v11085_v32 = vmul.f32 %v12666_v43, %v11061_v21  ;;  %v11036_v10 = vmul.f32 %v11007_v57, %v10988_v44 }
 0xbba   : > { %15617 = vset.pattern.permute.xlu1 %v16312_v15  ;;  %15642 = vset.pattern.permute.xlu0 %v16314_v48 }
 0xbbb   : > { %11418 = vperm.xlu1 %15617, %v22524_v62   ;;  %11243 = vperm.xlu0 %15642, %v22534_v23   ;;  %v11093_v39 = vadd.f32 %v11085_v32, %v11036_v10  ;;  %v12680_v32 = vld [vmem:[%s23029_s6 + $0xc0] sm:$0xff] }
 0xbbd   : > { %v11118_v63 = vpop.permute.xlu1 %11117  ;;  %v11403_v27 = vpop.permute.xlu0 %11402 }
 0xbbe   : > { %v11142_v59 = vmul.f32 %v12674_v8, %v11118_v63  ;;  %v11427_v2 = vmul.f32 %v12714_v28, %v11403_v27 }
 0xbbf   : > { %15619 = vset.pattern.permute.xlu1 %v25600_v50  ;;  %15646 = vset.pattern.permute.xlu0 %v16318_v20 }
 0xbc0   : > { %11016 = vperm.xlu1 %15619, %v22527_v24   ;;  %11471 = vperm.xlu0 %15646, %v22534_v23   ;;  %v11150_v1 = vadd.f32 %v11142_v59, %v11093_v39  ;;  %v12688_v39 = vld [vmem:[%s23029_s6 + $0x100] sm:$0xff] }
 0xbc2   : > { %v11175_v42 = vpop.permute.xlu1 %11174  ;;  %v10997_v30 = vpop.permute.xlu0 %10996 }
 0xbc3   : > { %v11199_v55 = vmul.f32 %v12682_v45, %v11175_v42  ;;  %v11034_v43 = vmul.f32 %v10997_v30, %v10986_v12 }
 0xbc4   : > { %15620 = vset.pattern.permute.xlu1 %v16309_v3  ;;  %15648 = vset.pattern.permute.xlu0 %v16317_v31 }
 0xbc5   : > { %v11207_v36 = vadd.f32 %v11199_v55, %v11150_v1  ;;  %11068 = vperm.xlu1 %15620, %v22527_v24   ;;  %11536 = vperm.xlu0 %15648, %v22531_v25  }
 0xbc7   : > { %v11232_v40 = vpop.permute.xlu1 %11231  ;;  %v11110_v35 = vpop.permute.xlu0 %11109 }
 0xbc8   : > { %v11256_v58 = vmul.f32 %v12690_v7, %v11232_v40  ;;  %v12704_v7 = vld [vmem:[%s23029_s6 + $0x180] sm:$0xff] }
 0xbc9   : > { %15622 = vset.pattern.permute.xlu1 %v16313_v47 }
 0xbca   : > { %v11264_v11 = vadd.f32 %v11256_v58, %v11207_v36  ;;  %11182 = vperm.xlu1 %15622, %v22527_v24  }
 0xbcc   : > { %v11289_v14 = vpop.permute.xlu1 %11288  ;;  %v11281_v38 = vpop.permute.xlu0 %11280 }
 0xbcd   : > { %v11313_v54 = vmul.f32 %v12698_v46, %v11289_v14  ;;  %v12712_v14 = vld [vmem:[%s23029_s6 + $0x1c0] sm:$0xff] }
 0xbce   : > { %15623 = vset.pattern.permute.xlu1 %v16314_v48 }
 0xbcf   : > { %v11321_v33 = vadd.f32 %v11313_v54, %v11264_v11  ;;  %11239 = vperm.xlu1 %15623, %v22527_v24  }
 0xbd1   : > { %v11346_v5 = vpop.permute.xlu1 %11345  ;;  %v11509_v6 = vpop.permute.xlu0 %11508 }
 0xbd2   : > { %v11370_v0 = vmul.f32 %v12706_v34, %v11346_v5  ;;  %v12728_v34 = vld [vmem:[%s23029_s6 + $0x240] sm:$0xff] }
 0xbd3   : > { %15624 = vset.pattern.permute.xlu1 %v16315_v16 }
 0xbd4   : > { %v11378_v13 = vadd.f32 %v11370_v0, %v11321_v33  ;;  %11296 = vperm.xlu1 %15624, %v22527_v24   ;;  %v12720_v33 = vld [vmem:[%s23029_s6 + $0x200] sm:$0xff]  ;;  %v11539_v0 = vmul.f32 %v12728_v34, %v11509_v6  ;;  %v12691_v6 = vld [vmem:[%s23029_s6 + $0x118] sm:$0xff] }
 0xbd6   : > { %v11460_v9 = vpop.permute.xlu1 %11459  ;;  %v11435_v22 = vadd.f32 %v11427_v2, %v11378_v13  ;;  %v11065_v57 = vpop.permute.xlu0 %11064  ;;  %v10989_v13 = vld [vmem:[%s23029_s6 + $0x18] sm:$0xff] }
 0xbd7   : > { %v11484_v26 = vmul.f32 %v12722_v49, %v11460_v9  ;;  %v12675_v49 = vld [vmem:[%s23029_s6 + $0x98] sm:$0xff] }
 0xbd8   : > { %15626 = vset.pattern.permute.xlu1 %v16312_v15 }
 0xbd9   : > { %v11492_v60 = vadd.f32 %v11484_v26, %v11435_v22  ;;  %11410 = vperm.xlu1 %15626, %v22527_v24  }
 0xbdb   : > { %v11517_v51 = vpop.permute.xlu1 %11516  ;;  %v11122_v42 = vpop.permute.xlu0 %11121 }
 0xbdc   : > { %v11541_v41 = vmul.f32 %v12730_v17, %v11517_v51 }
 0xbdd   : > { %15627 = vset.pattern.permute.xlu1 %v16318_v20  ;;  %v11140_v20 = vmul.f32 %v12672_v37, %v11110_v35  ;;  %v11581_v37 = vld [vmem:[%s23031_s8 + $0x50] sm:$0xff] }
 0xbde   : > { %v22676_v56 = vadd.f32 %v11541_v41, %v11492_v60  ;;  %11467 = vperm.xlu1 %15627, %v22527_v24   ;;  %v11143_v60 = vmul.f32 %v12675_v49, %v11122_v42  ;;  %v12683_v41 = vld [vmem:[%s23029_s6 + $0xd8] sm:$0xff] }
 0xbe0   : > { %v11053_v21 = vpop.permute.xlu1 %11052  ;;  %v11236_v40 = vpop.permute.xlu0 %11235 }
 0xbe1   : > { %v11083_v44 = vmul.f32 %v12664_v53, %v11053_v21  ;;  %v11582_v21 = vld [vmem:[%s23031_s8 + $0x58] sm:$0xff] }
 0xbe2   : > { %15628 = vset.pattern.permute.xlu1 %v16317_v31 }
 0xbe3   : > { %v11091_v8 = vadd.f32 %v11083_v44, %v11034_v43  ;;  %11524 = vperm.xlu1 %15628, %v22527_v24   ;;  %v12696_v24 = vld [vmem:[%s23029_s6 + $0x140] sm:$0xff]  ;;  %v14960_v44 = vpack.c.bf16 %v11582_v21, %v11581_v37 }
 0xbe4   : > { %v11311_v27 = vmul.f32 %v12696_v24, %v11281_v38 }
 0xbe5   : > { %v11167_v10 = vpop.permute.xlu1 %11166  ;;  %v11148_v63 = vadd.f32 %v11140_v20, %v11091_v8  ;;  %v11293_v52 = vpop.permute.xlu0 %11292  ;;  %v12699_v20 = vld [vmem:[%s23029_s6 + $0x158] sm:$0xff]  ;;  %14961 = vmatpush3.bf16.msra.mxu0 %v14960_v44 }
 0xbe6   : > { %v11197_v59 = vmul.f32 %v12680_v32, %v11167_v10  ;;  %v12707_v32 = vld [vmem:[%s23029_s6 + $0x198] sm:$0xff]  ;;  %14962 = vmatprep.subr.bf16.mxu0 %v16310_v29 }
 0xbe7   : > { %15629 = vset.pattern.permute.xlu1 %v25600_v50 }
 0xbe8   : > { %v11205_v45 = vadd.f32 %v11197_v59, %v11148_v63  ;;  %11031 = vperm.xlu1 %15629, %v22531_v25   ;;  %v11314_v63 = vmul.f32 %v12699_v20, %v11293_v52 }
 0xbea   : > { %v11224_v1 = vpop.permute.xlu1 %11223  ;;  %v11464_v5 = vpop.permute.xlu0 %11463 }
 0xbeb   : > { %v11254_v55 = vmul.f32 %v12688_v39, %v11224_v1  ;;  %v12723_v1 = vld [vmem:[%s23029_s6 + $0x218] sm:$0xff] }
 0xbec   : > { %15630 = vset.pattern.permute.xlu1 %v16309_v3 }
 0xbed   : > { %v11262_v36 = vadd.f32 %v11254_v55, %v11205_v45  ;;  %11080 = vperm.xlu1 %15630, %v22531_v25  }
 0xbef   : > { %v11338_v58 = vpop.permute.xlu1 %11337  ;;  %v11319_v11 = vadd.f32 %v11311_v27, %v11262_v36  ;;  %v11521_v17 = vpop.permute.xlu0 %11520 }
 0xbf0   : > { %v11368_v46 = vmul.f32 %v12704_v7, %v11338_v58  ;;  %v12731_v7 = vld [vmem:[%s23029_s6 + $0x258] sm:$0xff]  ;;  %v12665_v58 = vld [vmem:[%s23029_s6 + $0x48] sm:$0xff] }
 0xbf1   : > { %15631 = vset.pattern.permute.xlu1 %v16311_v18 }
 0xbf2   : > { %v11376_v30 = vadd.f32 %v11368_v46, %v11319_v11  ;;  %11137 = vperm.xlu1 %15631, %v22531_v25   ;;  %v11542_v11 = vmul.f32 %v12731_v7, %v11521_v17 }
 0xbf4   : > { %v11395_v19 = vpop.permute.xlu1 %11394  ;;  %v11002_v10 = vpop.permute.xlu0 %11001 }
 0xbf5   : > { %v11425_v54 = vmul.f32 %v12712_v14, %v11395_v19  ;;  %v10987_v14 = vld [vmem:[%s23029_s6 + $0x8] sm:$0xff] }
 0xbf6   : > { %15633 = vset.pattern.permute.xlu1 %v16314_v48  ;;  %v12667_v48 = vld [vmem:[%s23029_s6 + $0x58] sm:$0xff] }
 0xbf7   : > { %v11433_v61 = vadd.f32 %v11425_v54, %v11376_v30  ;;  %11251 = vperm.xlu1 %15633, %v22531_v25   ;;  %v11086_v38 = vmul.f32 %v12667_v48, %v11065_v57  ;;  %v11257_v57 = vmul.f32 %v12691_v6, %v11236_v40  ;;  %v12721_v6 = vld [vmem:[%s23029_s6 + $0x208] sm:$0xff] }
 0xbf9   : > { %v11452_v28 = vpop.permute.xlu1 %11451  ;;  %v11171_v55 = vpop.permute.xlu0 %11170 }
 0xbfa   : > { %v11482_v35 = vmul.f32 %v12720_v33, %v11452_v28  ;;  %v12681_v33 = vld [vmem:[%s23029_s6 + $0xc8] sm:$0xff] }
 0xbfb   : > { %15634 = vset.pattern.permute.xlu1 %v16315_v16 }
 0xbfc   : > { %v11490_v2 = vadd.f32 %v11482_v35, %v11433_v61  ;;  %11308 = vperm.xlu1 %15634, %v22531_v25   ;;  %v11035_v61 = vmul.f32 %v11002_v10, %v10987_v14 }
 0xbfe   : > { %v22727_v9 = vadd.f32 %v11539_v0, %v11490_v2  ;;  %v11012_v22 = vpop.permute.xlu1 %11011  ;;  %v11228_v19 = vpop.permute.xlu0 %11227  ;;  %v12697_v2 = vld [vmem:[%s23029_s6 + $0x148] sm:$0xff] }
 0xbff   : > { %v11037_v26 = vmul.f32 %v11012_v22, %v10989_v13 }
 0xc00   : > { %15635 = vset.pattern.permute.xlu1 %v16316_v4 }
 0xc01   : > { %v11094_v51 = vadd.f32 %v11086_v38, %v11037_v26  ;;  %11365 = vperm.xlu1 %15635, %v22531_v25   ;;  %v12705_v38 = vld [vmem:[%s23029_s6 + $0x188] sm:$0xff] }
 0xc03   : > { %v11151_v12 = vadd.f32 %v11143_v60, %v11094_v51  ;;  %v11179_v53 = vpop.permute.xlu1 %11178  ;;  %v11342_v0 = vpop.permute.xlu0 %11341 }
 0xc04   : > { %v11200_v43 = vmul.f32 %v12683_v41, %v11179_v53  ;;  %v11369_v51 = vmul.f32 %v12705_v38, %v11342_v0  ;;  %v11586_v38 = vld [vmem:[%s23031_s8 + $0x78] sm:$0xff] }
 0xc05   : > { %15636 = vset.pattern.permute.xlu1 %v16312_v15 }
 0xc06   : > { %v11208_v8 = vadd.f32 %v11200_v43, %v11151_v12  ;;  %11422 = vperm.xlu1 %15636, %v22531_v25   ;;  %v12715_v25 = vld [vmem:[%s23029_s6 + $0x1d8] sm:$0xff]  ;;  %v12729_v43 = vld [vmem:[%s23029_s6 + $0x248] sm:$0xff] }
 0xc08   : > { %v11265_v59 = vadd.f32 %v11257_v57, %v11208_v8  ;;  %v11350_v45 = vpop.permute.xlu1 %11349  ;;  %v11399_v17 = vpop.permute.xlu0 %11398 }
 0xc09   : > { %v11371_v39 = vmul.f32 %v12707_v32, %v11350_v45  ;;  %v12670_v32 = vld [vmem:[%s23029_s6 + $0x70] sm:$0xff] }
 0xc0a   : > { %v11322_v42 = vadd.f32 %v11314_v63, %v11265_v59  ;;  %15638 = vset.pattern.permute.xlu1 %v25600_v50  ;;  %v11485_v50 = vmul.f32 %v12723_v1, %v11464_v5  ;;  %v12689_v5 = vld [vmem:[%s23029_s6 + $0x108] sm:$0xff]  ;;  %v12678_v63 = vld [vmem:[%s23029_s6 + $0xb0] sm:$0xff] }
 0xc0b   : > { %11021 = vperm.xlu1 %15638, %v22534_v23   ;;  %v11255_v13 = vmul.f32 %v12689_v5, %v11228_v19  ;;  %v11584_v5 = vld [vmem:[%s23031_s8 + $0x68] sm:$0xff] }
 0xc0c   : > { %v11379_v24 = vadd.f32 %v11371_v39, %v11322_v42 }
 0xc0d   : > { %v11407_v27 = vpop.permute.xlu1 %11406  ;;  %v11077_v44 = vpop.permute.xlu0 %11076 }
 0xc0e   : > { %v11428_v36 = vmul.f32 %v12715_v25, %v11407_v27 }
 0xc0f   : > { %15639 = vset.pattern.permute.xlu1 %v16309_v3  ;;  %v12673_v3 = vld [vmem:[%s23029_s6 + $0x88] sm:$0xff] }
 0xc10   : > { %v11436_v40 = vadd.f32 %v11428_v36, %v11379_v24  ;;  %11072 = vperm.xlu1 %15639, %v22534_v23  }
 0xc12   : > { %v11493_v46 = vadd.f32 %v11485_v50, %v11436_v40  ;;  %v11057_v30 = vpop.permute.xlu1 %11056  ;;  %v11134_v59 = vpop.permute.xlu0 %11133 }
 0xc13   : > { %v11084_v54 = vmul.f32 %v12665_v58, %v11057_v30  ;;  %v11146_v24 = vmul.f32 %v12678_v63, %v11134_v59  ;;  %v12716_v59 = vld [vmem:[%s23029_s6 + $0x1e0] sm:$0xff] }
 0xc14   : > { %v11550_v52 = vadd.f32 %v11542_v11, %v11493_v46  ;;  %15640 = vset.pattern.permute.xlu1 %v16311_v18  ;;  %v11198_v18 = vmul.f32 %v12681_v33, %v11171_v55  ;;  %v12686_v55 = vld [vmem:[%s23029_s6 + $0xf0] sm:$0xff] }
 0xc15   : > { %11129 = vperm.xlu1 %15640, %v22534_v23   ;;  %v11092_v28 = vadd.f32 %v11084_v54, %v11035_v61  ;;  %v12710_v11 = vld [vmem:[%s23029_s6 + $0x1b0] sm:$0xff] }
 0xc17   : > { %v11114_v34 = vpop.permute.xlu1 %11113 }
 0xc18   : > { %v11141_v35 = vmul.f32 %v12673_v3, %v11114_v34 }
 0xc19   : > { %15641 = vset.pattern.permute.xlu1 %v16313_v47  ;;  %v12713_v47 = vld [vmem:[%s23029_s6 + $0x1c8] sm:$0xff] }
 0xc1a   : > { %v11149_v48 = vadd.f32 %v11141_v35, %v11092_v28  ;;  %11186 = vperm.xlu1 %15641, %v22534_v23   ;;  %v11426_v53 = vmul.f32 %v12713_v47, %v11399_v17  ;;  %v11583_v35 = vld [vmem:[%s23031_s8 + $0x60] sm:$0xff] }
 0xc1b   : > { %v14963_v0 = vpack.c.bf16 %v11584_v5, %v11583_v35  ;;  %v12685_v5 = vld [vmem:[%s23029_s6 + $0xe8] sm:$0xff] }
 0xc1c   : > { %v11206_v49 = vadd.f32 %v11198_v18, %v11149_v48  ;;  %v11285_v22 = vpop.permute.xlu1 %11284  ;;  %v10990_v18 = vld [vmem:[%s23029_s6 + $0x20] sm:$0xff] }
 0xc1d   : > { %v11312_v26 = vmul.f32 %v12697_v2, %v11285_v22  ;;  %v12668_v48 = vld [vmem:[%s23029_s6 + $0x60] sm:$0xff]  ;;  %14964 = vmatpush3.bf16.msra.mxu0 %v14963_v0  ;;  %v11585_v22 = vld [vmem:[%s23031_s8 + $0x70] sm:$0xff]  ;;  %v10993_v0 = vld [vmem:[%s23029_s6 + $0x38] sm:$0xff] }
 0xc1e   : > { %v11263_v60 = vadd.f32 %v11255_v13, %v11206_v49  ;;  %15643 = vset.pattern.permute.xlu1 %v16315_v16  ;;  %v12676_v2 = vld [vmem:[%s23029_s6 + $0xa0] sm:$0xff]  ;;  %14965 = vmatprep.subr.bf16.mxu0 %v16310_v29  ;;  %v14966_v47 = vpack.c.bf16 %v11586_v38, %v11585_v22 }
 0xc1f   : > { %11300 = vperm.xlu1 %15643, %v22534_v23  }
 0xc20   : > { %v11320_v41 = vadd.f32 %v11312_v26, %v11263_v60 }
 0xc21   : > { %v11456_v12 = vpop.permute.xlu1 %11455  ;;  %14967 = vmatpush3.bf16.msra.mxu0 %v14966_v47 }
 0xc22   : > { %v11377_v37 = vadd.f32 %v11369_v51, %v11320_v41  ;;  %v11483_v16 = vmul.f32 %v12721_v6, %v11456_v12  ;;  %v12684_v41 = vld [vmem:[%s23029_s6 + $0xe0] sm:$0xff]  ;;  %14968 = vmatprep.subr.bf16.mxu0 %v16310_v29 }
 0xc23   : > { %15644 = vset.pattern.permute.xlu1 %v16316_v4  ;;  %v10992_v4 = vld [vmem:[%s23029_s6 + $0x30] sm:$0xff]  ;;  %v12700_v29 = vld [vmem:[%s23029_s6 + $0x160] sm:$0xff] }
 0xc24   : > { %v11434_v21 = vadd.f32 %v11426_v53, %v11377_v37  ;;  %11357 = vperm.xlu1 %15644, %v22534_v23   ;;  %v16320_v53 = vmov 0.0  }
 0xc25   : > { %14934 = vmatprep.mubr.msk.f32.mxu0 %vm16319_vm1, %v16320_v53 }
 0xc26   : > { %v11491_v20 = vadd.f32 %v11483_v16, %v11434_v21  ;;  %v11513_v57 = vpop.permute.xlu1 %11512  ;;  %v12692_v16 = vld [vmem:[%s23029_s6 + $0x120] sm:$0xff] }
 0xc27   : > { %v11540_v8 = vmul.f32 %v12729_v43, %v11513_v57  ;;  %v12708_v57 = vld [vmem:[%s23029_s6 + $0x1a0] sm:$0xff] }
 0xc28   : > { %15645 = vset.pattern.permute.xlu1 %v16312_v15  ;;  %v11089_v15 = vmul.f32 %v12670_v32, %v11077_v44 }
 0xc29   : > { %v11548_v10 = vadd.f32 %v11540_v8, %v11491_v20  ;;  %11414 = vperm.xlu1 %15645, %v22534_v23  }
 0xc2b   : > { %v11555_v45 = vadd.f32 %v11548_v10, %v22727_v9  ;;  %v11027_v39 = vpop.permute.xlu1 %11026  ;;  %v11305_v9 = vpop.permute.xlu0 %11304 }
 0xc2c   : > { %v11040_v42 = vmul.f32 %v11027_v39, %v10992_v4 }
 0xc2d   : > { %v11556_v25 = vadd.f32 %v11555_v45, %v22676_v56  ;;  %15647 = vset.pattern.permute.xlu1 %v16317_v31  ;;  %v12694_v31 = vld [vmem:[%s23029_s6 + $0x130] sm:$0xff] }
 0xc2e   : > { %v11097_v1 = vadd.f32 %v11089_v15, %v11040_v42  ;;  %11528 = vperm.xlu1 %15647, %v22534_v23   ;;  %v12702_v23 = vld [vmem:[%s23029_s6 + $0x170] sm:$0xff] }
 0xc2f   : > { %v22821_v27 = vadd.f32 %v11556_v25, %v11550_v52  ;;  %v11362_v46 = vpop.permute.xlu0 %11361  ;;  %v11317_v30 = vmul.f32 %v12702_v23, %v11305_v9  ;;  %v12724_v25 = vld [vmem:[%s23029_s6 + $0x220] sm:$0xff] }
 0xc30   : > { %v11154_v36 = vadd.f32 %v11146_v24, %v11097_v1  ;;  %v11191_v7 = vpop.permute.xlu1 %11190  ;;  %v11374_v19 = vmul.f32 %v12710_v11, %v11362_v46 }
 0xc31   : > { %v11203_v50 = vmul.f32 %v12686_v55, %v11191_v7  ;;  %v12732_v55 = vld [vmem:[%s23029_s6 + $0x260] sm:$0xff] }
 0xc32   : > { %11532 = vperm.xlu1 %15647, %v22524_v62   ;;  %v12718_v62 = vld [vmem:[%s23029_s6 + $0x1f0] sm:$0xff] }
 0xc33   : > { %v11211_v40 = vadd.f32 %v11203_v50, %v11154_v36  ;;  %v22836_v33 = vpop.permute.xlu0 %11475 }
 0xc35   : > { %v11248_v56 = vpop.permute.xlu1 %11247 }
 0xc36   : > { %v11260_v58 = vmul.f32 %v12694_v31, %v11248_v56 }
 0xc37   : > { %v11126_v13 = vpop.permute.xlu0 %11125 }
 0xc38   : > { %v11268_v14 = vadd.f32 %v11260_v58, %v11211_v40  ;;  %v11144_v17 = vmul.f32 %v12676_v2, %v11126_v13 }
 0xc3a   : > { %v11325_v52 = vadd.f32 %v11317_v30, %v11268_v14  ;;  %v11419_v54 = vpop.permute.xlu1 %11418 }
 0xc3b   : > { %v11431_v3 = vmul.f32 %v12718_v62, %v11419_v54  ;;  %v11354_v8 = vpop.permute.xlu0 %11353 }
 0xc3c   : > { %v11382_v61 = vadd.f32 %v11374_v19, %v11325_v52  ;;  %v11372_v4 = vmul.f32 %v12708_v57, %v11354_v8  ;;  %v12669_v52 = vld [vmem:[%s23029_s6 + $0x68] sm:$0xff]  ;;  %v12703_v57 = vld [vmem:[%s23029_s6 + $0x178] sm:$0xff] }
 0xc3e   : > { %v22838_v34 = vadd.f32 %v11431_v3, %v11382_v61  ;;  %v12677_v3 = vld [vmem:[%s23029_s6 + $0xa8] sm:$0xff]  ;;  %v12671_v61 = vld [vmem:[%s23029_s6 + $0x78] sm:$0xff] }
 0xc3f   : > { %v11017_v28 = vpop.permute.xlu1 %11016  ;;  %v11195_v19 = vpop.permute.xlu0 %11194 }
 0xc40   : > { %v11038_v26 = vmul.f32 %v11017_v28, %v10990_v18  ;;  %v12679_v18 = vld [vmem:[%s23029_s6 + $0xb8] sm:$0xff] }
 0xc43   : > { %v11480_v35 = vpop.permute.xlu0 %11479 }
 0xc44   : > { %v11069_v49 = vpop.permute.xlu1 %11068 }
 0xc45   : > { %v11087_v60 = vmul.f32 %v12668_v48, %v11069_v49 }
 0xc47   : > { %v11095_v51 = vadd.f32 %v11087_v60, %v11038_v26 }
 0xc49   : > { %v11152_v6 = vadd.f32 %v11144_v17, %v11095_v51  ;;  %v11183_v12 = vpop.permute.xlu1 %11182  ;;  %v12693_v17 = vld [vmem:[%s23029_s6 + $0x128] sm:$0xff]  ;;  %v11244_v51 = vpop.permute.xlu0 %11243 }
 0xc4a   : > { %v11201_v37 = vmul.f32 %v12684_v41, %v11183_v12  ;;  %v12687_v12 = vld [vmem:[%s23029_s6 + $0xf8] sm:$0xff] }
 0xc4c   : > { %v11209_v21 = vadd.f32 %v11201_v37, %v11152_v6 }
 0xc4e   : > { %v11240_v43 = vpop.permute.xlu1 %11239 }
 0xc4f   : > { %v11258_v44 = vmul.f32 %v12692_v16, %v11240_v43  ;;  %v12701_v16 = vld [vmem:[%s23029_s6 + $0x168] sm:$0xff]  ;;  %v11259_v43 = vmul.f32 %v12693_v17, %v11244_v51 }
 0xc51   : > { %v11266_v20 = vadd.f32 %v11258_v44, %v11209_v21  ;;  %v12695_v44 = vld [vmem:[%s23029_s6 + $0x138] sm:$0xff] }
 0xc53   : > { %v11297_v32 = vpop.permute.xlu1 %11296 }
 0xc54   : > { %v11315_v10 = vmul.f32 %v12700_v29, %v11297_v32  ;;  %v12709_v29 = vld [vmem:[%s23029_s6 + $0x1a8] sm:$0xff] }
 0xc56   : > { %v11323_v63 = vadd.f32 %v11315_v10, %v11266_v20  ;;  %v11204_v20 = vmul.f32 %v12687_v12, %v11195_v19 }
 0xc58   : > { %v11380_v45 = vadd.f32 %v11372_v4, %v11323_v63  ;;  %v11411_v39 = vpop.permute.xlu1 %11410 }
 0xc59   : > { %v11429_v15 = vmul.f32 %v12716_v59, %v11411_v39  ;;  %v12711_v59 = vld [vmem:[%s23029_s6 + $0x1b8] sm:$0xff] }
 0xc5b   : > { %v11437_v42 = vadd.f32 %v11429_v15, %v11380_v45  ;;  %v12717_v15 = vld [vmem:[%s23029_s6 + $0x1e8] sm:$0xff] }
 0xc5d   : > { %v11468_v24 = vpop.permute.xlu1 %11467 }
 0xc5e   : > { %v11486_v1 = vmul.f32 %v12724_v25, %v11468_v24  ;;  %v12725_v24 = vld [vmem:[%s23029_s6 + $0x228] sm:$0xff] }
 0xc60   : > { %v11494_v7 = vadd.f32 %v11486_v1, %v11437_v42  ;;  %v12719_v42 = vld [vmem:[%s23029_s6 + $0x1f8] sm:$0xff]  ;;  %v11472_v1 = vpop.permute.xlu0 %11471 }
 0xc62   : > { %v11525_v36 = vpop.permute.xlu1 %11524 }
 0xc63   : > { %v11543_v9 = vmul.f32 %v12732_v55, %v11525_v36 }
 0xc65   : > { %v11551_v50 = vadd.f32 %v11543_v9, %v11494_v7 }
 0xc67   : > { %v22887_v40 = vadd.f32 %v22821_v27, %v11551_v50  ;;  %v11032_v31 = vpop.permute.xlu1 %11031  ;;  %v10991_v27 = vld [vmem:[%s23029_s6 + $0x28] sm:$0xff] }
 0xc68   : > { %v11041_v26 = vmul.f32 %v11032_v31, %v10993_v0  ;;  %v11537_v0 = vpop.permute.xlu0 %11536 }
 0xc6c   : > { %v11081_v23 = vpop.permute.xlu1 %11080 }
 0xc6d   : > { %v11090_v49 = vmul.f32 %v12671_v61, %v11081_v23 }
 0xc6f   : > { %v11098_v41 = vadd.f32 %v11090_v49, %v11041_v26 }
 0xc71   : > { %v11138_v56 = vpop.permute.xlu1 %11137 }
 0xc72   : > { %v11147_v60 = vmul.f32 %v12679_v18, %v11138_v56  ;;  %v11487_v56 = vmul.f32 %v12725_v24, %v11472_v1 }
 0xc74   : > { %v11155_v21 = vadd.f32 %v11147_v60, %v11098_v41 }
 0xc76   : > { %v11252_v58 = vpop.permute.xlu1 %11251  ;;  %v11212_v4 = vadd.f32 %v11204_v20, %v11155_v21  ;;  %v11660_v21 = vld [vmem:[%s23033_s10 + $0x8] sm:$0xff] }
 0xc77   : > { %v11261_v63 = vmul.f32 %v12695_v44, %v11252_v58 }
 0xc79   : > { %v11269_v55 = vadd.f32 %v11261_v63, %v11212_v4 }
 0xc7b   : > { %v11309_v11 = vpop.permute.xlu1 %11308 }
 0xc7c   : > { %v11318_v39 = vmul.f32 %v12703_v57, %v11309_v11  ;;  %v12733_v11 = vld [vmem:[%s23029_s6 + $0x268] sm:$0xff] }
 0xc7e   : > { %v11326_v31 = vadd.f32 %v11318_v39, %v11269_v55 }
 0xc80   : > { %v11366_v46 = vpop.permute.xlu1 %11365 }
 0xc81   : > { %v11375_v36 = vmul.f32 %v12711_v59, %v11366_v46  ;;  %v12727_v46 = vld [vmem:[%s23029_s6 + $0x238] sm:$0xff] }
 0xc82   : > { %v11489_v61 = vmul.f32 %v12727_v46, %v11480_v35 }
 0xc85   : > { %v11423_v30 = vpop.permute.xlu1 %11422 }
 0xc86   : > { %v11432_v23 = vmul.f32 %v12719_v42, %v11423_v30  ;;  %v12734_v30 = vld [vmem:[%s23029_s6 + $0x270] sm:$0xff] }
 0xc8a   : > { %v11022_v14 = vpop.permute.xlu1 %11021 }
 0xc8b   : > { %v11039_v48 = vmul.f32 %v11022_v14, %v10991_v27  ;;  %v11383_v14 = vadd.f32 %v11375_v36, %v11326_v31 }
 0xc8f   : > { %v11073_v62 = vpop.permute.xlu1 %11072 }
 0xc90   : > { %v11088_v28 = vmul.f32 %v12669_v52, %v11073_v62  ;;  %v12726_v62 = vld [vmem:[%s23029_s6 + $0x230] sm:$0xff] }
 0xc92   : > { %v11096_v22 = vadd.f32 %v11088_v28, %v11039_v48 }
 0xc94   : > { %v11130_v54 = vpop.permute.xlu1 %11129 }
 0xc95   : > { %v11145_v2 = vmul.f32 %v12677_v3, %v11130_v54  ;;  %v11440_v54 = vadd.f32 %v11432_v23, %v11383_v14  ;;  %v11488_v3 = vmul.f32 %v12726_v62, %v22836_v33 }
 0xc97   : > { %v11153_v47 = vadd.f32 %v11145_v2, %v11096_v22  ;;  %v11497_v48 = vadd.f32 %v11489_v61, %v11440_v54  ;;  %v11496_v2 = vadd.f32 %v11488_v3, %v22838_v34 }
 0xc99   : > { %v11187_v13 = vpop.permute.xlu1 %11186 }
 0xc9a   : > { %v11202_v38 = vmul.f32 %v12685_v5, %v11187_v13  ;;  %v12735_v5 = vld [vmem:[%s23029_s6 + $0x278] sm:$0xff] }
 0xc9b   : > { %v11546_v49 = vmul.f32 %v12735_v5, %v11537_v0 }
 0xc9c   : > { %v11210_v37 = vadd.f32 %v11202_v38, %v11153_v47 }
 0xc9d   : > { %v11554_v26 = vadd.f32 %v11546_v49, %v11497_v48 }
 0xc9e   : > { %v11301_v6 = vpop.permute.xlu1 %11300  ;;  %v11267_v8 = vadd.f32 %v11259_v43, %v11210_v37  ;;  %v11587_v43 = vld [vmem:[%s23032_s9] sm:$0x1] }
 0xc9f   : > { %v11316_v32 = vmul.f32 %v12701_v16, %v11301_v6  ;;  %v11568_v6 = vld [vmem:[%s23030_s7] sm:$0x1] }
 0xca1   : > { %v11324_v25 = vadd.f32 %v11316_v32, %v11267_v8 }
 0xca3   : > { %v11358_v10 = vpop.permute.xlu1 %11357 }
 0xca4   : > { %v11373_v45 = vmul.f32 %v12709_v29, %v11358_v10 }
 0xca6   : > { %v11381_v9 = vadd.f32 %v11373_v45, %v11324_v25 }
 0xca8   : > { %v11415_v7 = vpop.permute.xlu1 %11414 }
 0xca9   : > { %v11430_v50 = vmul.f32 %v12717_v15, %v11415_v7 }
 0xcab   : > { %v11438_v58 = vadd.f32 %v11430_v50, %v11381_v9 }
 0xcad   : > { %v11495_v19 = vadd.f32 %v11487_v56, %v11438_v58  ;;  %v11529_v52 = vpop.permute.xlu1 %11528 }
 0xcae   : > { %v11544_v27 = vmul.f32 %v12733_v11, %v11529_v52 }
 0xcb0   : > { %v11552_v28 = vadd.f32 %v11544_v27, %v11495_v19 }
 0xcb1   : > { %v11533_v18 = vpop.permute.xlu1 %11532 }
 0xcb2   : > { %v11545_v13 = vmul.f32 %v12734_v30, %v11533_v18  ;;  %v11559_v22 = vadd.f32 %v22887_v40, %v11552_v28  ;;  %v11659_v40 = vld [vmem:[%s23033_s10] sm:$0xff] }
 0xcb3   : > { %v14969_v16 = vpack.c.bf16 %v11660_v21, %v11659_v40 }
 0xcb4   : > { %v11553_v38 = vadd.f32 %v11545_v13, %v11496_v2 }
 0xcb6   : > { %v11560_v60 = vadd.f32 %v11559_v22, %v11553_v38 }
 0xcb8   : > { %v11561_v47 = vadd.f32 %v11560_v60, %v11554_v26 }
 0xcba   : > { %v11562_v33 = vrot.slane %v11561_v47, 4 }
 0xcbc   : > { %v11563_v35 = vadd.f32 %v11562_v33, %v11561_v47 }
 0xcbe   : > { %v11564_v17 = vrot.slane %v11563_v35, 2 }
 0xcc0   : > { %v11565_v51 = vadd.f32 %v11564_v17, %v11563_v35 }
 0xcc2   : > { %v11566_v41 = vrot.slane %v11565_v51, 1 }
 0xcc4   : > { %v11567_v12 = vadd.f32 %v11566_v41, %v11565_v51 }
 0xcc6   : > { %v11569_v34 = vadd.f32 %v11568_v6, %v11567_v12 }
 0xcc8   : > { %v11570_v37 = vmax.f32 %v11569_v34, 0.0 }
 0xcca   : > { %14935 = vmatmul.mubr.f32.vlgmr.msra.gmra.mrb[140].mxu0 %v11570_v37 }
 0xccb   : > { %14941 = vmatprep.mubr.msk.f32.mxu0 %vm16319_vm1, %v16320_v53  ;;  %14970 = vmatpush3.bf16.msra.mxu0 %v14969_v16  ;;  %v11661_v53 = vld [vmem:[%s23034_s11] sm:$0x1] }
 0xd9d   : > { %v11654_v44 = vpop.f32.mrb[140].mxu0 }
 0xd9e   : > { %v11655_v20 = vadd.f32 %v11654_v44, %v11587_v43  ;;  %v14936_v29 = vpop.f32.mrb[141].mxu0 }
 0xda0   : > { %v11658_v57 = vmax.f32 %v11655_v20, 0.0 }
 0xda2   : > { %14942 = vmatmul.mubr.msk.f32.vlgmr.msra.gmra.mrb[142].mxu0 %vm700_vm0, %v11658_v57 }
 0xe75   : > { %v11731_v8 = vpop.f32.mrb[142].mxu0 }
 0xe76   : > { %v11732_v32 = vadd.f32 %v11731_v8, %v11661_v53  ;;  %v14943_v10 = vpop.f32.mrb[143].mxu0 }
 0xe78   : > { %11736 = vst.msk [vmem:[%s405_s18] sm:$0x1] %vm11735_vm2, %v11732_v32 }
 0xe79   : > { %16257 = shalt.err (!%p16254_p3)
}
 0xe7a   : > { %s16258_s0 = scalar_lea.hbm %s22981_s28, 16  ;;  %s16262_s20 = scalar_lea.hbm %s23035_s12, 32 }
 0xe7b   : > { %p16259_p4 = scmp.ne.s32.totalorder %s22981_s28, %s16258_s0  ;;  %p16263_p9 = scmp.lt.u32.totalorder %s22981_s28, %s23035_s12 }
 0xe7c   : > { %p16264_p10 = scmp.lt.u32.totalorder %s16262_s20, %s16258_s0  ;;  %p16266_p12 = scmp.lt.u32.totalorder %s16258_s0, %s22981_s28 }
 0xe7d   : > { %p16260_p7 = pnand %p16259_p4, %p16425_p5 }
 0xe7e   : > { %p16265_p11 = por %p16264_p10, %p16263_p9 }
 0xe7f   : > { %p16261_p8 = pneg %p16260_p7 }
 0xe80   : > { %p16267_p13 = por %p16266_p12, %p16265_p11 }
 0xe82   : > { %p16268_p0 = pnand %p16267_p13, %p16261_p8 }
 0xe84   : > { %16271 = shalt.err (!%p16268_p0)
}
 0xe85   : > { %15518 = dma.vmem_to_hbm [thread:$0]  (%p16425_p5), %s22983_s19, 16, %s22981_s28, %s11738_s15  }
 0xe86 PF: > { %p15524_p1 = scmp.ge.s32.totalorder %s16306_s24, 2  ;;  %s11762_s1 = sand.u32 1, %s16294_s21  }
 0xe87   : > { %s11763_s16 = scalar_lea.sflag [#allocation3], %s11762_s1 }
 0xe88   : > { %p15521_p2 = pnand %p15524_p1, %p16429_p6 }
 0xe8a   : > { %16289 = dma.done.wait (!%p15521_p2), %s11763_s16, 16  }
 0xe8b   : > { %16291 = vsyncadd (!%p15521_p2), %s11763_s16, 4294967280  ;;  %p22_p3 = scmp.ge.s32.totalorder %s16412_s27, 4   ;;  %s25601_s21 = smov %s16298_s22 }
 0xe8c   : > { %s25602_s22 = smov %s16302_s23  ;;  %s25603_s23 = smov %s16423_s30 }
 0xe8d   : > { %s25604_s24 = smov %s16412_s27  ;;  %24 = sbr.rel (!%p22_p3) target bundleno = 6 (0x6), region = 125 }
 0xe94   :  { %11767 = vsyncpa [#allocation3], 1 }
 0xe95   :  { %11769 = vsyncpa [#allocation3 + $0x1], 1 }

</bundles_post_ra>
